<compile_context>
chip_gen: v6e
topology: v6e:2x2x1
jax: 0.10.0
libtpu: 0.0.40
codegen_flags: <defaults>
</compile_context>

<pallas_src>
import math
import jax
import jax.numpy as jnp
from jax.experimental import pallas as pl
from jax.experimental.pallas import tpu as pltpu


def _gelu_exact(x):
    # PyTorch torch._C._nn.gelu default: exact erf-based GELU.
    return 0.5 * x * (1.0 + jax.lax.erf(x * (1.0 / math.sqrt(2.0))))


def _is_v7x():
    try:
        return "v7" in jax.devices()[0].device_kind.lower()
    except Exception:
        return False


def _pick_tile(dim, candidates):
    for c in candidates:
        if dim % c == 0:
            return c
    return dim


def _make_kernel(gelu_bf16):
    def kernel(x_ref, w_ref, b_ref, res_ref, o_ref):
        k = pl.program_id(1)

        @pl.when(k == 0)
        def _():
            # Fold the bias + residual epilogue into the accumulator init.
            # o_ref is f32 and resident across the k axis (its index_map is
            # constant in k), so it doubles as the accumulator: no VMEM
            # scratch, no final cast/copy branch.
            o_ref[...] = res_ref[...] + b_ref[...]

        x = x_ref[...]
        if gelu_bf16:
            # v7x: bf16 vregs hold 2x the elements -> 2x VALU throughput on
            # the erf polynomial (the saturating slot there).
            x = x.astype(jnp.bfloat16)
        g = _gelu_exact(x)
        o_ref[...] += jnp.dot(g.astype(jnp.bfloat16), w_ref[...],
                              preferred_element_type=jnp.float32)

    return kernel


def gelu_linear_add(x, w_t, b, residual, *, tm=None, tk=None, gelu_bf16=False):
    """x: (M, K) pre-GELU activations (f32); w_t: (K, N) bf16; b: (N,) f32;
    residual: (M, N) f32.  Returns (M, N) f32 = gelu(x) @ w_t + b + residual."""
    M, K = x.shape
    Kw, N = w_t.shape
    assert K == Kw and residual.shape == (M, N) and b.shape == (N,)
    if tm is None:
        tm = _pick_tile(M, (192, 256, 128, 64, 32, 16, 8))
    if tk is None:
        tk = _pick_tile(K, (1024, 768, 512, 256, 128))
    assert M % tm == 0 and K % tk == 0, "tile sizes must divide the problem"
    b2d = b.reshape(1, N)
    grid = (M // tm, K // tk)

    def build(use_bf16_gelu, nbuf):
        def spec(shape, imap, stream):
            if stream and nbuf is not None:
                return pl.BlockSpec(shape, imap, pipeline_mode=pl.Buffered(nbuf))
            return pl.BlockSpec(shape, imap)

        return pl.pallas_call(
            _make_kernel(use_bf16_gelu),
            out_shape=jax.ShapeDtypeStruct((M, N), x.dtype),
            grid_spec=pltpu.PrefetchScalarGridSpec(
                num_scalar_prefetch=0,
                grid=grid,
                in_specs=[
                    spec((tm, tk), lambda i, k: (i, k), True),   # x tile (f32)
                    spec((tk, N), lambda i, k: (k, 0), True),    # W tile (bf16)
                    spec((1, N), lambda i, k: (0, 0), False),    # bias (f32)
                    spec((tm, N), lambda i, k: (i, 0), False),   # residual (f32)
                ],
                out_specs=pl.BlockSpec((tm, N), lambda i, k: (i, 0)),
            ),
            compiler_params=pltpu.CompilerParams(
                dimension_semantics=("parallel", "arbitrary"),
                # ~10 MB live with Buffered(3); 32 MiB >= scoped default on
                # v5e/v6e/v7x and comfortably under every physical VMEM size.
                vmem_limit_bytes=32 * 1024 * 1024,
            ),
        )

    # Preferred config first (bf16 GELU where requested, 3-deep input
    # buffering); fall back to the conservative, known-good configuration if
    # a feature is unavailable in the local jax / Mosaic build.
    configs = list(dict.fromkeys(
        [(gelu_bf16, 3), (gelu_bf16, None), (False, 3), (False, None)]))
    last_err = None
    for gb, nbuf in configs:
        try:
            out = build(gb, nbuf)(x, w_t, b2d, residual)
            return jax.block_until_ready(out)
        except Exception as e:  # deliberate graceful degrade
            last_err = e
    raise last_err


class MPallas:
    """JAX/Pallas port of PyTorch M: gelu -> Linear(3072, 768) -> add."""

    def __init__(self, key, gelu_bf16=None):
        k1, k2 = jax.random.split(key, 2)
        in_f, out_f = 3072, 768
        bound = 1.0 / math.sqrt(in_f)   # nn.Linear default uniform init
        w = jax.random.uniform(k1, (out_f, in_f), jnp.float32, -bound, bound)
        # Weight stored transposed + bf16: half the HBM bytes, MXU-native.
        self.w_t = jnp.asarray(w.T, dtype=jnp.bfloat16)          # (3072, 768)
        self.b = jax.random.uniform(k2, (out_f,), jnp.float32, -bound, bound)
        # bf16 GELU only where the VALU is the binding unit (v7x).
        self.gelu_bf16 = _is_v7x() if gelu_bf16 is None else gelu_bf16

    def __call__(self, x321, x320):
        B, S, K = x321.shape
        _, _, N = x320.shape
        out = gelu_linear_add(x321.reshape(B * S, K), self.w_t, self.b,
                              x320.reshape(B * S, N), gelu_bf16=self.gelu_bf16)
        return out.reshape(B, S, N)


if __name__ == "__main__":
    key = jax.random.PRNGKey(0)
    km, kx1, kx2 = jax.random.split(key, 3)

    model = MPallas(km)

    # inputs matching the module's shapes: x321 [1,384,3072], x320 [1,384,768]
    x321 = jax.random.normal(kx1, (1, 384, 3072), jnp.float32)
    x320 = jax.random.normal(kx2, (1, 384, 768), jnp.float32)

    out = jax.block_until_ready(model(x321, x320))
    assert out.shape == (1, 384, 768)

    # Reference matched to the kernel's matmul numerics (bf16 operands,
    # f32 accumulation).  Tolerance loosens if GELU itself ran in bf16 (v7x).
    g_bf16 = _gelu_exact(x321.reshape(384, 3072)).astype(jnp.bfloat16)
    ref_bf16 = (jnp.dot(g_bf16, model.w_t, preferred_element_type=jnp.float32)
                + model.b + x320.reshape(384, 768)).reshape(1, 384, 768)
    tol = 2.5e-2 if model.gelu_bf16 else 2e-3
    assert jnp.allclose(out, ref_bf16, atol=tol, rtol=tol), \
        "mismatch vs bf16-matched reference"

    # Full-precision reference (loose tolerance: bf16 matmul rounding).
    ref_f32 = (_gelu_exact(x321) @ model.w_t.astype(jnp.float32)
               + model.b + x320)
    assert jnp.allclose(out, ref_f32, atol=6e-2, rtol=6e-2), \
        "mismatch vs f32 reference"

    print("KERNEL_OK")
</pallas_src>

<mosaic_0001>
module attributes {stable_mosaic.version = 11 : i64} {
  func.func @kernel(%arg0: i32, %arg1: i32, %arg2: memref<192x1024xf32, #tpu.memory_space<vmem>>, %arg3: memref<1024x768xbf16, #tpu.memory_space<vmem>>, %arg4: memref<1x768xf32, #tpu.memory_space<vmem>>, %arg5: memref<192x768xf32, #tpu.memory_space<vmem>>, %arg6: memref<192x768xf32, #tpu.memory_space<vmem>>) attributes {dimension_semantics = [#tpu.dimension_semantics<parallel>, #tpu.dimension_semantics<arbitrary>], iteration_bounds = array<i64: 2, 3>, scalar_prefetch = 0 : i64, scratch_operands = 0 : i64, tpu.core_type = #tpu.core_type<tc>, window_params = [{transform_indices = @transform_0, window_bounds = array<i64: 192, 1024>}, {transform_indices = @transform_1, window_bounds = array<i64: 1024, 768>}, {pipeline_mode = #tpu.pipeline_mode<synchronous>, transform_indices = @transform_2, window_bounds = array<i64: 1, 768>}, {transform_indices = @transform_3, window_bounds = array<i64: 192, 768>}, {transform_indices = @transform_4, window_bounds = array<i64: 192, 768>}]} {
    %c0_i32 = arith.constant 0 : i32
    %0 = arith.cmpi eq, %arg1, %c0_i32 : i32
    %1 = arith.extui %0 : i1 to i32
    %c0_i32_0 = arith.constant 0 : i32
    %2 = arith.cmpi ne, %1, %c0_i32_0 : i32
    scf.if %2 {
      %c0_11 = arith.constant 0 : index
      %c0_12 = arith.constant 0 : index
      %18 = vector.load %arg5[%c0_11, %c0_12] : memref<192x768xf32, #tpu.memory_space<vmem>>, vector<192x768xf32>
      %c0_13 = arith.constant 0 : index
      %c0_14 = arith.constant 0 : index
      %19 = vector.load %arg4[%c0_13, %c0_14] : memref<1x768xf32, #tpu.memory_space<vmem>>, vector<1x768xf32>
      %20 = vector.broadcast %19 : vector<1x768xf32> to vector<192x768xf32>
      %21 = arith.addf %18, %20 : vector<192x768xf32>
      %c0_15 = arith.constant 0 : index
      %c0_16 = arith.constant 0 : index
      %22 = vector.load %arg6[%c0_15, %c0_16] : memref<192x768xf32, #tpu.memory_space<vmem>>, vector<192x768xf32>
      tpu.vector_store %arg6[%c0_15, %c0_16], %21 {strides = array<i32>} : memref<192x768xf32, #tpu.memory_space<vmem>>, vector<192x768xf32>,
    } else {
    }
    %c0 = arith.constant 0 : index
    %c0_1 = arith.constant 0 : index
    %3 = vector.load %arg2[%c0, %c0_1] : memref<192x1024xf32, #tpu.memory_space<vmem>>, vector<192x1024xf32>
    %cst = arith.constant 5.000000e-01 : f32
    %4 = vector.broadcast %cst : f32 to vector<192x1024xf32>
    %5 = arith.mulf %4, %3 : vector<192x1024xf32>
    %cst_2 = arith.constant 0.707106769 : f32
    %6 = vector.broadcast %cst_2 : f32 to vector<192x1024xf32>
    %7 = arith.mulf %3, %6 : vector<192x1024xf32>
    %8 = math.erf %7 : vector<192x1024xf32>
    %cst_3 = arith.constant 1.000000e+00 : f32
    %9 = vector.broadcast %cst_3 : f32 to vector<192x1024xf32>
    %10 = arith.addf %9, %8 : vector<192x1024xf32>
    %11 = arith.mulf %5, %10 : vector<192x1024xf32>
    %c0_4 = arith.constant 0 : index
    %c0_5 = arith.constant 0 : index
    %12 = vector.load %arg6[%c0_4, %c0_5] : memref<192x768xf32, #tpu.memory_space<vmem>>, vector<192x768xf32>
    %13 = arith.truncf %11 : vector<192x1024xf32> to vector<192x1024xbf16>
    %c0_6 = arith.constant 0 : index
    %c0_7 = arith.constant 0 : index
    %14 = vector.load %arg3[%c0_6, %c0_7] : memref<1024x768xbf16, #tpu.memory_space<vmem>>, vector<1024x768xbf16>
    %cst_8 = arith.constant dense<0.000000e+00> : vector<192x768xf32>
    %15 = tpu.matmul %13, %14, %cst_8 {dimension_numbers = #tpu.dot_dimension_numbers<[1], [0], [0], [1], [0, 0, 1, 1], [], []>} : vector<192x1024xbf16>, vector<1024x768xbf16>, vector<192x768xf32> -> vector<192x768xf32>
    %16 = arith.addf %12, %15 : vector<192x768xf32>
    %c0_9 = arith.constant 0 : index
    %c0_10 = arith.constant 0 : index
    %17 = vector.load %arg6[%c0_9, %c0_10] : memref<192x768xf32, #tpu.memory_space<vmem>>, vector<192x768xf32>
    tpu.vector_store %arg6[%c0_9, %c0_10], %16 {strides = array<i32>} : memref<192x768xf32, #tpu.memory_space<vmem>>, vector<192x768xf32>,
    return
  }
  func.func @transform_0(%arg0: i32, %arg1: i32) -> (i32, i32) {
    %c0_i32 = arith.constant 0 : i32
    return %arg0, %arg1 : i32, i32
  }
  func.func @transform_1(%arg0: i32, %arg1: i32) -> (i32, i32) {
    %c0_i32 = arith.constant 0 : i32
    %c0_i32_0 = arith.constant 0 : i32
    return %arg1, %c0_i32 : i32, i32
  }
  func.func @transform_2(%arg0: i32, %arg1: i32) -> (i32, i32) {
    %c0_i32 = arith.constant 0 : i32
    %c0_i32_0 = arith.constant 0 : i32
    %c0_i32_1 = arith.constant 0 : i32
    return %c0_i32, %c0_i32_0 : i32, i32
  }
  func.func @transform_3(%arg0: i32, %arg1: i32) -> (i32, i32) {
    %c0_i32 = arith.constant 0 : i32
    %c0_i32_0 = arith.constant 0 : i32
    return %arg0, %c0_i32 : i32, i32
  }
  func.func @transform_4(%arg0: i32, %arg1: i32) -> (i32, i32) {
    %c0_i32 = arith.constant 0 : i32
    %c0_i32_0 = arith.constant 0 : i32
    return %arg0, %c0_i32 : i32, i32
  }
}

</mosaic_0001>

<bundles_post_ra>
// kernel: tpu_custom_call.1
= control target key start
LH: loop header
LB: loop body
LE: loop exit
PB: predicated region body
PF: predicated region fallthrough
CT: control target
= control target key end

     0   :  { %s12171_s0 = inlined_call_operand.hbm [shape: f32[384,3072], index: 0, kind: input, shape index: {}]   ;;  %s12172_s1 = inlined_call_operand.hbm [shape: bf16[3072,768], index: 1, kind: input, shape index: {}]   ;;  %s12173_s2 = inlined_call_operand.hbm [shape: f32[1,768], index: 2, kind: input, shape index: {}]   ;;  %s12174_s3 = inlined_call_operand.hbm [shape: f32[384,768], index: 3, kind: input, shape index: {}]   ;;  %s12175_s4 = inlined_call_operand.hbm [shape: f32[384,768], index: 4, kind: output, shape index: {}]  }
   0x1   :  { %12377 = sst [smem:[#allocation137_spill]] %s12171_s0 }
   0x2   :  { %12378 = sst [smem:[#allocation138_spill]] %s12173_s2 }
   0x3   :  { %12379 = sst [smem:[#allocation139_spill]] %s12175_s4 }
   0x4   :  { %9 = vsyncpa [#allocation3], 0 }
   0x5   :  { %11 = vsyncpa [#allocation3 + $0x1], 0 }
   0x6   :  { %12 = vsyncpa [#allocation6], 0 }
   0x7   :  { %14 = vsyncpa [#allocation6 + $0x1], 0 }
   0x8   :  { %15 = vsyncpa [#allocation9], 0 }
   0x9   :  { %17 = vsyncpa [#allocation9 + $0x1], 0 }
   0xa   :  { %18 = vsyncpa [#allocation4], 0 }
   0xb   :  { %20 = vsyncpa [#allocation4 + $0x1], 0  ;;  %s8614_s15 = smov 0   ;;  %s8616_s16 = smov 0  }
   0xc   :  { %s8618_s17 = smov 0   ;;  %s8620_s18 = smov 0  }
   0xd   :  { %s8622_s19 = smov 0   ;;  %s8624_s20 = smov 0  }
   0xe   :  { %s8626_s21 = smov 0   ;;  %s8628_s22 = smov 0  }
   0xf   :  { %s8630_s23 = smov 0   ;;  %s8632_s24 = smov 0  }
  0x10   :  { %s8634_s25 = smov 0   ;;  %s8636_s26 = smov 0  }
  0x11   :  { %s8638_s27 = smov 0   ;;  %s8640_s28 = smov 0  }
  0x12 LB: > { %12380 = sst [smem:[#allocation16_spill]] %s8521_s15  ;;  %s8681_s29 = sadd.s32 4294967295, %s8573_s28   ;;  %s8573_s28 = sphi %s8640_s28, %s26_s28   ;;  %s8569_s27 = sphi %s8638_s27, %s12753_s27   ;;  %s8565_s26 = sphi %s8636_s26, %s12752_s26   ;;  %s8561_s25 = sphi %s8634_s25, %s12751_s25   ;;  %s8557_s24 = sphi %s8632_s24, %s12750_s24   ;;  %s8553_s23 = sphi %s8630_s23, %s12749_s23   ;;  %s8549_s22 = sphi %s8628_s22, %s12748_s22   ;;  %s8545_s21 = sphi %s8626_s21, %s12738_s21   ;;  %s8541_s20 = sphi %s8624_s20, %s12747_s20   ;;  %s8537_s19 = sphi %s8622_s19, %s12746_s19   ;;  %s8533_s18 = sphi %s8620_s18, %s12745_s18   ;;  %s8529_s17 = sphi %s8618_s17, %s12744_s17   ;;  %s8525_s16 = sphi %s8616_s16, %s12743_s16   ;;  %s8521_s15 = sphi %s8614_s15, %s12742_s15  }
  0x13   : > { %12381 = sst [smem:[#allocation17_spill]] %s8549_s22  ;;  %s6778_s30 = sadd.s32 4294967294, %s8573_s28  }
  0x14   : > { %12382 = sst [smem:[#allocation18_spill]] %s8557_s24  ;;  %p60_p0 = scmp.ne.s32.totalorder %s8549_s22, %s8545_s21 }
  0x15   : > { %12383 = sst [smem:[#allocation19_spill]] %s8561_s25  ;;  %p12189_p1 = scmp.eq.s32.totalorder %s8681_s29, 0 }
  0x16   : > { %p86_p2 = scmp.ne.s32.totalorder %s8537_s19, %s8533_s18  ;;  %p133_p3 = scmp.ne.s32.totalorder %s8525_s16, %s8521_s15 }
  0x17   : > { %p8691_p4 = por %p12189_p1, %p60_p0  ;;  %p163_p8 = scmp.eq.s32.totalorder %s6778_s30, 5 }
  0x18   : > { %p8698_p6 = por %p86_p2, %p12189_p1  ;;  %p8704_p7 = por %p133_p3, %p12189_p1 }
  0x19   : > { %s12384_s5 = scalar_select %p8691_p4, 1, 0 }
  0x1a   : > { %s12386_s6 = scalar_select %p8698_p6, 1, 0 }
  0x1b   : > { %12385 = sst [smem:[#allocation20_spill]] %s12384_s5  ;;  %p6779_p9 = scmp.ge.s32.totalorder %s8573_s28, 1 }
  0x1c   : > { %12387 = sst [smem:[#allocation21_spill]] %s12386_s6  ;;  %p170_p10 = scmp.lt.s32.totalorder %s8573_s28, 7 }
  0x1d   : > { %s12388_s7 = scalar_select %p8704_p7, 1, 0 }
  0x1e   : > { %p8710_p11 = por %p163_p8, %p133_p3  ;;  %p8714_p12 = pnand %p6779_p9, %p170_p10 }
  0x1f   : > { %12389 = sst [smem:[#allocation22_spill]] %s12388_s7  ;;  %s8575_s10 = smov [#allocation7]  }
  0x20   : > { %s12390_s8 = scalar_select %p8710_p11, 1, 0 }
  0x21   : > { %s183_s11 = sshll.u32 %s8575_s10, 4  ;;  %p7200_p13 = pneg %p8714_p12  ;;  %s184_s11 = int_to_ptr.vmem [resolvable:$true] %s183_s11 }
  0x22   : > { %12391 = sst [smem:[#allocation23_spill]] %s12390_s8  ;;  %s35_s12 = sadd.s32 1, %s8565_s26 }
  0x23   : > { %p7201_p0 = pnand %p7200_p13, %p12189_p1  ;;  %s8318_s13 = scalar_lea.vmem %s184_s11, 96 }
  0x24   : > { %p8319_p5 = scmp.ne.s32.totalorder %s184_s11, %s8318_s13  ;;  %p8326_p7 = scmp.lt.s32.totalorder %s184_s11, %s184_s11 }
  0x25   : > { %p8309_p2 = pneg %p7201_p0  ;;  %p8327_p11 = scmp.lt.s32.totalorder %s8318_s13, %s8318_s13 }
  0x27   : > { %p8321_p3 = pnand %p8319_p5, %p8309_p2  ;;  %p8328_p9 = por %p8327_p11, %p8326_p7 }
  0x29   : > { %p8322_p8 = pneg %p8321_p3 }
  0x2b   : > { %p8329_p10 = pnand %p8328_p9, %p8322_p8 }
  0x2d   : > { %8332 = shalt.err (!%p8329_p10)
}
  0x2e   : > { %s12393_s2 = sld [smem:[#allocation138_spill]]  ;;  %p36_p5 = scmp.ge.s32.totalorder %s35_s12, 3 }
  0x2f   : > { %s38_s21 = sadd.s32 1, %s8569_s27  ;;  %s47_s30 = sadd.s32 1, %s8553_s23 }
  0x30   : > { %p54_p7 = scmp.ne.s32.totalorder %s8553_s23, %s8549_s22  ;;  %s12755_s12 = smov (%p36_p5, %s35_s12), 0 }
  0x31   : > { %12394 = sst [smem:[#allocation24_spill]] %s12755_s12  ;;  %s12757_s21 = smov (!%p36_p5, %s38_s21), %s8569_s27 }
  0x32   : > { %s8735_s10 = ssub.s32 %s8565_s26, %s12755_s12  ;;  %p12190_p11 = scmp.eq.s32.totalorder %s8573_s28, 0 }
  0x33   : > { %p40_p13 = scmp.ge.s32.totalorder %s12757_s21, 2  ;;  %p7219_p3 = scmp.lt.s32.totalorder %s8573_s28, 6 }
  0x34   : > { %7203 = dma.hbm_to_vmem [thread:$0]  (!%p7201_p0), %s12393_s2, 96, %s184_s11, [#allocation6]  }
  0x35   : > { %p8741_p0 = por %p12190_p11, %p54_p7  ;;  %s12759_s21 = smov (%p40_p13, %s12757_s21), 0 }
  0x36   : > { %12396 = sst [smem:[#allocation25_spill]] %s12759_s21  ;;  %s194_s13 = sand.u32 1, %s8553_s23  }
  0x37   : > { %s8751_s14 = ssub.s32 %s8569_s27, %s12759_s21  ;;  %s7178_s2 = smul.u32 1536, %s194_s13 }
  0x38   : > { %s44_s18 = sor.u32 %s8735_s10, %s8751_s14  ;;  %s6782_s12 = sshll.u32 %s8565_s26, 3 }
  0x39   : > { %p45_p8 = scmp.eq.s32.totalorder %s44_s18, 0  ;;  %s7220_s8 = smul.u32 576, %s8569_s27 }
  0x3a   : > { %s198_s25 = scalar_lea.vmem [#allocation2], %s7178_s2  ;;  %s12397_s0 = sld [smem:[#allocation137_spill]] }
  0x3b   : > { %s8758_s15 = scalar_select %p45_p8, %s8553_s23, %s47_s30  }
  0x3c   : > { %s205_s4 = sadd.s32 %s7220_s8, %s6782_s12  ;;  %s208_s24 = sshll.u32 %s198_s25, 4  ;;  %s209_s24 = int_to_ptr.vmem [resolvable:$true] %s208_s24 }
  0x3d   : > { %s6783_s7 = sshll.u32 %s205_s4, 7  ;;  %p8767_p9 = pnand %p7219_p3, %p8741_p0 }
  0x3e   : > { %s195_s18 = scalar_lea.sflag [#allocation3], %s194_s13  ;;  %s8346_s30 = scalar_lea.vmem %s209_s24, 24576 }
  0x3f   : > { %p8335_p10 = pneg %p8767_p9  ;;  %p8347_p5 = scmp.ne.s32.totalorder %s209_s24, %s8346_s30 }
  0x40   : > { %s207_s22 = scalar_lea.hbm %s12397_s0, %s6783_s7  ;;  %s8576_s2 = smov [#allocation2]  }
  0x41   : > { %p8349_p7 = pnand %p8347_p5, %p8335_p10  ;;  %s8351_s4 = sshll.u32 %s8576_s2, 4  ;;  %s8352_s4 = int_to_ptr.vmem [resolvable:$false] %s8351_s4 }
  0x42   : > { %s8353_s25 = scalar_lea.vmem %s8352_s4, 49152  ;;  %p8354_p8 = scmp.lt.s32.totalorder %s209_s24, %s8352_s4 }
  0x43   : > { %p8350_p13 = pneg %p8349_p7  ;;  %p8355_p1 = scmp.lt.s32.totalorder %s8353_s25, %s8346_s30 }
  0x45   : > { %p8356_p11 = por %p8355_p1, %p8354_p8 }
  0x47   : > { %p8357_p2 = pnand %p8356_p11, %p8350_p13 }
  0x49   : > { %8360 = shalt.err (!%p8357_p2)
}
  0x4a   : > { %s8577_s5 = smov 3072   ;;  %s8578_s6 = smov 1024  }
  0x4b   : > { %s8579_s7 = smov 64   ;;  %s218_s8 = sand.u32 1, %s8573_s28  }
  0x4c   : > { %7207 = dma.hbm_to_vmem [thread:$0]  (!%p8767_p9), %s207_s22, 24576, %s209_s24, %s195_s18, %s8577_s5, %s8578_s6, %s8579_s7  }
  0x4d   : > { %s73_s12 = sadd.s32 1, %s8541_s20  ;;  %p80_p1 = scmp.ne.s32.totalorder %s8541_s20, %s8537_s19 }
  0x4e   : > { %p12399_p11 = scmp.eq.s32.totalorder %s8735_s10, 0  ;;  %p12400_p2 = scmp.eq.s32.totalorder %s8573_s28, 0 }
  0x4f   : > { %s220_s13 = sand.u32 1, %s8541_s20   ;;  %s7181_s2 = smul.u32 49152, %s8565_s26 }
  0x50   : > { %s8782_s11 = scalar_select %p12399_p11, %s8541_s20, %s73_s12  }
  0x51   : > { %p82_p0 = por %p80_p1, %p12400_p2  ;;  %s7180_s30 = smul.u32 3072, %s220_s13 }
  0x52   : > { %s229_s22 = scalar_lea.hbm %s12172_s1, %s7181_s2  ;;  %s219_s10 = scalar_lea.sflag [#allocation6], %s218_s8 }
  0x53   : > { %p8790_p10 = pnand %p7219_p3, %p82_p0  ;;  %s222_s24 = scalar_lea.vmem [#allocation5], %s7180_s30 }
  0x54   : > { %s230_s21 = sshll.u32 %s222_s24, 4  ;;  %s8580_s5 = smov [#allocation5]   ;;  %s231_s21 = int_to_ptr.vmem [resolvable:$true] %s230_s21 }
  0x55   : > { %p8363_p9 = pneg %p8790_p10  ;;  %s8374_s18 = scalar_lea.vmem %s231_s21, 49152 }
  0x56   : > { %p8375_p5 = scmp.ne.s32.totalorder %s231_s21, %s8374_s18  ;;  %s8379_s6 = sshll.u32 %s8580_s5, 4  ;;  %s8380_s6 = int_to_ptr.vmem [resolvable:$false] %s8379_s6 }
  0x57   : > { %s8381_s7 = scalar_lea.vmem %s8380_s6, 98304  ;;  %p8382_p8 = scmp.lt.s32.totalorder %s231_s21, %s8380_s6 }
  0x58   : > { %p8377_p7 = pnand %p8375_p5, %p8363_p9  ;;  %p8383_p1 = scmp.lt.s32.totalorder %s8381_s7, %s8374_s18 }
  0x5a   : > { %p8378_p13 = pneg %p8377_p7  ;;  %p8384_p11 = por %p8383_p1, %p8382_p8 }
  0x5c   : > { %p8385_p2 = pnand %p8384_p11, %p8378_p13 }
  0x5e   : > { %8388 = shalt.err (!%p8385_p2)
}
  0x5f   : > { %s8581_s0 = smov 384   ;;  %s8582_s8 = smov 24  }
  0x60   : > { %7210 = dma.hbm_to_vmem [thread:$0]  (!%p8790_p10), %s229_s22, 49152, %s231_s21, %s219_s10, %s8581_s0, %s8581_s0, %s8582_s8  }
  0x61   : > { %p118_p0 = scmp.eq.s32.totalorder %s8751_s14, 0  ;;  %s7221_s12 = smul.u32 18432, %s8569_s27 }
  0x62   : > { %s120_s13 = sadd.s32 1, %s8529_s17  ;;  %p127_p9 = scmp.ne.s32.totalorder %s8529_s17, %s8525_s16 }
  0x63   : > { %s8807_s30 = scalar_select %p118_p0, %s8529_s17, %s120_s13  }
  0x64   : > { %p12402_p5 = scmp.eq.s32.totalorder %s8573_s28, 0  ;;  %p12403_p13 = scmp.eq.s32.totalorder %s8681_s29, 5 }
  0x65   : > { %s240_s25 = sand.u32 1, %s8529_s17   ;;  %s251_s5 = scalar_lea.hbm %s12174_s3, %s7221_s12 }
  0x66   : > { %p129_p7 = por %p127_p9, %p12402_p5  ;;  %p8813_p8 = por %p12403_p13, %p127_p9 }
  0x67   : > { %s7182_s4 = smul.u32 1152, %s240_s25  ;;  %s241_s10 = scalar_lea.sflag [#allocation9], %s240_s25 }
  0x68   : > { %p8823_p10 = pnand %p7219_p3, %p129_p7  ;;  %s8583_s7 = smov [#allocation8]  }
  0x69   : > { %s244_s22 = scalar_lea.vmem [#allocation8], %s7182_s4  ;;  %s8407_s0 = sshll.u32 %s8583_s7, 4  ;;  %s8408_s0 = int_to_ptr.vmem [resolvable:$false] %s8407_s0 }
  0x6a   : > { %s252_s21 = sshll.u32 %s244_s22, 4  ;;  %p8391_p1 = pneg %p8823_p10  ;;  %s253_s21 = int_to_ptr.vmem [resolvable:$true] %s252_s21 }
  0x6b   : > { %s8402_s6 = scalar_lea.vmem %s253_s21, 18432  ;;  %s8409_s8 = scalar_lea.vmem %s8408_s0, 36864 }
  0x6c   : > { %p8403_p11 = scmp.ne.s32.totalorder %s253_s21, %s8402_s6  ;;  %p8410_p9 = scmp.lt.s32.totalorder %s253_s21, %s8408_s0 }
  0x6d   : > { %p8411_p3 = scmp.lt.s32.totalorder %s8409_s8, %s8402_s6 }
  0x6e   : > { %p8405_p2 = pnand %p8403_p11, %p8391_p1 }
  0x6f   : > { %p8412_p5 = por %p8411_p3, %p8410_p9 }
  0x70   : > { %p8406_p0 = pneg %p8405_p2 }
  0x72   : > { %p8413_p7 = pnand %p8412_p5, %p8406_p0 }
  0x74   : > { %8416 = shalt.err (!%p8413_p7)
}
  0x75   : > { %s8584_s12 = smov 768   ;;  %s8585_s13 = smov 48  }
  0x76   : > { %7213 = dma.hbm_to_vmem [thread:$0]  (!%p8823_p10), %s251_s5, 18432, %s253_s21, %s241_s10, %s8584_s12, %s8584_s12, %s8585_s13  }
  0x77   : > { %264 = sbr.rel (%p8714_p12) target bundleno = 1168 (0x490), region = 36 }
  0x7c   : > { %s12406_s25 = sld [smem:[#allocation17_spill]] }
  0x82   : > { %s266_s18 = sand.u32 1, %s12406_s25  }
  0x83   : > { %s7184_s4 = smul.u32 1536, %s266_s18  ;;  %s267_s22 = scalar_lea.sflag [#allocation3], %s266_s18 }
  0x85   : > { %s8834_s7 = scalar_lea.vmem [#allocation2], %s7184_s4 }
  0x86   : > { %8500 = dma.done.wait (%p8691_p4), %s267_s22, 24576  }
  0x87   : > { %8502 = vsyncadd (%p8691_p4), %s267_s22, 4294942720  ;;  %s275_s14 = sand.u32 1, %s8681_s29   ;;  %s277_s5 = sand.u32 1, %s8537_s19  }
  0x88   : > { %s7185_s21 = smul.u32 3072, %s277_s5  ;;  %s276_s9 = scalar_lea.sflag [#allocation6], %s275_s14 }
  0x8a   : > { %s8842_s10 = scalar_lea.vmem [#allocation5], %s7185_s21 }
  0x8b   : > { %8504 = dma.done.wait (%p8698_p6), %s276_s9, 49152  }
  0x8c   : > { %8506 = vsyncadd (%p8698_p6), %s276_s9, 4294918144  ;;  %p12409_p12 = scmp.eq.s32.totalorder %s8681_s29, 0 }
  0x8e   : > { %8508 = dma.done.wait (%p12409_p12), [#allocation6], 96   ;;  %p12410_p13 = pmov %p12409_p12 }
  0x8f   : > { %s12411_s0 = sld [smem:[#allocation22_spill]]  ;;  %s8853_s8 = sand.u32 1, %s8525_s16  }
  0x90   : > { %8510 = vsyncadd (%p12410_p13), [#allocation6], 4294967200  ;;  %s7186_s12 = smul.u32 1152, %s8853_s8  ;;  %s289_s13 = scalar_lea.sflag [#allocation9], %s8853_s8 }
  0x92   : > { %s8857_s25 = scalar_lea.vmem [#allocation8], %s7186_s12 }
  0x95   : > { %p12412_p4 = scmp.ne.s32.totalorder %s12411_s0, 0 }
  0x97   : > { %8512 = dma.done.wait (%p12412_p4), %s289_s13, 18432  }
  0x98   : > { %8514 = vsyncadd (%p12412_p4), %s289_s13, 4294948864  ;;  %s8863_s24 = scalar_lea.vmem [#allocation10], %s7186_s12  ;;  %s12413_s18 = sld [smem:[#allocation18_spill]] }
  0x9e   : > { %p6790_p6 = scmp.ne.s32.totalorder %s12413_s18, 0 }
  0xa0   : > { %335 = sbr.rel (%p6790_p6) target bundleno = 247 (0xf7), region = 56 }
  0xa5   : > { %v482_v0 = vlaneseq  ;;  %v480_v1 = vld [vmem:[#allocation7] sm:$0x3f]  ;;  %v336_v3 = vld [vmem:[%s8857_s25] sm:$0xff]  ;;  %v337_v4 = vld [vmem:[%s8857_s25 + $0x8] sm:$0xff] }
  0xa6   : > { %v338_v5 = vld [vmem:[%s8857_s25 + $0x10] sm:$0xff]  ;;  %v339_v6 = vld [vmem:[%s8857_s25 + $0x18] sm:$0xff]  ;;  %v340_v11 = vld [vmem:[%s8857_s25 + $0x20] sm:$0xff] }
  0xa7   : > { %v483_v2 = vshrl.u32 %v482_v0, 7  ;;  %v341_v12 = vld [vmem:[%s8857_s25 + $0x28] sm:$0xff]  ;;  %v342_v13 = vld [vmem:[%s8857_s25 + $0x30] sm:$0xff]  ;;  %v343_v14 = vld [vmem:[%s8857_s25 + $0x38] sm:$0xff] }
  0xa8   : > { %v344_v17 = vld [vmem:[%s8857_s25 + $0x40] sm:$0xff]  ;;  %v345_v18 = vld [vmem:[%s8857_s25 + $0x48] sm:$0xff]  ;;  %v346_v19 = vld [vmem:[%s8857_s25 + $0x50] sm:$0xff] }
  0xa9   : > { %v484_v7 = vsub.s32 0, %v483_v2  ;;  %v488_v8 = vsub.s32 1, %v483_v2  ;;  %v492_v9 = vsub.s32 2, %v483_v2  ;;  %v496_v10 = vsub.s32 3, %v483_v2  ;;  %v347_v20 = vld [vmem:[%s8857_s25 + $0x58] sm:$0xff]  ;;  %v348_v25 = vld [vmem:[%s8857_s25 + $0x60] sm:$0xff] }
  0xaa   : > { %v500_v15 = vsub.s32 4, %v483_v2  ;;  %v504_v16 = vsub.s32 5, %v483_v2  ;;  %v349_v26 = vld [vmem:[%s8857_s25 + $0x68] sm:$0xff]  ;;  %v350_v27 = vld [vmem:[%s8857_s25 + $0x70] sm:$0xff]  ;;  %v351_v28 = vld [vmem:[%s8857_s25 + $0x78] sm:$0xff] }
  0xab   : > { %v8878_v21 = vrot.slane %v480_v1, %v484_v7  ;;  %v8880_v22 = vrot.slane %v480_v1, %v488_v8  ;;  %v8882_v23 = vrot.slane %v480_v1, %v492_v9  ;;  %v8884_v24 = vrot.slane %v480_v1, %v496_v10  ;;  %v352_v31 = vld [vmem:[%s8857_s25 + $0x80] sm:$0xff]  ;;  %v353_v32 = vld [vmem:[%s8857_s25 + $0x88] sm:$0xff]  ;;  %v354_v33 = vld [vmem:[%s8857_s25 + $0x90] sm:$0xff] }
  0xac   : > { %v8890_v29 = vrot.slane %v480_v1, %v500_v15  ;;  %v8892_v30 = vrot.slane %v480_v1, %v504_v16  ;;  %v355_v34 = vld [vmem:[%s8857_s25 + $0x98] sm:$0xff]  ;;  %v356_v39 = vld [vmem:[%s8857_s25 + $0xa0] sm:$0xff]  ;;  %v357_v40 = vld [vmem:[%s8857_s25 + $0xa8] sm:$0xff] }
  0xad   : > { %v512_v35 = vadd.f32 %v8878_v21, %v336_v3  ;;  %v513_v36 = vadd.f32 %v8880_v22, %v337_v4  ;;  %v514_v37 = vadd.f32 %v8882_v23, %v338_v5  ;;  %v515_v38 = vadd.f32 %v8884_v24, %v339_v6  ;;  %v358_v41 = vld [vmem:[%s8857_s25 + $0xb0] sm:$0xff]  ;;  %v359_v42 = vld [vmem:[%s8857_s25 + $0xb8] sm:$0xff]  ;;  %v360_v47 = vld [vmem:[%s8857_s25 + $0xc0] sm:$0xff] }
  0xae   : > { %v516_v43 = vadd.f32 %v8890_v29, %v340_v11  ;;  %v517_v44 = vadd.f32 %v8892_v30, %v341_v12  ;;  %v518_v45 = vadd.f32 %v8878_v21, %v342_v13  ;;  %v519_v46 = vadd.f32 %v8880_v22, %v343_v14  ;;  %v361_v48 = vld [vmem:[%s8857_s25 + $0xc8] sm:$0xff]  ;;  %v362_v49 = vld [vmem:[%s8857_s25 + $0xd0] sm:$0xff]  ;;  %v363_v50 = vld [vmem:[%s8857_s25 + $0xd8] sm:$0xff] }
  0xaf   : > { %656 = vst [vmem:[%s8863_s24] sm:$0xff] %v512_v35  ;;  %657 = vst [vmem:[%s8863_s24 + $0x8] sm:$0xff] %v513_v36  ;;  %v520_v51 = vadd.f32 %v8882_v23, %v344_v17  ;;  %v521_v52 = vadd.f32 %v8884_v24, %v345_v18  ;;  %v522_v53 = vadd.f32 %v8890_v29, %v346_v19  ;;  %v364_v55 = vld [vmem:[%s8857_s25 + $0xe0] sm:$0xff]  ;;  %v365_v56 = vld [vmem:[%s8857_s25 + $0xe8] sm:$0xff] }
  0xb0   : > { %658 = vst [vmem:[%s8863_s24 + $0x10] sm:$0xff] %v514_v37  ;;  %659 = vst [vmem:[%s8863_s24 + $0x18] sm:$0xff] %v515_v38  ;;  %v523_v54 = vadd.f32 %v8892_v30, %v347_v20  ;;  %v366_v57 = vld [vmem:[%s8857_s25 + $0xf0] sm:$0xff]  ;;  %v524_v58 = vadd.f32 %v8878_v21, %v348_v25  ;;  %v525_v59 = vadd.f32 %v8880_v22, %v349_v26  ;;  %v367_v62 = vld [vmem:[%s8857_s25 + $0xf8] sm:$0xff] }
  0xb1   : > { %660 = vst [vmem:[%s8863_s24 + $0x20] sm:$0xff] %v516_v43  ;;  %661 = vst [vmem:[%s8863_s24 + $0x28] sm:$0xff] %v517_v44  ;;  %v526_v60 = vadd.f32 %v8882_v23, %v350_v27  ;;  %v527_v61 = vadd.f32 %v8884_v24, %v351_v28  ;;  %v368_v63 = vld [vmem:[%s8857_s25 + $0x100] sm:$0xff]  ;;  %v369_v0 = vld [vmem:[%s8857_s25 + $0x108] sm:$0xff]  ;;  %v528_v1 = vadd.f32 %v8890_v29, %v352_v31 }
  0xb2   : > { %662 = vst [vmem:[%s8863_s24 + $0x30] sm:$0xff] %v518_v45  ;;  %663 = vst [vmem:[%s8863_s24 + $0x38] sm:$0xff] %v519_v46  ;;  %v529_v2 = vadd.f32 %v8892_v30, %v353_v32  ;;  %v530_v3 = vadd.f32 %v8878_v21, %v354_v33  ;;  %v531_v4 = vadd.f32 %v8880_v22, %v355_v34  ;;  %v370_v5 = vld [vmem:[%s8857_s25 + $0x110] sm:$0xff]  ;;  %v371_v6 = vld [vmem:[%s8857_s25 + $0x118] sm:$0xff] }
  0xb3   : > { %664 = vst [vmem:[%s8863_s24 + $0x40] sm:$0xff] %v520_v51  ;;  %665 = vst [vmem:[%s8863_s24 + $0x48] sm:$0xff] %v521_v52  ;;  %v372_v7 = vld [vmem:[%s8857_s25 + $0x120] sm:$0xff]  ;;  %v532_v8 = vadd.f32 %v8882_v23, %v356_v39  ;;  %v533_v9 = vadd.f32 %v8884_v24, %v357_v40  ;;  %v534_v10 = vadd.f32 %v8890_v29, %v358_v41  ;;  %v373_v12 = vld [vmem:[%s8857_s25 + $0x128] sm:$0xff] }
  0xb4   : > { %666 = vst [vmem:[%s8863_s24 + $0x50] sm:$0xff] %v522_v53  ;;  %667 = vst [vmem:[%s8863_s24 + $0x58] sm:$0xff] %v523_v54  ;;  %v535_v11 = vadd.f32 %v8892_v30, %v359_v42  ;;  %v374_v13 = vld [vmem:[%s8857_s25 + $0x130] sm:$0xff]  ;;  %v375_v14 = vld [vmem:[%s8857_s25 + $0x138] sm:$0xff]  ;;  %v536_v15 = vadd.f32 %v8878_v21, %v360_v47  ;;  %v537_v16 = vadd.f32 %v8880_v22, %v361_v48 }
  0xb5   : > { %668 = vst [vmem:[%s8863_s24 + $0x60] sm:$0xff] %v524_v58  ;;  %669 = vst [vmem:[%s8863_s24 + $0x68] sm:$0xff] %v525_v59  ;;  %v538_v17 = vadd.f32 %v8882_v23, %v362_v49  ;;  %v539_v18 = vadd.f32 %v8884_v24, %v363_v50  ;;  %v376_v19 = vld [vmem:[%s8857_s25 + $0x140] sm:$0xff]  ;;  %v377_v20 = vld [vmem:[%s8857_s25 + $0x148] sm:$0xff]  ;;  %v540_v26 = vadd.f32 %v8890_v29, %v364_v55 }
  0xb6   : > { %670 = vst [vmem:[%s8863_s24 + $0x70] sm:$0xff] %v526_v60  ;;  %671 = vst [vmem:[%s8863_s24 + $0x78] sm:$0xff] %v527_v61  ;;  %v378_v25 = vld [vmem:[%s8857_s25 + $0x150] sm:$0xff]  ;;  %v541_v27 = vadd.f32 %v8892_v30, %v365_v56  ;;  %v542_v28 = vadd.f32 %v8878_v21, %v366_v57  ;;  %v543_v31 = vadd.f32 %v8880_v22, %v367_v62  ;;  %v379_v32 = vld [vmem:[%s8857_s25 + $0x158] sm:$0xff] }
  0xb7   : > { %672 = vst [vmem:[%s8863_s24 + $0x80] sm:$0xff] %v528_v1  ;;  %673 = vst [vmem:[%s8863_s24 + $0x88] sm:$0xff] %v529_v2  ;;  %v380_v33 = vld [vmem:[%s8857_s25 + $0x160] sm:$0xff]  ;;  %v381_v34 = vld [vmem:[%s8857_s25 + $0x168] sm:$0xff]  ;;  %v544_v35 = vadd.f32 %v8882_v23, %v368_v63  ;;  %v545_v36 = vadd.f32 %v8884_v24, %v369_v0  ;;  %v546_v37 = vadd.f32 %v8890_v29, %v370_v5 }
  0xb8   : > { %674 = vst [vmem:[%s8863_s24 + $0x90] sm:$0xff] %v530_v3  ;;  %675 = vst [vmem:[%s8863_s24 + $0x98] sm:$0xff] %v531_v4  ;;  %v547_v38 = vadd.f32 %v8892_v30, %v371_v6  ;;  %v382_v39 = vld [vmem:[%s8857_s25 + $0x170] sm:$0xff]  ;;  %v383_v40 = vld [vmem:[%s8857_s25 + $0x178] sm:$0xff]  ;;  %v548_v42 = vadd.f32 %v8878_v21, %v372_v7  ;;  %v549_v43 = vadd.f32 %v8880_v22, %v373_v12 }
  0xb9   : > { %676 = vst [vmem:[%s8863_s24 + $0xa0] sm:$0xff] %v532_v8  ;;  %677 = vst [vmem:[%s8863_s24 + $0xa8] sm:$0xff] %v533_v9  ;;  %v384_v41 = vld [vmem:[%s8857_s25 + $0x180] sm:$0xff]  ;;  %v550_v44 = vadd.f32 %v8882_v23, %v374_v13  ;;  %v551_v45 = vadd.f32 %v8884_v24, %v375_v14  ;;  %v385_v46 = vld [vmem:[%s8857_s25 + $0x188] sm:$0xff]  ;;  %v552_v49 = vadd.f32 %v8890_v29, %v376_v19 }
  0xba   : > { %678 = vst [vmem:[%s8863_s24 + $0xb0] sm:$0xff] %v534_v10  ;;  %679 = vst [vmem:[%s8863_s24 + $0xb8] sm:$0xff] %v535_v11  ;;  %v386_v47 = vld [vmem:[%s8857_s25 + $0x190] sm:$0xff]  ;;  %v387_v48 = vld [vmem:[%s8857_s25 + $0x198] sm:$0xff]  ;;  %v553_v50 = vadd.f32 %v8892_v30, %v377_v20  ;;  %v554_v51 = vadd.f32 %v8878_v21, %v378_v25  ;;  %v555_v52 = vadd.f32 %v8880_v22, %v379_v32 }
  0xbb   : > { %680 = vst [vmem:[%s8863_s24 + $0xc0] sm:$0xff] %v536_v15  ;;  %681 = vst [vmem:[%s8863_s24 + $0xc8] sm:$0xff] %v537_v16  ;;  %v388_v53 = vld [vmem:[%s8857_s25 + $0x1a0] sm:$0xff]  ;;  %v389_v54 = vld [vmem:[%s8857_s25 + $0x1a8] sm:$0xff]  ;;  %v556_v56 = vadd.f32 %v8882_v23, %v380_v33  ;;  %v557_v57 = vadd.f32 %v8884_v24, %v381_v34  ;;  %v558_v58 = vadd.f32 %v8890_v29, %v382_v39 }
  0xbc   : > { %682 = vst [vmem:[%s8863_s24 + $0xd0] sm:$0xff] %v538_v17  ;;  %683 = vst [vmem:[%s8863_s24 + $0xd8] sm:$0xff] %v539_v18  ;;  %v390_v55 = vld [vmem:[%s8857_s25 + $0x1b0] sm:$0xff]  ;;  %v559_v59 = vadd.f32 %v8892_v30, %v383_v40  ;;  %v391_v60 = vld [vmem:[%s8857_s25 + $0x1b8] sm:$0xff]  ;;  %v560_v63 = vadd.f32 %v8878_v21, %v384_v41  ;;  %v561_v0 = vadd.f32 %v8880_v22, %v385_v46 }
  0xbd   : > { %684 = vst [vmem:[%s8863_s24 + $0xe0] sm:$0xff] %v540_v26  ;;  %685 = vst [vmem:[%s8863_s24 + $0xe8] sm:$0xff] %v541_v27  ;;  %v392_v61 = vld [vmem:[%s8857_s25 + $0x1c0] sm:$0xff]  ;;  %v393_v62 = vld [vmem:[%s8857_s25 + $0x1c8] sm:$0xff]  ;;  %v562_v1 = vadd.f32 %v8882_v23, %v386_v47  ;;  %v563_v2 = vadd.f32 %v8884_v24, %v387_v48  ;;  %v564_v6 = vadd.f32 %v8890_v29, %v388_v53 }
  0xbe   : > { %686 = vst [vmem:[%s8863_s24 + $0xf0] sm:$0xff] %v542_v28  ;;  %687 = vst [vmem:[%s8863_s24 + $0xf8] sm:$0xff] %v543_v31  ;;  %v394_v3 = vld [vmem:[%s8857_s25 + $0x1d0] sm:$0xff]  ;;  %v395_v4 = vld [vmem:[%s8857_s25 + $0x1d8] sm:$0xff]  ;;  %v565_v7 = vadd.f32 %v8892_v30, %v389_v54  ;;  %v566_v8 = vadd.f32 %v8878_v21, %v390_v55  ;;  %v567_v9 = vadd.f32 %v8880_v22, %v391_v60 }
  0xbf   : > { %688 = vst [vmem:[%s8863_s24 + $0x100] sm:$0xff] %v544_v35  ;;  %689 = vst [vmem:[%s8863_s24 + $0x108] sm:$0xff] %v545_v36  ;;  %v396_v5 = vld [vmem:[%s8857_s25 + $0x1e0] sm:$0xff]  ;;  %v397_v10 = vld [vmem:[%s8857_s25 + $0x1e8] sm:$0xff]  ;;  %v568_v13 = vadd.f32 %v8882_v23, %v392_v61  ;;  %v569_v14 = vadd.f32 %v8884_v24, %v393_v62  ;;  %v570_v15 = vadd.f32 %v8890_v29, %v394_v3 }
  0xc0   : > { %690 = vst [vmem:[%s8863_s24 + $0x110] sm:$0xff] %v546_v37  ;;  %691 = vst [vmem:[%s8863_s24 + $0x118] sm:$0xff] %v547_v38  ;;  %v398_v11 = vld [vmem:[%s8857_s25 + $0x1f0] sm:$0xff]  ;;  %v399_v12 = vld [vmem:[%s8857_s25 + $0x1f8] sm:$0xff]  ;;  %v571_v16 = vadd.f32 %v8892_v30, %v395_v4  ;;  %v572_v20 = vadd.f32 %v8878_v21, %v396_v5  ;;  %v573_v25 = vadd.f32 %v8880_v22, %v397_v10 }
  0xc1   : > { %692 = vst [vmem:[%s8863_s24 + $0x120] sm:$0xff] %v548_v42  ;;  %693 = vst [vmem:[%s8863_s24 + $0x128] sm:$0xff] %v549_v43  ;;  %v400_v17 = vld [vmem:[%s8857_s25 + $0x200] sm:$0xff]  ;;  %v401_v18 = vld [vmem:[%s8857_s25 + $0x208] sm:$0xff]  ;;  %v574_v26 = vadd.f32 %v8882_v23, %v398_v11  ;;  %v575_v27 = vadd.f32 %v8884_v24, %v399_v12 }
  0xc2   : > { %694 = vst [vmem:[%s8863_s24 + $0x130] sm:$0xff] %v550_v44  ;;  %695 = vst [vmem:[%s8863_s24 + $0x138] sm:$0xff] %v551_v45  ;;  %v402_v19 = vld [vmem:[%s8857_s25 + $0x210] sm:$0xff]  ;;  %v403_v28 = vld [vmem:[%s8857_s25 + $0x218] sm:$0xff]  ;;  %v576_v33 = vadd.f32 %v8890_v29, %v400_v17  ;;  %v577_v34 = vadd.f32 %v8892_v30, %v401_v18 }
  0xc3   : > { %696 = vst [vmem:[%s8863_s24 + $0x140] sm:$0xff] %v552_v49  ;;  %697 = vst [vmem:[%s8863_s24 + $0x148] sm:$0xff] %v553_v50  ;;  %v404_v31 = vld [vmem:[%s8857_s25 + $0x220] sm:$0xff]  ;;  %v405_v32 = vld [vmem:[%s8857_s25 + $0x228] sm:$0xff]  ;;  %v578_v35 = vadd.f32 %v8878_v21, %v402_v19  ;;  %v579_v36 = vadd.f32 %v8880_v22, %v403_v28 }
  0xc4   : > { %698 = vst [vmem:[%s8863_s24 + $0x150] sm:$0xff] %v554_v51  ;;  %699 = vst [vmem:[%s8863_s24 + $0x158] sm:$0xff] %v555_v52  ;;  %v406_v37 = vld [vmem:[%s8857_s25 + $0x230] sm:$0xff]  ;;  %v407_v38 = vld [vmem:[%s8857_s25 + $0x238] sm:$0xff]  ;;  %v580_v40 = vadd.f32 %v8882_v23, %v404_v31  ;;  %v581_v41 = vadd.f32 %v8884_v24, %v405_v32 }
  0xc5   : > { %700 = vst [vmem:[%s8863_s24 + $0x160] sm:$0xff] %v556_v56  ;;  %701 = vst [vmem:[%s8863_s24 + $0x168] sm:$0xff] %v557_v57  ;;  %v408_v39 = vld [vmem:[%s8857_s25 + $0x240] sm:$0xff]  ;;  %v582_v42 = vadd.f32 %v8890_v29, %v406_v37  ;;  %v583_v43 = vadd.f32 %v8892_v30, %v407_v38  ;;  %v409_v44 = vld [vmem:[%s8857_s25 + $0x248] sm:$0xff] }
  0xc6   : > { %702 = vst [vmem:[%s8863_s24 + $0x170] sm:$0xff] %v558_v58  ;;  %703 = vst [vmem:[%s8863_s24 + $0x178] sm:$0xff] %v559_v59  ;;  %v410_v45 = vld [vmem:[%s8857_s25 + $0x250] sm:$0xff]  ;;  %v411_v46 = vld [vmem:[%s8857_s25 + $0x258] sm:$0xff]  ;;  %v584_v47 = vadd.f32 %v8878_v21, %v408_v39  ;;  %v585_v48 = vadd.f32 %v8880_v22, %v409_v44 }
  0xc7   : > { %704 = vst [vmem:[%s8863_s24 + $0x180] sm:$0xff] %v560_v63  ;;  %705 = vst [vmem:[%s8863_s24 + $0x188] sm:$0xff] %v561_v0  ;;  %v586_v49 = vadd.f32 %v8882_v23, %v410_v45  ;;  %v587_v50 = vadd.f32 %v8884_v24, %v411_v46  ;;  %v412_v51 = vld [vmem:[%s8857_s25 + $0x260] sm:$0xff]  ;;  %v413_v52 = vld [vmem:[%s8857_s25 + $0x268] sm:$0xff] }
  0xc8   : > { %706 = vst [vmem:[%s8863_s24 + $0x190] sm:$0xff] %v562_v1  ;;  %707 = vst [vmem:[%s8863_s24 + $0x198] sm:$0xff] %v563_v2  ;;  %v414_v53 = vld [vmem:[%s8857_s25 + $0x270] sm:$0xff]  ;;  %v588_v54 = vadd.f32 %v8890_v29, %v412_v51  ;;  %v589_v55 = vadd.f32 %v8892_v30, %v413_v52  ;;  %v415_v57 = vld [vmem:[%s8857_s25 + $0x278] sm:$0xff] }
  0xc9   : > { %708 = vst [vmem:[%s8863_s24 + $0x1a0] sm:$0xff] %v564_v6  ;;  %709 = vst [vmem:[%s8863_s24 + $0x1a8] sm:$0xff] %v565_v7  ;;  %v590_v56 = vadd.f32 %v8878_v21, %v414_v53  ;;  %v416_v58 = vld [vmem:[%s8857_s25 + $0x280] sm:$0xff]  ;;  %v417_v59 = vld [vmem:[%s8857_s25 + $0x288] sm:$0xff]  ;;  %v591_v60 = vadd.f32 %v8880_v22, %v415_v57 }
  0xca   : > { %710 = vst [vmem:[%s8863_s24 + $0x1b0] sm:$0xff] %v566_v8  ;;  %711 = vst [vmem:[%s8863_s24 + $0x1b8] sm:$0xff] %v567_v9  ;;  %v592_v61 = vadd.f32 %v8882_v23, %v416_v58  ;;  %v593_v62 = vadd.f32 %v8884_v24, %v417_v59  ;;  %v418_v63 = vld [vmem:[%s8857_s25 + $0x290] sm:$0xff]  ;;  %v419_v0 = vld [vmem:[%s8857_s25 + $0x298] sm:$0xff] }
  0xcb   : > { %712 = vst [vmem:[%s8863_s24 + $0x1c0] sm:$0xff] %v568_v13  ;;  %713 = vst [vmem:[%s8863_s24 + $0x1c8] sm:$0xff] %v569_v14  ;;  %v420_v1 = vld [vmem:[%s8857_s25 + $0x2a0] sm:$0xff]  ;;  %v594_v2 = vadd.f32 %v8890_v29, %v418_v63  ;;  %v595_v3 = vadd.f32 %v8892_v30, %v419_v0  ;;  %v421_v5 = vld [vmem:[%s8857_s25 + $0x2a8] sm:$0xff] }
  0xcc   : > { %714 = vst [vmem:[%s8863_s24 + $0x1d0] sm:$0xff] %v570_v15  ;;  %715 = vst [vmem:[%s8863_s24 + $0x1d8] sm:$0xff] %v571_v16  ;;  %v596_v4 = vadd.f32 %v8878_v21, %v420_v1  ;;  %v422_v6 = vld [vmem:[%s8857_s25 + $0x2b0] sm:$0xff]  ;;  %v423_v7 = vld [vmem:[%s8857_s25 + $0x2b8] sm:$0xff]  ;;  %v597_v8 = vadd.f32 %v8880_v22, %v421_v5 }
  0xcd   : > { %716 = vst [vmem:[%s8863_s24 + $0x1e0] sm:$0xff] %v572_v20  ;;  %717 = vst [vmem:[%s8863_s24 + $0x1e8] sm:$0xff] %v573_v25  ;;  %v598_v9 = vadd.f32 %v8882_v23, %v422_v6  ;;  %v599_v10 = vadd.f32 %v8884_v24, %v423_v7  ;;  %v424_v11 = vld [vmem:[%s8857_s25 + $0x2c0] sm:$0xff]  ;;  %v425_v12 = vld [vmem:[%s8857_s25 + $0x2c8] sm:$0xff] }
  0xce   : > { %718 = vst [vmem:[%s8863_s24 + $0x1f0] sm:$0xff] %v574_v26  ;;  %719 = vst [vmem:[%s8863_s24 + $0x1f8] sm:$0xff] %v575_v27  ;;  %v426_v13 = vld [vmem:[%s8857_s25 + $0x2d0] sm:$0xff]  ;;  %v600_v14 = vadd.f32 %v8890_v29, %v424_v11  ;;  %v601_v15 = vadd.f32 %v8892_v30, %v425_v12  ;;  %v427_v17 = vld [vmem:[%s8857_s25 + $0x2d8] sm:$0xff] }
  0xcf   : > { %720 = vst [vmem:[%s8863_s24 + $0x200] sm:$0xff] %v576_v33  ;;  %721 = vst [vmem:[%s8863_s24 + $0x208] sm:$0xff] %v577_v34  ;;  %v602_v16 = vadd.f32 %v8878_v21, %v426_v13  ;;  %v428_v18 = vld [vmem:[%s8857_s25 + $0x2e0] sm:$0xff]  ;;  %v429_v19 = vld [vmem:[%s8857_s25 + $0x2e8] sm:$0xff]  ;;  %v603_v20 = vadd.f32 %v8880_v22, %v427_v17 }
  0xd0   : > { %722 = vst [vmem:[%s8863_s24 + $0x210] sm:$0xff] %v578_v35  ;;  %723 = vst [vmem:[%s8863_s24 + $0x218] sm:$0xff] %v579_v36  ;;  %v604_v25 = vadd.f32 %v8882_v23, %v428_v18  ;;  %v605_v26 = vadd.f32 %v8884_v24, %v429_v19  ;;  %v430_v27 = vld [vmem:[%s8857_s25 + $0x2f0] sm:$0xff]  ;;  %v431_v28 = vld [vmem:[%s8857_s25 + $0x2f8] sm:$0xff] }
  0xd1   : > { %724 = vst [vmem:[%s8863_s24 + $0x220] sm:$0xff] %v580_v40  ;;  %725 = vst [vmem:[%s8863_s24 + $0x228] sm:$0xff] %v581_v41  ;;  %v432_v31 = vld [vmem:[%s8857_s25 + $0x300] sm:$0xff]  ;;  %v606_v32 = vadd.f32 %v8890_v29, %v430_v27  ;;  %v607_v33 = vadd.f32 %v8892_v30, %v431_v28  ;;  %v433_v35 = vld [vmem:[%s8857_s25 + $0x308] sm:$0xff] }
  0xd2   : > { %726 = vst [vmem:[%s8863_s24 + $0x230] sm:$0xff] %v582_v42  ;;  %727 = vst [vmem:[%s8863_s24 + $0x238] sm:$0xff] %v583_v43  ;;  %v608_v34 = vadd.f32 %v8878_v21, %v432_v31  ;;  %v434_v36 = vld [vmem:[%s8857_s25 + $0x310] sm:$0xff]  ;;  %v435_v37 = vld [vmem:[%s8857_s25 + $0x318] sm:$0xff]  ;;  %v609_v38 = vadd.f32 %v8880_v22, %v433_v35 }
  0xd3   : > { %728 = vst [vmem:[%s8863_s24 + $0x240] sm:$0xff] %v584_v47  ;;  %729 = vst [vmem:[%s8863_s24 + $0x248] sm:$0xff] %v585_v48  ;;  %v610_v39 = vadd.f32 %v8882_v23, %v434_v36  ;;  %v611_v40 = vadd.f32 %v8884_v24, %v435_v37  ;;  %v436_v41 = vld [vmem:[%s8857_s25 + $0x320] sm:$0xff]  ;;  %v437_v42 = vld [vmem:[%s8857_s25 + $0x328] sm:$0xff] }
  0xd4   : > { %730 = vst [vmem:[%s8863_s24 + $0x250] sm:$0xff] %v586_v49  ;;  %731 = vst [vmem:[%s8863_s24 + $0x258] sm:$0xff] %v587_v50  ;;  %v438_v43 = vld [vmem:[%s8857_s25 + $0x330] sm:$0xff]  ;;  %v612_v44 = vadd.f32 %v8890_v29, %v436_v41  ;;  %v613_v45 = vadd.f32 %v8892_v30, %v437_v42  ;;  %v439_v47 = vld [vmem:[%s8857_s25 + $0x338] sm:$0xff] }
  0xd5   : > { %732 = vst [vmem:[%s8863_s24 + $0x260] sm:$0xff] %v588_v54  ;;  %733 = vst [vmem:[%s8863_s24 + $0x268] sm:$0xff] %v589_v55  ;;  %v614_v46 = vadd.f32 %v8878_v21, %v438_v43  ;;  %v440_v48 = vld [vmem:[%s8857_s25 + $0x340] sm:$0xff]  ;;  %v441_v49 = vld [vmem:[%s8857_s25 + $0x348] sm:$0xff]  ;;  %v615_v50 = vadd.f32 %v8880_v22, %v439_v47 }
  0xd6   : > { %734 = vst [vmem:[%s8863_s24 + $0x270] sm:$0xff] %v590_v56  ;;  %735 = vst [vmem:[%s8863_s24 + $0x278] sm:$0xff] %v591_v60  ;;  %v616_v51 = vadd.f32 %v8882_v23, %v440_v48  ;;  %v617_v52 = vadd.f32 %v8884_v24, %v441_v49  ;;  %v442_v53 = vld [vmem:[%s8857_s25 + $0x350] sm:$0xff]  ;;  %v443_v54 = vld [vmem:[%s8857_s25 + $0x358] sm:$0xff] }
  0xd7   : > { %736 = vst [vmem:[%s8863_s24 + $0x280] sm:$0xff] %v592_v61  ;;  %737 = vst [vmem:[%s8863_s24 + $0x288] sm:$0xff] %v593_v62  ;;  %v444_v55 = vld [vmem:[%s8857_s25 + $0x360] sm:$0xff]  ;;  %v618_v56 = vadd.f32 %v8890_v29, %v442_v53  ;;  %v619_v57 = vadd.f32 %v8892_v30, %v443_v54  ;;  %v445_v59 = vld [vmem:[%s8857_s25 + $0x368] sm:$0xff] }
  0xd8   : > { %738 = vst [vmem:[%s8863_s24 + $0x290] sm:$0xff] %v594_v2  ;;  %739 = vst [vmem:[%s8863_s24 + $0x298] sm:$0xff] %v595_v3  ;;  %v620_v58 = vadd.f32 %v8878_v21, %v444_v55  ;;  %v446_v60 = vld [vmem:[%s8857_s25 + $0x370] sm:$0xff]  ;;  %v447_v61 = vld [vmem:[%s8857_s25 + $0x378] sm:$0xff]  ;;  %v621_v62 = vadd.f32 %v8880_v22, %v445_v59 }
  0xd9   : > { %740 = vst [vmem:[%s8863_s24 + $0x2a0] sm:$0xff] %v596_v4  ;;  %741 = vst [vmem:[%s8863_s24 + $0x2a8] sm:$0xff] %v597_v8  ;;  %v622_v63 = vadd.f32 %v8882_v23, %v446_v60  ;;  %v623_v0 = vadd.f32 %v8884_v24, %v447_v61  ;;  %v448_v1 = vld [vmem:[%s8857_s25 + $0x380] sm:$0xff]  ;;  %v449_v2 = vld [vmem:[%s8857_s25 + $0x388] sm:$0xff] }
  0xda   : > { %742 = vst [vmem:[%s8863_s24 + $0x2b0] sm:$0xff] %v598_v9  ;;  %743 = vst [vmem:[%s8863_s24 + $0x2b8] sm:$0xff] %v599_v10  ;;  %v450_v3 = vld [vmem:[%s8857_s25 + $0x390] sm:$0xff]  ;;  %v624_v4 = vadd.f32 %v8890_v29, %v448_v1  ;;  %v625_v5 = vadd.f32 %v8892_v30, %v449_v2  ;;  %v451_v7 = vld [vmem:[%s8857_s25 + $0x398] sm:$0xff] }
  0xdb   : > { %744 = vst [vmem:[%s8863_s24 + $0x2c0] sm:$0xff] %v600_v14  ;;  %745 = vst [vmem:[%s8863_s24 + $0x2c8] sm:$0xff] %v601_v15  ;;  %v626_v6 = vadd.f32 %v8878_v21, %v450_v3  ;;  %v452_v8 = vld [vmem:[%s8857_s25 + $0x3a0] sm:$0xff]  ;;  %v453_v9 = vld [vmem:[%s8857_s25 + $0x3a8] sm:$0xff]  ;;  %v627_v10 = vadd.f32 %v8880_v22, %v451_v7 }
  0xdc   : > { %746 = vst [vmem:[%s8863_s24 + $0x2d0] sm:$0xff] %v602_v16  ;;  %747 = vst [vmem:[%s8863_s24 + $0x2d8] sm:$0xff] %v603_v20  ;;  %v628_v11 = vadd.f32 %v8882_v23, %v452_v8  ;;  %v629_v12 = vadd.f32 %v8884_v24, %v453_v9  ;;  %v454_v13 = vld [vmem:[%s8857_s25 + $0x3b0] sm:$0xff]  ;;  %v455_v14 = vld [vmem:[%s8857_s25 + $0x3b8] sm:$0xff] }
  0xdd   : > { %748 = vst [vmem:[%s8863_s24 + $0x2e0] sm:$0xff] %v604_v25  ;;  %749 = vst [vmem:[%s8863_s24 + $0x2e8] sm:$0xff] %v605_v26  ;;  %v456_v15 = vld [vmem:[%s8857_s25 + $0x3c0] sm:$0xff]  ;;  %v630_v16 = vadd.f32 %v8890_v29, %v454_v13  ;;  %v631_v17 = vadd.f32 %v8892_v30, %v455_v14  ;;  %v457_v19 = vld [vmem:[%s8857_s25 + $0x3c8] sm:$0xff] }
  0xde   : > { %750 = vst [vmem:[%s8863_s24 + $0x2f0] sm:$0xff] %v606_v32  ;;  %751 = vst [vmem:[%s8863_s24 + $0x2f8] sm:$0xff] %v607_v33  ;;  %v632_v18 = vadd.f32 %v8878_v21, %v456_v15  ;;  %v458_v20 = vld [vmem:[%s8857_s25 + $0x3d0] sm:$0xff]  ;;  %v459_v25 = vld [vmem:[%s8857_s25 + $0x3d8] sm:$0xff]  ;;  %v633_v26 = vadd.f32 %v8880_v22, %v457_v19 }
  0xdf   : > { %752 = vst [vmem:[%s8863_s24 + $0x300] sm:$0xff] %v608_v34  ;;  %753 = vst [vmem:[%s8863_s24 + $0x308] sm:$0xff] %v609_v38  ;;  %v634_v27 = vadd.f32 %v8882_v23, %v458_v20  ;;  %v635_v28 = vadd.f32 %v8884_v24, %v459_v25  ;;  %v460_v31 = vld [vmem:[%s8857_s25 + $0x3e0] sm:$0xff]  ;;  %v461_v32 = vld [vmem:[%s8857_s25 + $0x3e8] sm:$0xff] }
  0xe0   : > { %754 = vst [vmem:[%s8863_s24 + $0x310] sm:$0xff] %v610_v39  ;;  %755 = vst [vmem:[%s8863_s24 + $0x318] sm:$0xff] %v611_v40  ;;  %v462_v33 = vld [vmem:[%s8857_s25 + $0x3f0] sm:$0xff]  ;;  %v636_v34 = vadd.f32 %v8890_v29, %v460_v31  ;;  %v637_v35 = vadd.f32 %v8892_v30, %v461_v32  ;;  %v463_v37 = vld [vmem:[%s8857_s25 + $0x3f8] sm:$0xff] }
  0xe1   : > { %756 = vst [vmem:[%s8863_s24 + $0x320] sm:$0xff] %v612_v44  ;;  %757 = vst [vmem:[%s8863_s24 + $0x328] sm:$0xff] %v613_v45  ;;  %v638_v36 = vadd.f32 %v8878_v21, %v462_v33  ;;  %v464_v38 = vld [vmem:[%s8857_s25 + $0x400] sm:$0xff]  ;;  %v465_v39 = vld [vmem:[%s8857_s25 + $0x408] sm:$0xff]  ;;  %v639_v40 = vadd.f32 %v8880_v22, %v463_v37 }
  0xe2   : > { %758 = vst [vmem:[%s8863_s24 + $0x330] sm:$0xff] %v614_v46  ;;  %759 = vst [vmem:[%s8863_s24 + $0x338] sm:$0xff] %v615_v50  ;;  %v640_v41 = vadd.f32 %v8882_v23, %v464_v38  ;;  %v641_v42 = vadd.f32 %v8884_v24, %v465_v39  ;;  %v466_v43 = vld [vmem:[%s8857_s25 + $0x410] sm:$0xff]  ;;  %v467_v44 = vld [vmem:[%s8857_s25 + $0x418] sm:$0xff] }
  0xe3   : > { %760 = vst [vmem:[%s8863_s24 + $0x340] sm:$0xff] %v616_v51  ;;  %761 = vst [vmem:[%s8863_s24 + $0x348] sm:$0xff] %v617_v52  ;;  %v468_v45 = vld [vmem:[%s8857_s25 + $0x420] sm:$0xff]  ;;  %v642_v46 = vadd.f32 %v8890_v29, %v466_v43  ;;  %v643_v47 = vadd.f32 %v8892_v30, %v467_v44  ;;  %v469_v49 = vld [vmem:[%s8857_s25 + $0x428] sm:$0xff] }
  0xe4   : > { %762 = vst [vmem:[%s8863_s24 + $0x350] sm:$0xff] %v618_v56  ;;  %763 = vst [vmem:[%s8863_s24 + $0x358] sm:$0xff] %v619_v57  ;;  %v644_v48 = vadd.f32 %v8878_v21, %v468_v45  ;;  %v470_v50 = vld [vmem:[%s8857_s25 + $0x430] sm:$0xff]  ;;  %v471_v51 = vld [vmem:[%s8857_s25 + $0x438] sm:$0xff]  ;;  %v645_v52 = vadd.f32 %v8880_v22, %v469_v49 }
  0xe5   : > { %764 = vst [vmem:[%s8863_s24 + $0x360] sm:$0xff] %v620_v58  ;;  %765 = vst [vmem:[%s8863_s24 + $0x368] sm:$0xff] %v621_v62  ;;  %v646_v53 = vadd.f32 %v8882_v23, %v470_v50  ;;  %v647_v54 = vadd.f32 %v8884_v24, %v471_v51  ;;  %v472_v55 = vld [vmem:[%s8857_s25 + $0x440] sm:$0xff]  ;;  %v473_v56 = vld [vmem:[%s8857_s25 + $0x448] sm:$0xff] }
  0xe6   : > { %766 = vst [vmem:[%s8863_s24 + $0x370] sm:$0xff] %v622_v63  ;;  %767 = vst [vmem:[%s8863_s24 + $0x378] sm:$0xff] %v623_v0  ;;  %v474_v57 = vld [vmem:[%s8857_s25 + $0x450] sm:$0xff]  ;;  %v648_v58 = vadd.f32 %v8890_v29, %v472_v55  ;;  %v649_v59 = vadd.f32 %v8892_v30, %v473_v56  ;;  %v475_v61 = vld [vmem:[%s8857_s25 + $0x458] sm:$0xff] }
  0xe7   : > { %768 = vst [vmem:[%s8863_s24 + $0x380] sm:$0xff] %v624_v4  ;;  %769 = vst [vmem:[%s8863_s24 + $0x388] sm:$0xff] %v625_v5  ;;  %v650_v60 = vadd.f32 %v8878_v21, %v474_v57  ;;  %v476_v62 = vld [vmem:[%s8857_s25 + $0x460] sm:$0xff]  ;;  %v477_v63 = vld [vmem:[%s8857_s25 + $0x468] sm:$0xff]  ;;  %v651_v0 = vadd.f32 %v8880_v22, %v475_v61 }
  0xe8   : > { %770 = vst [vmem:[%s8863_s24 + $0x390] sm:$0xff] %v626_v6  ;;  %771 = vst [vmem:[%s8863_s24 + $0x398] sm:$0xff] %v627_v10  ;;  %v652_v1 = vadd.f32 %v8882_v23, %v476_v62  ;;  %v653_v2 = vadd.f32 %v8884_v24, %v477_v63  ;;  %v478_v3 = vld [vmem:[%s8857_s25 + $0x470] sm:$0xff]  ;;  %v479_v4 = vld [vmem:[%s8857_s25 + $0x478] sm:$0xff] }
  0xe9   : > { %772 = vst [vmem:[%s8863_s24 + $0x3a0] sm:$0xff] %v628_v11  ;;  %773 = vst [vmem:[%s8863_s24 + $0x3a8] sm:$0xff] %v629_v12  ;;  %v654_v21 = vadd.f32 %v8890_v29, %v478_v3  ;;  %v655_v5 = vadd.f32 %v8892_v30, %v479_v4 }
  0xea   : > { %774 = vst [vmem:[%s8863_s24 + $0x3b0] sm:$0xff] %v630_v16  ;;  %775 = vst [vmem:[%s8863_s24 + $0x3b8] sm:$0xff] %v631_v17 }
  0xeb   : > { %776 = vst [vmem:[%s8863_s24 + $0x3c0] sm:$0xff] %v632_v18  ;;  %777 = vst [vmem:[%s8863_s24 + $0x3c8] sm:$0xff] %v633_v26 }
  0xec   : > { %778 = vst [vmem:[%s8863_s24 + $0x3d0] sm:$0xff] %v634_v27  ;;  %779 = vst [vmem:[%s8863_s24 + $0x3d8] sm:$0xff] %v635_v28 }
  0xed   : > { %780 = vst [vmem:[%s8863_s24 + $0x3e0] sm:$0xff] %v636_v34  ;;  %781 = vst [vmem:[%s8863_s24 + $0x3e8] sm:$0xff] %v637_v35 }
  0xee   : > { %782 = vst [vmem:[%s8863_s24 + $0x3f0] sm:$0xff] %v638_v36  ;;  %783 = vst [vmem:[%s8863_s24 + $0x3f8] sm:$0xff] %v639_v40 }
  0xef   : > { %784 = vst [vmem:[%s8863_s24 + $0x400] sm:$0xff] %v640_v41  ;;  %785 = vst [vmem:[%s8863_s24 + $0x408] sm:$0xff] %v641_v42 }
  0xf0   : > { %786 = vst [vmem:[%s8863_s24 + $0x410] sm:$0xff] %v642_v46  ;;  %787 = vst [vmem:[%s8863_s24 + $0x418] sm:$0xff] %v643_v47 }
  0xf1   : > { %788 = vst [vmem:[%s8863_s24 + $0x420] sm:$0xff] %v644_v48  ;;  %789 = vst [vmem:[%s8863_s24 + $0x428] sm:$0xff] %v645_v52 }
  0xf2   : > { %790 = vst [vmem:[%s8863_s24 + $0x430] sm:$0xff] %v646_v53  ;;  %791 = vst [vmem:[%s8863_s24 + $0x438] sm:$0xff] %v647_v54 }
  0xf3   : > { %792 = vst [vmem:[%s8863_s24 + $0x440] sm:$0xff] %v648_v58  ;;  %793 = vst [vmem:[%s8863_s24 + $0x448] sm:$0xff] %v649_v59 }
  0xf4   : > { %794 = vst [vmem:[%s8863_s24 + $0x450] sm:$0xff] %v650_v60  ;;  %795 = vst [vmem:[%s8863_s24 + $0x458] sm:$0xff] %v651_v0 }
  0xf5   : > { %796 = vst [vmem:[%s8863_s24 + $0x460] sm:$0xff] %v652_v1  ;;  %797 = vst [vmem:[%s8863_s24 + $0x468] sm:$0xff] %v653_v2 }
  0xf6   : > { %798 = vst [vmem:[%s8863_s24 + $0x470] sm:$0xff] %v654_v21  ;;  %799 = vst [vmem:[%s8863_s24 + $0x478] sm:$0xff] %v655_v5 }
  0xf7 PF: > { %v7347_v22 = vld [vmem:[%s8842_s10 + $0x154] ss:$24 sps:$4 sm:$0xff]   ;;  %v7351_v24 = vld [vmem:[%s8842_s10 + $0x150] ss:$24 sps:$4 sm:$0xff]   ;;  %v7353_v30 = vld [vmem:[%s8842_s10 + $0x124] ss:$24 sps:$4 sm:$0xff]  }
  0xf8   : > { %v7349_v23 = vld [vmem:[%s8842_s10 + $0x454] ss:$24 sps:$4 sm:$0xff]   ;;  %4496 = vmatprep.subr.bf16.mxu0 %v7347_v22  ;;  %v7352_v29 = vld [vmem:[%s8842_s10 + $0x450] ss:$24 sps:$4 sm:$0xff]   ;;  %v7355_v6 = vld [vmem:[%s8842_s10 + $0x424] ss:$24 sps:$4 sm:$0xff]  }
  0xf9   : > { %4649 = vmatprep.subr.bf16.mxu1 %v7349_v23  ;;  %4497 = vmatpush1.bf16.msra.mxu0 %v7351_v24  ;;  %v7357_v7 = vld [vmem:[%s8842_s10 + $0x120] ss:$24 sps:$4 sm:$0xff]   ;;  %v7359_v9 = vld [vmem:[%s8842_s10 + $0xf4] ss:$24 sps:$4 sm:$0xff]   ;;  %v7363_v11 = vld [vmem:[%s8842_s10 + $0xf0] ss:$24 sps:$4 sm:$0xff]  }
  0xfa   : > { %4650 = vmatpush1.bf16.msra.mxu1 %v7352_v29  ;;  %4498 = vmatprep.subr.bf16.mxu0 %v7353_v30  ;;  %v7358_v8 = vld [vmem:[%s8842_s10 + $0x420] ss:$24 sps:$4 sm:$0xff]   ;;  %v7361_v10 = vld [vmem:[%s8842_s10 + $0x3f4] ss:$24 sps:$4 sm:$0xff]   ;;  %v7364_v12 = vld [vmem:[%s8842_s10 + $0x3f0] ss:$24 sps:$4 sm:$0xff]  }
  0xfb   : > { %4651 = vmatprep.subr.bf16.mxu1 %v7355_v6  ;;  %v7365_v13 = vld [vmem:[%s8842_s10 + $0xc4] ss:$24 sps:$4 sm:$0xff]   ;;  %v7369_v15 = vld [vmem:[%s8842_s10 + $0xc0] ss:$24 sps:$4 sm:$0xff]   ;;  %v7371_v17 = vld [vmem:[%s8842_s10 + $0x94] ss:$24 sps:$4 sm:$0xff]  }
  0xfc   : > { %v7367_v14 = vld [vmem:[%s8842_s10 + $0x3c4] ss:$24 sps:$4 sm:$0xff]   ;;  %v7370_v16 = vld [vmem:[%s8842_s10 + $0x3c0] ss:$24 sps:$4 sm:$0xff]   ;;  %v7373_v18 = vld [vmem:[%s8842_s10 + $0x394] ss:$24 sps:$4 sm:$0xff]  }
  0xfd   : > { %4499 = vmatpush1.bf16.msra.mxu0 %v7357_v7  ;;  %v7375_v19 = vld [vmem:[%s8842_s10 + $0x90] ss:$24 sps:$4 sm:$0xff]   ;;  %v7377_v25 = vld [vmem:[%s8842_s10 + $0x64] ss:$24 sps:$4 sm:$0xff]   ;;  %v7381_v27 = vld [vmem:[%s8842_s10 + $0x60] ss:$24 sps:$4 sm:$0xff]  }
  0xfe   : > { %4652 = vmatpush1.bf16.msra.mxu1 %v7358_v8  ;;  %4500 = vmatprep.subr.bf16.mxu0 %v7359_v9  ;;  %v7376_v20 = vld [vmem:[%s8842_s10 + $0x390] ss:$24 sps:$4 sm:$0xff]   ;;  %v7379_v26 = vld [vmem:[%s8842_s10 + $0x364] ss:$24 sps:$4 sm:$0xff]   ;;  %v7382_v28 = vld [vmem:[%s8842_s10 + $0x360] ss:$24 sps:$4 sm:$0xff]  }
  0xff   : > { %4653 = vmatprep.subr.bf16.mxu1 %v7361_v10  ;;  %v7383_v31 = vld [vmem:[%s8842_s10 + $0x34] ss:$24 sps:$4 sm:$0xff]   ;;  %v7387_v33 = vld [vmem:[%s8842_s10 + $0x30] ss:$24 sps:$4 sm:$0xff]   ;;  %v7389_v35 = vld [vmem:[%s8842_s10 + $0x4] ss:$24 sps:$4 sm:$0xff]  }
 0x100   : > { %v7385_v32 = vld [vmem:[%s8842_s10 + $0x334] ss:$24 sps:$4 sm:$0xff]   ;;  %v7388_v34 = vld [vmem:[%s8842_s10 + $0x330] ss:$24 sps:$4 sm:$0xff]   ;;  %v7391_v36 = vld [vmem:[%s8842_s10 + $0x304] ss:$24 sps:$4 sm:$0xff]  }
 0x101   : > { %4501 = vmatpush1.bf16.msra.mxu0 %v7363_v11  ;;  %v7393_v37 = vld [vmem:[%s8842_s10] ss:$24 sps:$4 sm:$0xff]   ;;  %v7395_v39 = vld [vmem:[%s8842_s10 + $0x2d4] ss:$24 sps:$4 sm:$0xff]   ;;  %v7399_v41 = vld [vmem:[%s8842_s10 + $0x2d0] ss:$24 sps:$4 sm:$0xff]  }
 0x102   : > { %4654 = vmatpush1.bf16.msra.mxu1 %v7364_v12  ;;  %4502 = vmatprep.subr.bf16.mxu0 %v7365_v13  ;;  %v7394_v38 = vld [vmem:[%s8842_s10 + $0x300] ss:$24 sps:$4 sm:$0xff]   ;;  %v7397_v40 = vld [vmem:[%s8842_s10 + $0x5d4] ss:$24 sps:$4 sm:$0xff]   ;;  %v7400_v42 = vld [vmem:[%s8842_s10 + $0x5d0] ss:$24 sps:$4 sm:$0xff]  }
 0x103   : > { %4655 = vmatprep.subr.bf16.mxu1 %v7367_v14  ;;  %v7401_v43 = vld [vmem:[%s8842_s10 + $0x2a4] ss:$24 sps:$4 sm:$0xff]   ;;  %v7405_v45 = vld [vmem:[%s8842_s10 + $0x2a0] ss:$24 sps:$4 sm:$0xff]   ;;  %v7407_v47 = vld [vmem:[%s8842_s10 + $0x274] ss:$24 sps:$4 sm:$0xff]  }
 0x104   : > { %v7403_v44 = vld [vmem:[%s8842_s10 + $0x5a4] ss:$24 sps:$4 sm:$0xff]   ;;  %v7406_v46 = vld [vmem:[%s8842_s10 + $0x5a0] ss:$24 sps:$4 sm:$0xff]   ;;  %v7409_v48 = vld [vmem:[%s8842_s10 + $0x574] ss:$24 sps:$4 sm:$0xff]  }
 0x105   : > { %4503 = vmatpush1.bf16.msra.mxu0 %v7369_v15  ;;  %v7411_v49 = vld [vmem:[%s8842_s10 + $0x270] ss:$24 sps:$4 sm:$0xff]   ;;  %v7413_v51 = vld [vmem:[%s8842_s10 + $0x244] ss:$24 sps:$4 sm:$0xff]   ;;  %v7417_v53 = vld [vmem:[%s8842_s10 + $0x240] ss:$24 sps:$4 sm:$0xff]  }
 0x106   : > { %4656 = vmatpush1.bf16.msra.mxu1 %v7370_v16  ;;  %4504 = vmatprep.subr.bf16.mxu0 %v7371_v17  ;;  %v7412_v50 = vld [vmem:[%s8842_s10 + $0x570] ss:$24 sps:$4 sm:$0xff]   ;;  %v7415_v52 = vld [vmem:[%s8842_s10 + $0x544] ss:$24 sps:$4 sm:$0xff]   ;;  %v7418_v54 = vld [vmem:[%s8842_s10 + $0x540] ss:$24 sps:$4 sm:$0xff]  }
 0x107   : > { %4657 = vmatprep.subr.bf16.mxu1 %v7373_v18  ;;  %v801_v55 = vld [vmem:[%s8834_s7 + $0x8] sm:$0xff]  ;;  %v9362_v59 = vld [vmem:[%s8834_s7 + $0x18] sm:$0xff]  ;;  %v9369_v63 = vld [vmem:[%s8834_s7] sm:$0xff]  ;;  %s12731_s29 = sld [smem:[#allocation19_spill]]  ;;  %s6635_s22 = sshll.u32 %s8863_s24, 4  ;;  %s12093_s22 = int_to_ptr.vmem [resolvable:$true] %s6635_s22 }
 0x108   : > { %v7419_v56 = vld [vmem:[%s8842_s10 + $0x214] ss:$24 sps:$4 sm:$0xff]   ;;  %v1185_v58 = vmul.f32 0.70710677, %v801_v55  ;;  %v9365_v60 = vld [vmem:[%s8834_s7 + $0x58] sm:$0xff]  ;;  %v9374_v2 = vld [vmem:[%s8834_s7 + $0x40] sm:$0xff] }
 0x109   : > { %4505 = vmatpush1.bf16.msra.mxu0 %v7375_v19  ;;  %v809_v57 = vld [vmem:[%s8834_s7 + $0x48] sm:$0xff]  ;;  %v1187_v0 = vmul.f32 0.70710677, %v9362_v59  ;;  %v1195_v1 = vmul.f32 0.70710677, %v9365_v60  ;;  %v802_v5 = vld [vmem:[%s8834_s7 + $0x10] sm:$0xff] }
 0x10a   : > { %4658 = vmatpush1.bf16.msra.mxu1 %v7376_v20  ;;  %4506 = vmatprep.subr.bf16.mxu0 %v7377_v25  ;;  %v7421_v61 = vld [vmem:[%s8842_s10 + $0x514] ss:$24 sps:$4 sm:$0xff]   ;;  %v1193_v62 = vmul.f32 0.70710677, %v809_v57  ;;  %7923 = verf.f32 %v1185_v58  ;;  %v7423_v3 = vld [vmem:[%s8842_s10 + $0x210] ss:$24 sps:$4 sm:$0xff]  }
 0x10b   : > { %4659 = vmatprep.subr.bf16.mxu1 %v7379_v26  ;;  %v1184_v4 = vmul.f32 0.70710677, %v9369_v63  ;;  %v1192_v21 = vmul.f32 0.70710677, %v9374_v2  ;;  %v810_v22 = vld [vmem:[%s8834_s7 + $0x50] sm:$0xff]  ;;  %v817_v10 = vld [vmem:[%s8834_s7 + $0x88] sm:$0xff] }
 0x10c   : > { %7925 = verf.f32 %v1193_v62  ;;  %v1186_v23 = vmul.f32 0.70710677, %v802_v5  ;;  %v7424_v24 = vld [vmem:[%s8842_s10 + $0x510] ss:$24 sps:$4 sm:$0xff]   ;;  %v1194_v29 = vmul.f32 0.70710677, %v810_v22 }
 0x10d   : > { %4507 = vmatpush1.bf16.msra.mxu0 %v7381_v27  ;;  %7927 = verf.f32 %v1187_v0  ;;  %v7425_v30 = vld [vmem:[%s8842_s10 + $0x1e4] ss:$24 sps:$4 sm:$0xff]   ;;  %v7429_v7 = vld [vmem:[%s8842_s10 + $0x1e0] ss:$24 sps:$4 sm:$0xff]   ;;  %v7431_v9 = vld [vmem:[%s8842_s10 + $0x1b4] ss:$24 sps:$4 sm:$0xff]  }
 0x10e   : > { %4660 = vmatpush1.bf16.msra.mxu1 %v7382_v28  ;;  %4508 = vmatprep.subr.bf16.mxu0 %v7383_v31  ;;  %7929 = verf.f32 %v1195_v1  ;;  %v7427_v6 = vld [vmem:[%s8842_s10 + $0x4e4] ss:$24 sps:$4 sm:$0xff]   ;;  %v7430_v8 = vld [vmem:[%s8842_s10 + $0x4e0] ss:$24 sps:$4 sm:$0xff]   ;;  %v825_v11 = vld [vmem:[%s8834_s7 + $0xc8] sm:$0xff]  ;;  %v993_v20 = vmul.f32 0.5, %v801_v55 }
 0x10f   : > { %4661 = vmatprep.subr.bf16.mxu1 %v7385_v32  ;;  %7931 = verf.f32 %v1184_v4  ;;  %v1201_v12 = vmul.f32 0.70710677, %v817_v10  ;;  %v819_v13 = vld [vmem:[%s8834_s7 + $0x98] sm:$0xff]  ;;  %v7433_v15 = vld [vmem:[%s8842_s10 + $0x4b4] ss:$24 sps:$4 sm:$0xff]   ;;  %v816_v17 = vld [vmem:[%s8834_s7 + $0x80] sm:$0xff] }
 0x110   : > { %7933 = verf.f32 %v1192_v21  ;;  %v827_v14 = vld [vmem:[%s8834_s7 + $0xd8] sm:$0xff]  ;;  %v1209_v16 = vmul.f32 0.70710677, %v825_v11  ;;  %v7435_v18 = vld [vmem:[%s8842_s10 + $0x1b0] ss:$24 sps:$4 sm:$0xff]   ;;  %v824_v27 = vld [vmem:[%s8834_s7 + $0xc0] sm:$0xff] }
 0x111   : > { %4509 = vmatpush1.bf16.msra.mxu0 %v7387_v33  ;;  %7935 = verf.f32 %v1186_v23  ;;  %v7436_v19 = vld [vmem:[%s8842_s10 + $0x4b0] ss:$24 sps:$4 sm:$0xff]   ;;  %v1203_v25 = vmul.f32 0.70710677, %v819_v13  ;;  %v1211_v26 = vmul.f32 0.70710677, %v827_v14 }
 0x112   : > { %4662 = vmatpush1.bf16.msra.mxu1 %v7388_v34  ;;  %4510 = vmatprep.subr.bf16.mxu0 %v7389_v35  ;;  %7937 = verf.f32 %v1194_v29  ;;  %v7437_v28 = vld [vmem:[%s8842_s10 + $0x184] ss:$24 sps:$4 sm:$0xff]   ;;  %v1001_v32 = vmul.f32 0.5, %v809_v57  ;;  %v1200_v33 = vmul.f32 0.70710677, %v816_v17  ;;  %v818_v35 = vld [vmem:[%s8834_s7 + $0x90] sm:$0xff] }
 0x113   : > { %4663 = vmatprep.subr.bf16.mxu1 %v7391_v36  ;;  %7939 = verf.f32 %v1201_v12  ;;  %v7439_v31 = vld [vmem:[%s8842_s10 + $0x484] ss:$24 sps:$4 sm:$0xff]   ;;  %v1208_v34 = vmul.f32 0.70710677, %v824_v27  ;;  %v995_v36 = vmul.f32 0.5, %v9362_v59  ;;  %v9413_v55 = vmul.f32 0.5, %v819_v13 }
 0x114   : > { %7941 = verf.f32 %v1209_v16  ;;  %v833_v57 = vld [vmem:[%s8834_s7 + $0x108] sm:$0xff]  ;;  %v9419_v62 = vmul.f32 0.5, %v816_v17  ;;  %v9424_v23 = vmul.f32 0.5, %v818_v35  ;;  %v835_v29 = vld [vmem:[%s8834_s7 + $0x118] sm:$0xff]  ;;  %s7223_s4 = smul.u32 18432, %s12731_s29  ;;  %s12733_s14 = sld [smem:[#allocation139_spill]] }
 0x115   : > { %4511 = vmatpush1.bf16.msra.mxu0 %v7393_v37  ;;  %7943 = verf.f32 %v1203_v25  ;;  %v826_v37 = vld [vmem:[%s8834_s7 + $0xd0] sm:$0xff]  ;;  %v1217_v4 = vmul.f32 0.70710677, %v833_v57  ;;  %v1219_v17 = vmul.f32 0.70710677, %v835_v29  ;;  %s6621_s21 = scalar_lea.sflag [#allocation4], %s8853_s8 }
 0x116   : > { %4664 = vmatpush1.bf16.msra.mxu1 %v7394_v38  ;;  %4512 = vmatprep.subr.bf16.mxu0 %v7395_v39  ;;  %v1202_v38 = vmul.f32 0.70710677, %v818_v35  ;;  %v1003_v39 = vmul.f32 0.5, %v9365_v60  ;;  %7945 = verf.f32 %v1211_v26  ;;  %v9430_v13 = vmul.f32 0.5, %v826_v37  ;;  %v7443_v26 = vld [vmem:[%s8842_s10 + $0x750] ss:$24 sps:$4 sm:$0xff]  }
 0x117   : > { %4665 = vmatprep.subr.bf16.mxu1 %v7397_v40  ;;  %v992_v40 = vmul.f32 0.5, %v9369_v63  ;;  %7947 = verf.f32 %v1200_v33  ;;  %v841_v63 = vld [vmem:[%s8834_s7 + $0x148] sm:$0xff]  ;;  %s8417_s9 = scalar_lea.vmem %s12093_s22, 18432 }
 0x118   : > { %7949 = verf.f32 %v1208_v34  ;;  %v7446_v35 = vld [vmem:[%s8842_s10 + $0xa50] ss:$24 sps:$4 sm:$0xff]   ;;  %p8418_p10 = scmp.ne.s32.totalorder %s12093_s22, %s8417_s9 }
 0x119   : > { %4513 = vmatpush2.bf16.msra.mxu0 %v7399_v41  ;;  %v1210_v41 = vmul.f32 0.70710677, %v826_v37  ;;  %7951 = verf.f32 %v1202_v38 }
 0x11a   : > { %4666 = vmatpush2.bf16.msra.mxu1 %v7400_v42  ;;  %4514 = vmatprep.subr.bf16.mxu0 %v7401_v43  ;;  %v7924_v42 = vpop.eup %7923  ;;  %v7441_v43 = vld [vmem:[%s8842_s10 + $0x180] ss:$24 sps:$4 sm:$0xff]   ;;  %s12090_s5 = scalar_lea.hbm %s12733_s14, %s7223_s4  ;;  %p8419_p1 = pnand %p8418_p10, %p8813_p8 }
 0x11b   : > { %4667 = vmatprep.subr.bf16.mxu1 %v7403_v44  ;;  %v7442_v44 = vld [vmem:[%s8842_s10 + $0x480] ss:$24 sps:$4 sm:$0xff]   ;;  %7953 = verf.f32 %v1210_v41 }
 0x11c   : > { %7955 = verf.f32 %v1217_v4  ;;  %p8420_p11 = pneg %p8419_p1 }
 0x11d   : > { %4515 = vmatpush2.bf16.msra.mxu0 %v7405_v45  ;;  %v1000_v45 = vmul.f32 0.5, %v9374_v2 }
 0x11e   : > { %4668 = vmatpush2.bf16.msra.mxu1 %v7406_v46  ;;  %4516 = vmatprep.subr.bf16.mxu0 %v7407_v47  ;;  %v994_v46 = vmul.f32 0.5, %v802_v5  ;;  %v9406_v47 = vmul.f32 0.5, %v810_v22 }
 0x11f   : > { %4669 = vmatprep.subr.bf16.mxu1 %v7409_v48  ;;  %v7926_v48 = vpop.eup %7925 }
 0x121   : > { %4517 = vmatpush2.bf16.msra.mxu0 %v7411_v49  ;;  %v1569_v49 = vadd.f32 1.0, %v7924_v42 }
 0x122   : > { %4670 = vmatpush2.bf16.msra.mxu1 %v7412_v50  ;;  %4518 = vmatprep.subr.bf16.mxu0 %v7413_v51  ;;  %v9408_v50 = vmul.f32 0.5, %v817_v10  ;;  %v9410_v51 = vmul.f32 0.5, %v825_v11 }
 0x123   : > { %4671 = vmatprep.subr.bf16.mxu1 %v7415_v52  ;;  %v7928_v52 = vpop.eup %7927  ;;  %v1761_v59 = vmul.f32 %v1569_v49, %v993_v20  ;;  %v9458_v49 = vmul.f32 0.5, %v835_v29 }
 0x124   : > { %v7930_v58 = vpop.eup %7929  ;;  %v1571_v60 = vadd.f32 1.0, %v7928_v52  ;;  %v842_v52 = vld [vmem:[%s8834_s7 + $0x150] sm:$0xff] }
 0x125   : > { %4519 = vmatpush2.bf16.msra.mxu0 %v7417_v53  ;;  %v1577_v53 = vadd.f32 1.0, %v7926_v48  ;;  %v7932_v0 = vpop.eup %7931  ;;  %v1579_v2 = vadd.f32 1.0, %v7930_v58  ;;  %v7454_v48 = vld [vmem:[%s8842_s10 + $0xa24] ss:$24 sps:$4 sm:$0xff]   ;;  %v7452_v58 = vld [vmem:[%s8842_s10 + $0xa20] ss:$24 sps:$4 sm:$0xff]  }
 0x126   : > { %4672 = vmatpush2.bf16.msra.mxu1 %v7418_v54  ;;  %4520 = vmatprep.subr.bf16.mxu0 %v7419_v56  ;;  %v7445_v54 = vld [vmem:[%s8842_s10 + $0x754] ss:$24 sps:$4 sm:$0xff]   ;;  %v9415_v56 = vmul.f32 0.5, %v827_v14  ;;  %v7934_v21 = vpop.eup %7933  ;;  %v1763_v5 = vmul.f32 %v1571_v60, %v995_v36  ;;  %v1568_v22 = vadd.f32 1.0, %v7932_v0  ;;  %v7451_v36 = vld [vmem:[%s8842_s10 + $0x724] ss:$24 sps:$4 sm:$0xff]  }
 0x127   : > { %4673 = vmatprep.subr.bf16.mxu1 %v7421_v61  ;;  %v7448_v61 = vld [vmem:[%s8842_s10 + $0xa54] ss:$24 sps:$4 sm:$0xff]   ;;  %v1769_v1 = vmul.f32 %v1577_v53, %v1001_v32 }
 0x128   : > { %v1760_v11 = vmul.f32 %v1568_v22, %v992_v40  ;;  %v857_v22 = vld [vmem:[%s8834_s7 + $0x1c8] sm:$0xff] }
 0x129   : > { %4521 = vmatpush2.bf16.msra.mxu0 %v7423_v3  ;;  %v9422_v3 = vmul.f32 0.5, %v824_v27  ;;  %v9440_v27 = vmul.f32 0.5, %v833_v57 }
 0x12a   : > { %4674 = vmatpush2.bf16.msra.mxu1 %v7424_v24  ;;  %4522 = vmatprep.subr.bf16.mxu0 %v7425_v30  ;;  %v1225_v24 = vmul.f32 0.70710677, %v841_v63  ;;  %v7936_v30 = vpop.eup %7935 }
 0x12b   : > { %4675 = vmatprep.subr.bf16.mxu1 %v7427_v6  ;;  %v9427_v6 = vpack.c.bf16 %v1769_v1, %v1761_v59  ;;  %v7938_v10 = vpop.eup %7937  ;;  %v1570_v12 = vadd.f32 1.0, %v7936_v30  ;;  %v7455_v30 = vld [vmem:[%s8842_s10 + $0x6f0] ss:$24 sps:$4 sm:$0xff]  }
 0x12c   : > { %7957 = verf.f32 %v1225_v24  ;;  %v1578_v16 = vadd.f32 1.0, %v7938_v10  ;;  %v7940_v20 = vpop.eup %7939 }
 0x12d   : > { %4523 = vmatpush2.bf16.msra.mxu0 %v7429_v7  ;;  %12414 = vst [vmem:[#allocation26_spill] sm:$0xff] %v9427_v6  ;;  %v1771_v7 = vmul.f32 %v1579_v2, %v1003_v39  ;;  %4528 = vmatprep.mubr.bf16.mxu0 %v9427_v6  ;;  %v1762_v25 = vmul.f32 %v1570_v12, %v994_v46  ;;  %v7942_v32 = vpop.eup %7941  ;;  %v1585_v37 = vadd.f32 1.0, %v7940_v20  ;;  %7959 = verf.f32 %v1219_v17  ;;  %v7449_v39 = vld [vmem:[%s8842_s10 + $0x720] ss:$24 sps:$4 sm:$0xff]  }
 0x12e   : > { %4676 = vmatpush2.bf16.msra.mxu1 %v7430_v8  ;;  %4524 = vmatprep.subr.bf16.mxu0 %v7431_v9  ;;  %v1576_v8 = vadd.f32 1.0, %v7934_v21  ;;  %v843_v9 = vld [vmem:[%s8834_s7 + $0x158] sm:$0xff]  ;;  %v1770_v34 = vmul.f32 %v1578_v16, %v9406_v47  ;;  %v7944_v38 = vpop.eup %7943  ;;  %v1593_v40 = vadd.f32 1.0, %v7942_v32  ;;  %v1226_v21 = vmul.f32 0.70710677, %v842_v52 }
 0x12f   : > { %4677 = vmatprep.subr.bf16.mxu1 %v7433_v15  ;;  %v9433_v14 = vpack.c.bf16 %v1771_v7, %v1763_v5  ;;  %v1777_v46 = vmul.f32 %v1585_v37, %v9408_v50  ;;  %v1587_v47 = vadd.f32 1.0, %v7944_v38  ;;  %v9463_v59 = vmul.f32 0.5, %v843_v9  ;;  %v849_v5 = vld [vmem:[%s8834_s7 + $0x188] sm:$0xff]  ;;  %v859_v12 = vld [vmem:[%s8834_s7 + $0x1d8] sm:$0xff] }
 0x130   : > { %v1768_v15 = vmul.f32 %v1576_v8, %v1000_v45  ;;  %v9454_v45 = vpack.c.bf16 %v1770_v34, %v1762_v25  ;;  %v7460_v7 = vld [vmem:[%s8842_s10 + $0x9f4] ss:$24 sps:$4 sm:$0xff]   ;;  %v7458_v16 = vld [vmem:[%s8842_s10 + $0x9f0] ss:$24 sps:$4 sm:$0xff]   ;;  %v1241_v20 = vmul.f32 0.70710677, %v857_v22 }
 0x131   : > { %4525 = vmatpush2.bf16.msra.mxu0 %v7435_v18  ;;  %12415 = vst [vmem:[#allocation27_spill] sm:$0xff] %v9433_v14  ;;  %v832_v18 = vld [vmem:[%s8834_s7 + $0x100] sm:$0xff]  ;;  %4681 = vmatprep.mubr.bf16.mxu1 %v9433_v14  ;;  %v1779_v50 = vmul.f32 %v1587_v47, %v9413_v55  ;;  %v1243_v38 = vmul.f32 0.70710677, %v859_v12  ;;  %v9511_v47 = vmul.f32 0.5, %v857_v22 }
 0x132   : > { %4678 = vmatpush2.bf16.msra.mxu1 %v7436_v19  ;;  %4526 = vmatprep.subr.bf16.mxu0 %v7437_v28  ;;  %v9437_v19 = vld [vmem:[%s8834_s7 + $0x140] sm:$0xff]  ;;  %v9442_v28 = vmul.f32 0.5, %v841_v63  ;;  %v9445_v33 = vpack.c.bf16 %v1768_v15, %v1760_v11  ;;  %v1216_v41 = vmul.f32 0.70710677, %v832_v18  ;;  %12417 = vst [vmem:[#allocation29_spill] sm:$0xff] %v9454_v45  ;;  %v9476_v8 = vmul.f32 0.5, %v832_v18 }
 0x133   : > { %4679 = vmatprep.subr.bf16.mxu1 %v7439_v31  ;;  %v1227_v31 = vmul.f32 0.70710677, %v843_v9  ;;  %v1224_v42 = vmul.f32 0.70710677, %v9437_v19  ;;  %v7457_v63 = vld [vmem:[%s8842_s10 + $0x6f4] ss:$24 sps:$4 sm:$0xff]  }
 0x134   : > { %12416 = vst [vmem:[#allocation28_spill] sm:$0xff] %v9445_v33  ;;  %v7463_v11 = vld [vmem:[%s8842_s10 + $0x6c4] ss:$24 sps:$4 sm:$0xff]   ;;  %v9488_v17 = vmul.f32 0.5, %v9437_v19  ;;  %v1233_v18 = vmul.f32 0.70710677, %v849_v5 }
 0x135   : > { %4527 = vmatpush2.bf16.msra.mxu0 %v7441_v43  ;;  %7961 = verf.f32 %v1227_v31  ;;  %v834_v43 = vld [vmem:[%s8834_s7 + $0x110] sm:$0xff]  ;;  %v7466_v32 = vld [vmem:[%s8842_s10 + $0x9c4] ss:$24 sps:$4 sm:$0xff]  }
 0x136   : > { %4680 = vmatpush2.bf16.msra.mxu1 %v7442_v44  ;;  %4802 = vmatprep.subr.bf16.mxu0 %v7445_v54  ;;  %v7946_v44 = vpop.eup %7945  ;;  %v1785_v54 = vmul.f32 %v1593_v40, %v9410_v51  ;;  %7963 = verf.f32 %v1216_v41  ;;  %v1218_v0 = vmul.f32 0.70710677, %v834_v43  ;;  %v9494_v31 = vmul.f32 0.5, %v834_v43  ;;  %v848_v19 = vld [vmem:[%s8834_s7 + $0x180] sm:$0xff]  ;;  %v858_v43 = vld [vmem:[%s8834_s7 + $0x1d0] sm:$0xff] }
 0x137   : > { %4955 = vmatprep.subr.bf16.mxu1 %v7448_v61  ;;  %v7948_v53 = vpop.eup %7947  ;;  %v1595_v57 = vadd.f32 1.0, %v7946_v44  ;;  %7965 = verf.f32 %v1224_v42  ;;  %v9505_v41 = vmul.f32 0.5, %v849_v5  ;;  %v850_v42 = vld [vmem:[%s8834_s7 + $0x190] sm:$0xff] }
 0x138   : > { %4529 = vmatmul.mubr.bf16.vlgmr.msra.gmra.mxu0 %v9445_v33  ;;  %v7950_v60 = vpop.eup %7949  ;;  %v1584_v61 = vadd.f32 1.0, %v7948_v53  ;;  %v9468_v1 = vpack.c.bf16 %v1785_v54, %v1777_v46  ;;  %7967 = verf.f32 %v1218_v0  ;;  %v7464_v46 = vld [vmem:[%s8842_s10 + $0x9c0] ss:$24 sps:$4 sm:$0xff]   ;;  %v1234_v0 = vmul.f32 0.70710677, %v850_v42 }
 0x139   : > { %4803 = vmatpush1.bf16.msra.mxu0 %v7443_v26  ;;  %4682 = vmatmul.mubr.bf16.vlgmr.msra.gmra.mxu1 %v9454_v45  ;;  %v7952_v51 = vpop.eup %7951  ;;  %v1787_v2 = vmul.f32 %v1595_v57, %v9415_v56  ;;  %v1592_v4 = vadd.f32 1.0, %v7950_v60  ;;  %7969 = verf.f32 %v1226_v21  ;;  %v7472_v60 = vld [vmem:[%s8842_s10 + $0x994] ss:$24 sps:$4 sm:$0xff]  }
 0x13a   : > { %4804 = vmatprep.subr.bf16.mxu0 %v7451_v36  ;;  %4956 = vmatpush1.bf16.msra.mxu1 %v7446_v35  ;;  %12418 = vst [vmem:[#allocation30_spill] sm:$0xff] %v9468_v1  ;;  %v7954_v24 = vpop.eup %7953  ;;  %v1776_v55 = vmul.f32 %v1584_v61, %v9419_v62  ;;  %v1586_v29 = vadd.f32 1.0, %v7952_v51  ;;  %v851_v62 = vld [vmem:[%s8834_s7 + $0x198] sm:$0xff]  ;;  %7971 = verf.f32 %v1233_v18  ;;  %v7467_v51 = vld [vmem:[%s8842_s10 + $0x690] ss:$24 sps:$4 sm:$0xff]  }
 0x13b   : > { %4957 = vmatprep.subr.bf16.mxu1 %v7454_v48  ;;  %4538 = vmatprep.mubr.bf16.mxu0 %v9468_v1  ;;  %v9479_v56 = vpack.c.bf16 %v1787_v2, %v1779_v50  ;;  %v1784_v9 = vmul.f32 %v1592_v4, %v9422_v3  ;;  %v1594_v10 = vadd.f32 1.0, %v7954_v24  ;;  %v7956_v25 = vpop.eup %7955  ;;  %v7461_v36 = vld [vmem:[%s8842_s10 + $0x6c0] ss:$24 sps:$4 sm:$0xff]   ;;  %v1235_v37 = vmul.f32 0.70710677, %v851_v62  ;;  %v873_v21 = vld [vmem:[%s8834_s7 + $0x248] sm:$0xff] }
 0x13c   : > { %v1778_v15 = vmul.f32 %v1586_v29, %v9424_v23  ;;  %v9496_v23 = vmul.f32 0.5, %v842_v52  ;;  %v7958_v34 = vpop.eup %7957  ;;  %v1601_v35 = vadd.f32 1.0, %v7956_v25  ;;  %7973 = verf.f32 %v1241_v20  ;;  %v7469_v52 = vld [vmem:[%s8842_s10 + $0x694] ss:$24 sps:$4 sm:$0xff]   ;;  %v7470_v29 = vld [vmem:[%s8842_s10 + $0x990] ss:$24 sps:$4 sm:$0xff]  }
 0x13d   : > { %12419 = vst [vmem:[#allocation31_spill] sm:$0xff] %v9479_v56  ;;  %4805 = vmatpush1.bf16.msra.mxu0 %v7449_v39  ;;  %4691 = vmatprep.mubr.bf16.mxu1 %v9479_v56  ;;  %v9491_v3 = vpack.c.bf16 %v1784_v9, %v1776_v55  ;;  %v1786_v26 = vmul.f32 %v1594_v10, %v9430_v13  ;;  %v856_v39 = vld [vmem:[%s8834_s7 + $0x1c0] sm:$0xff]  ;;  %v1609_v40 = vadd.f32 1.0, %v7958_v34  ;;  %7975 = verf.f32 %v1235_v37  ;;  %v7960_v53 = vpop.eup %7959 }
 0x13e   : > { %4806 = vmatprep.subr.bf16.mxu0 %v7457_v63  ;;  %4958 = vmatpush1.bf16.msra.mxu1 %v7452_v58  ;;  %v1793_v44 = vmul.f32 %v1601_v35, %v9440_v27  ;;  %v1232_v48 = vmul.f32 0.70710677, %v848_v19  ;;  %v9516_v57 = vmul.f32 0.5, %v851_v62  ;;  %7977 = verf.f32 %v1243_v38  ;;  %v865_v27 = vld [vmem:[%s8834_s7 + $0x208] sm:$0xff]  ;;  %v875_v62 = vld [vmem:[%s8834_s7 + $0x258] sm:$0xff]  ;;  %v864_v20 = vld [vmem:[%s8834_s7 + $0x200] sm:$0xff] }
 0x13f   : > { %12420 = vst [vmem:[#allocation32_spill] sm:$0xff] %v9491_v3  ;;  %4959 = vmatprep.subr.bf16.mxu1 %v7460_v7  ;;  %v9503_v13 = vpack.c.bf16 %v1786_v26, %v1778_v15  ;;  %v1801_v54 = vmul.f32 %v1609_v40, %v9442_v28  ;;  %v1240_v58 = vmul.f32 0.70710677, %v856_v39  ;;  %v1603_v61 = vadd.f32 1.0, %v7960_v53  ;;  %v872_v34 = vld [vmem:[%s8834_s7 + $0x240] sm:$0xff]  ;;  %v9548_v35 = vld [vmem:[%s8834_s7 + $0x210] sm:$0xff] }
 0x140   : > { %4539 = vmatmul.mubr.bf16.gmra.mxu0 %v9491_v3  ;;  %v9520_v63 = vmul.f32 0.5, %v859_v12  ;;  %7979 = verf.f32 %v1232_v48  ;;  %v1242_v4 = vmul.f32 0.70710677, %v858_v43  ;;  %v9527_v24 = vmul.f32 0.5, %v848_v19  ;;  %v7481_v53 = vld [vmem:[%s8842_s10 + $0x634] ss:$24 sps:$4 sm:$0xff]  }
 0x141   : > { %12421 = vst [vmem:[#allocation33_spill] sm:$0xff] %v9503_v13  ;;  %4807 = vmatpush1.bf16.msra.mxu0 %v7455_v30  ;;  %4692 = vmatmul.mubr.bf16.gmra.mxu1 %v9503_v13  ;;  %v9523_v2 = vpack.c.bf16 %v1801_v54, %v1793_v44  ;;  %7981 = verf.f32 %v1240_v58  ;;  %v1795_v22 = vmul.f32 %v1603_v61, %v9458_v49  ;;  %v9529_v55 = vmul.f32 0.5, %v856_v39  ;;  %v867_v30 = vld [vmem:[%s8834_s7 + $0x218] sm:$0xff]  ;;  %v7484_v54 = vld [vmem:[%s8842_s10 + $0x934] ss:$24 sps:$4 sm:$0xff]  }
 0x142   : > { %4808 = vmatprep.subr.bf16.mxu0 %v7463_v11  ;;  %v7962_v50 = vpop.eup %7961  ;;  %4960 = vmatpush1.bf16.msra.mxu1 %v7458_v16  ;;  %7983 = verf.f32 %v1234_v0  ;;  %v7475_v11 = vld [vmem:[%s8842_s10 + $0x664] ss:$24 sps:$4 sm:$0xff]   ;;  %v1249_v49 = vmul.f32 0.70710677, %v865_v27  ;;  %v9537_v15 = vmul.f32 0.5, %v850_v42  ;;  %v9539_v16 = vmul.f32 0.5, %v858_v43 }
 0x143   : > { %12422 = vst [vmem:[#allocation34_spill] sm:$0xff] %v9523_v2  ;;  %v1611_v28 = vadd.f32 1.0, %v7962_v50  ;;  %4961 = vmatprep.subr.bf16.mxu1 %v7466_v32  ;;  %v7964_v5 = vpop.eup %7963  ;;  %4548 = vmatprep.mubr.bf16.mxu0 %v9523_v2  ;;  %7985 = verf.f32 %v1242_v4  ;;  %v1257_v18 = vmul.f32 0.70710677, %v873_v21  ;;  %v7473_v32 = vld [vmem:[%s8842_s10 + $0x660] ss:$24 sps:$4 sm:$0xff]  }
 0x144   : > { %v7966_v7 = vpop.eup %7965  ;;  %v1600_v10 = vadd.f32 1.0, %v7964_v5  ;;  %7987 = verf.f32 %v1249_v49  ;;  %v1251_v19 = vmul.f32 0.70710677, %v867_v30  ;;  %v1259_v40 = vmul.f32 0.70710677, %v875_v62  ;;  %v9553_v42 = vld [vmem:[%s8834_s7 + $0x250] sm:$0xff] }
 0x145   : > { %4809 = vmatpush1.bf16.msra.mxu0 %v7461_v36  ;;  %v1803_v9 = vmul.f32 %v1611_v28, %v9463_v59  ;;  %v1608_v12 = vadd.f32 1.0, %v7966_v7  ;;  %v7968_v25 = vpop.eup %7967  ;;  %v7478_v36 = vld [vmem:[%s8842_s10 + $0x964] ss:$24 sps:$4 sm:$0xff]   ;;  %7989 = verf.f32 %v1257_v18  ;;  %v9557_v44 = vmul.f32 0.5, %v865_v27  ;;  %v7479_v0 = vld [vmem:[%s8842_s10 + $0x630] ss:$24 sps:$4 sm:$0xff]  }
 0x146   : > { %4810 = vmatprep.subr.bf16.mxu0 %v7469_v52  ;;  %4962 = vmatpush1.bf16.msra.mxu1 %v7464_v46  ;;  %v1792_v26 = vmul.f32 %v1600_v10, %v9476_v8  ;;  %v7970_v37 = vpop.eup %7969  ;;  %v1602_v39 = vadd.f32 1.0, %v7968_v25  ;;  %v7476_v8 = vld [vmem:[%s8842_s10 + $0x960] ss:$24 sps:$4 sm:$0xff]   ;;  %v9559_v46 = vmul.f32 0.5, %v873_v21  ;;  %7991 = verf.f32 %v1251_v19  ;;  %v881_v21 = vld [vmem:[%s8834_s7 + $0x288] sm:$0xff] }
 0x147   : > { %v9542_v59 = vpack.c.bf16 %v1803_v9, %v1795_v22  ;;  %4963 = vmatprep.subr.bf16.mxu1 %v7472_v60  ;;  %v1800_v38 = vmul.f32 %v1608_v12, %v9488_v17  ;;  %v1610_v43 = vadd.f32 1.0, %v7970_v37  ;;  %7993 = verf.f32 %v1259_v40  ;;  %v7972_v58 = vpop.eup %7971  ;;  %v889_v7 = vld [vmem:[%s8834_s7 + $0x2c8] sm:$0xff]  ;;  %v7487_v12 = vld [vmem:[%s8842_s10 + $0x604] ss:$24 sps:$4 sm:$0xff]  }
 0x148   : > { %v1794_v48 = vmul.f32 %v1602_v39, %v9494_v31  ;;  %v1248_v52 = vmul.f32 0.70710677, %v864_v20  ;;  %v9567_v50 = vmul.f32 0.5, %v867_v30  ;;  %v9569_v27 = vmul.f32 0.5, %v875_v62  ;;  %v7482_v30 = vld [vmem:[%s8842_s10 + $0x930] ss:$24 sps:$4 sm:$0xff]  }
 0x149   : > { %12423 = vst [vmem:[#allocation35_spill] sm:$0xff] %v9542_v59  ;;  %4811 = vmatpush1.bf16.msra.mxu0 %v7467_v51  ;;  %4701 = vmatprep.mubr.bf16.mxu1 %v9542_v59  ;;  %v9561_v17 = vpack.c.bf16 %v1800_v38, %v1792_v26  ;;  %v1802_v60 = vmul.f32 %v1610_v43, %v9496_v23  ;;  %v1256_v61 = vmul.f32 0.70710677, %v872_v34  ;;  %v7974_v51 = vpop.eup %7973  ;;  %v1617_v31 = vadd.f32 1.0, %v7972_v58  ;;  %v9586_v62 = vld [vmem:[%s8834_s7 + $0x298] sm:$0xff]  ;;  %v9603_v43 = vld [vmem:[%s8834_s7 + $0x280] sm:$0xff] }
 0x14a   : > { %4812 = vmatprep.subr.bf16.mxu0 %v7475_v11  ;;  %4964 = vmatpush1.bf16.msra.mxu1 %v7470_v29  ;;  %7995 = verf.f32 %v1248_v52  ;;  %v1250_v28 = vmul.f32 0.70710677, %v9548_v35  ;;  %v1258_v4 = vmul.f32 0.70710677, %v9553_v42  ;;  %v7976_v23 = vpop.eup %7975  ;;  %v1625_v22 = vadd.f32 1.0, %v7974_v51  ;;  %v9592_v26 = vld [vmem:[%s8834_s7 + $0x2d8] sm:$0xff] }
 0x14b   : > { %12424 = vst [vmem:[#allocation36_spill] sm:$0xff] %v9561_v17  ;;  %4965 = vmatprep.subr.bf16.mxu1 %v7478_v36  ;;  %4549 = vmatmul.mubr.bf16.gmra.mxu0 %v9561_v17  ;;  %v9576_v5 = vpack.c.bf16 %v1802_v60, %v1794_v48  ;;  %v9578_v29 = vmul.f32 0.5, %v864_v20  ;;  %7997 = verf.f32 %v1256_v61  ;;  %v7978_v9 = vpop.eup %7977  ;;  %v1809_v10 = vmul.f32 %v1617_v31, %v9505_v41  ;;  %v9606_v48 = vld [vmem:[%s8834_s7 + $0x2c0] sm:$0xff]  ;;  %v10893_v17 = vld [vmem:[%s8834_s7 + $0x5f0] sm:$0xff] }
 0x14c   : > { %v1619_v11 = vadd.f32 1.0, %v7976_v23  ;;  %v9583_v49 = vmul.f32 0.5, %v872_v34  ;;  %7999 = verf.f32 %v1250_v28  ;;  %v1817_v20 = vmul.f32 %v1625_v22, %v9511_v47  ;;  %v7485_v52 = vld [vmem:[%s8842_s10 + $0x600] ss:$24 sps:$4 sm:$0xff]   ;;  %v7491_v22 = vld [vmem:[%s8842_s10 + $0x8d0] ss:$24 sps:$4 sm:$0xff]  }
 0x14d   : > { %12425 = vst [vmem:[#allocation37_spill] sm:$0xff] %v9576_v5  ;;  %4813 = vmatpush1.bf16.msra.mxu0 %v7473_v32  ;;  %v7980_v18 = vpop.eup %7979  ;;  %4702 = vmatmul.mubr.bf16.gmra.mxu1 %v9576_v5  ;;  %v1627_v25 = vadd.f32 1.0, %v7978_v9  ;;  %8001 = verf.f32 %v1258_v4  ;;  %v1265_v41 = vmul.f32 0.70710677, %v881_v21  ;;  %v7490_v32 = vld [vmem:[%s8842_s10 + $0x904] ss:$24 sps:$4 sm:$0xff]  }
 0x14e   : > { %4966 = vmatpush1.bf16.msra.mxu1 %v7476_v8  ;;  %4814 = vmatprep.subr.bf16.mxu0 %v7481_v53  ;;  %v7982_v19 = vpop.eup %7981  ;;  %v1811_v34 = vmul.f32 %v1619_v11, %v9516_v57  ;;  %v1616_v36 = vadd.f32 1.0, %v7980_v18  ;;  %v9597_v37 = vmul.f32 0.5, %v9548_v35  ;;  %v1273_v38 = vmul.f32 0.70710677, %v889_v7  ;;  %v7488_v57 = vld [vmem:[%s8842_s10 + $0x900] ss:$24 sps:$4 sm:$0xff]  }
 0x14f   : > { %4967 = vmatprep.subr.bf16.mxu1 %v7484_v54  ;;  %v7984_v47 = vpop.eup %7983  ;;  %v9599_v39 = vpack.c.bf16 %v1817_v20, %v1809_v10  ;;  %v1819_v40 = vmul.f32 %v1627_v25, %v9520_v63  ;;  %v1624_v8 = vadd.f32 1.0, %v7982_v19  ;;  %8003 = verf.f32 %v1265_v41  ;;  %v7493_v63 = vld [vmem:[%s8842_s10 + $0x8d4] ss:$24 sps:$4 sm:$0xff]  }
 0x150   : > { %v7986_v53 = vpop.eup %7985  ;;  %v1808_v35 = vmul.f32 %v1616_v36, %v9527_v24  ;;  %v1618_v54 = vadd.f32 1.0, %v7984_v47  ;;  %v9612_v58 = vmul.f32 0.5, %v9553_v42  ;;  %8005 = verf.f32 %v1273_v38  ;;  %v7496_v24 = vld [vmem:[%s8842_s10 + $0xbd4] ss:$24 sps:$4 sm:$0xff]  }
 0x151   : > { %12426 = vst [vmem:[#allocation38_spill] sm:$0xff] %v9599_v39  ;;  %4815 = vmatpush1.bf16.msra.mxu0 %v7479_v0  ;;  %4558 = vmatprep.mubr.bf16.mxu0 %v9599_v39  ;;  %v9616_v60 = vpack.c.bf16 %v1819_v40, %v1811_v34  ;;  %v1816_v61 = vmul.f32 %v1624_v8, %v9529_v55  ;;  %v1626_v0 = vadd.f32 1.0, %v7986_v53  ;;  %v1267_v51 = vmul.f32 0.70710677, %v9586_v62  ;;  %v7988_v42 = vpop.eup %7987  ;;  %v9633_v11 = vld [vmem:[%s8834_s7 + $0x290] sm:$0xff]  ;;  %v9650_v36 = vld [vmem:[%s8834_s7 + $0x308] sm:$0xff] }
 0x152   : > { %4968 = vmatpush1.bf16.msra.mxu1 %v7482_v30  ;;  %4816 = vmatprep.subr.bf16.mxu0 %v7487_v12  ;;  %v1810_v31 = vmul.f32 %v1618_v54, %v9537_v15  ;;  %v9622_v28 = vmul.f32 0.5, %v881_v21  ;;  %v9624_v4 = vmul.f32 0.5, %v889_v7  ;;  %v1275_v23 = vmul.f32 0.70710677, %v9592_v26  ;;  %v7990_v55 = vpop.eup %7989  ;;  %v7494_v15 = vld [vmem:[%s8842_s10 + $0xbd0] ss:$24 sps:$4 sm:$0xff]  }
 0x153   : > { %12427 = vst [vmem:[#allocation39_spill] sm:$0xff] %v9616_v60  ;;  %4969 = vmatprep.subr.bf16.mxu1 %v7490_v32  ;;  %4711 = vmatprep.mubr.bf16.mxu1 %v9616_v60  ;;  %v9629_v30 = vpack.c.bf16 %v1816_v61, %v1808_v35  ;;  %v1818_v9 = vmul.f32 %v1626_v0, %v9539_v16  ;;  %v1633_v10 = vadd.f32 1.0, %v7988_v42  ;;  %8007 = verf.f32 %v1267_v51  ;;  %v7499_v21 = vld [vmem:[%s8842_s10 + $0x8a4] ss:$24 sps:$4 sm:$0xff]   ;;  %v7992_v7 = vpop.eup %7991  ;;  %v9640_v25 = vld [vmem:[%s8834_s7 + $0x2d0] sm:$0xff]  ;;  %v9657_v8 = vld [vmem:[%s8834_s7 + $0x348] sm:$0xff] }
 0x154   : > { %v1641_v12 = vadd.f32 1.0, %v7990_v55  ;;  %8009 = verf.f32 %v1275_v23  ;;  %v1264_v18 = vmul.f32 0.70710677, %v9603_v43  ;;  %v1272_v20 = vmul.f32 0.70710677, %v9606_v48  ;;  %v7994_v16 = vpop.eup %7993  ;;  %v9665_v53 = vld [vmem:[%s8834_s7 + $0x318] sm:$0xff] }
 0x155   : > { %12428 = vst [vmem:[#allocation40_spill] sm:$0xff] %v9629_v30  ;;  %4817 = vmatpush1.bf16.msra.mxu0 %v7485_v52  ;;  %v9643_v41 = vpack.c.bf16 %v1818_v9, %v1810_v31  ;;  %v1825_v32 = vmul.f32 %v1633_v10, %v9557_v44  ;;  %v1635_v19 = vadd.f32 1.0, %v7992_v7  ;;  %v9647_v34 = vmul.f32 0.5, %v9586_v62  ;;  %v7497_v52 = vld [vmem:[%s8842_s10 + $0x8a0] ss:$24 sps:$4 sm:$0xff]  }
 0x156   : > { %4970 = vmatpush1.bf16.msra.mxu1 %v7488_v57  ;;  %4818 = vmatprep.subr.bf16.mxu0 %v7493_v63  ;;  %v1833_v38 = vmul.f32 %v1641_v12, %v9559_v46  ;;  %v1643_v47 = vadd.f32 1.0, %v7994_v16  ;;  %v9654_v40 = vmul.f32 0.5, %v9592_v26  ;;  %8011 = verf.f32 %v1264_v18  ;;  %v7502_v0 = vld [vmem:[%s8842_s10 + $0xba4] ss:$24 sps:$4 sm:$0xff]   ;;  %v7503_v7 = vld [vmem:[%s8842_s10 + $0x870] ss:$24 sps:$4 sm:$0xff]  }
 0x157   : > { %4559 = vmatmul.mubr.bf16.gmra.mxu0 %v9629_v30  ;;  %12429 = vst [vmem:[#allocation41_spill] sm:$0xff] %v9643_v41  ;;  %4971 = vmatprep.subr.bf16.mxu1 %v7496_v24  ;;  %v7996_v44 = vpop.eup %7995  ;;  %v1827_v62 = vmul.f32 %v1635_v19, %v9567_v50  ;;  %8013 = verf.f32 %v1272_v20  ;;  %v1266_v57 = vmul.f32 0.70710677, %v9633_v11  ;;  %v1274_v46 = vmul.f32 0.70710677, %v9640_v25  ;;  %v907_v55 = vld [vmem:[%s8834_s7 + $0x358] sm:$0xff] }
 0x158   : > { %4712 = vmatmul.mubr.bf16.gmra.mxu1 %v9643_v41  ;;  %v7998_v26 = vpop.eup %7997  ;;  %v9667_v35 = vpack.c.bf16 %v1833_v38, %v1825_v32  ;;  %v1835_v54 = vmul.f32 %v1643_v47, %v9569_v27  ;;  %v1632_v63 = vadd.f32 1.0, %v7996_v44  ;;  %v9671_v61 = vmul.f32 0.5, %v9603_v43  ;;  %v7500_v50 = vld [vmem:[%s8842_s10 + $0xba0] ss:$24 sps:$4 sm:$0xff]   ;;  %v7506_v20 = vld [vmem:[%s8842_s10 + $0xb70] ss:$24 sps:$4 sm:$0xff]  }
 0x159   : > { %4819 = vmatpush2.bf16.msra.mxu0 %v7491_v22  ;;  %v8000_v51 = vpop.eup %7999  ;;  %v1640_v24 = vadd.f32 1.0, %v7998_v26  ;;  %v9676_v42 = vmul.f32 0.5, %v9606_v48  ;;  %8015 = verf.f32 %v1266_v57  ;;  %v1281_v31 = vmul.f32 0.70710677, %v9650_v36  ;;  %v7505_v48 = vld [vmem:[%s8842_s10 + $0x874] ss:$24 sps:$4 sm:$0xff]  }
 0x15a   : > { %12430 = vst [vmem:[#allocation42_spill] sm:$0xff] %v9667_v35  ;;  %4972 = vmatpush2.bf16.msra.mxu1 %v7494_v15  ;;  %4820 = vmatprep.subr.bf16.mxu0 %v7499_v21  ;;  %v8002_v27 = vpop.eup %8001  ;;  %v9680_v43 = vpack.c.bf16 %v1835_v54, %v1827_v62  ;;  %v1824_v23 = vmul.f32 %v1632_v63, %v9578_v29  ;;  %v1634_v22 = vadd.f32 1.0, %v8000_v51  ;;  %8017 = verf.f32 %v1274_v46  ;;  %v9688_v21 = vld [vmem:[%s8834_s7 + $0x300] sm:$0xff]  ;;  %v9704_v62 = vld [vmem:[%s8834_s7 + $0x310] sm:$0xff]  ;;  %v9716_v54 = vld [vmem:[%s8834_s7 + $0x388] sm:$0xff] }
 0x15b   : > { %4568 = vmatprep.mubr.bf16.mxu0 %v9667_v35  ;;  %4973 = vmatprep.subr.bf16.mxu1 %v7502_v0  ;;  %v1832_v9 = vmul.f32 %v1640_v24, %v9583_v49  ;;  %v1642_v10 = vadd.f32 1.0, %v8002_v27  ;;  %v1289_v15 = vmul.f32 0.70710677, %v9657_v8  ;;  %8019 = verf.f32 %v1281_v31  ;;  %v7508_v49 = vld [vmem:[%s8842_s10 + $0xb74] ss:$24 sps:$4 sm:$0xff]   ;;  %v904_v47 = vld [vmem:[%s8834_s7 + $0x340] sm:$0xff] }
 0x15c   : > { %12431 = vst [vmem:[#allocation43_spill] sm:$0xff] %v9680_v43  ;;  %v8004_v12 = vpop.eup %8003  ;;  %4721 = vmatprep.mubr.bf16.mxu1 %v9680_v43  ;;  %v1826_v29 = vmul.f32 %v1634_v22, %v9597_v37  ;;  %v1283_v18 = vmul.f32 0.70710677, %v9665_v53  ;;  %v9701_v37 = vmul.f32 0.5, %v9633_v11  ;;  %v1291_v44 = vmul.f32 0.70710677, %v907_v55 }
 0x15d   : > { %4821 = vmatpush2.bf16.msra.mxu0 %v7497_v52  ;;  %v8006_v16 = vpop.eup %8005  ;;  %v9696_v32 = vpack.c.bf16 %v1832_v9, %v1824_v23  ;;  %v1834_v19 = vmul.f32 %v1642_v10, %v9612_v58  ;;  %v1649_v38 = vadd.f32 1.0, %v8004_v12  ;;  %8021 = verf.f32 %v1289_v15  ;;  %v906_v11 = vld [vmem:[%s8834_s7 + $0x350] sm:$0xff]  ;;  %v9723_v24 = vld [vmem:[%s8834_s7 + $0x3c8] sm:$0xff]  ;;  %v9735_v9 = vld [vmem:[%s8834_s7 + $0x398] sm:$0xff] }
 0x15e   : > { %4974 = vmatpush2.bf16.msra.mxu1 %v7500_v50  ;;  %4822 = vmatprep.subr.bf16.mxu0 %v7505_v48  ;;  %v1657_v52 = vadd.f32 1.0, %v8006_v16  ;;  %8023 = verf.f32 %v1283_v18  ;;  %v9711_v46 = vmul.f32 0.5, %v9640_v25  ;;  %v1280_v26 = vmul.f32 0.70710677, %v9688_v21  ;;  %v7512_v12 = vld [vmem:[%s8842_s10 + $0xb40] ss:$24 sps:$4 sm:$0xff]  }
 0x15f   : > { %12432 = vst [vmem:[#allocation44_spill] sm:$0xff] %v9696_v32  ;;  %4975 = vmatprep.subr.bf16.mxu1 %v7508_v49  ;;  %4569 = vmatmul.mubr.bf16.gmra.mxu0 %v9696_v32  ;;  %v9707_v58 = vpack.c.bf16 %v1834_v19, %v1826_v29  ;;  %v1841_v57 = vmul.f32 %v1649_v38, %v9622_v28  ;;  %v9720_v0 = vmul.f32 0.5, %v9650_v36  ;;  %8025 = verf.f32 %v1291_v44  ;;  %v7509_v28 = vld [vmem:[%s8842_s10 + $0x840] ss:$24 sps:$4 sm:$0xff]   ;;  %v7511_v36 = vld [vmem:[%s8842_s10 + $0x844] ss:$24 sps:$4 sm:$0xff]  }
 0x160   : > { %v8008_v63 = vpop.eup %8007  ;;  %v1849_v50 = vmul.f32 %v1657_v52, %v9624_v4  ;;  %v1288_v51 = vmul.f32 0.70710677, %v904_v47  ;;  %v9728_v27 = vmul.f32 0.5, %v9657_v8  ;;  %8027 = verf.f32 %v1280_v26  ;;  %v7514_v29 = vld [vmem:[%s8842_s10 + $0xb44] ss:$24 sps:$4 sm:$0xff]   ;;  %v10824_v41 = vld [vmem:[%s8834_s7 + $0x570] sm:$0xff] }
 0x161   : > { %12433 = vst [vmem:[#allocation45_spill] sm:$0xff] %v9707_v58  ;;  %4823 = vmatpush2.bf16.msra.mxu0 %v7503_v7  ;;  %v8010_v25 = vpop.eup %8009  ;;  %4722 = vmatmul.mubr.bf16.gmra.mxu1 %v9707_v58  ;;  %v1651_v31 = vadd.f32 1.0, %v8008_v63  ;;  %v1282_v4 = vmul.f32 0.70710677, %v9704_v62  ;;  %v1290_v48 = vmul.f32 0.70710677, %v906_v11 }
 0x162   : > { %4976 = vmatpush2.bf16.msra.mxu1 %v7506_v20  ;;  %v9732_v23 = vpack.c.bf16 %v1849_v50, %v1841_v57  ;;  %v1659_v22 = vadd.f32 1.0, %v8010_v25  ;;  %8029 = verf.f32 %v1288_v51  ;;  %v9739_v7 = vmul.f32 0.5, %v9665_v53  ;;  %4824 = vmatprep.subr.bf16.mxu0 %v7511_v36  ;;  %v923_v53 = vld [vmem:[%s8834_s7 + $0x3d8] sm:$0xff]  ;;  %v9760_v26 = vld [vmem:[%s8834_s7 + $0x380] sm:$0xff] }
 0x163   : > { %v8012_v10 = vpop.eup %8011  ;;  %v1843_v15 = vmul.f32 %v1651_v31, %v9647_v34  ;;  %v9741_v8 = vmul.f32 0.5, %v907_v55  ;;  %8031 = verf.f32 %v1282_v4  ;;  %v1297_v34 = vmul.f32 0.70710677, %v9716_v54  ;;  %4977 = vmatprep.subr.bf16.mxu1 %v7514_v29  ;;  %v9763_v63 = vld [vmem:[%s8834_s7 + $0x3c0] sm:$0xff]  ;;  %v7518_v29 = vld [vmem:[%s8842_s10 + $0xb10] ss:$24 sps:$4 sm:$0xff]  }
 0x164   : > { %12434 = vst [vmem:[#allocation46_spill] sm:$0xff] %v9732_v23  ;;  %v8014_v18 = vpop.eup %8013  ;;  %4578 = vmatprep.mubr.bf16.mxu0 %v9732_v23  ;;  %v1851_v20 = vmul.f32 %v1659_v22, %v9654_v40  ;;  %v1648_v49 = vadd.f32 1.0, %v8012_v10  ;;  %8033 = verf.f32 %v1290_v48  ;;  %v9750_v16 = vmul.f32 0.5, %v9688_v21  ;;  %v9766_v21 = vld [vmem:[%s8834_s7 + $0x390] sm:$0xff]  ;;  %v10771_v23 = vld [vmem:[%s8834_s7 + $0x528] sm:$0xff] }
 0x165   : > { %4825 = vmatpush2.bf16.msra.mxu0 %v7509_v28  ;;  %v1656_v55 = vadd.f32 1.0, %v8014_v18  ;;  %v9752_v19 = vmul.f32 0.5, %v904_v47  ;;  %v1305_v38 = vmul.f32 0.70710677, %v9723_v24  ;;  %8035 = verf.f32 %v1297_v34  ;;  %v9770_v28 = vld [vmem:[%s8834_s7 + $0x3d0] sm:$0xff] }
 0x166   : > { %v8016_v40 = vpop.eup %8015  ;;  %v9755_v52 = vpack.c.bf16 %v1851_v20, %v1843_v15  ;;  %v1840_v44 = vmul.f32 %v1648_v49, %v9671_v61  ;;  %v1299_v57 = vmul.f32 0.70710677, %v9735_v9  ;;  %4978 = vmatpush2.bf16.msra.mxu1 %v7512_v12  ;;  %v1307_v61 = vmul.f32 0.70710677, %v923_v53  ;;  %v7515_v22 = vld [vmem:[%s8842_s10 + $0x810] ss:$24 sps:$4 sm:$0xff]  }
 0x167   : > { %v8018_v47 = vpop.eup %8017  ;;  %v1848_v50 = vmul.f32 %v1656_v55, %v9676_v42  ;;  %v1650_v51 = vadd.f32 1.0, %v8016_v40  ;;  %8037 = verf.f32 %v1305_v38  ;;  %v9774_v4 = vmul.f32 0.5, %v9704_v62  ;;  %v9783_v15 = vld [vmem:[%s8834_s7 + $0x408] sm:$0xff] }
 0x168   : > { %12435 = vst [vmem:[#allocation47_spill] sm:$0xff] %v9755_v52  ;;  %v8020_v25 = vpop.eup %8019  ;;  %4731 = vmatprep.mubr.bf16.mxu1 %v9755_v52  ;;  %v1658_v31 = vadd.f32 1.0, %v8018_v47  ;;  %v9776_v36 = vmul.f32 0.5, %v906_v11  ;;  %8039 = verf.f32 %v1299_v57  ;;  %v7517_v12 = vld [vmem:[%s8842_s10 + $0x814] ss:$24 sps:$4 sm:$0xff]   ;;  %v9789_v62 = vmul.f32 0.5, %v9716_v54 }
 0x169   : > { %v9779_v42 = vpack.c.bf16 %v1848_v50, %v1840_v44  ;;  %v1842_v48 = vmul.f32 %v1650_v51, %v9701_v37  ;;  %v1665_v10 = vadd.f32 1.0, %v8020_v25  ;;  %8041 = verf.f32 %v1307_v61  ;;  %4826 = vmatprep.subr.bf16.mxu0 %v7517_v12  ;;  %v7520_v54 = vld [vmem:[%s8842_s10 + $0xb14] ss:$24 sps:$4 sm:$0xff]   ;;  %v7521_v50 = vld [vmem:[%s8842_s10 + $0x7e0] ss:$24 sps:$4 sm:$0xff]  }
 0x16a   : > { %v8022_v18 = vpop.eup %8021  ;;  %v1850_v20 = vmul.f32 %v1658_v31, %v9711_v46  ;;  %v1296_v11 = vmul.f32 0.70710677, %v9760_v26  ;;  %v1304_v49 = vmul.f32 0.70710677, %v9763_v63  ;;  %v9796_v38 = vmul.f32 0.5, %v9723_v24  ;;  %v9804_v47 = vld [vmem:[%s8834_s7 + $0x448] sm:$0xff]  ;;  %4827 = vmatpush2.bf16.msra.mxu0 %v7515_v22  ;;  %4979 = vmatprep.subr.bf16.mxu1 %v7520_v54 }
 0x16b   : > { %12436 = vst [vmem:[#allocation48_spill] sm:$0xff] %v9779_v42  ;;  %v8024_v37 = vpop.eup %8023  ;;  %4579 = vmatmul.mubr.bf16.gmra.mxu0 %v9779_v42  ;;  %v1673_v34 = vadd.f32 1.0, %v8022_v18  ;;  %v1857_v55 = vmul.f32 %v1665_v10, %v9720_v0  ;;  %v1298_v46 = vmul.f32 0.70710677, %v9766_v21  ;;  %v1306_v57 = vmul.f32 0.70710677, %v9770_v28  ;;  %4980 = vmatpush2.bf16.msra.mxu1 %v7518_v29 }
 0x16c   : > { %v9800_v40 = vpack.c.bf16 %v1850_v20, %v1842_v48  ;;  %v1667_v44 = vadd.f32 1.0, %v8024_v37  ;;  %8043 = verf.f32 %v1296_v11  ;;  %v8026_v51 = vpop.eup %8025  ;;  %v9809_v24 = vmul.f32 0.5, %v9735_v9  ;;  %v7523_v25 = vld [vmem:[%s8842_s10 + $0x7e4] ss:$24 sps:$4 sm:$0xff]   ;;  %v10755_v42 = vld [vmem:[%s8834_s7 + $0x4b0] sm:$0xff] }
 0x16d   : > { %v1865_v0 = vmul.f32 %v1673_v34, %v9728_v27  ;;  %v9811_v61 = vmul.f32 0.5, %v923_v53  ;;  %8045 = verf.f32 %v1304_v49  ;;  %v8028_v31 = vpop.eup %8027  ;;  %v1675_v48 = vadd.f32 1.0, %v8026_v51  ;;  %v9821_v18 = vld [vmem:[%s8834_s7 + $0x418] sm:$0xff]  ;;  %4828 = vmatprep.subr.bf16.mxu0 %v7523_v25  ;;  %v9842_v51 = vld [vmem:[%s8834_s7 + $0x400] sm:$0xff]  ;;  %v10758_v52 = vld [vmem:[%s8834_s7 + $0x4f0] sm:$0xff] }
 0x16e   : > { %12437 = vst [vmem:[#allocation49_spill] sm:$0xff] %v9800_v40  ;;  %4732 = vmatmul.mubr.bf16.gmra.mxu1 %v9800_v40  ;;  %v1859_v22 = vmul.f32 %v1667_v44, %v9739_v7  ;;  %8047 = verf.f32 %v1298_v46  ;;  %v1313_v10 = vmul.f32 0.70710677, %v9783_v15  ;;  %v1664_v12 = vadd.f32 1.0, %v8028_v31  ;;  %v9824_v20 = vld [vmem:[%s8834_s7 + $0x458] sm:$0xff]  ;;  %4829 = vmatpush2.bf16.msra.mxu0 %v7521_v50  ;;  %v10202_v40 = vld [vmem:[%s8834_s7 + $0x1a8] sm:$0xff] }
 0x16f   : > { %v8030_v27 = vpop.eup %8029  ;;  %v9817_v9 = vpack.c.bf16 %v1865_v0, %v1857_v55  ;;  %8049 = verf.f32 %v1306_v57  ;;  %v1321_v53 = vmul.f32 0.70710677, %v9804_v47  ;;  %v1867_v7 = vmul.f32 %v1675_v48, %v9741_v8  ;;  %v7524_v34 = vld [vmem:[%s8842_s10 + $0xae0] ss:$24 sps:$4 sm:$0xff]   ;;  %v7526_v8 = vld [vmem:[%s8842_s10 + $0xae4] ss:$24 sps:$4 sm:$0xff]  }
 0x170   : > { %v8032_v11 = vpop.eup %8031  ;;  %v1672_v49 = vadd.f32 1.0, %v8030_v27  ;;  %v9828_v37 = vmul.f32 0.5, %v9760_v26  ;;  %8051 = verf.f32 %v1313_v10  ;;  %v1856_v46 = vmul.f32 %v1664_v12, %v9750_v16  ;;  %v9845_v0 = vld [vmem:[%s8834_s7 + $0x440] sm:$0xff]  ;;  %4981 = vmatprep.subr.bf16.mxu1 %v7526_v8  ;;  %v7527_v31 = vld [vmem:[%s8842_s10 + $0x7b0] ss:$24 sps:$4 sm:$0xff]  }
 0x171   : > { %12438 = vst [vmem:[#allocation50_spill] sm:$0xff] %v9817_v9  ;;  %v8034_v55 = vpop.eup %8033  ;;  %4588 = vmatprep.mubr.bf16.mxu0 %v9817_v9  ;;  %v1666_v29 = vadd.f32 1.0, %v8032_v11  ;;  %v9834_v54 = vmul.f32 0.5, %v9763_v63  ;;  %8053 = verf.f32 %v1321_v53  ;;  %v9837_v44 = vpack.c.bf16 %v1867_v7, %v1859_v22  ;;  %v7529_v48 = vld [vmem:[%s8842_s10 + $0x7b4] ss:$24 sps:$4 sm:$0xff]   ;;  %4982 = vmatpush2.bf16.msra.mxu1 %v7524_v34 }
 0x172   : > { %v1864_v26 = vmul.f32 %v1672_v49, %v9752_v19  ;;  %v1674_v57 = vadd.f32 1.0, %v8034_v55  ;;  %v1315_v50 = vmul.f32 0.70710677, %v9821_v18  ;;  %v8036_v16 = vpop.eup %8035  ;;  %v1323_v25 = vmul.f32 0.70710677, %v9824_v20  ;;  %v9856_v12 = vld [vmem:[%s8834_s7 + $0x410] sm:$0xff]  ;;  %4830 = vmatprep.subr.bf16.mxu0 %v7529_v48 }
 0x173   : > { %12439 = vst [vmem:[#allocation51_spill] sm:$0xff] %v9837_v44  ;;  %v1858_v63 = vmul.f32 %v1666_v29, %v9774_v4  ;;  %4741 = vmatprep.mubr.bf16.mxu1 %v9837_v44  ;;  %v1681_v27 = vadd.f32 1.0, %v8036_v16  ;;  %v7530_v53 = vld [vmem:[%s8842_s10 + $0xab0] ss:$24 sps:$4 sm:$0xff]   ;;  %v7532_v4 = vld [vmem:[%s8842_s10 + $0xab4] ss:$24 sps:$4 sm:$0xff]   ;;  %4831 = vmatpush2.bf16.msra.mxu0 %v7527_v31 }
 0x174   : > { %v8038_v19 = vpop.eup %8037  ;;  %v9852_v22 = vpack.c.bf16 %v1864_v26, %v1856_v46  ;;  %v1866_v10 = vmul.f32 %v1674_v57, %v9776_v36  ;;  %8055 = verf.f32 %v1315_v50  ;;  %v1312_v49 = vmul.f32 0.70710677, %v9842_v51  ;;  %v9863_v46 = vld [vmem:[%s8834_s7 + $0x450] sm:$0xff]  ;;  %4983 = vmatprep.subr.bf16.mxu1 %v7532_v4  ;;  %v9876_v48 = vld [vmem:[%s8834_s7 + $0x4c8] sm:$0xff]  ;;  %v7535_v4 = vld [vmem:[%s8842_s10 + $0x784] ss:$24 sps:$4 sm:$0xff]  }
 0x175   : > { %v8040_v11 = vpop.eup %8039  ;;  %v1689_v7 = vadd.f32 1.0, %v8038_v19  ;;  %8057 = verf.f32 %v1323_v25  ;;  %v1320_v55 = vmul.f32 0.70710677, %v9845_v0  ;;  %v1873_v34 = vmul.f32 %v1681_v27, %v9789_v62  ;;  %v9873_v25 = vld [vmem:[%s8834_s7 + $0x488] sm:$0xff]  ;;  %4984 = vmatpush2.bf16.msra.mxu1 %v7530_v53  ;;  %v9899_v53 = vld [vmem:[%s8834_s7 + $0x4d8] sm:$0xff]  ;;  %4832 = vmatprep.subr.bf16.mxu0 %v7535_v4  ;;  %v9909_v4 = vld [vmem:[%s8834_s7 + $0x480] sm:$0xff] }
 0x176   : > { %12440 = vst [vmem:[#allocation52_spill] sm:$0xff] %v9852_v22  ;;  %v8042_v36 = vpop.eup %8041  ;;  %4589 = vmatmul.mubr.bf16.gmra.mxu0 %v9852_v22  ;;  %v9866_v29 = vpack.c.bf16 %v1866_v10, %v1858_v63  ;;  %v1683_v8 = vadd.f32 1.0, %v8040_v11  ;;  %v1106_v26 = vmul.f32 0.5, %v9766_v21  ;;  %v1114_v16 = vmul.f32 0.5, %v9770_v28  ;;  %v9883_v63 = vld [vmem:[%s8834_s7 + $0x498] sm:$0xff] }
 0x177   : > { %v1881_v57 = vmul.f32 %v1689_v7, %v9796_v38  ;;  %v1691_v50 = vadd.f32 1.0, %v8042_v36  ;;  %8059 = verf.f32 %v1312_v49  ;;  %v1314_v21 = vmul.f32 0.70710677, %v9856_v12  ;;  %v7548_v22 = vld [vmem:[%s8842_s10 + $0x428] ss:$24 sps:$4 sm:$0xff]  }
 0x178   : > { %12441 = vst [vmem:[#allocation53_spill] sm:$0xff] %v9866_v29  ;;  %4742 = vmatmul.mubr.bf16.gmra.mxu1 %v9866_v29  ;;  %v1875_v62 = vmul.f32 %v1683_v8, %v9809_v24  ;;  %8061 = verf.f32 %v1320_v55  ;;  %v1322_v38 = vmul.f32 0.70710677, %v9863_v46  ;;  %v1121_v27 = vmul.f32 0.5, %v9783_v15  ;;  %v7533_v24 = vld [vmem:[%s8842_s10 + $0x780] ss:$24 sps:$4 sm:$0xff]  }
 0x179   : > { %v8044_v28 = vpop.eup %8043  ;;  %v9885_v19 = vpack.c.bf16 %v1881_v57, %v1873_v34  ;;  %v1883_v10 = vmul.f32 %v1691_v50, %v9811_v61  ;;  %v1129_v31 = vmul.f32 0.5, %v9804_v47  ;;  %8063 = verf.f32 %v1314_v21  ;;  %v7536_v34 = vld [vmem:[%s8842_s10 + $0xa80] ss:$24 sps:$4 sm:$0xff]   ;;  %4833 = vmatpush2.bf16.msra.mxu0 %v7533_v24  ;;  %v7553_v44 = vld [vmem:[%s8842_s10 + $0xfc] ss:$24 sps:$4 sm:$0xff]  }
 0x17a   : > { %v8046_v11 = vpop.eup %8045  ;;  %v1680_v7 = vadd.f32 1.0, %v8044_v28  ;;  %v1329_v49 = vmul.f32 0.70710677, %v9873_v25  ;;  %v1337_v55 = vmul.f32 0.70710677, %v9876_v48  ;;  %v1123_v47 = vmul.f32 0.5, %v9821_v18 }
 0x17b   : > { %12442 = vst [vmem:[#allocation54_spill] sm:$0xff] %v9885_v19  ;;  %v8048_v36 = vpop.eup %8047  ;;  %4598 = vmatprep.mubr.bf16.mxu0 %v9885_v19  ;;  %v9895_v61 = vpack.c.bf16 %v1883_v10, %v1875_v62  ;;  %v1688_v15 = vadd.f32 1.0, %v8046_v11  ;;  %8065 = verf.f32 %v1322_v38  ;;  %v1131_v21 = vmul.f32 0.5, %v9824_v20  ;;  %v7538_v62 = vld [vmem:[%s8842_s10 + $0xa84] ss:$24 sps:$4 sm:$0xff]  }
 0x17c   : > { %v8050_v8 = vpop.eup %8049  ;;  %v1872_v57 = vmul.f32 %v1680_v7, %v9828_v37  ;;  %v1682_v50 = vadd.f32 1.0, %v8048_v36  ;;  %8067 = verf.f32 %v1329_v49  ;;  %v1331_v10 = vmul.f32 0.70710677, %v9883_v63  ;;  %v9914_v49 = vld [vmem:[%s8834_s7 + $0x4c0] sm:$0xff]  ;;  %v9917_v36 = vld [vmem:[%s8834_s7 + $0x490] sm:$0xff]  ;;  %4985 = vmatprep.subr.bf16.mxu1 %v7538_v62 }
 0x17d   : > { %12443 = vst [vmem:[#allocation55_spill] sm:$0xff] %v9895_v61  ;;  %v8052_v28 = vpop.eup %8051  ;;  %4751 = vmatprep.mubr.bf16.mxu1 %v9895_v61  ;;  %v1880_v18 = vmul.f32 %v1688_v15, %v9834_v54  ;;  %v1690_v38 = vadd.f32 1.0, %v8050_v8  ;;  %8069 = verf.f32 %v1337_v55  ;;  %v1120_v7 = vmul.f32 0.5, %v9842_v51  ;;  %v9922_v8 = vld [vmem:[%s8834_s7 + $0x4d0] sm:$0xff]  ;;  %4986 = vmatpush2.bf16.msra.mxu1 %v7536_v34  ;;  %v9933_v34 = vld [vmem:[%s8834_s7 + $0x508] sm:$0xff] }
 0x17e   : > { %v8054_v37 = vpop.eup %8053  ;;  %v1874_v11 = vmul.f32 %v1682_v50, %v1106_v26  ;;  %v1697_v20 = vadd.f32 1.0, %v8052_v28  ;;  %v1339_v24 = vmul.f32 0.70710677, %v9899_v53  ;;  %8071 = verf.f32 %v1331_v10  ;;  %v7541_v28 = vld [vmem:[%s8842_s10 + $0x15c] ss:$24 sps:$4 sm:$0xff]  }
 0x17f   : > { %v9919_v54 = vpack.c.bf16 %v1880_v18, %v1872_v57  ;;  %v1882_v55 = vmul.f32 %v1690_v38, %v1114_v16  ;;  %v1705_v15 = vadd.f32 1.0, %v8054_v37  ;;  %v1128_v50 = vmul.f32 0.5, %v9845_v0  ;;  %5108 = vmatprep.subr.bf16.mxu0 %v7541_v28  ;;  %v7544_v37 = vld [vmem:[%s8842_s10 + $0x45c] ss:$24 sps:$4 sm:$0xff]  }
 0x180   : > { %v1889_v26 = vmul.f32 %v1697_v20, %v1121_v27  ;;  %8073 = verf.f32 %v1339_v24  ;;  %v1328_v51 = vmul.f32 0.70710677, %v9909_v4  ;;  %v1122_v62 = vmul.f32 0.5, %v9856_v12  ;;  %v9943_v20 = vld [vmem:[%s8834_s7 + $0x548] sm:$0xff]  ;;  %5261 = vmatprep.subr.bf16.mxu1 %v7544_v37 }
 0x181   : > { %12444 = vst [vmem:[#allocation56_spill] sm:$0xff] %v9919_v54  ;;  %v8056_v61 = vpop.eup %8055  ;;  %4599 = vmatmul.mubr.bf16.gmra.mxu0 %v9919_v54  ;;  %v9928_v57 = vpack.c.bf16 %v1882_v55, %v1874_v11  ;;  %v1897_v16 = vmul.f32 %v1705_v15, %v1129_v31  ;;  %v1336_v18 = vmul.f32 0.70710677, %v9914_v49  ;;  %v1130_v38 = vmul.f32 0.5, %v9863_v46  ;;  %v9948_v15 = vld [vmem:[%s8834_s7 + $0x518] sm:$0xff] }
 0x182   : > { %v8058_v27 = vpop.eup %8057  ;;  %v1699_v0 = vadd.f32 1.0, %v8056_v61  ;;  %8075 = verf.f32 %v1328_v51  ;;  %v1330_v10 = vmul.f32 0.70710677, %v9917_v36  ;;  %v1338_v12 = vmul.f32 0.70710677, %v9922_v8 }
 0x183   : > { %12445 = vst [vmem:[#allocation57_spill] sm:$0xff] %v9928_v57  ;;  %4752 = vmatmul.mubr.bf16.gmra.mxu1 %v9928_v57  ;;  %v9939_v31 = vpack.c.bf16 %v1897_v16, %v1889_v26  ;;  %v1707_v11 = vadd.f32 1.0, %v8058_v27  ;;  %8077 = verf.f32 %v1336_v18  ;;  %v1137_v46 = vmul.f32 0.5, %v9873_v25  ;;  %v9953_v18 = vld [vmem:[%s8834_s7 + $0x558] sm:$0xff] }
 0x184   : > { %v8060_v61 = vpop.eup %8059  ;;  %v1891_v24 = vmul.f32 %v1699_v0, %v1123_v47  ;;  %v1145_v55 = vmul.f32 0.5, %v9876_v48  ;;  %8079 = verf.f32 %v1330_v10  ;;  %v1345_v16 = vmul.f32 0.70710677, %v9933_v34 }
 0x185   : > { %12446 = vst [vmem:[#allocation58_spill] sm:$0xff] %v9939_v31  ;;  %v8062_v51 = vpop.eup %8061  ;;  %4608 = vmatprep.mubr.bf16.mxu0 %v9939_v31  ;;  %v1899_v26 = vmul.f32 %v1707_v11, %v1131_v21  ;;  %v1696_v28 = vadd.f32 1.0, %v8060_v61  ;;  %8081 = verf.f32 %v1338_v12  ;;  %v1139_v25 = vmul.f32 0.5, %v9883_v63  ;;  %v9962_v11 = vld [vmem:[%s8834_s7 + $0x500] sm:$0xff] }
 0x186   : > { %v1704_v47 = vadd.f32 1.0, %v8062_v51  ;;  %v1147_v48 = vmul.f32 0.5, %v9899_v53  ;;  %v1353_v27 = vmul.f32 0.70710677, %v9943_v20  ;;  %v8064_v0 = vpop.eup %8063  ;;  %8083 = verf.f32 %v1345_v16  ;;  %v9965_v12 = vld [vmem:[%s8834_s7 + $0x540] sm:$0xff] }
 0x187   : > { %v9958_v10 = vpack.c.bf16 %v1899_v26, %v1891_v24  ;;  %v1888_v37 = vmul.f32 %v1696_v28, %v1120_v7  ;;  %v1347_v21 = vmul.f32 0.70710677, %v9948_v15  ;;  %v1698_v63 = vadd.f32 1.0, %v8064_v0  ;;  %v9972_v28 = vld [vmem:[%s8834_s7 + $0x510] sm:$0xff] }
 0x188   : > { %v8066_v61 = vpop.eup %8065  ;;  %v1896_v51 = vmul.f32 %v1704_v47, %v1128_v50  ;;  %8085 = verf.f32 %v1353_v27  ;;  %v1355_v53 = vmul.f32 0.70710677, %v9953_v18  ;;  %v1136_v7 = vmul.f32 0.5, %v9909_v4  ;;  %v9977_v27 = vld [vmem:[%s8834_s7 + $0x550] sm:$0xff] }
 0x189   : > { %12447 = vst [vmem:[#allocation59_spill] sm:$0xff] %v9958_v10  ;;  %v8068_v57 = vpop.eup %8067  ;;  %4761 = vmatprep.mubr.bf16.mxu1 %v9958_v10  ;;  %v1706_v24 = vadd.f32 1.0, %v8066_v61  ;;  %v1144_v26 = vmul.f32 0.5, %v9914_v49  ;;  %8087 = verf.f32 %v1347_v21  ;;  %v1890_v50 = vmul.f32 %v1698_v63, %v1122_v62 }
 0x18a   : > { %v8070_v16 = vpop.eup %8069  ;;  %v9974_v31 = vpack.c.bf16 %v1896_v51, %v1888_v37  ;;  %v1713_v47 = vadd.f32 1.0, %v8068_v57  ;;  %8089 = verf.f32 %v1355_v53  ;;  %v1344_v61 = vmul.f32 0.70710677, %v9962_v11  ;;  %v9988_v53 = vld [vmem:[%s8834_s7 + $0x588] sm:$0xff] }
 0x18b   : > { %v1898_v0 = vmul.f32 %v1706_v24, %v1130_v38  ;;  %v1721_v54 = vadd.f32 1.0, %v8070_v16  ;;  %v1352_v4 = vmul.f32 0.70710677, %v9965_v12  ;;  %v8072_v10 = vpop.eup %8071  ;;  %v1138_v37 = vmul.f32 0.5, %v9917_v36 }
 0x18c   : > { %12448 = vst [vmem:[#allocation60_spill] sm:$0xff] %v9974_v31  ;;  %4609 = vmatmul.mubr.bf16.gmra.mxu0 %v9974_v31  ;;  %v1905_v49 = vmul.f32 %v1713_v47, %v1137_v46  ;;  %v1146_v62 = vmul.f32 0.5, %v9922_v8  ;;  %v1346_v57 = vmul.f32 0.70710677, %v9972_v28  ;;  %v1715_v63 = vadd.f32 1.0, %v8072_v10  ;;  %v9993_v46 = vld [vmem:[%s8834_s7 + $0x5c8] sm:$0xff] }
 0x18d   : > { %v8074_v21 = vpop.eup %8073  ;;  %v9985_v51 = vpack.c.bf16 %v1898_v0, %v1890_v50  ;;  %v1913_v38 = vmul.f32 %v1721_v54, %v1145_v55  ;;  %8091 = verf.f32 %v1344_v61  ;;  %v1153_v16 = vmul.f32 0.5, %v9933_v34  ;;  %v10001_v61 = vld [vmem:[%s8834_s7 + $0x598] sm:$0xff] }
 0x18e   : > { %v1723_v24 = vadd.f32 1.0, %v8074_v21  ;;  %8093 = verf.f32 %v1352_v4  ;;  %v1354_v36 = vmul.f32 0.70710677, %v9977_v27  ;;  %v1907_v54 = vmul.f32 %v1715_v63, %v1139_v25  ;;  %v10004_v4 = vld [vmem:[%s8834_s7 + $0x5d8] sm:$0xff] }
 0x18f   : > { %12449 = vst [vmem:[#allocation61_spill] sm:$0xff] %v9985_v51  ;;  %v8076_v8 = vpop.eup %8075  ;;  %4762 = vmatmul.mubr.bf16.gmra.mxu1 %v9985_v51  ;;  %v9996_v50 = vpack.c.bf16 %v1913_v38, %v1905_v49  ;;  %v1161_v55 = vmul.f32 0.5, %v9943_v20  ;;  %8095 = verf.f32 %v1346_v57  ;;  %v1361_v34 = vmul.f32 0.70710677, %v9988_v53 }
 0x190   : > { %v8078_v10 = vpop.eup %8077  ;;  %v1915_v47 = vmul.f32 %v1723_v24, %v1147_v48  ;;  %v1712_v0 = vadd.f32 1.0, %v8076_v8  ;;  %8097 = verf.f32 %v1354_v36  ;;  %v1155_v25 = vmul.f32 0.5, %v9948_v15 }
 0x191   : > { %12450 = vst [vmem:[#allocation62_spill] sm:$0xff] %v9996_v50  ;;  %v8080_v21 = vpop.eup %8079  ;;  %4618 = vmatprep.mubr.bf16.mxu0 %v9996_v50  ;;  %v1720_v49 = vadd.f32 1.0, %v8078_v10  ;;  %v1163_v20 = vmul.f32 0.5, %v9953_v18  ;;  %v1369_v48 = vmul.f32 0.70710677, %v9993_v46  ;;  %8099 = verf.f32 %v1361_v34  ;;  %v10014_v50 = vld [vmem:[%s8834_s7 + $0x580] sm:$0xff] }
 0x192   : > { %v8082_v57 = vpop.eup %8081  ;;  %v10010_v38 = vpack.c.bf16 %v1915_v47, %v1907_v54  ;;  %v1904_v63 = vmul.f32 %v1712_v0, %v1136_v7  ;;  %v1714_v24 = vadd.f32 1.0, %v8080_v21  ;;  %v1363_v51 = vmul.f32 0.70710677, %v10001_v61  ;;  %v10017_v10 = vld [vmem:[%s8834_s7 + $0x5c0] sm:$0xff] }
 0x193   : > { %v1912_v36 = vmul.f32 %v1720_v49, %v1144_v26  ;;  %v1722_v8 = vadd.f32 1.0, %v8082_v57  ;;  %8101 = verf.f32 %v1369_v48  ;;  %v8084_v15 = vpop.eup %8083  ;;  %v1152_v54 = vmul.f32 0.5, %v9962_v11  ;;  %v10026_v49 = vld [vmem:[%s8834_s7 + $0x590] sm:$0xff] }
 0x194   : > { %12451 = vst [vmem:[#allocation63_spill] sm:$0xff] %v10010_v38  ;;  %4771 = vmatprep.mubr.bf16.mxu1 %v10010_v38  ;;  %v1906_v18 = vmul.f32 %v1714_v24, %v1138_v37  ;;  %v1160_v7 = vmul.f32 0.5, %v9965_v12  ;;  %v1371_v26 = vmul.f32 0.70710677, %v10004_v4  ;;  %v1729_v21 = vadd.f32 1.0, %v8084_v15  ;;  %v10031_v12 = vld [vmem:[%s8834_s7 + $0x5d0] sm:$0xff] }
 0x195   : > { %v8086_v47 = vpop.eup %8085  ;;  %v10023_v0 = vpack.c.bf16 %v1912_v36, %v1904_v63  ;;  %v1914_v34 = vmul.f32 %v1722_v8, %v1146_v62  ;;  %8103 = verf.f32 %v1363_v51  ;;  %v1360_v37 = vmul.f32 0.70710677, %v10014_v50  ;;  %v10038_v8 = vld [vmem:[%s8834_s7 + $0x28] sm:$0xff] }
 0x196   : > { %v8088_v48 = vpop.eup %8087  ;;  %v1737_v57 = vadd.f32 1.0, %v8086_v47  ;;  %8105 = verf.f32 %v1371_v26  ;;  %v1368_v11 = vmul.f32 0.70710677, %v10017_v10  ;;  %v1921_v62 = vmul.f32 %v1729_v21, %v1153_v16  ;;  %v10042_v38 = vld [vmem:[%s8834_s7 + $0x68] sm:$0xff] }
 0x197   : > { %12452 = vst [vmem:[#allocation64_spill] sm:$0xff] %v10023_v0  ;;  %v8090_v24 = vpop.eup %8089  ;;  %4619 = vmatmul.mubr.bf16.gmra.mxu0 %v10023_v0  ;;  %v10034_v63 = vpack.c.bf16 %v1914_v34, %v1906_v18  ;;  %v1731_v36 = vadd.f32 1.0, %v8088_v48  ;;  %v1154_v51 = vmul.f32 0.5, %v9972_v28  ;;  %v1162_v47 = vmul.f32 0.5, %v9977_v27  ;;  %v10052_v48 = vld [vmem:[%s8834_s7 + $0x38] sm:$0xff] }
 0x198   : > { %v1929_v15 = vmul.f32 %v1737_v57, %v1161_v55  ;;  %v1739_v26 = vadd.f32 1.0, %v8090_v24  ;;  %8107 = verf.f32 %v1360_v37  ;;  %v1362_v18 = vmul.f32 0.70710677, %v10026_v49 }
 0x199   : > { %12453 = vst [vmem:[#allocation65_spill] sm:$0xff] %v10034_v63  ;;  %4772 = vmatmul.mubr.bf16.gmra.mxu1 %v10034_v63  ;;  %v1923_v31 = vmul.f32 %v1731_v36, %v1155_v25  ;;  %8109 = verf.f32 %v1368_v11  ;;  %v1370_v16 = vmul.f32 0.70710677, %v10031_v12  ;;  %v1169_v55 = vmul.f32 0.5, %v9988_v53 }
 0x19a   : > { %v8092_v34 = vpop.eup %8091  ;;  %v10047_v28 = vpack.c.bf16 %v1929_v15, %v1921_v62  ;;  %v1931_v21 = vmul.f32 %v1739_v26, %v1163_v20  ;;  %v1177_v27 = vmul.f32 0.5, %v9993_v46  ;;  %8111 = verf.f32 %v1362_v18  ;;  %v815_v46 = vld [vmem:[%s8834_s7 + $0x78] sm:$0xff] }
 0x19b   : > { %v8094_v57 = vpop.eup %8093  ;;  %v1728_v37 = vadd.f32 1.0, %v8092_v34  ;;  %v1189_v25 = vmul.f32 0.70710677, %v10038_v8  ;;  %v1197_v11 = vmul.f32 0.70710677, %v10042_v38  ;;  %v1171_v53 = vmul.f32 0.5, %v10001_v61 }
 0x19c   : > { %12454 = vst [vmem:[#allocation66_spill] sm:$0xff] %v10047_v28  ;;  %v8096_v24 = vpop.eup %8095  ;;  %4628 = vmatprep.mubr.bf16.mxu0 %v10047_v28  ;;  %v10057_v62 = vpack.c.bf16 %v1931_v21, %v1923_v31  ;;  %v1736_v20 = vadd.f32 1.0, %v8094_v57  ;;  %8113 = verf.f32 %v1370_v16  ;;  %v1179_v18 = vmul.f32 0.5, %v10004_v4  ;;  %v10065_v21 = vld [vmem:[%s8834_s7 + $0x20] sm:$0xff]  ;;  %v10092_v28 = vld [vmem:[%s8834_s7 + $0xe8] sm:$0xff] }
 0x19d   : > { %v8098_v36 = vpop.eup %8097  ;;  %v1920_v15 = vmul.f32 %v1728_v37, %v1152_v54  ;;  %v1730_v26 = vadd.f32 1.0, %v8096_v24  ;;  %8115 = verf.f32 %v1189_v25  ;;  %v1191_v31 = vmul.f32 0.70710677, %v10052_v48  ;;  %v10068_v57 = vld [vmem:[%s8834_s7 + $0x60] sm:$0xff] }
 0x19e   : > { %12455 = vst [vmem:[#allocation67_spill] sm:$0xff] %v10057_v62  ;;  %4781 = vmatprep.mubr.bf16.mxu1 %v10057_v62  ;;  %v1928_v34 = vmul.f32 %v1736_v20, %v1160_v7  ;;  %v1738_v63 = vadd.f32 1.0, %v8098_v36  ;;  %8117 = verf.f32 %v1197_v11  ;;  %v8100_v61 = vpop.eup %8099  ;;  %v1168_v54 = vmul.f32 0.5, %v10014_v50  ;;  %v10075_v11 = vld [vmem:[%s8834_s7 + $0x30] sm:$0xff] }
 0x19f   : > { %v1922_v16 = vmul.f32 %v1730_v26, %v1154_v51  ;;  %v1176_v4 = vmul.f32 0.5, %v10017_v10  ;;  %v1199_v37 = vmul.f32 0.70710677, %v815_v46  ;;  %v1745_v20 = vadd.f32 1.0, %v8100_v61  ;;  %v10080_v50 = vld [vmem:[%s8834_s7 + $0x70] sm:$0xff] }
 0x1a0   : > { %v8102_v25 = vpop.eup %8101  ;;  %v10072_v24 = vpack.c.bf16 %v1928_v34, %v1920_v15  ;;  %v1930_v7 = vmul.f32 %v1738_v63, %v1162_v47  ;;  %8119 = verf.f32 %v1191_v31  ;;  %v1188_v62 = vmul.f32 0.70710677, %v10065_v21 }
 0x1a1   : > { %v1753_v36 = vadd.f32 1.0, %v8102_v25  ;;  %8121 = verf.f32 %v1199_v37  ;;  %v1196_v51 = vmul.f32 0.70710677, %v10068_v57  ;;  %v1937_v63 = vmul.f32 %v1745_v20, %v1169_v55  ;;  %v10089_v25 = vld [vmem:[%s8834_s7 + $0xa8] sm:$0xff]  ;;  %v10101_v20 = vld [vmem:[%s8834_s7 + $0xb8] sm:$0xff] }
 0x1a2   : > { %12456 = vst [vmem:[#allocation68_spill] sm:$0xff] %v10072_v24  ;;  %v8104_v10 = vpop.eup %8103  ;;  %4629 = vmatmul.mubr.bf16.gmra.mxu0 %v10072_v24  ;;  %v10083_v15 = vpack.c.bf16 %v1930_v7, %v1922_v16  ;;  %v1170_v47 = vmul.f32 0.5, %v10026_v49  ;;  %v1178_v26 = vmul.f32 0.5, %v10031_v12  ;;  %8123 = verf.f32 %v1188_v62 }
 0x1a3   : > { %v8106_v34 = vpop.eup %8105  ;;  %v1945_v31 = vmul.f32 %v1753_v36, %v1177_v27  ;;  %v1747_v61 = vadd.f32 1.0, %v8104_v10  ;;  %v1190_v37 = vmul.f32 0.70710677, %v10075_v11  ;;  %v997_v55 = vmul.f32 0.5, %v10038_v8 }
 0x1a4   : > { %12457 = vst [vmem:[#allocation69_spill] sm:$0xff] %v10083_v15  ;;  %4782 = vmatmul.mubr.bf16.gmra.mxu1 %v10083_v15  ;;  %v1755_v16 = vadd.f32 1.0, %v8106_v34  ;;  %8125 = verf.f32 %v1196_v51  ;;  %v1198_v49 = vmul.f32 0.70710677, %v10080_v50  ;;  %v1005_v62 = vmul.f32 0.5, %v10042_v38  ;;  %v10105_v15 = vld [vmem:[%s8834_s7 + $0xf8] sm:$0xff] }
 0x1a5   : > { %v8108_v12 = vpop.eup %8107  ;;  %v10097_v27 = vpack.c.bf16 %v1945_v31, %v1937_v63  ;;  %v1939_v7 = vmul.f32 %v1747_v61, %v1171_v53  ;;  %8127 = verf.f32 %v1190_v37  ;;  %v1205_v34 = vmul.f32 0.70710677, %v10089_v25 }
 0x1a6   : > { %v8110_v36 = vpop.eup %8109  ;;  %v1947_v10 = vmul.f32 %v1755_v16, %v1179_v18  ;;  %v1744_v24 = vadd.f32 1.0, %v8108_v12  ;;  %8129 = verf.f32 %v1198_v49  ;;  %v999_v53 = vmul.f32 0.5, %v10052_v48  ;;  %v10118_v48 = vld [vmem:[%s8834_s7 + $0xe0] sm:$0xff] }
 0x1a7   : > { %12458 = vst [vmem:[#allocation70_spill] sm:$0xff] %v10097_v27  ;;  %4638 = vmatprep.mubr.bf16.mxu0 %v10097_v27  ;;  %v1752_v8 = vadd.f32 1.0, %v8110_v36  ;;  %v1007_v51 = vmul.f32 0.5, %v815_v46  ;;  %v1213_v38 = vmul.f32 0.70710677, %v10092_v28  ;;  %v8112_v63 = vpop.eup %8111  ;;  %8131 = verf.f32 %v1205_v34  ;;  %v10115_v36 = vld [vmem:[%s8834_s7 + $0xa0] sm:$0xff] }
 0x1a8   : > { %v10110_v31 = vpack.c.bf16 %v1947_v10, %v1939_v7  ;;  %v1936_v18 = vmul.f32 %v1744_v24, %v1168_v54  ;;  %v1207_v61 = vmul.f32 0.70710677, %v10101_v20  ;;  %v1746_v49 = vadd.f32 1.0, %v8112_v63  ;;  %v10124_v10 = vld [vmem:[%s8834_s7 + $0xb0] sm:$0xff] }
 0x1a9   : > { %v8114_v37 = vpop.eup %8113  ;;  %v1944_v16 = vmul.f32 %v1752_v8, %v1176_v4  ;;  %8133 = verf.f32 %v1213_v38  ;;  %v1215_v12 = vmul.f32 0.70710677, %v10105_v15  ;;  %v996_v54 = vmul.f32 0.5, %v10065_v21  ;;  %v10129_v63 = vld [vmem:[%s8834_s7 + $0xf0] sm:$0xff] }
 0x1aa   : > { %12459 = vst [vmem:[#allocation71_spill] sm:$0xff] %v10110_v31  ;;  %v8116_v46 = vpop.eup %8115  ;;  %4791 = vmatprep.mubr.bf16.mxu1 %v10110_v31  ;;  %v1754_v7 = vadd.f32 1.0, %v8114_v37  ;;  %v1004_v24 = vmul.f32 0.5, %v10068_v57  ;;  %8135 = verf.f32 %v1207_v61  ;;  %v1938_v8 = vmul.f32 %v1746_v49, %v1170_v47 }
 0x1ab   : > { %v8118_v4 = vpop.eup %8117  ;;  %v10126_v34 = vpack.c.bf16 %v1944_v16, %v1936_v18  ;;  %v1573_v38 = vadd.f32 1.0, %v8116_v46  ;;  %8137 = verf.f32 %v1215_v12  ;;  %v1204_v37 = vmul.f32 0.70710677, %v10115_v36  ;;  %v10140_v46 = vld [vmem:[%s8834_s7 + $0x128] sm:$0xff] }
 0x1ac   : > { %v1946_v27 = vmul.f32 %v1754_v7, %v1178_v26  ;;  %v1581_v0 = vadd.f32 1.0, %v8118_v4  ;;  %v1212_v21 = vmul.f32 0.70710677, %v10118_v48  ;;  %v998_v18 = vmul.f32 0.5, %v10075_v11 }
 0x1ad   : > { %12460 = vst [vmem:[#allocation72_spill] sm:$0xff] %v10126_v34  ;;  %v8120_v31 = vpop.eup %8119  ;;  %4639 = vmatmul.mubr.bf16.gmra.mxu0 %v10126_v34  ;;  %v1765_v57 = vmul.f32 %v1573_v38, %v997_v55  ;;  %v1006_v47 = vmul.f32 0.5, %v10080_v50  ;;  %v1206_v61 = vmul.f32 0.70710677, %v10124_v10  ;;  %8139 = verf.f32 %v1204_v37  ;;  %v10145_v55 = vld [vmem:[%s8834_s7 + $0x168] sm:$0xff]  ;;  %v10190_v34 = vld [vmem:[%s8834_s7 + $0x170] sm:$0xff] }
 0x1ae   : > { %v8122_v16 = vpop.eup %8121  ;;  %v10137_v49 = vpack.c.bf16 %v1946_v27, %v1938_v8  ;;  %v1773_v26 = vmul.f32 %v1581_v0, %v1005_v62  ;;  %v1575_v12 = vadd.f32 1.0, %v8120_v31  ;;  %v1013_v4 = vmul.f32 0.5, %v10089_v25  ;;  %v10152_v62 = vld [vmem:[%s8834_s7 + $0x138] sm:$0xff] }
 0x1af   : > { %v1583_v7 = vadd.f32 1.0, %v8122_v16  ;;  %8141 = verf.f32 %v1212_v21  ;;  %v1214_v11 = vmul.f32 0.70710677, %v10129_v63  ;;  %v8124_v50 = vpop.eup %8123  ;;  %v1021_v0 = vmul.f32 0.5, %v10092_v28  ;;  %v10156_v21 = vld [vmem:[%s8834_s7 + $0x178] sm:$0xff] }
 0x1b0   : > { %12461 = vst [vmem:[#allocation73_spill] sm:$0xff] %v10137_v49  ;;  %4792 = vmatmul.mubr.bf16.gmra.mxu1 %v10137_v49  ;;  %v10148_v27 = vpack.c.bf16 %v1773_v26, %v1765_v57  ;;  %v1767_v8 = vmul.f32 %v1575_v12, %v999_v53  ;;  %8143 = verf.f32 %v1206_v61  ;;  %v1572_v38 = vadd.f32 1.0, %v8124_v50 }
 0x1b1   : > { %v8126_v31 = vpop.eup %8125  ;;  %v1775_v25 = vmul.f32 %v1583_v7, %v1007_v51  ;;  %8145 = verf.f32 %v1214_v11  ;;  %v1221_v37 = vmul.f32 0.70710677, %v10140_v46  ;;  %v1015_v28 = vmul.f32 0.5, %v10101_v20  ;;  %v7539_v11 = vld [vmem:[%s8842_s10 + $0x158] ss:$24 sps:$4 sm:$0xff]   ;;  %v10167_v20 = vld [vmem:[%s8834_s7 + $0x120] sm:$0xff] }
 0x1b2   : > { %12462 = vst [vmem:[#allocation74_spill] sm:$0xff] %v10148_v27  ;;  %v8128_v16 = vpop.eup %8127  ;;  %4834 = vmatprep.mubr.bf16.mxu0 %v10148_v27  ;;  %v1580_v53 = vadd.f32 1.0, %v8126_v31  ;;  %v1023_v57 = vmul.f32 0.5, %v10105_v15  ;;  %v1229_v61 = vmul.f32 0.70710677, %v10145_v55  ;;  %v1764_v12 = vmul.f32 %v1572_v38, %v996_v54  ;;  %v10170_v15 = vld [vmem:[%s8834_s7 + $0x160] sm:$0xff] }
 0x1b3   : > { %v8130_v51 = vpop.eup %8129  ;;  %v10162_v26 = vpack.c.bf16 %v1775_v25, %v1767_v8  ;;  %v1574_v7 = vadd.f32 1.0, %v8128_v16  ;;  %8147 = verf.f32 %v1221_v37  ;;  %v1223_v31 = vmul.f32 0.70710677, %v10152_v62  ;;  %v7542_v25 = vld [vmem:[%s8842_s10 + $0x458] ss:$24 sps:$4 sm:$0xff]  }
 0x1b4   : > { %v1772_v50 = vmul.f32 %v1580_v53, %v1004_v24  ;;  %v1582_v49 = vadd.f32 1.0, %v8130_v51  ;;  %8149 = verf.f32 %v1229_v61  ;;  %v8132_v27 = vpop.eup %8131  ;;  %v10175_v54 = vmul.f32 0.5, %v10115_v36  ;;  %v7547_v61 = vld [vmem:[%s8842_s10 + $0x12c] ss:$24 sps:$4 sm:$0xff]  }
 0x1b5   : > { %12463 = vst [vmem:[#allocation75_spill] sm:$0xff] %v10162_v26  ;;  %4987 = vmatprep.mubr.bf16.mxu1 %v10162_v26  ;;  %v1766_v8 = vmul.f32 %v1574_v7, %v998_v18  ;;  %v10178_v24 = vmul.f32 0.5, %v10118_v48  ;;  %v1231_v38 = vmul.f32 0.70710677, %v10156_v21  ;;  %v1589_v51 = vadd.f32 1.0, %v8132_v27  ;;  %v10185_v18 = vld [vmem:[%s8834_s7 + $0x130] sm:$0xff] }
 0x1b6   : > { %v8134_v37 = vpop.eup %8133  ;;  %v10181_v16 = vpack.c.bf16 %v1772_v50, %v1764_v12  ;;  %v1774_v53 = vmul.f32 %v1582_v49, %v1006_v47  ;;  %8151 = verf.f32 %v1223_v31  ;;  %v1220_v36 = vmul.f32 0.70710677, %v10167_v20  ;;  %v7545_v49 = vld [vmem:[%s8842_s10 + $0x128] ss:$24 sps:$4 sm:$0xff]  }
 0x1b7   : > { %v8136_v7 = vpop.eup %8135  ;;  %v1597_v26 = vadd.f32 1.0, %v8134_v37  ;;  %8153 = verf.f32 %v1231_v38  ;;  %v1228_v48 = vmul.f32 0.70710677, %v10170_v15  ;;  %v1781_v27 = vmul.f32 %v1589_v51, %v1013_v4  ;;  %v7550_v38 = vld [vmem:[%s8842_s10 + $0x42c] ss:$24 sps:$4 sm:$0xff]  }
 0x1b8   : > { %12464 = vst [vmem:[#allocation76_spill] sm:$0xff] %v10181_v16  ;;  %v8138_v12 = vpop.eup %8137  ;;  %4835 = vmatmul.mubr.bf16.vlgmr.msra.gmra.mxu0 %v10181_v16  ;;  %v10193_v47 = vpack.c.bf16 %v1774_v53, %v1766_v8  ;;  %v1591_v50 = vadd.f32 1.0, %v8136_v7  ;;  %v1014_v31 = vmul.f32 0.5, %v10124_v10  ;;  %v1022_v19 = vmul.f32 0.5, %v10129_v63  ;;  %v10205_v8 = vld [vmem:[%s8834_s7 + $0x1e8] sm:$0xff] }
 0x1b9   : > { %5109 = vmatpush1.bf16.msra.mxu0 %v7539_v11  ;;  %v1789_v37 = vmul.f32 %v1597_v26, %v1021_v0  ;;  %v1599_v29 = vadd.f32 1.0, %v8138_v12  ;;  %8155 = verf.f32 %v1220_v36  ;;  %v7556_v10 = vld [vmem:[%s8842_s10 + $0x3fc] ss:$24 sps:$4 sm:$0xff]   ;;  %v1222_v0 = vmul.f32 0.70710677, %v10185_v18 }
 0x1ba   : > { %12465 = vst [vmem:[#allocation77_spill] sm:$0xff] %v10193_v47  ;;  %4988 = vmatmul.mubr.bf16.vlgmr.msra.gmra.mxu1 %v10193_v47  ;;  %5110 = vmatprep.subr.bf16.mxu0 %v7547_v61  ;;  %v1783_v4 = vmul.f32 %v1591_v50, %v1015_v28  ;;  %8157 = verf.f32 %v1228_v48  ;;  %v1230_v26 = vmul.f32 0.70710677, %v10190_v34  ;;  %v8140_v63 = vpop.eup %8139  ;;  %v7551_v51 = vld [vmem:[%s8842_s10 + $0xf8] ss:$24 sps:$4 sm:$0xff]   ;;  %v1029_v7 = vmul.f32 0.5, %v10140_v46 }
 0x1bb   : > { %5262 = vmatpush1.bf16.msra.mxu1 %v7542_v25  ;;  %v10211_v11 = vpack.c.bf16 %v1789_v37, %v1781_v27  ;;  %v1791_v53 = vmul.f32 %v1599_v29, %v1023_v57  ;;  %v10216_v36 = vmul.f32 0.5, %v10145_v55  ;;  %v10219_v28 = vld [vmem:[%s8834_s7 + $0x1b8] sm:$0xff]  ;;  %v1588_v48 = vadd.f32 1.0, %v8140_v63  ;;  %v7557_v63 = vld [vmem:[%s8842_s10 + $0xc8] ss:$24 sps:$4 sm:$0xff]  }
 0x1bc   : > { %v8142_v61 = vpop.eup %8141  ;;  %5263 = vmatprep.subr.bf16.mxu1 %v7550_v38  ;;  %8159 = verf.f32 %v1222_v0  ;;  %v1237_v12 = vmul.f32 0.70710677, %v10202_v40  ;;  %v1245_v25 = vmul.f32 0.70710677, %v10205_v8  ;;  %v7554_v55 = vld [vmem:[%s8842_s10 + $0x3f8] ss:$24 sps:$4 sm:$0xff]  }
 0x1bd   : > { %12466 = vst [vmem:[#allocation78_spill] sm:$0xff] %v10211_v11  ;;  %v8144_v29 = vpop.eup %8143  ;;  %4844 = vmatprep.mubr.bf16.mxu0 %v10211_v11  ;;  %v10224_v57 = vpack.c.bf16 %v1791_v53, %v1783_v4  ;;  %5111 = vmatpush1.bf16.msra.mxu0 %v7545_v49  ;;  %v1596_v46 = vadd.f32 1.0, %v8142_v61  ;;  %v10228_v27 = vmul.f32 0.5, %v10152_v62  ;;  %8161 = verf.f32 %v1230_v26  ;;  %v10231_v50 = vld [vmem:[%s8834_s7 + $0x1f8] sm:$0xff]  ;;  %v7559_v49 = vld [vmem:[%s8842_s10 + $0xcc] ss:$24 sps:$4 sm:$0xff]  }
 0x1be   : > { %v8146_v38 = vpop.eup %8145  ;;  %v1780_v37 = vmul.f32 %v1588_v48, %v10175_v54  ;;  %v1590_v0 = vadd.f32 1.0, %v8144_v29  ;;  %5112 = vmatprep.subr.bf16.mxu0 %v7553_v44  ;;  %v10235_v4 = vmul.f32 0.5, %v10156_v21  ;;  %8163 = verf.f32 %v1237_v12  ;;  %v10243_v54 = vld [vmem:[%s8834_s7 + $0x1a0] sm:$0xff]  ;;  %v7578_v11 = vld [vmem:[%s8842_s10 + $0x338] ss:$24 sps:$4 sm:$0xff]  }
 0x1bf   : > { %12467 = vst [vmem:[#allocation79_spill] sm:$0xff] %v10224_v57  ;;  %4997 = vmatprep.mubr.bf16.mxu1 %v10224_v57  ;;  %v1788_v62 = vmul.f32 %v1596_v46, %v10178_v24  ;;  %v1598_v26 = vadd.f32 1.0, %v8146_v38  ;;  %5264 = vmatpush1.bf16.msra.mxu1 %v7548_v22  ;;  %8165 = verf.f32 %v1245_v25  ;;  %v1239_v53 = vmul.f32 0.70710677, %v10219_v28  ;;  %v10246_v44 = vld [vmem:[%s8834_s7 + $0x1e0] sm:$0xff] }
 0x1c0   : > { %v8148_v21 = vpop.eup %8147  ;;  %v1782_v61 = vmul.f32 %v1590_v0, %v1014_v31  ;;  %5265 = vmatprep.subr.bf16.mxu1 %v7556_v10  ;;  %v10249_v48 = vmul.f32 0.5, %v10167_v20  ;;  %v10252_v24 = vmul.f32 0.5, %v10170_v15  ;;  %v7562_v22 = vld [vmem:[%s8842_s10 + $0x3cc] ss:$24 sps:$4 sm:$0xff]   ;;  %v1247_v12 = vmul.f32 0.70710677, %v10231_v50 }
 0x1c1   : > { %v8150_v25 = vpop.eup %8149  ;;  %v10256_v29 = vpack.c.bf16 %v1788_v62, %v1780_v37  ;;  %v1790_v46 = vmul.f32 %v1598_v26, %v1022_v19  ;;  %5113 = vmatpush1.bf16.msra.mxu0 %v7551_v51  ;;  %v1605_v38 = vadd.f32 1.0, %v8148_v21  ;;  %v7560_v57 = vld [vmem:[%s8842_s10 + $0x3c8] ss:$24 sps:$4 sm:$0xff]   ;;  %8167 = verf.f32 %v1239_v53  ;;  %v10260_v31 = vld [vmem:[%s8834_s7 + $0x1b0] sm:$0xff] }
 0x1c2   : > { %v7565_v20 = vld [vmem:[%s8842_s10 + $0x9c] ss:$24 sps:$4 sm:$0xff]   ;;  %v1613_v15 = vadd.f32 1.0, %v8150_v25  ;;  %5114 = vmatprep.subr.bf16.mxu0 %v7559_v49  ;;  %8169 = verf.f32 %v1247_v12  ;;  %v1236_v10 = vmul.f32 0.70710677, %v10243_v54  ;;  %v10272_v26 = vmul.f32 0.5, %v10185_v18 }
 0x1c3   : > { %12468 = vst [vmem:[#allocation80_spill] sm:$0xff] %v10256_v29  ;;  %v1244_v0 = vmul.f32 0.70710677, %v10246_v44  ;;  %v10266_v37 = vld [vmem:[%s8834_s7 + $0x1f0] sm:$0xff]  ;;  %v8152_v19 = vpop.eup %8151  ;;  %4845 = vmatmul.mubr.bf16.gmra.mxu0 %v10256_v29  ;;  %v10269_v51 = vpack.c.bf16 %v1790_v46, %v1782_v61  ;;  %v1797_v62 = vmul.f32 %v1605_v38, %v1029_v7  ;;  %5266 = vmatpush1.bf16.msra.mxu1 %v7554_v55  ;;  %v10275_v53 = vmul.f32 0.5, %v10190_v34  ;;  %v10280_v12 = vld [vmem:[%s8834_s7 + $0x228] sm:$0xff] }
 0x1c4   : > { %v7563_v49 = vld [vmem:[%s8842_s10 + $0x98] ss:$24 sps:$4 sm:$0xff]   ;;  %v7568_v21 = vld [vmem:[%s8842_s10 + $0x39c] ss:$24 sps:$4 sm:$0xff]   ;;  %v8154_v25 = vpop.eup %8153  ;;  %v1805_v47 = vmul.f32 %v1613_v15, %v10216_v36  ;;  %v1607_v29 = vadd.f32 1.0, %v8152_v19  ;;  %5267 = vmatprep.subr.bf16.mxu1 %v7562_v22  ;;  %8171 = verf.f32 %v1236_v10  ;;  %v10286_v18 = vmul.f32 0.5, %v10202_v40 }
 0x1c5   : > { %12469 = vst [vmem:[#allocation81_spill] sm:$0xff] %v10269_v51  ;;  %v1238_v7 = vmul.f32 0.70710677, %v10260_v31  ;;  %4998 = vmatmul.mubr.bf16.gmra.mxu1 %v10269_v51  ;;  %v1615_v34 = vadd.f32 1.0, %v8154_v25  ;;  %5115 = vmatpush1.bf16.msra.mxu0 %v7557_v63  ;;  %8173 = verf.f32 %v1244_v0  ;;  %v1246_v55 = vmul.f32 0.70710677, %v10266_v37 }
 0x1c6   : > { %v7566_v61 = vld [vmem:[%s8842_s10 + $0x398] ss:$24 sps:$4 sm:$0xff]   ;;  %v10291_v36 = vld [vmem:[%s8834_s7 + $0x268] sm:$0xff]  ;;  %v8156_v22 = vpop.eup %8155  ;;  %v10293_v46 = vpack.c.bf16 %v1805_v47, %v1797_v62  ;;  %v1799_v38 = vmul.f32 %v1607_v29, %v10228_v27  ;;  %v10297_v15 = vmul.f32 0.5, %v10205_v8  ;;  %5116 = vmatprep.subr.bf16.mxu0 %v7565_v20  ;;  %v1253_v47 = vmul.f32 0.70710677, %v10280_v12 }
 0x1c7   : > { %8175 = verf.f32 %v1238_v7  ;;  %v7571_v40 = vld [vmem:[%s8842_s10 + $0x6c] ss:$24 sps:$4 sm:$0xff]   ;;  %v10301_v63 = vld [vmem:[%s8834_s7 + $0x238] sm:$0xff]  ;;  %v8158_v10 = vpop.eup %8157  ;;  %v1807_v0 = vmul.f32 %v1615_v34, %v10235_v4  ;;  %v1604_v19 = vadd.f32 1.0, %v8156_v22  ;;  %5268 = vmatpush1.bf16.msra.mxu1 %v7560_v57  ;;  %v7569_v25 = vld [vmem:[%s8842_s10 + $0x68] ss:$24 sps:$4 sm:$0xff]  }
 0x1c8   : > { %12470 = vst [vmem:[#allocation82_spill] sm:$0xff] %v10293_v46  ;;  %8177 = verf.f32 %v1246_v55  ;;  %v10307_v27 = vld [vmem:[%s8834_s7 + $0x278] sm:$0xff]  ;;  %v7574_v8 = vld [vmem:[%s8842_s10 + $0x36c] ss:$24 sps:$4 sm:$0xff]   ;;  %4854 = vmatprep.mubr.bf16.mxu0 %v10293_v46  ;;  %v1612_v29 = vadd.f32 1.0, %v8158_v10  ;;  %v10312_v20 = vmul.f32 0.5, %v10219_v28  ;;  %5269 = vmatprep.subr.bf16.mxu1 %v7568_v21 }
 0x1c9   : > { %v10315_v4 = vmul.f32 0.5, %v10231_v50  ;;  %v1261_v57 = vmul.f32 0.70710677, %v10291_v36  ;;  %v8160_v62 = vpop.eup %8159  ;;  %v10318_v7 = vpack.c.bf16 %v1807_v0, %v1799_v38  ;;  %v1796_v34 = vmul.f32 %v1604_v19, %v10249_v48  ;;  %5117 = vmatpush1.bf16.msra.mxu0 %v7563_v49  ;;  %v10323_v22 = vld [vmem:[%s8834_s7 + $0x220] sm:$0xff]  ;;  %v10332_v0 = vld [vmem:[%s8834_s7 + $0x230] sm:$0xff] }
 0x1ca   : > { %8179 = verf.f32 %v1253_v47  ;;  %v1255_v55 = vmul.f32 0.70710677, %v10301_v63  ;;  %v10326_v28 = vld [vmem:[%s8834_s7 + $0x260] sm:$0xff]  ;;  %v8162_v21 = vpop.eup %8161  ;;  %v1804_v10 = vmul.f32 %v1612_v29, %v10252_v24  ;;  %v1606_v51 = vadd.f32 1.0, %v8160_v62  ;;  %5118 = vmatprep.subr.bf16.mxu0 %v7571_v40  ;;  %v7577_v48 = vld [vmem:[%s8842_s10 + $0x3c] ss:$24 sps:$4 sm:$0xff]  }
 0x1cb   : > { %12471 = vst [vmem:[#allocation83_spill] sm:$0xff] %v10318_v7  ;;  %v7572_v50 = vld [vmem:[%s8842_s10 + $0x368] ss:$24 sps:$4 sm:$0xff]   ;;  %8181 = verf.f32 %v1261_v57  ;;  %v1263_v38 = vmul.f32 0.70710677, %v10307_v27  ;;  %v8164_v49 = vpop.eup %8163  ;;  %5007 = vmatprep.mubr.bf16.mxu1 %v10318_v7  ;;  %v1614_v19 = vadd.f32 1.0, %v8162_v21  ;;  %5270 = vmatpush1.bf16.msra.mxu1 %v7566_v61 }
 0x1cc   : > { %v10337_v47 = vmul.f32 0.5, %v10243_v54  ;;  %v10340_v46 = vmul.f32 0.5, %v10246_v44  ;;  %8183 = verf.f32 %v1255_v55  ;;  %v10343_v24 = vld [vmem:[%s8834_s7 + $0x270] sm:$0xff]  ;;  %v8166_v40 = vpop.eup %8165  ;;  %v10345_v29 = vpack.c.bf16 %v1804_v10, %v1796_v34  ;;  %5271 = vmatprep.subr.bf16.mxu1 %v7574_v8 }
 0x1cd   : > { %v1798_v57 = vmul.f32 %v1606_v51, %v10272_v26  ;;  %v1621_v62 = vadd.f32 1.0, %v8164_v49  ;;  %8185 = verf.f32 %v1263_v38  ;;  %v7575_v21 = vld [vmem:[%s8842_s10 + $0x38] ss:$24 sps:$4 sm:$0xff]   ;;  %v7580_v54 = vld [vmem:[%s8842_s10 + $0x33c] ss:$24 sps:$4 sm:$0xff]   ;;  %v1806_v7 = vmul.f32 %v1614_v19, %v10275_v53  ;;  %5119 = vmatpush1.bf16.msra.mxu0 %v7569_v25 }
 0x1ce   : > { %12472 = vst [vmem:[#allocation84_spill] sm:$0xff] %v10345_v29  ;;  %v1629_v44 = vadd.f32 1.0, %v8166_v40  ;;  %v1252_v61 = vmul.f32 0.70710677, %v10323_v22  ;;  %v1260_v55 = vmul.f32 0.70710677, %v10326_v28  ;;  %v8168_v34 = vpop.eup %8167  ;;  %4855 = vmatmul.mubr.bf16.gmra.mxu0 %v10345_v29  ;;  %5120 = vmatprep.subr.bf16.mxu0 %v7577_v48 }
 0x1cf   : > { %v1813_v51 = vmul.f32 %v1621_v62, %v10286_v18  ;;  %v1046_v26 = vmul.f32 0.5, %v10260_v31  ;;  %v10358_v8 = vmul.f32 0.5, %v10266_v37  ;;  %v1254_v53 = vmul.f32 0.70710677, %v10332_v0  ;;  %v7583_v25 = vld [vmem:[%s8842_s10 + $0xc] ss:$24 sps:$4 sm:$0xff]   ;;  %v8170_v10 = vpop.eup %8169  ;;  %5272 = vmatpush1.bf16.msra.mxu1 %v7572_v50 }
 0x1d0   : > { %v10362_v38 = vpack.c.bf16 %v1806_v7, %v1798_v57  ;;  %v1821_v49 = vmul.f32 %v1629_v44, %v10297_v15  ;;  %v1623_v19 = vadd.f32 1.0, %v8168_v34  ;;  %8187 = verf.f32 %v1252_v61  ;;  %v10366_v18 = vld [vmem:[%s8834_s7 + $0x2a8] sm:$0xff]  ;;  %5273 = vmatprep.subr.bf16.mxu1 %v7580_v54 }
 0x1d1   : > { %v10369_v31 = vld [vmem:[%s8834_s7 + $0x2e8] sm:$0xff]  ;;  %v1631_v37 = vadd.f32 1.0, %v8170_v10  ;;  %v10372_v40 = vmul.f32 0.5, %v10280_v12  ;;  %8189 = verf.f32 %v1260_v55  ;;  %v1262_v48 = vmul.f32 0.70710677, %v10343_v24  ;;  %v8172_v15 = vpop.eup %8171  ;;  %5121 = vmatpush1.bf16.msra.mxu0 %v7575_v21  ;;  %v10388_v10 = vld [vmem:[%s8834_s7 + $0x2b8] sm:$0xff] }
 0x1d2   : > { %12473 = vst [vmem:[#allocation85_spill] sm:$0xff] %v10362_v38  ;;  %v7586_v7 = vld [vmem:[%s8842_s10 + $0x30c] ss:$24 sps:$4 sm:$0xff]   ;;  %5008 = vmatmul.mubr.bf16.gmra.mxu1 %v10362_v38  ;;  %v10377_v50 = vpack.c.bf16 %v1821_v49, %v1813_v51  ;;  %v1815_v57 = vmul.f32 %v1623_v19, %v10312_v20  ;;  %v10381_v62 = vmul.f32 0.5, %v10291_v36  ;;  %8191 = verf.f32 %v1254_v53  ;;  %v7581_v12 = vld [vmem:[%s8842_s10 + $0x8] ss:$24 sps:$4 sm:$0xff]   ;;  %v8174_v61 = vpop.eup %8173  ;;  %5122 = vmatprep.subr.bf16.mxu0 %v7583_v25 }
 0x1d3   : > { %v7584_v44 = vld [vmem:[%s8842_s10 + $0x308] ss:$24 sps:$4 sm:$0xff]   ;;  %v1823_v54 = vmul.f32 %v1631_v37, %v10315_v4  ;;  %v1620_v55 = vadd.f32 1.0, %v8172_v15  ;;  %8193 = verf.f32 %v1262_v48  ;;  %v1269_v34 = vmul.f32 0.70710677, %v10366_v18  ;;  %v10398_v49 = vld [vmem:[%s8834_s7 + $0x2f8] sm:$0xff]  ;;  %5274 = vmatpush1.bf16.msra.mxu1 %v7578_v11 }
 0x1d4   : > { %12474 = vst [vmem:[#allocation86_spill] sm:$0xff] %v10377_v50  ;;  %v7589_v20 = vld [vmem:[%s8842_s10 + $0x2dc] ss:$24 sps:$4 sm:$0xff]   ;;  %v8176_v51 = vpop.eup %8175  ;;  %4864 = vmatprep.mubr.bf16.mxu0 %v10377_v50  ;;  %v1628_v36 = vadd.f32 1.0, %v8174_v61  ;;  %v1063_v21 = vmul.f32 0.5, %v10301_v63  ;;  %v10394_v53 = vmul.f32 0.5, %v10307_v27  ;;  %5275 = vmatprep.subr.bf16.mxu1 %v7586_v7 }
 0x1d5   : > { %v1277_v4 = vmul.f32 0.70710677, %v10369_v31  ;;  %v8178_v19 = vpop.eup %8177  ;;  %v10400_v25 = vpack.c.bf16 %v1823_v54, %v1815_v57  ;;  %v1812_v37 = vmul.f32 %v1620_v55, %v10337_v47  ;;  %v1622_v48 = vadd.f32 1.0, %v8176_v51  ;;  %v7592_v63 = vld [vmem:[%s8842_s10 + $0x5dc] ss:$24 sps:$4 sm:$0xff]   ;;  %v10407_v38 = vld [vmem:[%s8834_s7 + $0x2a0] sm:$0xff]  ;;  %5123 = vmatpush1.bf16.msra.mxu0 %v7581_v12 }
 0x1d6   : > { %8195 = verf.f32 %v1269_v34  ;;  %v1820_v27 = vmul.f32 %v1628_v36, %v10340_v46  ;;  %v1630_v15 = vadd.f32 1.0, %v8178_v19  ;;  %v1271_v61 = vmul.f32 0.70710677, %v10388_v10  ;;  %v10410_v11 = vld [vmem:[%s8834_s7 + $0x2e0] sm:$0xff]  ;;  %v10421_v55 = vld [vmem:[%s8834_s7 + $0x2b0] sm:$0xff]  ;;  %5124 = vmatprep.subr.bf16.mxu0 %v7589_v20 }
 0x1d7   : > { %12475 = vst [vmem:[#allocation87_spill] sm:$0xff] %v10400_v25  ;;  %8197 = verf.f32 %v1277_v4  ;;  %v8180_v57 = vpop.eup %8179  ;;  %5017 = vmatprep.mubr.bf16.mxu1 %v10400_v25  ;;  %v1814_v47 = vmul.f32 %v1622_v48, %v1046_v26  ;;  %v10414_v7 = vmul.f32 0.5, %v10323_v22  ;;  %v10417_v46 = vmul.f32 0.5, %v10326_v28  ;;  %v10424_v34 = vld [vmem:[%s8834_s7 + $0x2f0] sm:$0xff]  ;;  %5276 = vmatpush1.bf16.msra.mxu1 %v7584_v44  ;;  %v7595_v28 = vld [vmem:[%s8842_s10 + $0x2ac] ss:$24 sps:$4 sm:$0xff]  }
 0x1d8   : > { %v1279_v54 = vmul.f32 0.70710677, %v10398_v49  ;;  %v7587_v51 = vld [vmem:[%s8842_s10 + $0x2d8] ss:$24 sps:$4 sm:$0xff]   ;;  %v8182_v12 = vpop.eup %8181  ;;  %v10427_v36 = vpack.c.bf16 %v1820_v27, %v1812_v37  ;;  %v1822_v4 = vmul.f32 %v1630_v15, %v10358_v8  ;;  %v1637_v26 = vadd.f32 1.0, %v8180_v57  ;;  %5277 = vmatprep.subr.bf16.mxu1 %v7592_v63  ;;  %v10445_v63 = vld [vmem:[%s8834_s7 + $0x328] sm:$0xff] }
 0x1d9   : > { %8199 = verf.f32 %v1271_v61  ;;  %v7590_v22 = vld [vmem:[%s8842_s10 + $0x5d8] ss:$24 sps:$4 sm:$0xff]   ;;  %v8184_v19 = vpop.eup %8183  ;;  %v1645_v48 = vadd.f32 1.0, %v8182_v12  ;;  %v1268_v25 = vmul.f32 0.70710677, %v10407_v38  ;;  %v1062_v15 = vmul.f32 0.5, %v10332_v0  ;;  %5125 = vmatpush2.bf16.msra.mxu0 %v7587_v51 }
 0x1da   : > { %12476 = vst [vmem:[#allocation88_spill] sm:$0xff] %v10427_v36  ;;  %8201 = verf.f32 %v1279_v54  ;;  %v1276_v20 = vmul.f32 0.70710677, %v10410_v11  ;;  %v8186_v37 = vpop.eup %8185  ;;  %4865 = vmatmul.mubr.bf16.gmra.mxu0 %v10427_v36  ;;  %v10435_v8 = vpack.c.bf16 %v1822_v4, %v1814_v47  ;;  %v1829_v44 = vmul.f32 %v1637_v26, %v10372_v40  ;;  %v7598_v61 = vld [vmem:[%s8842_s10 + $0x5ac] ss:$24 sps:$4 sm:$0xff]   ;;  %5126 = vmatprep.subr.bf16.mxu0 %v7595_v28 }
 0x1db   : > { %v1639_v27 = vadd.f32 1.0, %v8184_v19  ;;  %v1837_v57 = vmul.f32 %v1645_v48, %v10381_v62  ;;  %v1647_v54 = vadd.f32 1.0, %v8186_v37  ;;  %v10442_v12 = vmul.f32 0.5, %v10343_v24  ;;  %v10448_v36 = vld [vmem:[%s8834_s7 + $0x368] sm:$0xff]  ;;  %v10455_v24 = vld [vmem:[%s8834_s7 + $0x338] sm:$0xff]  ;;  %5278 = vmatpush2.bf16.msra.mxu1 %v7590_v22 }
 0x1dc   : > { %12477 = vst [vmem:[#allocation89_spill] sm:$0xff] %v10435_v8  ;;  %8203 = verf.f32 %v1268_v25  ;;  %v7593_v40 = vld [vmem:[%s8842_s10 + $0x2a8] ss:$24 sps:$4 sm:$0xff]   ;;  %5018 = vmatmul.mubr.bf16.gmra.mxu1 %v10435_v8  ;;  %v1270_v62 = vmul.f32 0.70710677, %v10421_v55  ;;  %v1077_v19 = vmul.f32 0.5, %v10366_v18  ;;  %5279 = vmatprep.subr.bf16.mxu1 %v7598_v61 }
 0x1dd   : > { %v1831_v0 = vmul.f32 %v1639_v27, %v1063_v21  ;;  %8205 = verf.f32 %v1276_v20  ;;  %v1278_v47 = vmul.f32 0.70710677, %v10424_v34  ;;  %v7601_v25 = vld [vmem:[%s8842_s10 + $0x27c] ss:$24 sps:$4 sm:$0xff]   ;;  %v8188_v4 = vpop.eup %8187  ;;  %v10458_v26 = vpack.c.bf16 %v1837_v57, %v1829_v44  ;;  %v7596_v20 = vld [vmem:[%s8842_s10 + $0x5a8] ss:$24 sps:$4 sm:$0xff]   ;;  %5127 = vmatpush2.bf16.msra.mxu0 %v7593_v40 }
 0x1de   : > { %v1839_v51 = vmul.f32 %v1647_v54, %v10394_v53  ;;  %v10463_v48 = vmul.f32 0.5, %v10369_v31  ;;  %v10466_v21 = vld [vmem:[%s8834_s7 + $0x378] sm:$0xff]  ;;  %v8190_v28 = vpop.eup %8189  ;;  %v1636_v27 = vadd.f32 1.0, %v8188_v4  ;;  %8207 = verf.f32 %v1270_v62  ;;  %v10479_v54 = vld [vmem:[%s8834_s7 + $0x320] sm:$0xff]  ;;  %5128 = vmatprep.subr.bf16.mxu0 %v7601_v25 }
 0x1df   : > { %12478 = vst [vmem:[#allocation90_spill] sm:$0xff] %v10458_v26  ;;  %v7604_v37 = vld [vmem:[%s8842_s10 + $0x57c] ss:$24 sps:$4 sm:$0xff]   ;;  %v1285_v44 = vmul.f32 0.70710677, %v10445_v63  ;;  %v8192_v18 = vpop.eup %8191  ;;  %4874 = vmatprep.mubr.bf16.mxu0 %v10458_v26  ;;  %v1644_v57 = vadd.f32 1.0, %v8190_v28  ;;  %8209 = verf.f32 %v1278_v47  ;;  %5280 = vmatpush2.bf16.msra.mxu1 %v7596_v20 }
 0x1e0   : > { %v1293_v53 = vmul.f32 0.70710677, %v10448_v36  ;;  %v10473_v31 = vpack.c.bf16 %v1839_v51, %v1831_v0  ;;  %v10476_v22 = vmul.f32 0.5, %v10388_v10  ;;  %v10482_v62 = vld [vmem:[%s8834_s7 + $0x360] sm:$0xff]  ;;  %v7599_v4 = vld [vmem:[%s8842_s10 + $0x278] ss:$24 sps:$4 sm:$0xff]   ;;  %v8194_v61 = vpop.eup %8193  ;;  %v1828_v8 = vmul.f32 %v1636_v27, %v10414_v7  ;;  %5281 = vmatprep.subr.bf16.mxu1 %v7604_v37 }
 0x1e1   : > { %v1638_v50 = vadd.f32 1.0, %v8192_v18  ;;  %v10487_v0 = vmul.f32 0.5, %v10398_v49  ;;  %8211 = verf.f32 %v1285_v44  ;;  %v7607_v10 = vld [vmem:[%s8842_s10 + $0x24c] ss:$24 sps:$4 sm:$0xff]   ;;  %v1836_v47 = vmul.f32 %v1644_v57, %v10417_v46  ;;  %v10494_v28 = vld [vmem:[%s8834_s7 + $0x330] sm:$0xff]  ;;  %5129 = vmatpush2.bf16.msra.mxu0 %v7599_v4 }
 0x1e2   : > { %12479 = vst [vmem:[#allocation91_spill] sm:$0xff] %v10473_v31  ;;  %5027 = vmatprep.mubr.bf16.mxu1 %v10473_v31  ;;  %v1646_v51 = vadd.f32 1.0, %v8194_v61  ;;  %8213 = verf.f32 %v1293_v53  ;;  %v1287_v40 = vmul.f32 0.70710677, %v10455_v24  ;;  %v7602_v7 = vld [vmem:[%s8842_s10 + $0x578] ss:$24 sps:$4 sm:$0xff]   ;;  %5130 = vmatprep.subr.bf16.mxu0 %v7607_v10 }
 0x1e3   : > { %v8196_v49 = vpop.eup %8195  ;;  %v1830_v27 = vmul.f32 %v1638_v50, %v1062_v15  ;;  %v10498_v25 = vmul.f32 0.5, %v10407_v38  ;;  %v10501_v44 = vmul.f32 0.5, %v10410_v11  ;;  %v1295_v46 = vmul.f32 0.70710677, %v10466_v21  ;;  %v10505_v53 = vld [vmem:[%s8834_s7 + $0x370] sm:$0xff]  ;;  %v10516_v26 = vld [vmem:[%s8834_s7 + $0x3a8] sm:$0xff]  ;;  %5282 = vmatpush2.bf16.msra.mxu1 %v7602_v7 }
 0x1e4   : > { %v7610_v18 = vld [vmem:[%s8842_s10 + $0x54c] ss:$24 sps:$4 sm:$0xff]   ;;  %v8198_v57 = vpop.eup %8197  ;;  %v10508_v20 = vpack.c.bf16 %v1836_v47, %v1828_v8  ;;  %v1838_v61 = vmul.f32 %v1646_v51, %v10442_v12  ;;  %v1653_v31 = vadd.f32 1.0, %v8196_v49  ;;  %8215 = verf.f32 %v1287_v40  ;;  %v7605_v38 = vld [vmem:[%s8842_s10 + $0x248] ss:$24 sps:$4 sm:$0xff]  }
 0x1e5   : > { %v7613_v50 = vld [vmem:[%s8842_s10 + $0x21c] ss:$24 sps:$4 sm:$0xff]   ;;  %v1661_v11 = vadd.f32 1.0, %v8198_v57  ;;  %8217 = verf.f32 %v1295_v46  ;;  %v1284_v15 = vmul.f32 0.70710677, %v10479_v54  ;;  %v10522_v47 = vmul.f32 0.5, %v10421_v55  ;;  %5283 = vmatprep.subr.bf16.mxu1 %v7610_v18  ;;  %5131 = vmatpush2.bf16.msra.mxu0 %v7605_v38 }
 0x1e6   : > { %12480 = vst [vmem:[#allocation92_spill] sm:$0xff] %v10508_v20  ;;  %v1292_v37 = vmul.f32 0.70710677, %v10482_v62  ;;  %v8200_v8 = vpop.eup %8199  ;;  %4875 = vmatmul.mubr.bf16.gmra.mxu0 %v10508_v20  ;;  %v10519_v12 = vpack.c.bf16 %v1838_v61, %v1830_v27  ;;  %v1845_v4 = vmul.f32 %v1653_v31, %v1077_v19  ;;  %v10525_v51 = vmul.f32 0.5, %v10424_v34  ;;  %v10528_v40 = vld [vmem:[%s8834_s7 + $0x3e8] sm:$0xff]  ;;  %v10535_v31 = vld [vmem:[%s8834_s7 + $0x3b8] sm:$0xff]  ;;  %5132 = vmatprep.subr.bf16.mxu0 %v7613_v50 }
 0x1e7   : > { %v7608_v49 = vld [vmem:[%s8842_s10 + $0x548] ss:$24 sps:$4 sm:$0xff]   ;;  %v7616_v10 = vld [vmem:[%s8842_s10 + $0x51c] ss:$24 sps:$4 sm:$0xff]   ;;  %v8202_v46 = vpop.eup %8201  ;;  %v1853_v57 = vmul.f32 %v1661_v11, %v10463_v48  ;;  %v1655_v20 = vadd.f32 1.0, %v8200_v8  ;;  %8219 = verf.f32 %v1284_v15  ;;  %v10539_v34 = vmul.f32 0.5, %v10445_v63 }
 0x1e8   : > { %12481 = vst [vmem:[#allocation93_spill] sm:$0xff] %v10519_v12  ;;  %v1286_v19 = vmul.f32 0.70710677, %v10494_v28  ;;  %5028 = vmatmul.mubr.bf16.gmra.mxu1 %v10519_v12  ;;  %v1663_v55 = vadd.f32 1.0, %v8202_v46  ;;  %8221 = verf.f32 %v1292_v37  ;;  %v1294_v7 = vmul.f32 0.70710677, %v10505_v53 }
 0x1e9   : > { %v10543_v27 = vld [vmem:[%s8834_s7 + $0x3f8] sm:$0xff]  ;;  %v8204_v61 = vpop.eup %8203  ;;  %v10546_v11 = vpack.c.bf16 %v1853_v57, %v1845_v4  ;;  %v1847_v18 = vmul.f32 %v1655_v20, %v10476_v22  ;;  %v10550_v15 = vmul.f32 0.5, %v10448_v36  ;;  %v7619_v37 = vld [vmem:[%s8842_s10 + $0x1ec] ss:$24 sps:$4 sm:$0xff]   ;;  %v1301_v12 = vmul.f32 0.70710677, %v10516_v26  ;;  %5284 = vmatpush2.bf16.msra.mxu1 %v7608_v49 }
 0x1ea   : > { %v7611_v48 = vld [vmem:[%s8842_s10 + $0x218] ss:$24 sps:$4 sm:$0xff]   ;;  %8223 = verf.f32 %v1286_v19  ;;  %v8206_v8 = vpop.eup %8205  ;;  %v1855_v46 = vmul.f32 %v1663_v55, %v10487_v0  ;;  %v1652_v38 = vadd.f32 1.0, %v8204_v61  ;;  %v7622_v4 = vld [vmem:[%s8842_s10 + $0x4ec] ss:$24 sps:$4 sm:$0xff]   ;;  %v10559_v22 = vmul.f32 0.5, %v10455_v24  ;;  %5285 = vmatprep.subr.bf16.mxu1 %v7616_v10 }
 0x1eb   : > { %12482 = vst [vmem:[#allocation94_spill] sm:$0xff] %v10546_v11  ;;  %v7614_v63 = vld [vmem:[%s8842_s10 + $0x518] ss:$24 sps:$4 sm:$0xff]   ;;  %8225 = verf.f32 %v1294_v7  ;;  %4884 = vmatprep.mubr.bf16.mxu0 %v10546_v11  ;;  %v1660_v36 = vadd.f32 1.0, %v8206_v8  ;;  %v10562_v20 = vmul.f32 0.5, %v10466_v21  ;;  %v10566_v50 = vld [vmem:[%s8834_s7 + $0x3a0] sm:$0xff]  ;;  %v8208_v49 = vpop.eup %8207  ;;  %5133 = vmatpush2.bf16.msra.mxu0 %v7611_v48 }
 0x1ec   : > { %v1309_v0 = vmul.f32 0.70710677, %v10528_v40  ;;  %v10569_v57 = vld [vmem:[%s8834_s7 + $0x3e0] sm:$0xff]  ;;  %v10571_v19 = vpack.c.bf16 %v1855_v46, %v1847_v18  ;;  %v1844_v55 = vmul.f32 %v1652_v38, %v10498_v25  ;;  %8227 = verf.f32 %v1301_v12  ;;  %v10576_v24 = vld [vmem:[%s8834_s7 + $0x3b0] sm:$0xff]  ;;  %v8210_v8 = vpop.eup %8209  ;;  %5134 = vmatprep.subr.bf16.mxu0 %v7619_v37 }
 0x1ed   : > { %v1303_v7 = vmul.f32 0.70710677, %v10535_v31  ;;  %v7617_v21 = vld [vmem:[%s8842_s10 + $0x1e8] ss:$24 sps:$4 sm:$0xff]   ;;  %v7625_v61 = vld [vmem:[%s8842_s10 + $0x1bc] ss:$24 sps:$4 sm:$0xff]   ;;  %v1852_v11 = vmul.f32 %v1660_v36, %v10501_v44  ;;  %5286 = vmatpush2.bf16.msra.mxu1 %v7614_v63 }
 0x1ee   : > { %12483 = vst [vmem:[#allocation95_spill] sm:$0xff] %v10571_v19  ;;  %v1654_v29 = vadd.f32 1.0, %v8208_v49  ;;  %8229 = verf.f32 %v1309_v0  ;;  %v1311_v10 = vmul.f32 0.70710677, %v10543_v27  ;;  %v8212_v25 = vpop.eup %8211  ;;  %5037 = vmatprep.mubr.bf16.mxu1 %v10571_v19  ;;  %v1662_v12 = vadd.f32 1.0, %v8210_v8  ;;  %v10590_v44 = vld [vmem:[%s8834_s7 + $0x3f0] sm:$0xff]  ;;  %5287 = vmatprep.subr.bf16.mxu1 %v7622_v4 }
 0x1ef   : > { %v10584_v18 = vmul.f32 0.5, %v10479_v54  ;;  %v10587_v48 = vmul.f32 0.5, %v10482_v62  ;;  %8231 = verf.f32 %v1303_v7  ;;  %v7620_v46 = vld [vmem:[%s8842_s10 + $0x4e8] ss:$24 sps:$4 sm:$0xff]   ;;  %v8214_v38 = vpop.eup %8213  ;;  %v10593_v37 = vpack.c.bf16 %v1852_v11, %v1844_v55  ;;  %v7623_v54 = vld [vmem:[%s8842_s10 + $0x1b8] ss:$24 sps:$4 sm:$0xff]   ;;  %5135 = vmatpush2.bf16.msra.mxu0 %v7617_v21 }
 0x1f0   : > { %v1846_v36 = vmul.f32 %v1654_v29, %v10522_v47  ;;  %v1669_v0 = vadd.f32 1.0, %v8212_v25  ;;  %8233 = verf.f32 %v1311_v10  ;;  %v7628_v49 = vld [vmem:[%s8842_s10 + $0x4bc] ss:$24 sps:$4 sm:$0xff]   ;;  %v1854_v62 = vmul.f32 %v1662_v12, %v10525_v51  ;;  %v10602_v19 = vld [vmem:[%s8834_s7 + $0x428] sm:$0xff]  ;;  %5136 = vmatprep.subr.bf16.mxu0 %v7625_v61 }
 0x1f1   : > { %12484 = vst [vmem:[#allocation96_spill] sm:$0xff] %v10593_v37  ;;  %v1677_v7 = vadd.f32 1.0, %v8214_v38  ;;  %v1300_v8 = vmul.f32 0.70710677, %v10566_v50  ;;  %v1308_v63 = vmul.f32 0.70710677, %v10569_v57  ;;  %v8216_v11 = vpop.eup %8215  ;;  %4885 = vmatmul.mubr.bf16.gmra.mxu0 %v10593_v37  ;;  %5288 = vmatpush2.bf16.msra.mxu1 %v7620_v46 }
 0x1f2   : > { %v1861_v29 = vmul.f32 %v1669_v0, %v10539_v34  ;;  %v10607_v47 = vmul.f32 0.5, %v10494_v28  ;;  %v10610_v51 = vmul.f32 0.5, %v10505_v53  ;;  %v1302_v4 = vmul.f32 0.70710677, %v10576_v24  ;;  %v10614_v55 = vld [vmem:[%s8834_s7 + $0x468] sm:$0xff]  ;;  %v8218_v10 = vpop.eup %8217  ;;  %v10627_v37 = vld [vmem:[%s8834_s7 + $0x438] sm:$0xff]  ;;  %5289 = vmatprep.subr.bf16.mxu1 %v7628_v49 }
 0x1f3   : > { %v7631_v21 = vld [vmem:[%s8842_s10 + $0x18c] ss:$24 sps:$4 sm:$0xff]   ;;  %v10617_v25 = vpack.c.bf16 %v1854_v62, %v1846_v36  ;;  %v1869_v12 = vmul.f32 %v1677_v7, %v10550_v15  ;;  %v1671_v38 = vadd.f32 1.0, %v8216_v11  ;;  %8235 = verf.f32 %v1300_v8  ;;  %v7626_v28 = vld [vmem:[%s8842_s10 + $0x4b8] ss:$24 sps:$4 sm:$0xff]   ;;  %5137 = vmatpush2.bf16.msra.mxu0 %v7623_v54 }
 0x1f4   : > { %v7634_v53 = vld [vmem:[%s8842_s10 + $0x48c] ss:$24 sps:$4 sm:$0xff]   ;;  %v1679_v34 = vadd.f32 1.0, %v8218_v10  ;;  %v10623_v0 = vmul.f32 0.5, %v10516_v26  ;;  %8237 = verf.f32 %v1308_v63  ;;  %v1310_v61 = vmul.f32 0.70710677, %v10590_v44  ;;  %v8220_v36 = vpop.eup %8219  ;;  %5138 = vmatprep.subr.bf16.mxu0 %v7631_v21 }
 0x1f5   : > { %12485 = vst [vmem:[#allocation97_spill] sm:$0xff] %v10617_v25  ;;  %5038 = vmatmul.mubr.bf16.gmra.mxu1 %v10617_v25  ;;  %v10630_v15 = vpack.c.bf16 %v1869_v12, %v1861_v29  ;;  %v1863_v46 = vmul.f32 %v1671_v38, %v10559_v22  ;;  %v10634_v62 = vmul.f32 0.5, %v10528_v40  ;;  %8239 = verf.f32 %v1302_v4  ;;  %v10637_v26 = vld [vmem:[%s8834_s7 + $0x478] sm:$0xff]  ;;  %v7629_v7 = vld [vmem:[%s8842_s10 + $0x188] ss:$24 sps:$4 sm:$0xff]   ;;  %v8222_v63 = vpop.eup %8221 }
 0x1f6   : > { %v7632_v8 = vld [vmem:[%s8842_s10 + $0x488] ss:$24 sps:$4 sm:$0xff]   ;;  %v1871_v49 = vmul.f32 %v1679_v34, %v10562_v20  ;;  %v1668_v11 = vadd.f32 1.0, %v8220_v36  ;;  %8241 = verf.f32 %v1310_v61  ;;  %v1317_v10 = vmul.f32 0.70710677, %v10602_v19  ;;  %5290 = vmatpush2.bf16.msra.mxu1 %v7626_v28 }
 0x1f7   : > { %12486 = vst [vmem:[#allocation98_spill] sm:$0xff] %v10630_v15  ;;  %v7637_v29 = vld [vmem:[%s8842_s10 + $0x75c] ss:$24 sps:$4 sm:$0xff]   ;;  %v8224_v22 = vpop.eup %8223  ;;  %4894 = vmatprep.mubr.bf16.mxu0 %v10630_v15  ;;  %v1676_v40 = vadd.f32 1.0, %v8222_v63  ;;  %v1111_v4 = vmul.f32 0.5, %v10535_v31  ;;  %v10647_v54 = vmul.f32 0.5, %v10543_v27  ;;  %5291 = vmatprep.subr.bf16.mxu1 %v7634_v53 }
 0x1f8   : > { %v1325_v20 = vmul.f32 0.70710677, %v10614_v55  ;;  %v10650_v12 = vpop.f32.mrf.mxu0  ;;  %v8226_v38 = vpop.eup %8225  ;;  %v10652_v21 = vpack.c.bf16 %v1871_v49, %v1863_v46  ;;  %v1860_v34 = vmul.f32 %v1668_v11, %v10584_v18  ;;  %v1670_v61 = vadd.f32 1.0, %v8224_v22  ;;  %v7640_v36 = vld [vmem:[%s8842_s10 + $0xa5c] ss:$24 sps:$4 sm:$0xff]   ;;  %v10659_v25 = vld [vmem:[%s8834_s7 + $0x420] sm:$0xff]  ;;  %5139 = vmatpush2.bf16.msra.mxu0 %v7629_v7 }
 0x1f9   : > { %8243 = verf.f32 %v1317_v10  ;;  %v1868_v31 = vmul.f32 %v1676_v40, %v10587_v48  ;;  %v1678_v27 = vadd.f32 1.0, %v8226_v38  ;;  %v1319_v63 = vmul.f32 0.70710677, %v10627_v37  ;;  %v10662_v28 = vld [vmem:[%s8834_s7 + $0x460] sm:$0xff]  ;;  %v10664_v46 = vpop.f32.mrf.mxu1  ;;  %v8228_v49 = vpop.eup %8227  ;;  %v10676_v22 = vld [vmem:[%s8834_s7 + $0x430] sm:$0xff]  ;;  %5414 = vmatprep.subr.bf16.mxu0 %v7637_v29 }
 0x1fa   : > { %12487 = vst [vmem:[#allocation99_spill] sm:$0xff] %v10652_v21  ;;  %8245 = verf.f32 %v1325_v20  ;;  %v10666_v18 = vpop.f32.mrf.mxu0  ;;  %5047 = vmatprep.mubr.bf16.mxu1 %v10652_v21  ;;  %v1862_v53 = vmul.f32 %v1670_v61, %v10607_v47  ;;  %v1108_v48 = vmul.f32 0.5, %v10566_v50  ;;  %v10672_v11 = vmul.f32 0.5, %v10569_v57  ;;  %v10682_v21 = vld [vmem:[%s8834_s7 + $0x470] sm:$0xff]  ;;  %5292 = vmatpush2.bf16.msra.mxu1 %v7632_v8 }
 0x1fb   : > { %v1327_v10 = vmul.f32 0.70710677, %v10637_v26  ;;  %v8230_v7 = vpop.eup %8229  ;;  %v10678_v40 = vpack.c.bf16 %v1868_v31, %v1860_v34  ;;  %v1870_v20 = vmul.f32 %v1678_v27, %v10610_v51  ;;  %v1685_v38 = vadd.f32 1.0, %v8228_v49  ;;  %v10684_v50 = vpop.f32.mrf.mxu1  ;;  %5567 = vmatprep.subr.bf16.mxu1 %v7640_v36  ;;  %v10696_v49 = vld [vmem:[%s8834_s7 + $0x4a8] sm:$0xff] }
 0x1fc   : > { %8247 = verf.f32 %v1319_v63  ;;  %v10686_v57 = vpop.f32.mrf.mxu0  ;;  %v8232_v47 = vpop.eup %8231  ;;  %v1693_v61 = vadd.f32 1.0, %v8230_v7  ;;  %v1316_v29 = vmul.f32 0.70710677, %v10659_v25  ;;  %v1324_v34 = vmul.f32 0.70710677, %v10662_v28 }
 0x1fd   : > { %12488 = vst [vmem:[#allocation100_spill] sm:$0xff] %v10678_v40  ;;  %8249 = verf.f32 %v1327_v10  ;;  %v8234_v51 = vpop.eup %8233  ;;  %4895 = vmatmul.mubr.bf16.gmra.mxu0 %v10678_v40  ;;  %v10691_v31 = vpack.c.bf16 %v1870_v20, %v1862_v53  ;;  %v1877_v8 = vmul.f32 %v1685_v38, %v10623_v0  ;;  %v1687_v27 = vadd.f32 1.0, %v8232_v47  ;;  %v10698_v7 = vpop.f32.mrf.mxu1  ;;  %v10705_v53 = vld [vmem:[%s8834_s7 + $0x4e8] sm:$0xff] }
 0x1fe   : > { %v1110_v63 = vmul.f32 0.5, %v10576_v24  ;;  %v10700_v10 = vpop.f32.mrf.mxu0  ;;  %v1885_v15 = vmul.f32 %v1693_v61, %v10634_v62  ;;  %v1695_v36 = vadd.f32 1.0, %v8234_v51  ;;  %v1118_v16 = vmul.f32 0.5, %v10590_v44 }
 0x1ff   : > { %12489 = vst [vmem:[#allocation101_spill] sm:$0xff] %v10691_v31  ;;  %12490 = vst [vmem:[#allocation102_spill] sm:$0xff] %v10700_v10  ;;  %8251 = verf.f32 %v1316_v29  ;;  %5048 = vmatmul.mubr.bf16.gmra.mxu1 %v10691_v31  ;;  %v1879_v0 = vmul.f32 %v1687_v27, %v1111_v4  ;;  %v1318_v24 = vmul.f32 0.70710677, %v10676_v22  ;;  %v1326_v20 = vmul.f32 0.70710677, %v10682_v21  ;;  %v10710_v38 = vpop.f32.mrf.mxu1 }
 0x200   : > { %8253 = verf.f32 %v1324_v34  ;;  %12491 = vst [vmem:[#allocation103_spill] sm:$0xff] %v10710_v38  ;;  %v8236_v47 = vpop.eup %8235  ;;  %v10712_v40 = vpack.c.bf16 %v1885_v15, %v1877_v8  ;;  %v1887_v62 = vmul.f32 %v1695_v36, %v10647_v54  ;;  %v1125_v44 = vmul.f32 0.5, %v10602_v19  ;;  %v10718_v29 = vld [vmem:[%s8834_s7 + $0x4b8] sm:$0xff]  ;;  %v10720_v4 = vpop.f32.mrf.mxu0 }
 0x201   : > { %v1133_v61 = vmul.f32 0.5, %v10614_v55  ;;  %v8238_v34 = vpop.eup %8237  ;;  %v1684_v51 = vadd.f32 1.0, %v8236_v47  ;;  %8255 = verf.f32 %v1318_v24  ;;  %v1333_v27 = vmul.f32 0.70710677, %v10696_v49  ;;  %v10729_v55 = vld [vmem:[%s8834_s7 + $0x4f8] sm:$0xff]  ;;  %v10731_v36 = vpop.f32.mrf.mxu1 }
 0x202   : > { %12492 = vst [vmem:[#allocation104_spill] sm:$0xff] %v10712_v40  ;;  %v1341_v31 = vmul.f32 0.70710677, %v10705_v53  ;;  %v8240_v15 = vpop.eup %8239  ;;  %4904 = vmatprep.mubr.bf16.mxu0 %v10712_v40  ;;  %v10725_v54 = vpack.c.bf16 %v1887_v62, %v1879_v0  ;;  %v1692_v8 = vadd.f32 1.0, %v8238_v34  ;;  %v1127_v19 = vmul.f32 0.5, %v10627_v37  ;;  %v10733_v24 = vpop.f32.mrf.mxu0  ;;  %v10743_v34 = vld [vmem:[%s8834_s7 + $0x4e0] sm:$0xff] }
 0x203   : > { %8257 = verf.f32 %v1326_v20  ;;  %v8242_v47 = vpop.eup %8241  ;;  %v1876_v38 = vmul.f32 %v1684_v51, %v1108_v48  ;;  %v1686_v10 = vadd.f32 1.0, %v8240_v15  ;;  %v1135_v9 = vmul.f32 0.5, %v10637_v26  ;;  %v10740_v20 = vld [vmem:[%s8834_s7 + $0x4a0] sm:$0xff]  ;;  %v10745_v40 = vpop.f32.mrf.mxu1 }
 0x204   : > { %12493 = vst [vmem:[#allocation105_spill] sm:$0xff] %v10725_v54  ;;  %8259 = verf.f32 %v1333_v27  ;;  %5057 = vmatprep.mubr.bf16.mxu1 %v10725_v54  ;;  %v1884_v0 = vmul.f32 %v1692_v8, %v10672_v11  ;;  %v1694_v62 = vadd.f32 1.0, %v8242_v47  ;;  %v1335_v37 = vmul.f32 0.70710677, %v10718_v29  ;;  %v10750_v15 = vpop.f32.mrf.mxu0 }
 0x205   : > { %8261 = verf.f32 %v1341_v31  ;;  %v1878_v51 = vmul.f32 %v1686_v10, %v1110_v63  ;;  %v1124_v26 = vmul.f32 0.5, %v10659_v25  ;;  %v1132_v27 = vmul.f32 0.5, %v10662_v28 }
 0x206   : > { %v8244_v48 = vpop.eup %8243  ;;  %v1343_v11 = vmul.f32 0.70710677, %v10729_v55  ;;  %v10752_v8 = vpack.c.bf16 %v1884_v0, %v1876_v38  ;;  %v1886_v47 = vmul.f32 %v1694_v62, %v1118_v16  ;;  %8263 = verf.f32 %v1335_v37  ;;  %v10767_v62 = vpop.f32.mrf.mxu1 }
 0x207   : > { %v8246_v31 = vpop.eup %8245  ;;  %v1701_v54 = vadd.f32 1.0, %v8244_v48  ;;  %v1332_v25 = vmul.f32 0.70710677, %v10740_v20  ;;  %v1340_v28 = vmul.f32 0.70710677, %v10743_v34  ;;  %v1126_v16 = vmul.f32 0.5, %v10676_v22 }
 0x208   : > { %12494 = vst [vmem:[#allocation106_spill] sm:$0xff] %v10752_v8  ;;  %v1709_v58 = vadd.f32 1.0, %v8246_v31  ;;  %8265 = verf.f32 %v1343_v11  ;;  %4905 = vmatmul.mubr.bf16.gmra.mxu0 %v10752_v8  ;;  %v10763_v10 = vpack.c.bf16 %v1886_v47, %v1878_v51  ;;  %v1134_v0 = vmul.f32 0.5, %v10682_v21  ;;  %v10773_v8 = vpop.f32.mrf.mxu0 }
 0x209   : > { %v8248_v63 = vpop.eup %8247  ;;  %v1893_v38 = vmul.f32 %v1701_v54, %v1125_v44  ;;  %8267 = verf.f32 %v1332_v25  ;;  %v1334_v31 = vmul.f32 0.70710677, %v10755_v42  ;;  %12496 = vst [vmem:[#allocation108_spill] sm:$0xff] %v10773_v8  ;;  %v1141_v22 = vmul.f32 0.5, %v10696_v49  ;;  %v10779_v54 = vld [vmem:[%s8834_s7 + $0x568] sm:$0xff]  ;;  %v10785_v25 = vld [vmem:[%s8834_s7 + $0x538] sm:$0xff]  ;;  %v10791_v8 = vpop.f32.mrf.mxu1 }
 0x20a   : > { %12495 = vst [vmem:[#allocation107_spill] sm:$0xff] %v10763_v10  ;;  %v8250_v37 = vpop.eup %8249  ;;  %v1901_v48 = vmul.f32 %v1709_v58, %v1133_v61  ;;  %v1703_v11 = vadd.f32 1.0, %v8248_v63  ;;  %5058 = vmatmul.mubr.bf16.gmra.mxu1 %v10763_v10  ;;  %8269 = verf.f32 %v1340_v28  ;;  %v1342_v21 = vmul.f32 0.70710677, %v10758_v52  ;;  %v10789_v28 = vld [vmem:[%s8834_s7 + $0x578] sm:$0xff]  ;;  %12498 = vst [vmem:[#allocation110_spill] sm:$0xff] %v10791_v8 }
 0x20b   : > { %v1711_v44 = vadd.f32 1.0, %v8250_v37  ;;  %v1149_v47 = vmul.f32 0.5, %v10705_v53  ;;  %8271 = verf.f32 %v1334_v31  ;;  %v1349_v49 = vmul.f32 0.70710677, %v10771_v23  ;;  %v10809_v8 = vld [vmem:[%s8834_s7 + $0x560] sm:$0xff] }
 0x20c   : > { %v8252_v58 = vpop.eup %8251  ;;  %v10781_v61 = vpack.c.bf16 %v1901_v48, %v1893_v38  ;;  %v1895_v51 = vmul.f32 %v1703_v11, %v1127_v19  ;;  %8273 = verf.f32 %v1342_v21  ;;  %v1143_v53 = vmul.f32 0.5, %v10718_v29  ;;  %v10799_v48 = vpop.f32.mrf.mxu0 }
 0x20d   : > { %v8254_v63 = vpop.eup %8253  ;;  %v1903_v10 = vmul.f32 %v1711_v44, %v1135_v9  ;;  %v1700_v37 = vadd.f32 1.0, %v8252_v58  ;;  %v10796_v19 = vmul.f32 0.5, %v10729_v55  ;;  %v1357_v9 = vmul.f32 0.70710677, %v10779_v54  ;;  %v10806_v55 = vld [vmem:[%s8834_s7 + $0x520] sm:$0xff] }
 0x20e   : > { %12497 = vst [vmem:[#allocation109_spill] sm:$0xff] %v10781_v61  ;;  %4914 = vmatprep.mubr.bf16.mxu0 %v10781_v61  ;;  %v1708_v38 = vadd.f32 1.0, %v8254_v63  ;;  %v8256_v11 = vpop.eup %8255  ;;  %8275 = verf.f32 %v1349_v49  ;;  %v1351_v21 = vmul.f32 0.70710677, %v10785_v25  ;;  %v1359_v29 = vmul.f32 0.70710677, %v10789_v28  ;;  %v10811_v32 = vpop.f32.mrf.mxu0 }
 0x20f   : > { %v10801_v31 = vpack.c.bf16 %v1903_v10, %v1895_v51  ;;  %v1892_v44 = vmul.f32 %v1700_v37, %v1124_v26  ;;  %v1702_v61 = vadd.f32 1.0, %v8256_v11  ;;  %8277 = verf.f32 %v1357_v9  ;;  %v10819_v49 = vpop.f32.mrf.mxu1 }
 0x210   : > { %v8258_v58 = vpop.eup %8257  ;;  %v1900_v63 = vmul.f32 %v1708_v38, %v1132_v27  ;;  %v1140_v51 = vmul.f32 0.5, %v10740_v20  ;;  %v1148_v37 = vmul.f32 0.5, %v10743_v34  ;;  %8279 = verf.f32 %v1351_v21  ;;  %v10817_v27 = vld [vmem:[%s8834_s7 + $0x530] sm:$0xff]  ;;  %v10826_v35 = vpop.f32.mrf.mxu0 }
 0x211   : > { %12499 = vst [vmem:[#allocation111_spill] sm:$0xff] %v10801_v31  ;;  %v8260_v10 = vpop.eup %8259  ;;  %5067 = vmatprep.mubr.bf16.mxu1 %v10801_v31  ;;  %v1710_v26 = vadd.f32 1.0, %v8258_v58  ;;  %v1894_v11 = vmul.f32 %v1702_v61, %v1126_v16  ;;  %8281 = verf.f32 %v1359_v29  ;;  %v1348_v34 = vmul.f32 0.70710677, %v10806_v55  ;;  %v10830_v31 = vpop.f32.mrf.mxu1 }
 0x212   : > { %v8262_v38 = vpop.eup %8261  ;;  %v10821_v9 = vpack.c.bf16 %v1900_v63, %v1892_v44  ;;  %v1717_v43 = vadd.f32 1.0, %v8260_v10  ;;  %v1356_v21 = vmul.f32 0.70710677, %v10809_v8  ;;  %v1142_v16 = vmul.f32 0.5, %v10755_v42  ;;  %v10843_v5 = vpop.f32.mrf.mxu0  ;;  %v10848_v42 = vld [vmem:[%s8834_s7 + $0x5e8] sm:$0xff] }
 0x213   : > { %v1902_v58 = vmul.f32 %v1710_v26, %v1134_v0  ;;  %v1725_v20 = vadd.f32 1.0, %v8262_v38  ;;  %v8264_v30 = vpop.eup %8263  ;;  %v1150_v61 = vmul.f32 0.5, %v10758_v52  ;;  %v1350_v63 = vmul.f32 0.70710677, %v10817_v27  ;;  %v10839_v38 = vld [vmem:[%s8834_s7 + $0x5a8] sm:$0xff]  ;;  %v10841_v60 = vpop.f32.mrf.mxu1  ;;  %12502 = vst [vmem:[#allocation114_spill] sm:$0xff] %v10843_v5 }
 0x214   : > { %12500 = vst [vmem:[#allocation112_spill] sm:$0xff] %v10821_v9  ;;  %4915 = vmatmul.mubr.bf16.gmra.mxu0 %v10821_v9  ;;  %v1909_v44 = vmul.f32 %v1717_v43, %v1141_v22  ;;  %v1719_v26 = vadd.f32 1.0, %v8264_v30  ;;  %8283 = verf.f32 %v1348_v34  ;;  %v1157_v22 = vmul.f32 0.5, %v10771_v23  ;;  %v10859_v9 = vld [vmem:[%s8834_s7 + $0x5b8] sm:$0xff] }
 0x215   : > { %v8266_v0 = vpop.eup %8265  ;;  %v10836_v29 = vpack.c.bf16 %v1902_v58, %v1894_v11  ;;  %v1917_v10 = vmul.f32 %v1725_v20, %v1149_v47  ;;  %8285 = verf.f32 %v1356_v21  ;;  %v1358_v52 = vmul.f32 0.70710677, %v10824_v41  ;;  %v10854_v20 = vpop.f32.mrf.mxu1  ;;  %v10862_v5 = vld [vmem:[%s8834_s7 + $0x5f8] sm:$0xff] }
 0x216   : > { %v1727_v43 = vadd.f32 1.0, %v8266_v0  ;;  %v8268_v11 = vpop.eup %8267  ;;  %v1911_v47 = vmul.f32 %v1719_v26, %v1143_v53  ;;  %v1165_v58 = vmul.f32 0.5, %v10779_v54  ;;  %8287 = verf.f32 %v1350_v63  ;;  %12504 = vst [vmem:[#allocation116_spill] sm:$0xff] %v10854_v20 }
 0x217   : > { %12501 = vst [vmem:[#allocation113_spill] sm:$0xff] %v10836_v29  ;;  %5068 = vmatmul.mubr.bf16.gmra.mxu1 %v10836_v29  ;;  %v10851_v30 = vpack.c.bf16 %v1917_v10, %v1909_v44  ;;  %v8270_v34 = vpop.eup %8269  ;;  %v1716_v21 = vadd.f32 1.0, %v8268_v11  ;;  %8289 = verf.f32 %v1358_v52  ;;  %v1365_v0 = vmul.f32 0.70710677, %v10839_v38  ;;  %v10868_v63 = vpop.f32.mrf.mxu0 }
 0x218   : > { %v1919_v23 = vmul.f32 %v1727_v43, %v10796_v19  ;;  %v8272_v29 = vpop.eup %8271  ;;  %v1724_v54 = vadd.f32 1.0, %v8270_v34  ;;  %v1159_v53 = vmul.f32 0.5, %v10785_v25  ;;  %v1167_v44 = vmul.f32 0.5, %v10789_v28  ;;  %v10877_v25 = vld [vmem:[%s8834_s7 + $0x5e0] sm:$0xff]  ;;  %v10879_v28 = vpop.f32.mrf.mxu1 }
 0x219   : > { %12503 = vst [vmem:[#allocation115_spill] sm:$0xff] %v10851_v30  ;;  %4924 = vmatprep.mubr.bf16.mxu0 %v10851_v30  ;;  %v1373_v19 = vmul.f32 0.70710677, %v10848_v42  ;;  %v8274_v10 = vpop.eup %8273  ;;  %v1908_v43 = vmul.f32 %v1716_v21, %v1140_v51  ;;  %v1718_v52 = vadd.f32 1.0, %v8272_v29  ;;  %8291 = verf.f32 %v1365_v0  ;;  %v10874_v30 = vld [vmem:[%s8834_s7 + $0x5a0] sm:$0xff]  ;;  %v10881_v39 = vpop.f32.mrf.mxu0  ;;  %v10888_v21 = vld [vmem:[%s8834_s7 + $0x5b0] sm:$0xff] }
 0x21a   : > { %v10870_v26 = vpack.c.bf16 %v1919_v23, %v1911_v47  ;;  %v1916_v11 = vmul.f32 %v1724_v54, %v1148_v37  ;;  %v1726_v20 = vadd.f32 1.0, %v8274_v10  ;;  %v1367_v34 = vmul.f32 0.70710677, %v10859_v9  ;;  %v10895_v59 = vpop.f32.mrf.mxu1 }
 0x21b   : > { %8293 = verf.f32 %v1373_v19  ;;  %v8276_v47 = vpop.eup %8275  ;;  %v1910_v51 = vmul.f32 %v1718_v52, %v1142_v16  ;;  %v1156_v29 = vmul.f32 0.5, %v10806_v55  ;;  %v1164_v37 = vmul.f32 0.5, %v10809_v8 }
 0x21c   : > { %12505 = vst [vmem:[#allocation117_spill] sm:$0xff] %v10870_v26  ;;  %5077 = vmatprep.mubr.bf16.mxu1 %v10870_v26  ;;  %v1375_v23 = vmul.f32 0.70710677, %v10862_v5  ;;  %v8278_v0 = vpop.eup %8277  ;;  %v10890_v54 = vpack.c.bf16 %v1916_v11, %v1908_v43  ;;  %v1918_v19 = vmul.f32 %v1726_v20, %v1150_v61  ;;  %v1733_v10 = vadd.f32 1.0, %v8276_v47  ;;  %v10897_v26 = vpop.f32.mrf.mxu0 }
 0x21d   : > { %8295 = verf.f32 %v1367_v34  ;;  %v8280_v16 = vpop.eup %8279  ;;  %v1741_v55 = vadd.f32 1.0, %v8278_v0  ;;  %v1364_v8 = vmul.f32 0.70710677, %v10874_v30  ;;  %v1372_v52 = vmul.f32 0.70710677, %v10877_v25  ;;  %v4717_v34 = vpop.f32.mrf.mxu1 }
 0x21e   : > { %12506 = vst [vmem:[#allocation118_spill] sm:$0xff] %v10890_v54  ;;  %8297 = verf.f32 %v1375_v23  ;;  %v8282_v13 = vpop.eup %8281  ;;  %4925 = vmatmul.mubr.bf16.gmra.mxu0 %v10890_v54  ;;  %v10902_v43 = vpack.c.bf16 %v1918_v19, %v1910_v51  ;;  %v1925_v61 = vmul.f32 %v1733_v10, %v1157_v22  ;;  %v1735_v20 = vadd.f32 1.0, %v8280_v16  ;;  %v10905_v47 = vpop.f32.mrf.mxu0 }
 0x21f   : > { %v1158_v11 = vmul.f32 0.5, %v10817_v27  ;;  %v1933_v2 = vmul.f32 %v1741_v55, %v1165_v58  ;;  %v1743_v3 = vadd.f32 1.0, %v8282_v13  ;;  %v1166_v23 = vmul.f32 0.5, %v10824_v41  ;;  %v10911_v22 = vpop.f32.mrf.mxu1 }
 0x220   : > { %12507 = vst [vmem:[#allocation119_spill] sm:$0xff] %v10902_v43  ;;  %8299 = verf.f32 %v1364_v8  ;;  %5078 = vmatmul.mubr.bf16.gmra.mxu1 %v10902_v43  ;;  %v1927_v0 = vmul.f32 %v1735_v20, %v1159_v53  ;;  %v1366_v54 = vmul.f32 0.70710677, %v10888_v21  ;;  %v1374_v51 = vmul.f32 0.70710677, %v10893_v17 }
 0x221   : > { %8301 = verf.f32 %v1372_v52  ;;  %v8284_v19 = vpop.eup %8283  ;;  %v10913_v27 = vpack.c.bf16 %v1933_v2, %v1925_v61  ;;  %v1935_v10 = vmul.f32 %v1743_v3, %v1167_v44  ;;  %v10917_v13 = vadd.f32 %v10664_v46, %v10650_v12  ;;  %v4570_v2 = vpop.f32.mrf.mxu0 }
 0x222   : > { %v10921_v41 = vadd.f32 %v10684_v50, %v10666_v18  ;;  %v8286_v58 = vpop.eup %8285  ;;  %v1732_v53 = vadd.f32 1.0, %v8284_v19  ;;  %v1173_v16 = vmul.f32 0.5, %v10839_v38  ;;  %8303 = verf.f32 %v1366_v54 }
 0x223   : > { %12508 = vst [vmem:[#allocation120_spill] sm:$0xff] %v10913_v27  ;;  %v10926_v55 = vadd.f32 %v10698_v7, %v10686_v57  ;;  %v8288_v8 = vpop.eup %8287  ;;  %4934 = vmatprep.mubr.bf16.mxu0 %v10913_v27  ;;  %v10929_v3 = vpack.c.bf16 %v1935_v10, %v1927_v0  ;;  %v1740_v12 = vadd.f32 1.0, %v8286_v58  ;;  %8305 = verf.f32 %v1374_v51  ;;  %v4723_v7 = vpop.f32.mrf.mxu1  ;;  %v12559_v27 = vld [vmem:[#allocation64_spill] sm:$0xff] }
 0x224   : > { %v10933_v46 = vadd.f32 %v10731_v36, %v10720_v4  ;;  %v8290_v18 = vpop.eup %8289  ;;  %v1924_v50 = vmul.f32 %v1732_v53, %v1156_v29  ;;  %v1734_v38 = vadd.f32 1.0, %v8288_v8  ;;  %v10937_v44 = vadd.f32 %v10745_v40, %v10733_v24  ;;  %v4572_v54 = vpop.f32.mrf.mxu0 }
 0x225   : > { %12509 = vst [vmem:[#allocation121_spill] sm:$0xff] %v10929_v3  ;;  %v10941_v57 = vadd.f32 %v10767_v62, %v10750_v15  ;;  %5087 = vmatprep.mubr.bf16.mxu1 %v10929_v3  ;;  %v1932_v52 = vmul.f32 %v1740_v12, %v1164_v37  ;;  %v1742_v61 = vadd.f32 1.0, %v8290_v18  ;;  %v1181_v4 = vmul.f32 0.5, %v10848_v42  ;;  %v4725_v62 = vpop.f32.mrf.mxu1 }
 0x226   : > { %v10947_v36 = vadd.f32 %v10819_v49, %v10799_v48  ;;  %v8292_v29 = vpop.eup %8291  ;;  %v1926_v20 = vmul.f32 %v1734_v38, %v1158_v11  ;;  %v1175_v40 = vmul.f32 0.5, %v10859_v9  ;;  %v10952_v24 = vadd.f32 %v10830_v31, %v10811_v32  ;;  %v4574_v37 = vpop.f32.mrf.mxu0 }
 0x227   : > { %v10956_v15 = vadd.f32 %v10841_v60, %v10826_v35  ;;  %v10958_v42 = vpack.c.bf16 %v1932_v52, %v1924_v50  ;;  %v1934_v51 = vmul.f32 %v1742_v61, %v1166_v23  ;;  %v1749_v48 = vadd.f32 1.0, %v8292_v29  ;;  %v4727_v35 = vpop.f32.mrf.mxu1 }
 0x228   : > { %v8294_v0 = vpop.eup %8293  ;;  %v10962_v49 = vadd.f32 %v10879_v28, %v10868_v63  ;;  %v1183_v11 = vmul.f32 0.5, %v10862_v5  ;;  %v10967_v32 = vadd.f32 %v10895_v59, %v10881_v39  ;;  %v10970_v60 = vadd.f32 %v4717_v34, %v10897_v26  ;;  %v10981_v59 = vpop.f32.mrf.mxu0 }
 0x229   : > { %12510 = vst [vmem:[#allocation122_spill] sm:$0xff] %v10958_v42  ;;  %v1757_v9 = vadd.f32 1.0, %v8294_v0  ;;  %4935 = vmatmul.mubr.bf16.gmra.mxu0 %v10958_v42  ;;  %v10973_v23 = vpack.c.bf16 %v1934_v51, %v1926_v20  ;;  %v1941_v19 = vmul.f32 %v1749_v48, %v1173_v16  ;;  %v10975_v10 = vadd.f32 %v4723_v7, %v4570_v2  ;;  %v10988_v38 = vpop.f32.mrf.mxu1  ;;  %v7707_v42 = vld [vmem:[%s8842_s10 + $0x818] ss:$24 sps:$4 sm:$0xff]  }
 0x22a   : > { %v8296_v31 = vpop.eup %8295  ;;  %v10977_v63 = vadd.f32 %v4725_v62, %v4572_v54  ;;  %v10979_v53 = vadd.f32 %v4727_v35, %v4574_v37  ;;  %v1172_v26 = vmul.f32 0.5, %v10874_v30  ;;  %v1180_v2 = vmul.f32 0.5, %v10877_v25 }
 0x22b   : > { %12511 = vst [vmem:[#allocation123_spill] sm:$0xff] %v10973_v23  ;;  %v8298_v28 = vpop.eup %8297  ;;  %v1949_v5 = vmul.f32 %v1757_v9, %v1181_v4  ;;  %v1751_v58 = vadd.f32 1.0, %v8296_v31  ;;  %5088 = vmatmul.mubr.bf16.gmra.mxu1 %v10973_v23  ;;  %v1174_v54 = vmul.f32 0.5, %v10888_v21  ;;  %v4580_v52 = vpop.f32.mrf.mxu0  ;;  %v1182_v29 = vmul.f32 0.5, %v10893_v17  ;;  %v12535_v23 = vld [vmem:[#allocation51_spill] sm:$0xff] }
 0x22c   : > { %v1759_v39 = vadd.f32 1.0, %v8298_v28 }
 0x22d   : > { %v8300_v34 = vpop.eup %8299  ;;  %v10985_v8 = vpack.c.bf16 %v1949_v5, %v1941_v19  ;;  %v1943_v16 = vmul.f32 %v1751_v58, %v1175_v40  ;;  %v4582_v62 = vpop.f32.mrf.mxu0 }
 0x22e   : > { %v8302_v12 = vpop.eup %8301  ;;  %v1951_v18 = vmul.f32 %v1759_v39, %v1183_v11  ;;  %v1748_v50 = vadd.f32 1.0, %v8300_v34  ;;  %v4733_v0 = vpop.f32.mrf.mxu1  ;;  %v7635_v39 = vld [vmem:[%s8842_s10 + $0x758] ss:$24 sps:$4 sm:$0xff]  }
 0x22f   : > { %12512 = vst [vmem:[#allocation124_spill] sm:$0xff] %v10985_v8  ;;  %4944 = vmatprep.mubr.bf16.mxu0 %v10985_v8  ;;  %v1756_v7 = vadd.f32 1.0, %v8302_v12  ;;  %v8304_v61 = vpop.eup %8303  ;;  %v10998_v21 = vadd.f32 %v4733_v0, %v4580_v52  ;;  %v4584_v9 = vpop.f32.mrf.mxu0  ;;  %v7638_v34 = vld [vmem:[%s8842_s10 + $0xa58] ss:$24 sps:$4 sm:$0xff]   ;;  %v7646_v12 = vld [vmem:[%s8842_s10 + $0xa2c] ss:$24 sps:$4 sm:$0xff]  }
 0x230   : > { %v10992_v4 = vpack.c.bf16 %v1951_v18, %v1943_v16  ;;  %v1940_v30 = vmul.f32 %v1748_v50, %v1172_v26  ;;  %v8306_v20 = vpop.eup %8305  ;;  %v1750_v25 = vadd.f32 1.0, %v8304_v61  ;;  %v4735_v17 = vpop.f32.mrf.mxu1  ;;  %v7643_v16 = vld [vmem:[%s8842_s10 + $0x72c] ss:$24 sps:$4 sm:$0xff]   ;;  %v7650_v0 = vld [vmem:[%s8842_s10 + $0x9f8] ss:$24 sps:$4 sm:$0xff]  }
 0x231   : > { %v1948_v40 = vmul.f32 %v1756_v7, %v1180_v2  ;;  %v1758_v37 = vadd.f32 1.0, %v8306_v20  ;;  %v11001_v35 = vadd.f32 %v4735_v17, %v4582_v62  ;;  %v11006_v28 = vpop.f32.mrf.mxu0  ;;  %v7641_v2 = vld [vmem:[%s8842_s10 + $0x728] ss:$24 sps:$4 sm:$0xff]   ;;  %v7649_v7 = vld [vmem:[%s8842_s10 + $0x6fc] ss:$24 sps:$4 sm:$0xff]  }
 0x232   : > { %12513 = vst [vmem:[#allocation125_spill] sm:$0xff] %v10992_v4  ;;  %5097 = vmatprep.mubr.bf16.mxu1 %v10992_v4  ;;  %v1942_v48 = vmul.f32 %v1750_v25, %v1174_v54  ;;  %v4737_v19 = vpop.f32.mrf.mxu1  ;;  %v7644_v20 = vld [vmem:[%s8842_s10 + $0xa28] ss:$24 sps:$4 sm:$0xff]   ;;  %v7647_v62 = vld [vmem:[%s8842_s10 + $0x6f8] ss:$24 sps:$4 sm:$0xff]  }
 0x233   : > { %v10996_v51 = vpack.c.bf16 %v1948_v40, %v1940_v30  ;;  %v1950_v11 = vmul.f32 %v1758_v37, %v1182_v29  ;;  %v11008_v5 = vadd.f32 %v4737_v19, %v4584_v9  ;;  %v7652_v37 = vld [vmem:[%s8842_s10 + $0x9fc] ss:$24 sps:$4 sm:$0xff]   ;;  %v7658_v17 = vld [vmem:[%s8842_s10 + $0x9cc] ss:$24 sps:$4 sm:$0xff]   ;;  %v7701_v4 = vld [vmem:[%s8842_s10 + $0x848] ss:$24 sps:$4 sm:$0xff]  }
 0x234   : > { %v11011_v58 = vpop.f32.mrf.mxu1  ;;  %v12516_v19 = vld [vmem:[#allocation32_spill] sm:$0xff]  ;;  %v7704_v8 = vld [vmem:[%s8842_s10 + $0xb48] ss:$24 sps:$4 sm:$0xff]  }
 0x235   : > { %12514 = vst [vmem:[#allocation126_spill] sm:$0xff] %v10996_v51  ;;  %4945 = vmatmul.mubr.bf16.gmra.mxu0 %v10996_v51  ;;  %v11003_v31 = vpack.c.bf16 %v1950_v11, %v1942_v48  ;;  %v7655_v48 = vld [vmem:[%s8842_s10 + $0x6cc] ss:$24 sps:$4 sm:$0xff]   ;;  %v7653_v11 = vld [vmem:[%s8842_s10 + $0x6c8] ss:$24 sps:$4 sm:$0xff]  }
 0x236   : > { %5140 = vmatprep.mubr.bf16.mxu0 %v9427_v6  ;;  %v4590_v26 = vpop.f32.mrf.mxu0  ;;  %v12530_v6 = vld [vmem:[#allocation45_spill] sm:$0xff] }
 0x237   : > { %12515 = vst [vmem:[#allocation127_spill] sm:$0xff] %v11003_v31  ;;  %5098 = vmatmul.mubr.bf16.gmra.mxu1 %v11003_v31  ;;  %v7694_v31 = vld [vmem:[%s8842_s10 + $0xbac] ss:$24 sps:$4 sm:$0xff]  }
 0x238   : > { %5293 = vmatprep.mubr.bf16.mxu1 %v9433_v14  ;;  %v4743_v18 = vpop.f32.mrf.mxu1  ;;  %v4592_v50 = vpop.f32.mrf.mxu0  ;;  %v7689_v14 = vld [vmem:[%s8842_s10 + $0x8a8] ss:$24 sps:$4 sm:$0xff]  }
 0x239   : > { %v11021_v54 = vadd.f32 %v4743_v18, %v4590_v26 }
 0x23a   : > { %v4745_v52 = vpop.f32.mrf.mxu1  ;;  %v4594_v61 = vpop.f32.mrf.mxu0 }
 0x23b   : > { %v11024_v30 = vadd.f32 %v4745_v52, %v4592_v50  ;;  %v12519_v50 = vld [vmem:[#allocation35_spill] sm:$0xff] }
 0x23c   : > { %v4747_v29 = vpop.f32.mrf.mxu1  ;;  %v11031_v25 = vpop.f32.mrf.mxu0  ;;  %v7659_v52 = vld [vmem:[%s8842_s10 + $0x698] ss:$24 sps:$4 sm:$0xff]  }
 0x23d   : > { %5141 = vmatmul.mubr.bf16.vlgmr.msra.gmra.mxu0 %v9445_v33  ;;  %v11029_v40 = vadd.f32 %v4747_v29, %v4594_v61 }
 0x23e   : > { %5415 = vmatpush1.bf16.msra.mxu0 %v7635_v39  ;;  %5150 = vmatprep.mubr.bf16.mxu0 %v9468_v1  ;;  %v11037_v9 = vpop.f32.mrf.mxu1  ;;  %v7661_v39 = vld [vmem:[%s8842_s10 + $0x69c] ss:$24 sps:$4 sm:$0xff]  }
 0x23f   : > { %5416 = vmatprep.subr.bf16.mxu0 %v7643_v16  ;;  %5294 = vmatmul.mubr.bf16.vlgmr.msra.gmra.mxu1 %v9454_v45  ;;  %v12524_v1 = vld [vmem:[#allocation40_spill] sm:$0xff] }
 0x240   : > { %5568 = vmatpush1.bf16.msra.mxu1 %v7638_v34  ;;  %5303 = vmatprep.mubr.bf16.mxu1 %v9479_v56  ;;  %v12517_v34 = vld [vmem:[#allocation34_spill] sm:$0xff] }
 0x241   : > { %5569 = vmatprep.subr.bf16.mxu1 %v7646_v12  ;;  %v4600_v26 = vpop.f32.mrf.mxu0  ;;  %v12518_v12 = vld [vmem:[#allocation33_spill] sm:$0xff] }
 0x242   : > { %5417 = vmatpush1.bf16.msra.mxu0 %v7641_v2  ;;  %v7682_v56 = vld [vmem:[%s8842_s10 + $0x90c] ss:$24 sps:$4 sm:$0xff]  }
 0x243   : > { %5418 = vmatprep.subr.bf16.mxu0 %v7649_v7  ;;  %v4753_v16 = vpop.f32.mrf.mxu1  ;;  %v4602_v2 = vpop.f32.mrf.mxu0  ;;  %v7656_v7 = vld [vmem:[%s8842_s10 + $0x9c8] ss:$24 sps:$4 sm:$0xff]  }
 0x244   : > { %5570 = vmatpush1.bf16.msra.mxu1 %v7644_v20  ;;  %v11045_v18 = vadd.f32 %v4753_v16, %v4600_v26  ;;  %v7664_v20 = vld [vmem:[%s8842_s10 + $0x99c] ss:$24 sps:$4 sm:$0xff]   ;;  %v7665_v26 = vld [vmem:[%s8842_s10 + $0x668] ss:$24 sps:$4 sm:$0xff]   ;;  %v7670_v16 = vld [vmem:[%s8842_s10 + $0x96c] ss:$24 sps:$4 sm:$0xff]  }
 0x245   : > { %5151 = vmatmul.mubr.bf16.gmra.mxu0 %v12516_v19  ;;  %5571 = vmatprep.subr.bf16.mxu1 %v7652_v37  ;;  %v4755_v61 = vpop.f32.mrf.mxu1  ;;  %v4604_v29 = vpop.f32.mrf.mxu0  ;;  %v7677_v19 = vld [vmem:[%s8842_s10 + $0x608] ss:$24 sps:$4 sm:$0xff]  }
 0x246   : > { %5419 = vmatpush1.bf16.msra.mxu0 %v7647_v62  ;;  %5160 = vmatprep.mubr.bf16.mxu0 %v12517_v34  ;;  %v7667_v62 = vld [vmem:[%s8842_s10 + $0x66c] ss:$24 sps:$4 sm:$0xff]   ;;  %v11052_v37 = vadd.f32 %v4755_v61, %v4602_v2 }
 0x247   : > { %5420 = vmatprep.subr.bf16.mxu0 %v7655_v48  ;;  %5304 = vmatmul.mubr.bf16.gmra.mxu1 %v12518_v12  ;;  %v7662_v48 = vld [vmem:[%s8842_s10 + $0x998] ss:$24 sps:$4 sm:$0xff]   ;;  %v4757_v12 = vpop.f32.mrf.mxu1  ;;  %v12522_v2 = vld [vmem:[#allocation37_spill] sm:$0xff] }
 0x248   : > { %5313 = vmatprep.mubr.bf16.mxu1 %v12519_v50  ;;  %5572 = vmatpush1.bf16.msra.mxu1 %v7650_v0  ;;  %v11057_v34 = vadd.f32 %v4757_v12, %v4604_v29  ;;  %v11059_v0 = vpop.f32.mrf.mxu0  ;;  %v12520_v50 = vld [vmem:[#allocation36_spill] sm:$0xff]  ;;  %v12523_v61 = vld [vmem:[#allocation39_spill] sm:$0xff]  ;;  %v7668_v29 = vld [vmem:[%s8842_s10 + $0x968] ss:$24 sps:$4 sm:$0xff]  }
 0x249   : > { %5573 = vmatprep.subr.bf16.mxu1 %v7658_v17  ;;  %v12521_v17 = vld [vmem:[#allocation38_spill] sm:$0xff] }
 0x24a   : > { %5421 = vmatpush1.bf16.msra.mxu0 %v7653_v11  ;;  %v7673_v11 = vld [vmem:[%s8842_s10 + $0x63c] ss:$24 sps:$4 sm:$0xff]  }
 0x24b   : > { %5422 = vmatprep.subr.bf16.mxu0 %v7661_v39  ;;  %v11064_v39 = vpop.f32.mrf.mxu1 }
 0x24c   : > { %5574 = vmatpush1.bf16.msra.mxu1 %v7656_v7  ;;  %v4610_v12 = vpop.f32.mrf.mxu0  ;;  %v7671_v7 = vld [vmem:[%s8842_s10 + $0x638] ss:$24 sps:$4 sm:$0xff]  }
 0x24d   : > { %5161 = vmatmul.mubr.bf16.gmra.mxu0 %v12520_v50  ;;  %5575 = vmatprep.subr.bf16.mxu1 %v7664_v20  ;;  %v7674_v20 = vld [vmem:[%s8842_s10 + $0x938] ss:$24 sps:$4 sm:$0xff]  }
 0x24e   : > { %5170 = vmatprep.mubr.bf16.mxu0 %v12521_v17  ;;  %5423 = vmatpush1.bf16.msra.mxu0 %v7659_v52  ;;  %v7676_v17 = vld [vmem:[%s8842_s10 + $0x93c] ss:$24 sps:$4 sm:$0xff]   ;;  %v4612_v52 = vpop.f32.mrf.mxu0 }
 0x24f   : > { %5424 = vmatprep.subr.bf16.mxu0 %v7667_v62  ;;  %5314 = vmatmul.mubr.bf16.gmra.mxu1 %v12522_v2  ;;  %v7679_v62 = vld [vmem:[%s8842_s10 + $0x60c] ss:$24 sps:$4 sm:$0xff]   ;;  %v4763_v50 = vpop.f32.mrf.mxu1 }
 0x250   : > { %5323 = vmatprep.mubr.bf16.mxu1 %v12523_v61  ;;  %5576 = vmatpush1.bf16.msra.mxu1 %v7662_v48  ;;  %v11075_v45 = vadd.f32 %v4763_v50, %v4610_v12  ;;  %v4614_v2 = vpop.f32.mrf.mxu0  ;;  %v7685_v48 = vld [vmem:[%s8842_s10 + $0x8dc] ss:$24 sps:$4 sm:$0xff]  }
 0x251   : > { %5577 = vmatprep.subr.bf16.mxu1 %v7670_v16  ;;  %v4765_v61 = vpop.f32.mrf.mxu1  ;;  %v12526_v12 = vld [vmem:[#allocation41_spill] sm:$0xff] }
 0x252   : > { %5425 = vmatpush1.bf16.msra.mxu0 %v7665_v26  ;;  %v12525_v26 = vld [vmem:[#allocation42_spill] sm:$0xff]  ;;  %v11080_v16 = vadd.f32 %v4765_v61, %v4612_v52  ;;  %v7688_v52 = vld [vmem:[%s8842_s10 + $0xbdc] ss:$24 sps:$4 sm:$0xff]  }
 0x253   : > { %5426 = vmatprep.subr.bf16.mxu0 %v7673_v11  ;;  %v4767_v50 = vpop.f32.mrf.mxu1  ;;  %v11082_v11 = vpop.f32.mrf.mxu0 }
 0x254   : > { %5578 = vmatpush1.bf16.msra.mxu1 %v7668_v29  ;;  %v11085_v29 = vadd.f32 %v4767_v50, %v4614_v2  ;;  %v7697_v2 = vld [vmem:[%s8842_s10 + $0x87c] ss:$24 sps:$4 sm:$0xff]  }
 0x255   : > { %5171 = vmatmul.mubr.bf16.gmra.mxu0 %v12524_v1  ;;  %5579 = vmatprep.subr.bf16.mxu1 %v7676_v17  ;;  %v12527_v1 = vld [vmem:[#allocation43_spill] sm:$0xff]  ;;  %v11089_v61 = vpop.f32.mrf.mxu1 }
 0x256   : > { %5180 = vmatprep.mubr.bf16.mxu0 %v12525_v26  ;;  %5427 = vmatpush1.bf16.msra.mxu0 %v7671_v7  ;;  %v7680_v7 = vld [vmem:[%s8842_s10 + $0x908] ss:$24 sps:$4 sm:$0xff]   ;;  %v7683_v17 = vld [vmem:[%s8842_s10 + $0x8d8] ss:$24 sps:$4 sm:$0xff]   ;;  %v7691_v26 = vld [vmem:[%s8842_s10 + $0x8ac] ss:$24 sps:$4 sm:$0xff]  }
 0x257   : > { %5428 = vmatprep.subr.bf16.mxu0 %v7679_v62  ;;  %5324 = vmatmul.mubr.bf16.gmra.mxu1 %v12526_v12  ;;  %v7686_v62 = vld [vmem:[%s8842_s10 + $0xbd8] ss:$24 sps:$4 sm:$0xff]   ;;  %v4620_v33 = vpop.f32.mrf.mxu0 }
 0x258   : > { %5333 = vmatprep.mubr.bf16.mxu1 %v12527_v1  ;;  %5580 = vmatpush1.bf16.msra.mxu1 %v7674_v20  ;;  %v12528_v12 = vld [vmem:[#allocation44_spill] sm:$0xff]  ;;  %v12529_v1 = vld [vmem:[#allocation46_spill] sm:$0xff] }
 0x259   : > { %5581 = vmatprep.subr.bf16.mxu1 %v7682_v56  ;;  %v4773_v20 = vpop.f32.mrf.mxu1  ;;  %v4622_v50 = vpop.f32.mrf.mxu0 }
 0x25a   : > { %5429 = vmatpush1.bf16.msra.mxu0 %v7677_v19  ;;  %v11100_v56 = vadd.f32 %v4773_v20, %v4620_v33  ;;  %v7700_v33 = vld [vmem:[%s8842_s10 + $0xb7c] ss:$24 sps:$4 sm:$0xff]  }
 0x25b   : > { %5430 = vmatprep.subr.bf16.mxu0 %v7685_v48  ;;  %v4775_v19 = vpop.f32.mrf.mxu1  ;;  %v4624_v48 = vpop.f32.mrf.mxu0 }
 0x25c   : > { %5582 = vmatpush1.bf16.msra.mxu1 %v7680_v7  ;;  %v11103_v7 = vadd.f32 %v4775_v19, %v4622_v50  ;;  %v7706_v50 = vld [vmem:[%s8842_s10 + $0xb4c] ss:$24 sps:$4 sm:$0xff]  }
 0x25d   : > { %5181 = vmatmul.mubr.bf16.gmra.mxu0 %v12528_v12  ;;  %5583 = vmatprep.subr.bf16.mxu1 %v7688_v52  ;;  %v12531_v12 = vld [vmem:[#allocation47_spill] sm:$0xff]  ;;  %v4777_v51 = vpop.f32.mrf.mxu1  ;;  %v11112_v20 = vpop.f32.mrf.mxu0 }
 0x25e   : > { %5190 = vmatprep.mubr.bf16.mxu0 %v12529_v1  ;;  %5431 = vmatpush2.bf16.msra.mxu0 %v7683_v17  ;;  %v7692_v1 = vld [vmem:[%s8842_s10 + $0xba8] ss:$24 sps:$4 sm:$0xff]   ;;  %v7695_v17 = vld [vmem:[%s8842_s10 + $0x878] ss:$24 sps:$4 sm:$0xff]   ;;  %v11110_v52 = vadd.f32 %v4777_v51, %v4624_v48 }
 0x25f   : > { %5432 = vmatprep.subr.bf16.mxu0 %v7691_v26  ;;  %5334 = vmatmul.mubr.bf16.gmra.mxu1 %v12530_v6  ;;  %v7703_v26 = vld [vmem:[%s8842_s10 + $0x84c] ss:$24 sps:$4 sm:$0xff]   ;;  %v7698_v6 = vld [vmem:[%s8842_s10 + $0xb78] ss:$24 sps:$4 sm:$0xff]   ;;  %v11117_v19 = vpop.f32.mrf.mxu1 }
 0x260   : > { %5343 = vmatprep.mubr.bf16.mxu1 %v12531_v12  ;;  %5584 = vmatpush2.bf16.msra.mxu1 %v7686_v62  ;;  %v12532_v62 = vld [vmem:[#allocation48_spill] sm:$0xff] }
 0x261   : > { %5585 = vmatprep.subr.bf16.mxu1 %v7694_v31  ;;  %v12533_v31 = vld [vmem:[#allocation50_spill] sm:$0xff] }
 0x262   : > { %5433 = vmatpush2.bf16.msra.mxu0 %v7689_v14  ;;  %v7709_v14 = vld [vmem:[%s8842_s10 + $0x81c] ss:$24 sps:$4 sm:$0xff]   ;;  %v4630_v51 = vpop.f32.mrf.mxu0 }
 0x263   : > { %5434 = vmatprep.subr.bf16.mxu0 %v7697_v2  ;;  %v12534_v2 = vld [vmem:[#allocation49_spill] sm:$0xff] }
 0x264   : > { %5586 = vmatpush2.bf16.msra.mxu1 %v7692_v1  ;;  %v4783_v48 = vpop.f32.mrf.mxu1  ;;  %v4632_v12 = vpop.f32.mrf.mxu0 }
 0x265   : > { %5191 = vmatmul.mubr.bf16.gmra.mxu0 %v12532_v62  ;;  %5587 = vmatprep.subr.bf16.mxu1 %v7700_v33  ;;  %v7712_v62 = vld [vmem:[%s8842_s10 + $0xb1c] ss:$24 sps:$4 sm:$0xff]   ;;  %v11127_v1 = vadd.f32 %v4783_v48, %v4630_v51  ;;  %v7718_v48 = vld [vmem:[%s8842_s10 + $0xaec] ss:$24 sps:$4 sm:$0xff]  }
 0x266   : > { %5200 = vmatprep.mubr.bf16.mxu0 %v12533_v31  ;;  %5435 = vmatpush2.bf16.msra.mxu0 %v7695_v17  ;;  %v7715_v17 = vld [vmem:[%s8842_s10 + $0x7ec] ss:$24 sps:$4 sm:$0xff]   ;;  %v4785_v33 = vpop.f32.mrf.mxu1  ;;  %v7710_v31 = vld [vmem:[%s8842_s10 + $0xb18] ss:$24 sps:$4 sm:$0xff]  }
 0x267   : > { %5436 = vmatprep.subr.bf16.mxu0 %v7703_v26  ;;  %5344 = vmatmul.mubr.bf16.gmra.mxu1 %v12534_v2  ;;  %12536 = vst [vmem:[#allocation128_spill] sm:$0xff] %v11127_v1  ;;  %v4634_v26 = vpop.f32.mrf.mxu0  ;;  %v11130_v2 = vadd.f32 %v4785_v33, %v4632_v12  ;;  %v7721_v12 = vld [vmem:[%s8842_s10 + $0x7bc] ss:$24 sps:$4 sm:$0xff]  }
 0x268   : > { %5353 = vmatprep.mubr.bf16.mxu1 %v12535_v23  ;;  %5588 = vmatpush2.bf16.msra.mxu1 %v7698_v6  ;;  %v4787_v3 = vpop.f32.mrf.mxu1  ;;  %v12538_v23 = vld [vmem:[#allocation52_spill] sm:$0xff]  ;;  %v12549_v1 = vld [vmem:[#allocation57_spill] sm:$0xff] }
 0x269   : > { %5589 = vmatprep.subr.bf16.mxu1 %v7706_v50  ;;  %12537 = vst [vmem:[#allocation129_spill] sm:$0xff] %v11130_v2  ;;  %v11134_v6 = vadd.f32 %v4787_v3, %v4634_v26  ;;  %v11136_v51 = vpop.f32.mrf.mxu0  ;;  %v7713_v50 = vld [vmem:[%s8842_s10 + $0x7e8] ss:$24 sps:$4 sm:$0xff]   ;;  %v12544_v3 = vld [vmem:[#allocation55_spill] sm:$0xff]  ;;  %v7733_v2 = vld [vmem:[%s8842_s10 + $0x164] ss:$24 sps:$4 sm:$0xff]  }
 0x26a   : > { %5437 = vmatpush2.bf16.msra.mxu0 %v7701_v4  ;;  %12540 = vst [vmem:[#allocation131_spill] sm:$0xff] %v11136_v51  ;;  %v12541_v4 = vld [vmem:[#allocation54_spill] sm:$0xff]  ;;  %v11143_v33 = vpop.f32.mrf.mxu1 }
 0x26b   : > { %5438 = vmatprep.subr.bf16.mxu0 %v7709_v14  ;;  %12539 = vst [vmem:[#allocation130_spill] sm:$0xff] %v11134_v6  ;;  %v12542_v14 = vld [vmem:[#allocation53_spill] sm:$0xff]  ;;  %12543 = vst [vmem:[#allocation132_spill] sm:$0xff] %v11143_v33  ;;  %v7722_v6 = vld [vmem:[%s8842_s10 + $0xab8] ss:$24 sps:$4 sm:$0xff]  }
 0x26c   : > { %5590 = vmatpush2.bf16.msra.mxu1 %v7704_v8  ;;  %v7716_v8 = vld [vmem:[%s8842_s10 + $0xae8] ss:$24 sps:$4 sm:$0xff]  }
 0x26d   : > { %5201 = vmatmul.mubr.bf16.gmra.mxu0 %v12538_v23  ;;  %5591 = vmatprep.subr.bf16.mxu1 %v7712_v62  ;;  %v4640_v26 = vpop.f32.mrf.mxu0 }
 0x26e   : > { %5210 = vmatprep.mubr.bf16.mxu0 %v12541_v4  ;;  %5439 = vmatpush2.bf16.msra.mxu0 %v7707_v42  ;;  %v7719_v42 = vld [vmem:[%s8842_s10 + $0x7b8] ss:$24 sps:$4 sm:$0xff]   ;;  %v7724_v4 = vld [vmem:[%s8842_s10 + $0xabc] ss:$24 sps:$4 sm:$0xff]  }
 0x26f   : > { %5440 = vmatprep.subr.bf16.mxu0 %v7715_v17  ;;  %5354 = vmatmul.mubr.bf16.gmra.mxu1 %v12542_v14  ;;  %v4642_v62 = vpop.f32.mrf.mxu0  ;;  %v7727_v17 = vld [vmem:[%s8842_s10 + $0x78c] ss:$24 sps:$4 sm:$0xff]   ;;  %v12545_v14 = vld [vmem:[#allocation56_spill] sm:$0xff] }
 0x270   : > { %5363 = vmatprep.mubr.bf16.mxu1 %v12544_v3  ;;  %5592 = vmatpush2.bf16.msra.mxu1 %v7710_v31  ;;  %v4793_v23 = vpop.f32.mrf.mxu1  ;;  %v12547_v3 = vld [vmem:[#allocation58_spill] sm:$0xff] }
 0x271   : > { %5593 = vmatprep.subr.bf16.mxu1 %v7718_v48  ;;  %v11152_v33 = vadd.f32 %v4793_v23, %v4640_v26  ;;  %v4644_v31 = vpop.f32.mrf.mxu0  ;;  %v7725_v48 = vld [vmem:[%s8842_s10 + $0x788] ss:$24 sps:$4 sm:$0xff]   ;;  %v12550_v23 = vld [vmem:[#allocation59_spill] sm:$0xff] }
 0x272   : > { %5441 = vmatpush2.bf16.msra.mxu0 %v7713_v50  ;;  %v4795_v50 = vpop.f32.mrf.mxu1 }
 0x273   : > { %5442 = vmatprep.subr.bf16.mxu0 %v7721_v12  ;;  %12546 = vst [vmem:[#allocation133_spill] sm:$0xff] %v11152_v33  ;;  %v7730_v12 = vld [vmem:[%s8842_s10 + $0xa8c] ss:$24 sps:$4 sm:$0xff]   ;;  %v11157_v51 = vadd.f32 %v4795_v50, %v4642_v62  ;;  %v12553_v50 = vld [vmem:[#allocation60_spill] sm:$0xff] }
 0x274   : > { %5594 = vmatpush2.bf16.msra.mxu1 %v7716_v8  ;;  %v4797_v8 = vpop.f32.mrf.mxu1  ;;  %v1959_v33 = vld [vmem:[%s8863_s24 + $0x38] sm:$0xff] }
 0x275   : > { %5211 = vmatmul.mubr.bf16.gmra.mxu0 %v12545_v14  ;;  %5595 = vmatprep.subr.bf16.mxu1 %v7724_v4  ;;  %12548 = vst [vmem:[#allocation134_spill] sm:$0xff] %v11157_v51  ;;  %v4646_v14 = vpop.f32.mrf.mxu0  ;;  %v11162_v26 = vadd.f32 %v4797_v8, %v4644_v31  ;;  %v7736_v4 = vld [vmem:[%s8842_s10 + $0x464] ss:$24 sps:$4 sm:$0xff]  }
 0x276   : > { %5220 = vmatprep.mubr.bf16.mxu0 %v12547_v3  ;;  %5443 = vmatpush2.bf16.msra.mxu0 %v7719_v42  ;;  %v7728_v42 = vld [vmem:[%s8842_s10 + $0xa88] ss:$24 sps:$4 sm:$0xff]   ;;  %v4799_v3 = vpop.f32.mrf.mxu1 }
 0x277   : > { %5444 = vmatprep.subr.bf16.mxu0 %v7727_v17  ;;  %5364 = vmatmul.mubr.bf16.gmra.mxu1 %v12549_v1  ;;  %12551 = vst [vmem:[#allocation135_spill] sm:$0xff] %v11162_v26  ;;  %v11166_v62 = vadd.f32 %v4799_v3, %v4646_v14  ;;  %v12554_v51 = vld [vmem:[#allocation62_spill] sm:$0xff]  ;;  %v12555_v14 = vld [vmem:[#allocation61_spill] sm:$0xff] }
 0x278   : > { %5373 = vmatprep.mubr.bf16.mxu1 %v12550_v23  ;;  %5596 = vmatpush2.bf16.msra.mxu1 %v7722_v6  ;;  %v4836_v17 = vpop.f32.mrf.mxu0  ;;  %v1952_v6 = vld [vmem:[%s8863_s24] sm:$0xff]  ;;  %v12557_v23 = vld [vmem:[#allocation103_spill] sm:$0xff] }
 0x279   : > { %5597 = vmatprep.subr.bf16.mxu1 %v7730_v12  ;;  %12552 = vst [vmem:[#allocation136_spill] sm:$0xff] %v11166_v62  ;;  %v4837_v1 = vadd.f32 %v4836_v17, %v10917_v13  ;;  %v12558_v17 = vld [vmem:[#allocation63_spill] sm:$0xff] }
 0x27a   : > { %5445 = vmatpush2.bf16.msra.mxu0 %v7725_v48  ;;  %v4989_v31 = vpop.f32.mrf.mxu1  ;;  %v4838_v8 = vpop.f32.mrf.mxu0 }
 0x27b   : > { %5720 = vmatprep.subr.bf16.mxu0 %v7733_v2  ;;  %v4990_v48 = vadd.f32 %v4989_v31, %v4837_v1  ;;  %v4839_v12 = vadd.f32 %v4838_v8, %v10921_v41  ;;  %v1953_v2 = vld [vmem:[%s8863_s24 + $0x8] sm:$0xff]  ;;  %v1958_v1 = vld [vmem:[%s8863_s24 + $0x30] sm:$0xff] }
 0x27c   : > { %5598 = vmatpush2.bf16.msra.mxu1 %v7728_v42  ;;  %v4991_v3 = vpop.f32.mrf.mxu1  ;;  %v12556_v42 = vld [vmem:[#allocation102_spill] sm:$0xff] }
 0x27d   : > { %5221 = vmatmul.mubr.bf16.gmra.mxu0 %v12553_v50  ;;  %5873 = vmatprep.subr.bf16.mxu1 %v7736_v4  ;;  %v4840_v50 = vpop.f32.mrf.mxu0  ;;  %v4690_v13 = vadd.f32 %v12557_v23, %v12556_v42  ;;  %v4992_v62 = vadd.f32 %v4991_v3, %v4839_v12  ;;  %v12561_v12 = vld [vmem:[#allocation65_spill] sm:$0xff] }
 0x27e   : > { %5230 = vmatprep.mubr.bf16.mxu0 %v12554_v51  ;;  %v6332_v51 = vadd.f32 %v4990_v48, %v1952_v6  ;;  %v4841_v4 = vadd.f32 %v4840_v50, %v10926_v55  ;;  %v4993_v31 = vpop.f32.mrf.mxu1  ;;  %v12560_v48 = vld [vmem:[#allocation66_spill] sm:$0xff] }
 0x27f   : > { %5374 = vmatmul.mubr.bf16.gmra.mxu1 %v12555_v14  ;;  %v4842_v41 = vpop.f32.mrf.mxu0  ;;  %v6333_v8 = vadd.f32 %v4992_v62, %v1953_v2  ;;  %v12562_v62 = vld [vmem:[#allocation67_spill] sm:$0xff]  ;;  %v1964_v2 = vld [vmem:[%s8863_s24 + $0x60] sm:$0xff] }
 0x280   : > { %5383 = vmatprep.mubr.bf16.mxu1 %v12558_v17  ;;  %6476 = vst [vmem:[%s8863_s24] sm:$0xff] %v6332_v51  ;;  %v4994_v14 = vadd.f32 %v4993_v31, %v4841_v4  ;;  %v4843_v26 = vadd.f32 %v4842_v41, %v4690_v13  ;;  %v4995_v43 = vpop.f32.mrf.mxu1  ;;  %v12563_v4 = vld [vmem:[#allocation108_spill] sm:$0xff] }
 0x281   : > { %6477 = vst [vmem:[%s8863_s24 + $0x8] sm:$0xff] %v6333_v8 }
 0x282   : > { %v6338_v23 = vadd.f32 %v4994_v14, %v1958_v1  ;;  %v4996_v6 = vadd.f32 %v4995_v43, %v4843_v26  ;;  %v1965_v26 = vld [vmem:[%s8863_s24 + $0x68] sm:$0xff]  ;;  %v12564_v1 = vld [vmem:[#allocation110_spill] sm:$0xff] }
 0x283   : > { %v4846_v50 = vpop.f32.mrf.mxu0  ;;  %v4700_v31 = vadd.f32 %v12564_v1, %v12563_v4  ;;  %v1971_v4 = vld [vmem:[%s8863_s24 + $0x98] sm:$0xff] }
 0x284   : > { %6482 = vst [vmem:[%s8863_s24 + $0x30] sm:$0xff] %v6338_v23  ;;  %v6339_v55 = vadd.f32 %v4996_v6, %v1959_v33  ;;  %v4847_v51 = vadd.f32 %v4846_v50, %v10933_v46  ;;  %v12565_v23 = vld [vmem:[#allocation68_spill] sm:$0xff] }
 0x285   : > { %5231 = vmatmul.mubr.bf16.gmra.mxu0 %v12559_v27  ;;  %v4999_v3 = vpop.f32.mrf.mxu1  ;;  %v4848_v42 = vpop.f32.mrf.mxu0  ;;  %v1970_v6 = vld [vmem:[%s8863_s24 + $0x90] sm:$0xff] }
 0x286   : > { %5240 = vmatprep.mubr.bf16.mxu0 %v12560_v48  ;;  %6483 = vst [vmem:[%s8863_s24 + $0x38] sm:$0xff] %v6339_v55  ;;  %v5000_v13 = vadd.f32 %v4999_v3, %v4847_v51  ;;  %v4849_v43 = vadd.f32 %v4848_v42, %v10937_v44  ;;  %v12566_v51 = vld [vmem:[#allocation70_spill] sm:$0xff] }
 0x287   : > { %5384 = vmatmul.mubr.bf16.gmra.mxu1 %v12561_v12  ;;  %v5001_v14 = vpop.f32.mrf.mxu1  ;;  %v4850_v33 = vpop.f32.mrf.mxu0 }
 0x288   : > { %5393 = vmatprep.mubr.bf16.mxu1 %v12562_v62  ;;  %v6344_v46 = vadd.f32 %v5000_v13, %v1964_v2  ;;  %v5002_v41 = vadd.f32 %v5001_v14, %v4849_v43  ;;  %v4851_v8 = vadd.f32 %v4850_v33, %v10941_v57  ;;  %v12567_v2 = vld [vmem:[#allocation69_spill] sm:$0xff]  ;;  %v12568_v43 = vld [vmem:[#allocation71_spill] sm:$0xff] }
 0x289   : > { %v5003_v55 = vpop.f32.mrf.mxu1  ;;  %v4852_v50 = vpop.f32.mrf.mxu0 }
 0x28a   : > { %6488 = vst [vmem:[%s8863_s24 + $0x60] sm:$0xff] %v6344_v46  ;;  %v6345_v44 = vadd.f32 %v5002_v41, %v1965_v26  ;;  %v5004_v3 = vadd.f32 %v5003_v55, %v4851_v8  ;;  %v4853_v42 = vadd.f32 %v4852_v50, %v4700_v31  ;;  %v12569_v46 = vld [vmem:[#allocation72_spill] sm:$0xff]  ;;  %v1976_v31 = vld [vmem:[%s8863_s24 + $0xc0] sm:$0xff] }
 0x28b   : > { %v5005_v1 = vpop.f32.mrf.mxu1  ;;  %v12570_v55 = vld [vmem:[#allocation74_spill] sm:$0xff] }
 0x28c   : > { %6489 = vst [vmem:[%s8863_s24 + $0x68] sm:$0xff] %v6345_v44  ;;  %v6350_v57 = vadd.f32 %v5004_v3, %v1970_v6  ;;  %v5006_v13 = vadd.f32 %v5005_v1, %v4853_v42  ;;  %v12571_v44 = vld [vmem:[#allocation114_spill] sm:$0xff]  ;;  %v12572_v3 = vld [vmem:[#allocation116_spill] sm:$0xff] }
 0x28d   : > { %5241 = vmatmul.mubr.bf16.gmra.mxu0 %v12565_v23  ;;  %v4710_v42 = vadd.f32 %v12572_v3, %v12571_v44  ;;  %v7731_v44 = vld [vmem:[%s8842_s10 + $0x160] ss:$24 sps:$4 sm:$0xff]  }
 0x28e   : > { %5250 = vmatprep.mubr.bf16.mxu0 %v12566_v51  ;;  %6494 = vst [vmem:[%s8863_s24 + $0x90] sm:$0xff] %v6350_v57  ;;  %v6351_v14 = vadd.f32 %v5006_v13, %v1971_v4  ;;  %v4856_v33 = vpop.f32.mrf.mxu0  ;;  %v12573_v57 = vld [vmem:[#allocation73_spill] sm:$0xff] }
 0x28f   : > { %5394 = vmatmul.mubr.bf16.gmra.mxu1 %v12567_v2  ;;  %v4857_v51 = vadd.f32 %v4856_v33, %v10947_v36  ;;  %v1977_v36 = vld [vmem:[%s8863_s24 + $0xc8] sm:$0xff] }
 0x290   : > { %5403 = vmatprep.mubr.bf16.mxu1 %v12568_v43  ;;  %6495 = vst [vmem:[%s8863_s24 + $0x98] sm:$0xff] %v6351_v14  ;;  %v4858_v26 = vpop.f32.mrf.mxu0  ;;  %v12574_v33 = vld [vmem:[#allocation75_spill] sm:$0xff] }
 0x291   : > { %v4859_v8 = vadd.f32 %v4858_v26, %v10952_v24 }
 0x292   : > { %v5009_v41 = vpop.f32.mrf.mxu1  ;;  %v4860_v50 = vpop.f32.mrf.mxu0 }
 0x293   : > { %v5010_v6 = vadd.f32 %v5009_v41, %v4857_v51  ;;  %v4861_v1 = vadd.f32 %v4860_v50, %v10956_v15  ;;  %v1982_v51 = vld [vmem:[%s8863_s24 + $0xf0] sm:$0xff]  ;;  %v1983_v50 = vld [vmem:[%s8863_s24 + $0xf8] sm:$0xff] }
 0x294   : > { %v5011_v4 = vpop.f32.mrf.mxu1  ;;  %v4862_v14 = vpop.f32.mrf.mxu0  ;;  %v7739_v15 = vld [vmem:[%s8842_s10 + $0x134] ss:$24 sps:$4 sm:$0xff]  }
 0x295   : > { %5251 = vmatmul.mubr.bf16.gmra.mxu0 %v12569_v46  ;;  %v6356_v13 = vadd.f32 %v5010_v6, %v1976_v31  ;;  %v5012_v24 = vadd.f32 %v5011_v4, %v4859_v8  ;;  %v4863_v41 = vadd.f32 %v4862_v14, %v4710_v42  ;;  %v12575_v6 = vld [vmem:[#allocation76_spill] sm:$0xff]  ;;  %v7737_v42 = vld [vmem:[%s8842_s10 + $0x130] ss:$24 sps:$4 sm:$0xff]  }
 0x296   : > { %5446 = vmatprep.mubr.bf16.mxu0 %v12570_v55  ;;  %v5013_v26 = vpop.f32.mrf.mxu1  ;;  %v7734_v4 = vld [vmem:[%s8842_s10 + $0x460] ss:$24 sps:$4 sm:$0xff]   ;;  %v12576_v14 = vld [vmem:[#allocation78_spill] sm:$0xff] }
 0x297   : > { %5404 = vmatmul.mubr.bf16.gmra.mxu1 %v12573_v57  ;;  %6500 = vst [vmem:[%s8863_s24 + $0xc0] sm:$0xff] %v6356_v13  ;;  %v6357_v3 = vadd.f32 %v5012_v24, %v1977_v36  ;;  %v5014_v55 = vadd.f32 %v5013_v26, %v4861_v1  ;;  %v7742_v13 = vld [vmem:[%s8842_s10 + $0x434] ss:$24 sps:$4 sm:$0xff]   ;;  %v7745_v24 = vld [vmem:[%s8842_s10 + $0x104] ss:$24 sps:$4 sm:$0xff]  }
 0x298   : > { %5599 = vmatprep.mubr.bf16.mxu1 %v12574_v33  ;;  %v5015_v57 = vpop.f32.mrf.mxu1  ;;  %v12577_v26 = vld [vmem:[#allocation77_spill] sm:$0xff] }
 0x299   : > { %6501 = vst [vmem:[%s8863_s24 + $0xc8] sm:$0xff] %v6357_v3  ;;  %v6362_v31 = vadd.f32 %v5014_v55, %v1982_v51  ;;  %v5016_v8 = vadd.f32 %v5015_v57, %v4863_v41  ;;  %v1988_v55 = vld [vmem:[%s8863_s24 + $0x120] sm:$0xff]  ;;  %v4720_v3 = vadd.f32 %v10911_v22, %v10905_v47  ;;  %v1994_v22 = vld [vmem:[%s8863_s24 + $0x150] sm:$0xff] }
 0x29a   : > { %v4866_v33 = vpop.f32.mrf.mxu0  ;;  %v7751_v47 = vld [vmem:[%s8842_s10 + $0xd4] ss:$24 sps:$4 sm:$0xff]  }
 0x29b   : > { %6506 = vst [vmem:[%s8863_s24 + $0xf0] sm:$0xff] %v6362_v31  ;;  %v6363_v36 = vadd.f32 %v5016_v8, %v1983_v50  ;;  %v4867_v1 = vadd.f32 %v4866_v33, %v10962_v49  ;;  %v12578_v49 = vld [vmem:[#allocation79_spill] sm:$0xff]  ;;  %v7743_v8 = vld [vmem:[%s8842_s10 + $0x100] ss:$24 sps:$4 sm:$0xff]  }
 0x29c   : > { %v5019_v57 = vpop.f32.mrf.mxu1  ;;  %v4868_v51 = vpop.f32.mrf.mxu0  ;;  %v7740_v33 = vld [vmem:[%s8842_s10 + $0x430] ss:$24 sps:$4 sm:$0xff]  }
 0x29d   : > { %5447 = vmatmul.mubr.bf16.vlgmr.msra.gmra.mxu0 %v12575_v6  ;;  %6507 = vst [vmem:[%s8863_s24 + $0xf8] sm:$0xff] %v6363_v36  ;;  %v5020_v41 = vadd.f32 %v5019_v57, %v4867_v1  ;;  %v7748_v36 = vld [vmem:[%s8842_s10 + $0x404] ss:$24 sps:$4 sm:$0xff]  }
 0x29e   : > { %5721 = vmatpush1.bf16.msra.mxu0 %v7731_v44  ;;  %5456 = vmatprep.mubr.bf16.mxu0 %v12576_v14  ;;  %v4869_v44 = vadd.f32 %v4868_v51, %v10967_v32  ;;  %v5021_v50 = vpop.f32.mrf.mxu1  ;;  %v4870_v31 = vpop.f32.mrf.mxu0 }
 0x29f   : > { %5722 = vmatprep.subr.bf16.mxu0 %v7739_v15  ;;  %5600 = vmatmul.mubr.bf16.vlgmr.msra.gmra.mxu1 %v12577_v26  ;;  %v1989_v15 = vld [vmem:[%s8863_s24 + $0x128] sm:$0xff]  ;;  %v6368_v32 = vadd.f32 %v5020_v41, %v1988_v55  ;;  %v4871_v57 = vadd.f32 %v4870_v31, %v10970_v60  ;;  %v12579_v26 = vld [vmem:[#allocation80_spill] sm:$0xff]  ;;  %v1995_v41 = vld [vmem:[%s8863_s24 + $0x158] sm:$0xff] }
 0x2a0   : > { %5874 = vmatpush1.bf16.msra.mxu1 %v7734_v4  ;;  %5609 = vmatprep.mubr.bf16.mxu1 %v12578_v49  ;;  %v5022_v1 = vadd.f32 %v5021_v50, %v4869_v44  ;;  %v5023_v4 = vpop.f32.mrf.mxu1  ;;  %v4872_v51 = vpop.f32.mrf.mxu0  ;;  %v7746_v55 = vld [vmem:[%s8842_s10 + $0x400] ss:$24 sps:$4 sm:$0xff]   ;;  %v7754_v44 = vld [vmem:[%s8842_s10 + $0x3d4] ss:$24 sps:$4 sm:$0xff]  }
 0x2a1   : > { %5875 = vmatprep.subr.bf16.mxu1 %v7742_v13  ;;  %6512 = vst [vmem:[%s8863_s24 + $0x120] sm:$0xff] %v6368_v32  ;;  %v4873_v13 = vadd.f32 %v4872_v51, %v4720_v3  ;;  %v12580_v31 = vld [vmem:[#allocation82_spill] sm:$0xff]  ;;  %v12581_v32 = vld [vmem:[#allocation81_spill] sm:$0xff] }
 0x2a2   : > { %5723 = vmatpush1.bf16.msra.mxu0 %v7737_v42  ;;  %v6369_v49 = vadd.f32 %v5022_v1, %v1989_v15  ;;  %v5024_v42 = vadd.f32 %v5023_v4, %v4871_v57  ;;  %v5025_v60 = vpop.f32.mrf.mxu1  ;;  %v7757_v3 = vld [vmem:[%s8842_s10 + $0xa4] ss:$24 sps:$4 sm:$0xff]   ;;  %v7755_v57 = vld [vmem:[%s8842_s10 + $0xa0] ss:$24 sps:$4 sm:$0xff]  }
 0x2a3   : > { %5724 = vmatprep.subr.bf16.mxu0 %v7745_v24  ;;  %v7749_v24 = vld [vmem:[%s8842_s10 + $0xd0] ss:$24 sps:$4 sm:$0xff]   ;;  %v5026_v15 = vadd.f32 %v5025_v60, %v4873_v13  ;;  %v7760_v51 = vld [vmem:[%s8842_s10 + $0x3a4] ss:$24 sps:$4 sm:$0xff]  }
 0x2a4   : > { %5876 = vmatpush1.bf16.msra.mxu1 %v7740_v33  ;;  %6513 = vst [vmem:[%s8863_s24 + $0x128] sm:$0xff] %v6369_v49  ;;  %v6374_v50 = vadd.f32 %v5024_v42, %v1994_v22  ;;  %v7752_v49 = vld [vmem:[%s8842_s10 + $0x3d0] ss:$24 sps:$4 sm:$0xff]   ;;  %v7763_v42 = vld [vmem:[%s8842_s10 + $0x74] ss:$24 sps:$4 sm:$0xff]  }
 0x2a5   : > { %5457 = vmatmul.mubr.bf16.gmra.mxu0 %v12579_v26  ;;  %5877 = vmatprep.subr.bf16.mxu1 %v7748_v36  ;;  %v6375_v33 = vadd.f32 %v5026_v15, %v1995_v41  ;;  %v12582_v36 = vld [vmem:[#allocation83_spill] sm:$0xff] }
 0x2a6   : > { %5725 = vmatpush1.bf16.msra.mxu0 %v7743_v8  ;;  %5466 = vmatprep.mubr.bf16.mxu0 %v12580_v31  ;;  %6518 = vst [vmem:[%s8863_s24 + $0x150] sm:$0xff] %v6374_v50  ;;  %v4876_v8 = vpop.f32.mrf.mxu0  ;;  %v2001_v41 = vld [vmem:[%s8863_s24 + $0x188] sm:$0xff]  ;;  %v7758_v50 = vld [vmem:[%s8842_s10 + $0x3a0] ss:$24 sps:$4 sm:$0xff]  }
 0x2a7   : > { %5726 = vmatprep.subr.bf16.mxu0 %v7751_v47  ;;  %5610 = vmatmul.mubr.bf16.gmra.mxu1 %v12581_v32  ;;  %v4877_v1 = vadd.f32 %v4876_v8, %v10975_v10  ;;  %6519 = vst [vmem:[%s8863_s24 + $0x158] sm:$0xff] %v6375_v33  ;;  %v2000_v47 = vld [vmem:[%s8863_s24 + $0x180] sm:$0xff]  ;;  %v4730_v10 = vadd.f32 %v10988_v38, %v10981_v59  ;;  %v2006_v59 = vld [vmem:[%s8863_s24 + $0x1b0] sm:$0xff] }
 0x2a8   : > { %5619 = vmatprep.mubr.bf16.mxu1 %v12582_v36  ;;  %5878 = vmatpush1.bf16.msra.mxu1 %v7746_v55  ;;  %v5029_v22 = vpop.f32.mrf.mxu1  ;;  %v4878_v4 = vpop.f32.mrf.mxu0  ;;  %v12584_v8 = vld [vmem:[#allocation86_spill] sm:$0xff] }
 0x2a9   : > { %5879 = vmatprep.subr.bf16.mxu1 %v7754_v44  ;;  %v5030_v13 = vadd.f32 %v5029_v22, %v4877_v1  ;;  %v4879_v55 = vadd.f32 %v4878_v4, %v10977_v63  ;;  %v12583_v44 = vld [vmem:[#allocation84_spill] sm:$0xff]  ;;  %v7761_v63 = vld [vmem:[%s8842_s10 + $0x70] ss:$24 sps:$4 sm:$0xff]  }
 0x2aa   : > { %5727 = vmatpush1.bf16.msra.mxu0 %v7749_v24  ;;  %v5031_v60 = vpop.f32.mrf.mxu1  ;;  %v4880_v24 = vpop.f32.mrf.mxu0  ;;  %v7766_v1 = vld [vmem:[%s8842_s10 + $0x374] ss:$24 sps:$4 sm:$0xff]   ;;  %v7769_v4 = vld [vmem:[%s8842_s10 + $0x44] ss:$24 sps:$4 sm:$0xff]  }
 0x2ab   : > { %5728 = vmatprep.subr.bf16.mxu0 %v7757_v3  ;;  %v6380_v15 = vadd.f32 %v5030_v13, %v2000_v47  ;;  %v5032_v3 = vadd.f32 %v5031_v60, %v4879_v55  ;;  %v4881_v33 = vadd.f32 %v4880_v24, %v10979_v53  ;;  %v12585_v13 = vld [vmem:[#allocation85_spill] sm:$0xff]  ;;  %v12586_v60 = vld [vmem:[#allocation87_spill] sm:$0xff] }
 0x2ac   : > { %5880 = vmatpush1.bf16.msra.mxu1 %v7752_v49  ;;  %v5033_v38 = vpop.f32.mrf.mxu1  ;;  %v4882_v22 = vpop.f32.mrf.mxu0  ;;  %v7764_v24 = vld [vmem:[%s8842_s10 + $0x370] ss:$24 sps:$4 sm:$0xff]  }
 0x2ad   : > { %5467 = vmatmul.mubr.bf16.gmra.mxu0 %v12583_v44  ;;  %5881 = vmatprep.subr.bf16.mxu1 %v7760_v51  ;;  %6524 = vst [vmem:[%s8863_s24 + $0x180] sm:$0xff] %v6380_v15  ;;  %v6381_v49 = vadd.f32 %v5032_v3, %v2001_v41  ;;  %v5034_v47 = vadd.f32 %v5033_v38, %v4881_v33  ;;  %v7767_v41 = vld [vmem:[%s8842_s10 + $0x40] ss:$24 sps:$4 sm:$0xff]   ;;  %v7772_v15 = vld [vmem:[%s8842_s10 + $0x344] ss:$24 sps:$4 sm:$0xff]  }
 0x2ae   : > { %5476 = vmatprep.mubr.bf16.mxu0 %v12584_v8  ;;  %5729 = vmatpush1.bf16.msra.mxu0 %v7755_v57  ;;  %v4883_v53 = vadd.f32 %v4882_v22, %v4730_v10  ;;  %v2007_v57 = vld [vmem:[%s8863_s24 + $0x1b8] sm:$0xff]  ;;  %v5035_v55 = vpop.f32.mrf.mxu1  ;;  %v7775_v33 = vld [vmem:[%s8842_s10 + $0x14] ss:$24 sps:$4 sm:$0xff]  }
 0x2af   : > { %5730 = vmatprep.subr.bf16.mxu0 %v7763_v42  ;;  %5620 = vmatmul.mubr.bf16.gmra.mxu1 %v12585_v13  ;;  %6525 = vst [vmem:[%s8863_s24 + $0x188] sm:$0xff] %v6381_v49  ;;  %v6386_v51 = vadd.f32 %v5034_v47, %v2006_v59  ;;  %v12587_v38 = vld [vmem:[#allocation88_spill] sm:$0xff]  ;;  %v2012_v22 = vld [vmem:[%s8863_s24 + $0x1e0] sm:$0xff] }
 0x2b0   : > { %5629 = vmatprep.mubr.bf16.mxu1 %v12586_v60  ;;  %5882 = vmatpush1.bf16.msra.mxu1 %v7758_v50  ;;  %v5036_v42 = vadd.f32 %v5035_v55, %v4883_v53  ;;  %v7770_v59 = vld [vmem:[%s8842_s10 + $0x340] ss:$24 sps:$4 sm:$0xff]   ;;  %v7778_v53 = vld [vmem:[%s8842_s10 + $0x314] ss:$24 sps:$4 sm:$0xff]   ;;  %v7781_v55 = vld [vmem:[%s8842_s10 + $0x2e4] ss:$24 sps:$4 sm:$0xff]  }
 0x2b1   : > { %5883 = vmatprep.subr.bf16.mxu1 %v7766_v1  ;;  %6530 = vst [vmem:[%s8863_s24 + $0x1b0] sm:$0xff] %v6386_v51  ;;  %v4886_v3 = vpop.f32.mrf.mxu0  ;;  %v12588_v1 = vld [vmem:[#allocation90_spill] sm:$0xff]  ;;  %v12589_v51 = vld [vmem:[#allocation89_spill] sm:$0xff] }
 0x2b2   : > { %5731 = vmatpush1.bf16.msra.mxu0 %v7761_v63  ;;  %v6387_v10 = vadd.f32 %v5036_v42, %v2007_v57  ;;  %v4887_v50 = vadd.f32 %v4886_v3, %v10998_v21  ;;  %v2013_v42 = vld [vmem:[%s8863_s24 + $0x1e8] sm:$0xff] }
 0x2b3   : > { %5732 = vmatprep.subr.bf16.mxu0 %v7769_v4  ;;  %v4888_v63 = vpop.f32.mrf.mxu0  ;;  %v7773_v4 = vld [vmem:[%s8842_s10 + $0x10] ss:$24 sps:$4 sm:$0xff]  }
 0x2b4   : > { %5884 = vmatpush1.bf16.msra.mxu1 %v7764_v24  ;;  %6531 = vst [vmem:[%s8863_s24 + $0x1b8] sm:$0xff] %v6387_v10  ;;  %v4889_v47 = vadd.f32 %v4888_v63, %v11001_v35  ;;  %v4740_v24 = vadd.f32 %v11011_v58, %v11006_v28  ;;  %v12590_v10 = vld [vmem:[#allocation91_spill] sm:$0xff]  ;;  %v2018_v28 = vld [vmem:[%s8863_s24 + $0x210] sm:$0xff] }
 0x2b5   : > { %5477 = vmatmul.mubr.bf16.gmra.mxu0 %v12587_v38  ;;  %v5039_v49 = vpop.f32.mrf.mxu1  ;;  %5885 = vmatprep.subr.bf16.mxu1 %v7772_v15  ;;  %v4890_v57 = vpop.f32.mrf.mxu0 }
 0x2b6   : > { %5486 = vmatprep.mubr.bf16.mxu0 %v12588_v1  ;;  %5733 = vmatpush1.bf16.msra.mxu0 %v7767_v41  ;;  %v5040_v21 = vadd.f32 %v5039_v49, %v4887_v50  ;;  %v4891_v35 = vadd.f32 %v4890_v57, %v11008_v5  ;;  %v7779_v49 = vld [vmem:[%s8842_s10 + $0x2e0] ss:$24 sps:$4 sm:$0xff]  }
 0x2b7   : > { %5734 = vmatprep.subr.bf16.mxu0 %v7775_v33  ;;  %5630 = vmatmul.mubr.bf16.gmra.mxu1 %v12589_v51  ;;  %v5041_v41 = vpop.f32.mrf.mxu1  ;;  %v7776_v33 = vld [vmem:[%s8842_s10 + $0x310] ss:$24 sps:$4 sm:$0xff]   ;;  %v4892_v50 = vpop.f32.mrf.mxu0 }
 0x2b8   : > { %5639 = vmatprep.mubr.bf16.mxu1 %v12590_v10  ;;  %5886 = vmatpush1.bf16.msra.mxu1 %v7770_v59  ;;  %v6392_v15 = vadd.f32 %v5040_v21, %v2012_v22  ;;  %v5042_v3 = vadd.f32 %v5041_v41, %v4889_v47  ;;  %v4893_v63 = vadd.f32 %v4892_v50, %v4740_v24  ;;  %v7784_v59 = vld [vmem:[%s8842_s10 + $0x5e4] ss:$24 sps:$4 sm:$0xff]   ;;  %v7787_v22 = vld [vmem:[%s8842_s10 + $0x2b4] ss:$24 sps:$4 sm:$0xff]   ;;  %v7782_v24 = vld [vmem:[%s8842_s10 + $0x5e0] ss:$24 sps:$4 sm:$0xff]  }
 0x2b9   : > { %v5043_v58 = vpop.f32.mrf.mxu1  ;;  %5887 = vmatprep.subr.bf16.mxu1 %v7778_v53  ;;  %v2019_v47 = vld [vmem:[%s8863_s24 + $0x218] sm:$0xff]  ;;  %v12591_v41 = vld [vmem:[#allocation92_spill] sm:$0xff] }
 0x2ba   : > { %5735 = vmatpush1.bf16.msra.mxu0 %v7773_v4  ;;  %6536 = vst [vmem:[%s8863_s24 + $0x1e0] sm:$0xff] %v6392_v15  ;;  %v6393_v5 = vadd.f32 %v5042_v3, %v2013_v42  ;;  %v5044_v57 = vadd.f32 %v5043_v58, %v4891_v35  ;;  %v12592_v15 = vld [vmem:[#allocation94_spill] sm:$0xff]  ;;  %v12593_v58 = vld [vmem:[#allocation93_spill] sm:$0xff] }
 0x2bb   : > { %5736 = vmatprep.subr.bf16.mxu0 %v7781_v55  ;;  %v5045_v21 = vpop.f32.mrf.mxu1  ;;  %v7785_v55 = vld [vmem:[%s8842_s10 + $0x2b0] ss:$24 sps:$4 sm:$0xff]   ;;  %v7790_v35 = vld [vmem:[%s8842_s10 + $0x5b4] ss:$24 sps:$4 sm:$0xff]  }
 0x2bc   : > { %6537 = vst [vmem:[%s8863_s24 + $0x1e8] sm:$0xff] %v6393_v5  ;;  %v6398_v4 = vadd.f32 %v5044_v57, %v2018_v28  ;;  %5888 = vmatpush1.bf16.msra.mxu1 %v7776_v33  ;;  %v5046_v53 = vadd.f32 %v5045_v21, %v4893_v63  ;;  %v7793_v28 = vld [vmem:[%s8842_s10 + $0x284] ss:$24 sps:$4 sm:$0xff]   ;;  %v12594_v57 = vld [vmem:[#allocation95_spill] sm:$0xff] }
 0x2bd   : > { %5487 = vmatmul.mubr.bf16.gmra.mxu0 %v12591_v41  ;;  %v4896_v42 = vpop.f32.mrf.mxu0  ;;  %5889 = vmatprep.subr.bf16.mxu1 %v7784_v59  ;;  %v2024_v33 = vld [vmem:[%s8863_s24 + $0x240] sm:$0xff]  ;;  %v2025_v59 = vld [vmem:[%s8863_s24 + $0x248] sm:$0xff] }
 0x2be   : > { %5496 = vmatprep.mubr.bf16.mxu0 %v12592_v15  ;;  %5737 = vmatpush2.bf16.msra.mxu0 %v7779_v49  ;;  %6542 = vst [vmem:[%s8863_s24 + $0x210] sm:$0xff] %v6398_v4  ;;  %v6399_v3 = vadd.f32 %v5046_v53, %v2019_v47  ;;  %v4897_v50 = vadd.f32 %v4896_v42, %v11021_v54  ;;  %v7788_v54 = vld [vmem:[%s8842_s10 + $0x5b0] ss:$24 sps:$4 sm:$0xff]   ;;  %v7791_v4 = vld [vmem:[%s8842_s10 + $0x280] ss:$24 sps:$4 sm:$0xff]  }
 0x2bf   : > { %5738 = vmatprep.subr.bf16.mxu0 %v7787_v22  ;;  %5640 = vmatmul.mubr.bf16.gmra.mxu1 %v12593_v58  ;;  %v5049_v63 = vpop.f32.mrf.mxu1  ;;  %v4898_v5 = vpop.f32.mrf.mxu0  ;;  %v4750_v53 = vadd.f32 %v11037_v9, %v11031_v25 }
 0x2c0   : > { %5649 = vmatprep.mubr.bf16.mxu1 %v12594_v57  ;;  %6543 = vst [vmem:[%s8863_s24 + $0x218] sm:$0xff] %v6399_v3  ;;  %v5050_v49 = vadd.f32 %v5049_v63, %v4897_v50  ;;  %v4899_v21 = vadd.f32 %v4898_v5, %v11024_v30  ;;  %5890 = vmatpush2.bf16.msra.mxu1 %v7782_v24  ;;  %v7796_v30 = vld [vmem:[%s8842_s10 + $0x584] ss:$24 sps:$4 sm:$0xff]   ;;  %v7799_v24 = vld [vmem:[%s8842_s10 + $0x254] ss:$24 sps:$4 sm:$0xff]  }
 0x2c1   : > { %v5051_v22 = vpop.f32.mrf.mxu1  ;;  %v4900_v47 = vpop.f32.mrf.mxu0  ;;  %5891 = vmatprep.subr.bf16.mxu1 %v7790_v35  ;;  %v2030_v63 = vld [vmem:[%s8863_s24 + $0x270] sm:$0xff] }
 0x2c2   : > { %5739 = vmatpush2.bf16.msra.mxu0 %v7785_v55  ;;  %v6404_v42 = vadd.f32 %v5050_v49, %v2024_v33  ;;  %v5052_v3 = vadd.f32 %v5051_v22, %v4899_v21  ;;  %v4901_v50 = vadd.f32 %v4900_v47, %v11029_v40  ;;  %v12595_v35 = vld [vmem:[#allocation96_spill] sm:$0xff]  ;;  %v12596_v40 = vld [vmem:[#allocation98_spill] sm:$0xff] }
 0x2c3   : > { %5740 = vmatprep.subr.bf16.mxu0 %v7793_v28  ;;  %v5053_v5 = vpop.f32.mrf.mxu1  ;;  %v4902_v55 = vpop.f32.mrf.mxu0  ;;  %v7794_v33 = vld [vmem:[%s8842_s10 + $0x580] ss:$24 sps:$4 sm:$0xff]   ;;  %v7797_v21 = vld [vmem:[%s8842_s10 + $0x250] ss:$24 sps:$4 sm:$0xff]   ;;  %v7802_v22 = vld [vmem:[%s8842_s10 + $0x554] ss:$24 sps:$4 sm:$0xff]  }
 0x2c4   : > { %6548 = vst [vmem:[%s8863_s24 + $0x240] sm:$0xff] %v6404_v42  ;;  %v6405_v57 = vadd.f32 %v5052_v3, %v2025_v59  ;;  %v5054_v25 = vadd.f32 %v5053_v5, %v4901_v50  ;;  %v4903_v9 = vadd.f32 %v4902_v55, %v4750_v53  ;;  %5892 = vmatpush2.bf16.msra.mxu1 %v7788_v54  ;;  %v2031_v28 = vld [vmem:[%s8863_s24 + $0x278] sm:$0xff]  ;;  %v12598_v53 = vld [vmem:[#allocation99_spill] sm:$0xff] }
 0x2c5   : > { %5497 = vmatmul.mubr.bf16.gmra.mxu0 %v12595_v35  ;;  %v5055_v49 = vpop.f32.mrf.mxu1  ;;  %5893 = vmatprep.subr.bf16.mxu1 %v7796_v30  ;;  %v7805_v59 = vld [vmem:[%s8842_s10 + $0x224] ss:$24 sps:$4 sm:$0xff]   ;;  %v7800_v50 = vld [vmem:[%s8842_s10 + $0x550] ss:$24 sps:$4 sm:$0xff]  }
 0x2c6   : > { %5506 = vmatprep.mubr.bf16.mxu0 %v12596_v40  ;;  %5741 = vmatpush2.bf16.msra.mxu0 %v7791_v4  ;;  %6549 = vst [vmem:[%s8863_s24 + $0x248] sm:$0xff] %v6405_v57  ;;  %v6410_v47 = vadd.f32 %v5054_v25, %v2030_v63  ;;  %v5056_v42 = vadd.f32 %v5055_v49, %v4903_v9  ;;  %v12597_v54 = vld [vmem:[#allocation97_spill] sm:$0xff]  ;;  %v2036_v30 = vld [vmem:[%s8863_s24 + $0x2a0] sm:$0xff]  ;;  %v2037_v49 = vld [vmem:[%s8863_s24 + $0x2a8] sm:$0xff] }
 0x2c7   : > { %5742 = vmatprep.subr.bf16.mxu0 %v7799_v24  ;;  %5650 = vmatmul.mubr.bf16.gmra.mxu1 %v12597_v54  ;;  %v7803_v63 = vld [vmem:[%s8842_s10 + $0x220] ss:$24 sps:$4 sm:$0xff]   ;;  %v7808_v55 = vld [vmem:[%s8842_s10 + $0x524] ss:$24 sps:$4 sm:$0xff]   ;;  %v7811_v25 = vld [vmem:[%s8842_s10 + $0x1f4] ss:$24 sps:$4 sm:$0xff]  }
 0x2c8   : > { %5659 = vmatprep.mubr.bf16.mxu1 %v12598_v53  ;;  %6554 = vst [vmem:[%s8863_s24 + $0x270] sm:$0xff] %v6410_v47  ;;  %v6411_v3 = vadd.f32 %v5056_v42, %v2031_v28  ;;  %v4906_v4 = vpop.f32.mrf.mxu0  ;;  %5894 = vmatpush2.bf16.msra.mxu1 %v7794_v33  ;;  %v12599_v28 = vld [vmem:[#allocation100_spill] sm:$0xff]  ;;  %v12657_v40 = vld [vmem:[#allocation51_spill] sm:$0xff] }
 0x2c9   : > { %v4907_v57 = vadd.f32 %v4906_v4, %v11045_v18  ;;  %5895 = vmatprep.subr.bf16.mxu1 %v7802_v22  ;;  %v4760_v18 = vadd.f32 %v11064_v39, %v11059_v0  ;;  %v7806_v47 = vld [vmem:[%s8842_s10 + $0x520] ss:$24 sps:$4 sm:$0xff]   ;;  %v12665_v35 = vld [vmem:[#allocation55_spill] sm:$0xff] }
 0x2ca   : > { %5743 = vmatpush2.bf16.msra.mxu0 %v7797_v21  ;;  %6555 = vst [vmem:[%s8863_s24 + $0x278] sm:$0xff] %v6411_v3  ;;  %v5059_v24 = vpop.f32.mrf.mxu1  ;;  %v4908_v5 = vpop.f32.mrf.mxu0  ;;  %v12600_v42 = vld [vmem:[#allocation104_spill] sm:$0xff] }
 0x2cb   : > { %5744 = vmatprep.subr.bf16.mxu0 %v7805_v59  ;;  %v5060_v9 = vadd.f32 %v5059_v24, %v4907_v57  ;;  %v4909_v33 = vadd.f32 %v4908_v5, %v11052_v37  ;;  %v7809_v37 = vld [vmem:[%s8842_s10 + $0x1f0] ss:$24 sps:$4 sm:$0xff]   ;;  %v7814_v57 = vld [vmem:[%s8842_s10 + $0x4f4] ss:$24 sps:$4 sm:$0xff]   ;;  %v12601_v5 = vld [vmem:[#allocation101_spill] sm:$0xff] }
 0x2cc   : > { %v5061_v21 = vpop.f32.mrf.mxu1  ;;  %v4910_v22 = vpop.f32.mrf.mxu0  ;;  %5896 = vmatpush2.bf16.msra.mxu1 %v7800_v50  ;;  %v2042_v0 = vld [vmem:[%s8863_s24 + $0x2d0] sm:$0xff] }
 0x2cd   : > { %5507 = vmatmul.mubr.bf16.gmra.mxu0 %v12599_v28  ;;  %v6416_v59 = vadd.f32 %v5060_v9, %v2036_v30  ;;  %v5062_v3 = vadd.f32 %v5061_v21, %v4909_v33  ;;  %v4911_v4 = vadd.f32 %v4910_v22, %v11057_v34  ;;  %5897 = vmatprep.subr.bf16.mxu1 %v7808_v55  ;;  %v7817_v50 = vld [vmem:[%s8842_s10 + $0x1c4] ss:$24 sps:$4 sm:$0xff]   ;;  %v7812_v22 = vld [vmem:[%s8842_s10 + $0x4f0] ss:$24 sps:$4 sm:$0xff]   ;;  %v7890_v28 = vld [vmem:[%s8842_s10 + $0xb80] ss:$24 sps:$4 sm:$0xff]  }
 0x2ce   : > { %5516 = vmatprep.mubr.bf16.mxu0 %v12600_v42  ;;  %5745 = vmatpush2.bf16.msra.mxu0 %v7803_v63  ;;  %v5063_v39 = vpop.f32.mrf.mxu1  ;;  %v4912_v24 = vpop.f32.mrf.mxu0  ;;  %v12602_v9 = vld [vmem:[#allocation105_spill] sm:$0xff]  ;;  %v12651_v42 = vld [vmem:[#allocation47_spill] sm:$0xff] }
 0x2cf   : > { %5746 = vmatprep.subr.bf16.mxu0 %v7811_v25  ;;  %5660 = vmatmul.mubr.bf16.gmra.mxu1 %v12601_v5  ;;  %6560 = vst [vmem:[%s8863_s24 + $0x2a0] sm:$0xff] %v6416_v59  ;;  %v6417_v30 = vadd.f32 %v5062_v3, %v2037_v49  ;;  %v5064_v34 = vadd.f32 %v5063_v39, %v4911_v4  ;;  %v2043_v33 = vld [vmem:[%s8863_s24 + $0x2d8] sm:$0xff]  ;;  %v12603_v39 = vld [vmem:[#allocation106_spill] sm:$0xff] }
 0x2d0   : > { %v4913_v63 = vadd.f32 %v4912_v24, %v4760_v18  ;;  %5669 = vmatprep.mubr.bf16.mxu1 %v12602_v9  ;;  %v5065_v21 = vpop.f32.mrf.mxu1  ;;  %5898 = vmatpush2.bf16.msra.mxu1 %v7806_v47  ;;  %v7815_v59 = vld [vmem:[%s8842_s10 + $0x1c0] ss:$24 sps:$4 sm:$0xff]   ;;  %v7820_v49 = vld [vmem:[%s8842_s10 + $0x4c4] ss:$24 sps:$4 sm:$0xff]   ;;  %v7823_v18 = vld [vmem:[%s8842_s10 + $0x194] ss:$24 sps:$4 sm:$0xff]  }
 0x2d1   : > { %6561 = vst [vmem:[%s8863_s24 + $0x2a8] sm:$0xff] %v6417_v30  ;;  %v6422_v55 = vadd.f32 %v5064_v34, %v2042_v0  ;;  %5899 = vmatprep.subr.bf16.mxu1 %v7814_v57  ;;  %v7818_v0 = vld [vmem:[%s8842_s10 + $0x4c0] ss:$24 sps:$4 sm:$0xff]   ;;  %v7821_v24 = vld [vmem:[%s8842_s10 + $0x190] ss:$24 sps:$4 sm:$0xff]  }
 0x2d2   : > { %v5066_v25 = vadd.f32 %v5065_v21, %v4913_v63  ;;  %5747 = vmatpush2.bf16.msra.mxu0 %v7809_v37  ;;  %v12604_v37 = vld [vmem:[#allocation109_spill] sm:$0xff]  ;;  %v2048_v30 = vld [vmem:[%s8863_s24 + $0x300] sm:$0xff]  ;;  %v12605_v21 = vld [vmem:[#allocation107_spill] sm:$0xff] }
 0x2d3   : > { %5748 = vmatprep.subr.bf16.mxu0 %v7817_v50  ;;  %6566 = vst [vmem:[%s8863_s24 + $0x2d0] sm:$0xff] %v6422_v55  ;;  %v7826_v50 = vld [vmem:[%s8842_s10 + $0x494] ss:$24 sps:$4 sm:$0xff]   ;;  %v4770_v55 = vadd.f32 %v11089_v61, %v11082_v11 }
 0x2d4   : > { %v6423_v3 = vadd.f32 %v5066_v25, %v2043_v33  ;;  %v4916_v4 = vpop.f32.mrf.mxu0  ;;  %5900 = vmatpush2.bf16.msra.mxu1 %v7812_v22  ;;  %v7829_v33 = vld [vmem:[%s8842_s10 + $0x764] ss:$24 sps:$4 sm:$0xff]   ;;  %v12606_v25 = vld [vmem:[#allocation111_spill] sm:$0xff] }
 0x2d5   : > { %5517 = vmatmul.mubr.bf16.gmra.mxu0 %v12603_v39  ;;  %v4917_v47 = vadd.f32 %v4916_v4, %v11075_v45  ;;  %5901 = vmatprep.subr.bf16.mxu1 %v7820_v49  ;;  %v7878_v39 = vld [vmem:[%s8842_s10 + $0xbe0] ss:$24 sps:$4 sm:$0xff]  }
 0x2d6   : > { %6567 = vst [vmem:[%s8863_s24 + $0x2d8] sm:$0xff] %v6423_v3  ;;  %5526 = vmatprep.mubr.bf16.mxu0 %v12604_v37  ;;  %v4918_v57 = vpop.f32.mrf.mxu0  ;;  %5749 = vmatpush2.bf16.msra.mxu0 %v7815_v59  ;;  %v2049_v59 = vld [vmem:[%s8863_s24 + $0x308] sm:$0xff]  ;;  %v12607_v37 = vld [vmem:[#allocation112_spill] sm:$0xff] }
 0x2d7   : > { %v5069_v34 = vpop.f32.mrf.mxu1  ;;  %v4919_v63 = vadd.f32 %v4918_v57, %v11080_v16  ;;  %5750 = vmatprep.subr.bf16.mxu0 %v7823_v18  ;;  %5670 = vmatmul.mubr.bf16.gmra.mxu1 %v12605_v21  ;;  %v7824_v16 = vld [vmem:[%s8842_s10 + $0x490] ss:$24 sps:$4 sm:$0xff]  }
 0x2d8   : > { %v5070_v45 = vadd.f32 %v5069_v34, %v4917_v47  ;;  %v4920_v22 = vpop.f32.mrf.mxu0  ;;  %5679 = vmatprep.mubr.bf16.mxu1 %v12606_v25  ;;  %5902 = vmatpush2.bf16.msra.mxu1 %v7818_v0  ;;  %v7832_v47 = vld [vmem:[%s8842_s10 + $0xa64] ss:$24 sps:$4 sm:$0xff]  }
 0x2d9   : > { %v5071_v3 = vpop.f32.mrf.mxu1  ;;  %v4921_v4 = vadd.f32 %v4920_v22, %v11085_v29  ;;  %5903 = vmatprep.subr.bf16.mxu1 %v7826_v50  ;;  %v2054_v34 = vld [vmem:[%s8863_s24 + $0x330] sm:$0xff]  ;;  %v2055_v29 = vld [vmem:[%s8863_s24 + $0x338] sm:$0xff]  ;;  %v12608_v50 = vld [vmem:[#allocation115_spill] sm:$0xff] }
 0x2da   : > { %v6428_v49 = vadd.f32 %v5070_v45, %v2048_v30  ;;  %v5072_v18 = vadd.f32 %v5071_v3, %v4919_v63  ;;  %v4922_v57 = vpop.f32.mrf.mxu0  ;;  %5751 = vmatpush2.bf16.msra.mxu0 %v7821_v24  ;;  %v12609_v45 = vld [vmem:[#allocation113_spill] sm:$0xff] }
 0x2db   : > { %v5073_v21 = vpop.f32.mrf.mxu1  ;;  %v4923_v11 = vadd.f32 %v4922_v57, %v4770_v55  ;;  %6026 = vmatprep.subr.bf16.mxu0 %v7829_v33  ;;  %v12610_v22 = vld [vmem:[#allocation117_spill] sm:$0xff]  ;;  %v2060_v55 = vld [vmem:[%s8863_s24 + $0x360] sm:$0xff]  ;;  %v4780_v57 = vadd.f32 %v11117_v19, %v11112_v20 }
 0x2dc   : > { %6572 = vst [vmem:[%s8863_s24 + $0x300] sm:$0xff] %v6428_v49  ;;  %v6429_v61 = vadd.f32 %v5072_v18, %v2049_v59  ;;  %v5074_v25 = vadd.f32 %v5073_v21, %v4921_v4  ;;  %5904 = vmatpush2.bf16.msra.mxu1 %v7824_v16  ;;  %v2061_v16 = vld [vmem:[%s8863_s24 + $0x368] sm:$0xff]  ;;  %v2067_v20 = vld [vmem:[%s8863_s24 + $0x398] sm:$0xff] }
 0x2dd   : > { %5527 = vmatmul.mubr.bf16.gmra.mxu0 %v12607_v37  ;;  %v5075_v0 = vpop.f32.mrf.mxu1  ;;  %6179 = vmatprep.subr.bf16.mxu1 %v7832_v47  ;;  %v12647_v37 = vld [vmem:[#allocation43_spill] sm:$0xff] }
 0x2de   : > { %6573 = vst [vmem:[%s8863_s24 + $0x308] sm:$0xff] %v6429_v61  ;;  %v6434_v30 = vadd.f32 %v5074_v25, %v2054_v34  ;;  %v5076_v24 = vadd.f32 %v5075_v0, %v4923_v11  ;;  %5536 = vmatprep.mubr.bf16.mxu0 %v12608_v50  ;;  %v4926_v63 = vpop.f32.mrf.mxu0  ;;  %v12611_v11 = vld [vmem:[#allocation118_spill] sm:$0xff]  ;;  %v2066_v61 = vld [vmem:[%s8863_s24 + $0x390] sm:$0xff] }
 0x2df   : > { %5680 = vmatmul.mubr.bf16.gmra.mxu1 %v12609_v45  ;;  %v4927_v21 = vadd.f32 %v4926_v63, %v11100_v56  ;;  %v12612_v63 = vld [vmem:[#allocation120_spill] sm:$0xff] }
 0x2e0   : > { %6578 = vst [vmem:[%s8863_s24 + $0x330] sm:$0xff] %v6434_v30  ;;  %v6435_v33 = vadd.f32 %v5076_v24, %v2055_v29  ;;  %5689 = vmatprep.mubr.bf16.mxu1 %v12610_v22  ;;  %v5079_v59 = vpop.f32.mrf.mxu1  ;;  %v4928_v3 = vpop.f32.mrf.mxu0  ;;  %v7866_v22 = vld [vmem:[%s8842_s10 + $0x940] ss:$24 sps:$4 sm:$0xff]  }
 0x2e1   : > { %v5080_v25 = vadd.f32 %v5079_v59, %v4927_v21  ;;  %v4929_v4 = vadd.f32 %v4928_v3, %v11103_v7 }
 0x2e2   : > { %6579 = vst [vmem:[%s8863_s24 + $0x338] sm:$0xff] %v6435_v33  ;;  %v5081_v49 = vpop.f32.mrf.mxu1  ;;  %v4930_v18 = vpop.f32.mrf.mxu0  ;;  %v12613_v33 = vld [vmem:[#allocation119_spill] sm:$0xff] }
 0x2e3   : > { %v6440_v56 = vadd.f32 %v5080_v25, %v2060_v55  ;;  %v5082_v47 = vadd.f32 %v5081_v49, %v4929_v4  ;;  %v4931_v34 = vadd.f32 %v4930_v18, %v11110_v52  ;;  %v12614_v55 = vld [vmem:[#allocation121_spill] sm:$0xff]  ;;  %v12615_v25 = vld [vmem:[#allocation128_spill] sm:$0xff] }
 0x2e4   : > { %v5083_v29 = vpop.f32.mrf.mxu1  ;;  %v4932_v0 = vpop.f32.mrf.mxu0 }
 0x2e5   : > { %5537 = vmatmul.mubr.bf16.gmra.mxu0 %v12611_v11  ;;  %6584 = vst [vmem:[%s8863_s24 + $0x360] sm:$0xff] %v6440_v56  ;;  %v6441_v7 = vadd.f32 %v5082_v47, %v2061_v16  ;;  %v5084_v30 = vadd.f32 %v5083_v29, %v4931_v34  ;;  %v4933_v24 = vadd.f32 %v4932_v0, %v4780_v57  ;;  %v2072_v16 = vld [vmem:[%s8863_s24 + $0x3c0] sm:$0xff]  ;;  %v12617_v47 = vld [vmem:[#allocation129_spill] sm:$0xff]  ;;  %v12643_v11 = vld [vmem:[#allocation39_spill] sm:$0xff] }
 0x2e6   : > { %5546 = vmatprep.mubr.bf16.mxu0 %v12612_v63  ;;  %v5085_v19 = vpop.f32.mrf.mxu1  ;;  %v12616_v56 = vld [vmem:[#allocation122_spill] sm:$0xff] }
 0x2e7   : > { %5690 = vmatmul.mubr.bf16.gmra.mxu1 %v12613_v33  ;;  %6585 = vst [vmem:[%s8863_s24 + $0x368] sm:$0xff] %v6441_v7  ;;  %v6446_v52 = vadd.f32 %v5084_v30, %v2066_v61  ;;  %v5086_v21 = vadd.f32 %v5085_v19, %v4933_v24  ;;  %v2073_v61 = vld [vmem:[%s8863_s24 + $0x3c8] sm:$0xff]  ;;  %v12618_v7 = vld [vmem:[#allocation124_spill] sm:$0xff] }
 0x2e8   : > { %5699 = vmatprep.mubr.bf16.mxu1 %v12614_v55  ;;  %v12619_v30 = vld [vmem:[#allocation131_spill] sm:$0xff]  ;;  %v12620_v24 = vld [vmem:[#allocation132_spill] sm:$0xff]  ;;  %v2079_v55 = vld [vmem:[%s8863_s24 + $0x3f8] sm:$0xff] }
 0x2e9   : > { %6590 = vst [vmem:[%s8863_s24 + $0x390] sm:$0xff] %v6446_v52  ;;  %v6447_v59 = vadd.f32 %v5086_v21, %v2067_v20  ;;  %v4936_v3 = vpop.f32.mrf.mxu0  ;;  %v4790_v20 = vadd.f32 %v12620_v24, %v12619_v30  ;;  %v12621_v21 = vld [vmem:[#allocation130_spill] sm:$0xff]  ;;  %v12625_v24 = vld [vmem:[#allocation133_spill] sm:$0xff] }
 0x2ea   : > { %v4937_v4 = vadd.f32 %v4936_v3, %v12615_v25  ;;  %v12622_v3 = vld [vmem:[#allocation123_spill] sm:$0xff]  ;;  %v2078_v25 = vld [vmem:[%s8863_s24 + $0x3f0] sm:$0xff] }
 0x2eb   : > { %6591 = vst [vmem:[%s8863_s24 + $0x398] sm:$0xff] %v6447_v59  ;;  %v5089_v49 = vpop.f32.mrf.mxu1  ;;  %v4938_v18 = vpop.f32.mrf.mxu0 }
 0x2ec   : > { %v5090_v57 = vadd.f32 %v5089_v49, %v4937_v4  ;;  %v4939_v34 = vadd.f32 %v4938_v18, %v12617_v47 }
 0x2ed   : > { %5547 = vmatmul.mubr.bf16.gmra.mxu0 %v12616_v56  ;;  %v5091_v29 = vpop.f32.mrf.mxu1  ;;  %v4940_v0 = vpop.f32.mrf.mxu0  ;;  %v12623_v56 = vld [vmem:[#allocation125_spill] sm:$0xff] }
 0x2ee   : > { %5556 = vmatprep.mubr.bf16.mxu0 %v12618_v7  ;;  %v6452_v19 = vadd.f32 %v5090_v57, %v2072_v16  ;;  %v5092_v52 = vadd.f32 %v5091_v29, %v4939_v34  ;;  %v4941_v59 = vadd.f32 %v4940_v0, %v12621_v21  ;;  %v12624_v0 = vld [vmem:[#allocation126_spill] sm:$0xff] }
 0x2ef   : > { %5700 = vmatmul.mubr.bf16.gmra.mxu1 %v12622_v3  ;;  %v5093_v4 = vpop.f32.mrf.mxu1  ;;  %v4942_v49 = vpop.f32.mrf.mxu0 }
 0x2f0   : > { %6596 = vst [vmem:[%s8863_s24 + $0x3c0] sm:$0xff] %v6452_v19  ;;  %v6453_v18 = vadd.f32 %v5092_v52, %v2073_v61  ;;  %v5094_v47 = vadd.f32 %v5093_v4, %v4941_v59  ;;  %v4943_v7 = vadd.f32 %v4942_v49, %v4790_v20  ;;  %5709 = vmatprep.mubr.bf16.mxu1 %v12623_v56  ;;  %v12626_v61 = vld [vmem:[#allocation26_spill] sm:$0xff]  ;;  %v12627_v59 = vld [vmem:[#allocation127_spill] sm:$0xff]  ;;  %v12632_v56 = vld [vmem:[#allocation28_spill] sm:$0xff] }
 0x2f1   : > { %v5095_v30 = vpop.f32.mrf.mxu1  ;;  %v2084_v52 = vld [vmem:[%s8863_s24 + $0x420] sm:$0xff]  ;;  %v12629_v49 = vld [vmem:[#allocation27_spill] sm:$0xff] }
 0x2f2   : > { %6597 = vst [vmem:[%s8863_s24 + $0x3c8] sm:$0xff] %v6453_v18  ;;  %v6458_v16 = vadd.f32 %v5094_v47, %v2078_v25  ;;  %v5096_v57 = vadd.f32 %v5095_v30, %v4943_v7  ;;  %v12628_v7 = vld [vmem:[#allocation134_spill] sm:$0xff]  ;;  %v2085_v18 = vld [vmem:[%s8863_s24 + $0x428] sm:$0xff] }
 0x2f3   : > { %v12630_v30 = vld [vmem:[#allocation135_spill] sm:$0xff] }
 0x2f4   : > { %6602 = vst [vmem:[%s8863_s24 + $0x3f0] sm:$0xff] %v6458_v16  ;;  %v6459_v34 = vadd.f32 %v5096_v57, %v2079_v55  ;;  %v7827_v57 = vld [vmem:[%s8842_s10 + $0x760] ss:$24 sps:$4 sm:$0xff]  }
 0x2f5   : > { %v4946_v29 = vpop.f32.mrf.mxu0  ;;  %5557 = vmatmul.mubr.bf16.gmra.mxu0 %v12624_v0 }
 0x2f6   : > { %v4947_v19 = vadd.f32 %v4946_v29, %v12625_v24  ;;  %5752 = vmatprep.mubr.bf16.mxu0 %v12626_v61  ;;  %6603 = vst [vmem:[%s8863_s24 + $0x3f8] sm:$0xff] %v6459_v34  ;;  %v7835_v61 = vld [vmem:[%s8842_s10 + $0x734] ss:$24 sps:$4 sm:$0xff]  }
 0x2f7   : > { %v4948_v20 = vpop.f32.mrf.mxu0  ;;  %v5099_v21 = vpop.f32.mrf.mxu1  ;;  %5710 = vmatmul.mubr.bf16.gmra.mxu1 %v12627_v59  ;;  %v2090_v59 = vld [vmem:[%s8863_s24 + $0x450] sm:$0xff] }
 0x2f8   : > { %v4949_v25 = vadd.f32 %v4948_v20, %v12628_v7  ;;  %v5100_v55 = vadd.f32 %v5099_v21, %v4947_v19  ;;  %5905 = vmatprep.mubr.bf16.mxu1 %v12629_v49  ;;  %v12631_v19 = vld [vmem:[#allocation136_spill] sm:$0xff] }
 0x2f9   : > { %v4950_v4 = vpop.f32.mrf.mxu0  ;;  %v5101_v47 = vpop.f32.mrf.mxu1 }
 0x2fa   : > { %v4951_v16 = vadd.f32 %v4950_v4, %v12630_v30  ;;  %v6464_v34 = vadd.f32 %v5100_v55, %v2084_v52  ;;  %v5102_v29 = vadd.f32 %v5101_v47, %v4949_v25  ;;  %v7830_v4 = vld [vmem:[%s8842_s10 + $0xa60] ss:$24 sps:$4 sm:$0xff]   ;;  %v7833_v25 = vld [vmem:[%s8842_s10 + $0x730] ss:$24 sps:$4 sm:$0xff]   ;;  %v7838_v30 = vld [vmem:[%s8842_s10 + $0xa34] ss:$24 sps:$4 sm:$0xff]  }
 0x2fb   : > { %v4952_v24 = vpop.f32.mrf.mxu0  ;;  %v5103_v20 = vpop.f32.mrf.mxu1  ;;  %v2091_v52 = vld [vmem:[%s8863_s24 + $0x458] sm:$0xff]  ;;  %v12633_v47 = vld [vmem:[#allocation30_spill] sm:$0xff] }
 0x2fc   : > { %v4953_v21 = vadd.f32 %v4952_v24, %v12631_v19  ;;  %6608 = vst [vmem:[%s8863_s24 + $0x420] sm:$0xff] %v6464_v34  ;;  %v6465_v7 = vadd.f32 %v5102_v29, %v2085_v18  ;;  %v5104_v49 = vadd.f32 %v5103_v20, %v4951_v16  ;;  %v7841_v16 = vld [vmem:[%s8842_s10 + $0x704] ss:$24 sps:$4 sm:$0xff]   ;;  %v12635_v19 = vld [vmem:[#allocation31_spill] sm:$0xff] }
 0x2fd   : > { %v5142_v0 = vpop.f32.mrf.mxu0  ;;  %5753 = vmatmul.mubr.bf16.vlgmr.msra.gmra.mxu0 %v12632_v56  ;;  %v5105_v55 = vpop.f32.mrf.mxu1  ;;  %v12634_v34 = vld [vmem:[#allocation29_spill] sm:$0xff] }
 0x2fe   : > { %6027 = vmatpush1.bf16.msra.mxu0 %v7827_v57  ;;  %5762 = vmatprep.mubr.bf16.mxu0 %v12633_v47  ;;  %6609 = vst [vmem:[%s8863_s24 + $0x428] sm:$0xff] %v6465_v7  ;;  %v6470_v3 = vadd.f32 %v5104_v49, %v2090_v59  ;;  %v5106_v24 = vadd.f32 %v5105_v55, %v4953_v21  ;;  %v7836_v59 = vld [vmem:[%s8842_s10 + $0xa30] ss:$24 sps:$4 sm:$0xff]   ;;  %v7844_v7 = vld [vmem:[%s8842_s10 + $0xa04] ss:$24 sps:$4 sm:$0xff]  }
 0x2ff   : > { %v5144_v18 = vpop.f32.mrf.mxu0  ;;  %6028 = vmatprep.subr.bf16.mxu0 %v7835_v61  ;;  %v5295_v56 = vpop.f32.mrf.mxu1  ;;  %5906 = vmatmul.mubr.bf16.vlgmr.msra.gmra.mxu1 %v12634_v34  ;;  %v7839_v61 = vld [vmem:[%s8842_s10 + $0x700] ss:$24 sps:$4 sm:$0xff]   ;;  %v12637_v34 = vld [vmem:[#allocation34_spill] sm:$0xff] }
 0x300   : > { %6614 = vst [vmem:[%s8863_s24 + $0x450] sm:$0xff] %v6470_v3  ;;  %v6471_v57 = vadd.f32 %v5106_v24, %v2091_v52  ;;  %v11459_v29 = vadd.f32 %v5295_v56, %v5142_v0  ;;  %6180 = vmatpush1.bf16.msra.mxu1 %v7830_v4  ;;  %5915 = vmatprep.mubr.bf16.mxu1 %v12635_v19  ;;  %v7847_v0 = vld [vmem:[%s8842_s10 + $0x6d4] ss:$24 sps:$4 sm:$0xff]   ;;  %v7845_v24 = vld [vmem:[%s8842_s10 + $0x6d0] ss:$24 sps:$4 sm:$0xff]   ;;  %v12638_v19 = vld [vmem:[#allocation33_spill] sm:$0xff] }
 0x301   : > { %v5146_v20 = vpop.f32.mrf.mxu0  ;;  %v5297_v21 = vpop.f32.mrf.mxu1  ;;  %6181 = vmatprep.subr.bf16.mxu1 %v7838_v30  ;;  %v12636_v47 = vld [vmem:[#allocation32_spill] sm:$0xff] }
 0x302   : > { %6029 = vmatpush1.bf16.msra.mxu0 %v7833_v25  ;;  %6615 = vst [vmem:[%s8863_s24 + $0x458] sm:$0xff] %v6471_v57  ;;  %v11466_v49 = vadd.f32 %v5297_v21, %v5144_v18  ;;  %v7842_v25 = vld [vmem:[%s8842_s10 + $0xa00] ss:$24 sps:$4 sm:$0xff]   ;;  %v7850_v56 = vld [vmem:[%s8842_s10 + $0x9d4] ss:$24 sps:$4 sm:$0xff]  }
 0x303   : > { %v5148_v3 = vpop.f32.mrf.mxu0  ;;  %6030 = vmatprep.subr.bf16.mxu0 %v7841_v16  ;;  %v5299_v4 = vpop.f32.mrf.mxu1  ;;  %v7853_v57 = vld [vmem:[%s8842_s10 + $0x6a4] ss:$24 sps:$4 sm:$0xff]  }
 0x304   : > { %v11469_v52 = vadd.f32 %v5299_v4, %v5146_v20  ;;  %6182 = vmatpush1.bf16.msra.mxu1 %v7836_v59  ;;  %v7851_v4 = vld [vmem:[%s8842_s10 + $0x6a0] ss:$24 sps:$4 sm:$0xff]  }
 0x305   : > { %v5152_v55 = vpop.f32.mrf.mxu0  ;;  %5763 = vmatmul.mubr.bf16.gmra.mxu0 %v12636_v47  ;;  %v5301_v30 = vpop.f32.mrf.mxu1  ;;  %6183 = vmatprep.subr.bf16.mxu1 %v7844_v7  ;;  %v7848_v7 = vld [vmem:[%s8842_s10 + $0x9d0] ss:$24 sps:$4 sm:$0xff]  }
 0x306   : > { %6031 = vmatpush1.bf16.msra.mxu0 %v7839_v61  ;;  %v11475_v18 = vadd.f32 %v5301_v30, %v5148_v3  ;;  %5772 = vmatprep.mubr.bf16.mxu0 %v12637_v34  ;;  %v12639_v61 = vld [vmem:[#allocation35_spill] sm:$0xff]  ;;  %v7856_v30 = vld [vmem:[%s8842_s10 + $0x9a4] ss:$24 sps:$4 sm:$0xff]  }
 0x307   : > { %v5154_v16 = vpop.f32.mrf.mxu0  ;;  %6032 = vmatprep.subr.bf16.mxu0 %v7847_v0  ;;  %v5305_v20 = vpop.f32.mrf.mxu1  ;;  %5916 = vmatmul.mubr.bf16.gmra.mxu1 %v12638_v19  ;;  %v7859_v34 = vld [vmem:[%s8842_s10 + $0x674] ss:$24 sps:$4 sm:$0xff]  }
 0x308   : > { %v11480_v59 = vadd.f32 %v5305_v20, %v5152_v55  ;;  %5925 = vmatprep.mubr.bf16.mxu1 %v12639_v61  ;;  %6184 = vmatpush1.bf16.msra.mxu1 %v7842_v25  ;;  %v12640_v25 = vld [vmem:[#allocation36_spill] sm:$0xff] }
 0x309   : > { %v5156_v21 = vpop.f32.mrf.mxu0  ;;  %v5307_v3 = vpop.f32.mrf.mxu1  ;;  %6185 = vmatprep.subr.bf16.mxu1 %v7850_v56  ;;  %v7854_v61 = vld [vmem:[%s8842_s10 + $0x9a0] ss:$24 sps:$4 sm:$0xff]   ;;  %v12641_v56 = vld [vmem:[#allocation38_spill] sm:$0xff] }
 0x30a   : > { %6033 = vmatpush1.bf16.msra.mxu0 %v7845_v24  ;;  %v11485_v0 = vadd.f32 %v5307_v3, %v5154_v16  ;;  %v7857_v16 = vld [vmem:[%s8842_s10 + $0x670] ss:$24 sps:$4 sm:$0xff]   ;;  %v7862_v3 = vld [vmem:[%s8842_s10 + $0x974] ss:$24 sps:$4 sm:$0xff]  }
 0x30b   : > { %v5158_v47 = vpop.f32.mrf.mxu0  ;;  %6034 = vmatprep.subr.bf16.mxu0 %v7853_v57  ;;  %v5309_v55 = vpop.f32.mrf.mxu1 }
 0x30c   : > { %v11489_v20 = vadd.f32 %v5309_v55, %v5156_v21  ;;  %6186 = vmatpush1.bf16.msra.mxu1 %v7848_v7  ;;  %v7865_v21 = vld [vmem:[%s8842_s10 + $0x644] ss:$24 sps:$4 sm:$0xff]  }
 0x30d   : > { %v5162_v19 = vpop.f32.mrf.mxu0  ;;  %5773 = vmatmul.mubr.bf16.gmra.mxu0 %v12640_v25  ;;  %v5311_v24 = vpop.f32.mrf.mxu1  ;;  %6187 = vmatprep.subr.bf16.mxu1 %v7856_v30  ;;  %v12642_v25 = vld [vmem:[#allocation37_spill] sm:$0xff] }
 0x30e   : > { %5782 = vmatprep.mubr.bf16.mxu0 %v12641_v56  ;;  %6035 = vmatpush1.bf16.msra.mxu0 %v7851_v4  ;;  %v11496_v57 = vadd.f32 %v5311_v24, %v5158_v47  ;;  %v7860_v4 = vld [vmem:[%s8842_s10 + $0x970] ss:$24 sps:$4 sm:$0xff]   ;;  %v7863_v47 = vld [vmem:[%s8842_s10 + $0x640] ss:$24 sps:$4 sm:$0xff]   ;;  %v7868_v24 = vld [vmem:[%s8842_s10 + $0x944] ss:$24 sps:$4 sm:$0xff]  }
 0x30f   : > { %v5164_v33 = vpop.f32.mrf.mxu0  ;;  %6036 = vmatprep.subr.bf16.mxu0 %v7859_v34  ;;  %v5315_v55 = vpop.f32.mrf.mxu1  ;;  %5926 = vmatmul.mubr.bf16.gmra.mxu1 %v12642_v25  ;;  %v7871_v25 = vld [vmem:[%s8842_s10 + $0x614] ss:$24 sps:$4 sm:$0xff]  }
 0x310   : > { %v11500_v7 = vadd.f32 %v5315_v55, %v5162_v19  ;;  %5935 = vmatprep.mubr.bf16.mxu1 %v12643_v11  ;;  %6188 = vmatpush1.bf16.msra.mxu1 %v7854_v61  ;;  %v12644_v61 = vld [vmem:[#allocation40_spill] sm:$0xff] }
 0x311   : > { %v5166_v63 = vpop.f32.mrf.mxu0  ;;  %v5317_v56 = vpop.f32.mrf.mxu1  ;;  %6189 = vmatprep.subr.bf16.mxu1 %v7862_v3  ;;  %v12645_v3 = vld [vmem:[#allocation42_spill] sm:$0xff] }
 0x312   : > { %6037 = vmatpush1.bf16.msra.mxu0 %v7857_v16  ;;  %v11505_v30 = vadd.f32 %v5317_v56, %v5164_v33  ;;  %v7869_v33 = vld [vmem:[%s8842_s10 + $0x610] ss:$24 sps:$4 sm:$0xff]   ;;  %v7874_v56 = vld [vmem:[%s8842_s10 + $0x914] ss:$24 sps:$4 sm:$0xff]  }
 0x313   : > { %v5168_v34 = vpop.f32.mrf.mxu0  ;;  %6038 = vmatprep.subr.bf16.mxu0 %v7865_v21  ;;  %v5319_v19 = vpop.f32.mrf.mxu1 }
 0x314   : > { %v11509_v55 = vadd.f32 %v5319_v19, %v5166_v63  ;;  %6190 = vmatpush1.bf16.msra.mxu1 %v7860_v4  ;;  %v7877_v63 = vld [vmem:[%s8842_s10 + $0x8e4] ss:$24 sps:$4 sm:$0xff]  }
 0x315   : > { %v5172_v11 = vpop.f32.mrf.mxu0  ;;  %5783 = vmatmul.mubr.bf16.gmra.mxu0 %v12644_v61  ;;  %v5321_v16 = vpop.f32.mrf.mxu1  ;;  %6191 = vmatprep.subr.bf16.mxu1 %v7868_v24  ;;  %v12646_v61 = vld [vmem:[#allocation41_spill] sm:$0xff] }
 0x316   : > { %5792 = vmatprep.mubr.bf16.mxu0 %v12645_v3  ;;  %6039 = vmatpush1.bf16.msra.mxu0 %v7863_v47  ;;  %v11516_v21 = vadd.f32 %v5321_v16, %v5168_v34  ;;  %v7872_v47 = vld [vmem:[%s8842_s10 + $0x910] ss:$24 sps:$4 sm:$0xff]   ;;  %v7875_v34 = vld [vmem:[%s8842_s10 + $0x8e0] ss:$24 sps:$4 sm:$0xff]   ;;  %v7880_v16 = vld [vmem:[%s8842_s10 + $0xbe4] ss:$24 sps:$4 sm:$0xff]  }
 0x317   : > { %v5174_v45 = vpop.f32.mrf.mxu0  ;;  %6040 = vmatprep.subr.bf16.mxu0 %v7871_v25  ;;  %v5325_v19 = vpop.f32.mrf.mxu1  ;;  %5936 = vmatmul.mubr.bf16.gmra.mxu1 %v12646_v61  ;;  %v7883_v61 = vld [vmem:[%s8842_s10 + $0x8b4] ss:$24 sps:$4 sm:$0xff]  }
 0x318   : > { %v11520_v4 = vadd.f32 %v5325_v19, %v5172_v11  ;;  %5945 = vmatprep.mubr.bf16.mxu1 %v12647_v37  ;;  %6192 = vmatpush1.bf16.msra.mxu1 %v7866_v22  ;;  %v12648_v22 = vld [vmem:[#allocation44_spill] sm:$0xff] }
 0x319   : > { %v5176_v50 = vpop.f32.mrf.mxu0  ;;  %v5327_v3 = vpop.f32.mrf.mxu1  ;;  %6193 = vmatprep.subr.bf16.mxu1 %v7874_v56  ;;  %v12649_v56 = vld [vmem:[#allocation46_spill] sm:$0xff] }
 0x31a   : > { %6041 = vmatpush1.bf16.msra.mxu0 %v7869_v33  ;;  %v11525_v24 = vadd.f32 %v5327_v3, %v5174_v45  ;;  %v7881_v45 = vld [vmem:[%s8842_s10 + $0x8b0] ss:$24 sps:$4 sm:$0xff]   ;;  %v7886_v3 = vld [vmem:[%s8842_s10 + $0xbb4] ss:$24 sps:$4 sm:$0xff]  }
 0x31b   : > { %v5178_v25 = vpop.f32.mrf.mxu0  ;;  %6042 = vmatprep.subr.bf16.mxu0 %v7877_v63  ;;  %v5329_v11 = vpop.f32.mrf.mxu1 }
 0x31c   : > { %v11529_v19 = vadd.f32 %v5329_v11, %v5176_v50  ;;  %6194 = vmatpush1.bf16.msra.mxu1 %v7872_v47  ;;  %v7889_v50 = vld [vmem:[%s8842_s10 + $0x884] ss:$24 sps:$4 sm:$0xff]  }
 0x31d   : > { %v5182_v37 = vpop.f32.mrf.mxu0  ;;  %5793 = vmatmul.mubr.bf16.gmra.mxu0 %v12648_v22  ;;  %v5331_v33 = vpop.f32.mrf.mxu1  ;;  %6195 = vmatprep.subr.bf16.mxu1 %v7880_v16  ;;  %v12650_v22 = vld [vmem:[#allocation45_spill] sm:$0xff] }
 0x31e   : > { %5802 = vmatprep.mubr.bf16.mxu0 %v12649_v56  ;;  %6043 = vmatpush2.bf16.msra.mxu0 %v7875_v34  ;;  %v11536_v63 = vadd.f32 %v5331_v33, %v5178_v25  ;;  %v7884_v34 = vld [vmem:[%s8842_s10 + $0xbb0] ss:$24 sps:$4 sm:$0xff]   ;;  %v7887_v25 = vld [vmem:[%s8842_s10 + $0x880] ss:$24 sps:$4 sm:$0xff]   ;;  %v7892_v33 = vld [vmem:[%s8842_s10 + $0xb84] ss:$24 sps:$4 sm:$0xff]  }
 0x31f   : > { %v5184_v9 = vpop.f32.mrf.mxu0  ;;  %6044 = vmatprep.subr.bf16.mxu0 %v7883_v61  ;;  %v5335_v11 = vpop.f32.mrf.mxu1  ;;  %5946 = vmatmul.mubr.bf16.gmra.mxu1 %v12650_v22  ;;  %v7895_v22 = vld [vmem:[%s8842_s10 + $0x854] ss:$24 sps:$4 sm:$0xff]  }
 0x320   : > { %v11540_v47 = vadd.f32 %v5335_v11, %v5182_v37  ;;  %5955 = vmatprep.mubr.bf16.mxu1 %v12651_v42  ;;  %6196 = vmatpush2.bf16.msra.mxu1 %v7878_v39  ;;  %v12652_v39 = vld [vmem:[#allocation48_spill] sm:$0xff] }
 0x321   : > { %v5186_v5 = vpop.f32.mrf.mxu0  ;;  %v5337_v56 = vpop.f32.mrf.mxu1  ;;  %6197 = vmatprep.subr.bf16.mxu1 %v7886_v3  ;;  %v12653_v3 = vld [vmem:[#allocation50_spill] sm:$0xff] }
 0x322   : > { %6045 = vmatpush2.bf16.msra.mxu0 %v7881_v45  ;;  %v11545_v16 = vadd.f32 %v5337_v56, %v5184_v9  ;;  %v7893_v9 = vld [vmem:[%s8842_s10 + $0x850] ss:$24 sps:$4 sm:$0xff]   ;;  %v7898_v56 = vld [vmem:[%s8842_s10 + $0xb54] ss:$24 sps:$4 sm:$0xff]  }
 0x323   : > { %v5188_v61 = vpop.f32.mrf.mxu0  ;;  %6046 = vmatprep.subr.bf16.mxu0 %v7889_v50  ;;  %v5339_v37 = vpop.f32.mrf.mxu1 }
 0x324   : > { %v11549_v11 = vadd.f32 %v5339_v37, %v5186_v5  ;;  %6198 = vmatpush2.bf16.msra.mxu1 %v7884_v34  ;;  %v7901_v5 = vld [vmem:[%s8842_s10 + $0x824] ss:$24 sps:$4 sm:$0xff]  }
 0x325   : > { %v5192_v42 = vpop.f32.mrf.mxu0  ;;  %5803 = vmatmul.mubr.bf16.gmra.mxu0 %v12652_v39  ;;  %v5341_v45 = vpop.f32.mrf.mxu1  ;;  %6199 = vmatprep.subr.bf16.mxu1 %v7892_v33  ;;  %v12655_v39 = vld [vmem:[#allocation49_spill] sm:$0xff] }
 0x326   : > { %5812 = vmatprep.mubr.bf16.mxu0 %v12653_v3  ;;  %6047 = vmatpush2.bf16.msra.mxu0 %v7887_v25  ;;  %v11556_v50 = vadd.f32 %v5341_v45, %v5188_v61  ;;  %v7896_v25 = vld [vmem:[%s8842_s10 + $0xb50] ss:$24 sps:$4 sm:$0xff]   ;;  %v7899_v61 = vld [vmem:[%s8842_s10 + $0x820] ss:$24 sps:$4 sm:$0xff]   ;;  %v7904_v45 = vld [vmem:[%s8842_s10 + $0xb24] ss:$24 sps:$4 sm:$0xff]  }
 0x327   : > { %v5194_v53 = vpop.f32.mrf.mxu0  ;;  %6048 = vmatprep.subr.bf16.mxu0 %v7895_v22  ;;  %v5345_v37 = vpop.f32.mrf.mxu1  ;;  %5956 = vmatmul.mubr.bf16.gmra.mxu1 %v12655_v39  ;;  %v7907_v39 = vld [vmem:[%s8842_s10 + $0x7f4] ss:$24 sps:$4 sm:$0xff]  }
 0x328   : > { %12654 = vst [vmem:[#allocation102_spill] sm:$0xff] %v11556_v50  ;;  %v11560_v34 = vadd.f32 %v5345_v37, %v5192_v42  ;;  %5965 = vmatprep.mubr.bf16.mxu1 %v12657_v40  ;;  %6200 = vmatpush2.bf16.msra.mxu1 %v7890_v28  ;;  %v12660_v28 = vld [vmem:[#allocation52_spill] sm:$0xff] }
 0x329   : > { %v5196_v54 = vpop.f32.mrf.mxu0  ;;  %v5347_v3 = vpop.f32.mrf.mxu1  ;;  %6201 = vmatprep.subr.bf16.mxu1 %v7898_v56  ;;  %v12661_v56 = vld [vmem:[#allocation54_spill] sm:$0xff] }
 0x32a   : > { %12656 = vst [vmem:[#allocation103_spill] sm:$0xff] %v11560_v34  ;;  %6049 = vmatpush2.bf16.msra.mxu0 %v7893_v9  ;;  %v11565_v33 = vadd.f32 %v5347_v3, %v5194_v53  ;;  %v7902_v34 = vld [vmem:[%s8842_s10 + $0xb20] ss:$24 sps:$4 sm:$0xff]   ;;  %v7905_v53 = vld [vmem:[%s8842_s10 + $0x7f0] ss:$24 sps:$4 sm:$0xff]  }
 0x32b   : > { %v5198_v22 = vpop.f32.mrf.mxu0  ;;  %6050 = vmatprep.subr.bf16.mxu0 %v7901_v5  ;;  %v5349_v42 = vpop.f32.mrf.mxu1  ;;  %v7910_v3 = vld [vmem:[%s8842_s10 + $0xaf4] ss:$24 sps:$4 sm:$0xff]  }
 0x32c   : > { %12658 = vst [vmem:[#allocation63_spill] sm:$0xff] %v11565_v33  ;;  %v11569_v37 = vadd.f32 %v5349_v42, %v5196_v54  ;;  %6202 = vmatpush2.bf16.msra.mxu1 %v7896_v25  ;;  %v7913_v54 = vld [vmem:[%s8842_s10 + $0x7c4] ss:$24 sps:$4 sm:$0xff]  }
 0x32d   : > { %v5202_v40 = vpop.f32.mrf.mxu0  ;;  %5813 = vmatmul.mubr.bf16.gmra.mxu0 %v12660_v28  ;;  %v5351_v9 = vpop.f32.mrf.mxu1  ;;  %6203 = vmatprep.subr.bf16.mxu1 %v7904_v45  ;;  %v12663_v28 = vld [vmem:[#allocation53_spill] sm:$0xff] }
 0x32e   : > { %12659 = vst [vmem:[#allocation64_spill] sm:$0xff] %v11569_v37  ;;  %5822 = vmatprep.mubr.bf16.mxu0 %v12661_v56  ;;  %6051 = vmatpush2.bf16.msra.mxu0 %v7899_v61  ;;  %v11576_v5 = vadd.f32 %v5351_v9, %v5198_v22  ;;  %v7908_v61 = vld [vmem:[%s8842_s10 + $0xaf0] ss:$24 sps:$4 sm:$0xff]   ;;  %v7911_v22 = vld [vmem:[%s8842_s10 + $0x7c0] ss:$24 sps:$4 sm:$0xff]  }
 0x32f   : > { %v5204_v33 = vpop.f32.mrf.mxu0  ;;  %6052 = vmatprep.subr.bf16.mxu0 %v7907_v39  ;;  %v5355_v42 = vpop.f32.mrf.mxu1  ;;  %5966 = vmatmul.mubr.bf16.gmra.mxu1 %v12663_v28  ;;  %v7916_v9 = vld [vmem:[%s8842_s10 + $0xac4] ss:$24 sps:$4 sm:$0xff]   ;;  %v7919_v28 = vld [vmem:[%s8842_s10 + $0x794] ss:$24 sps:$4 sm:$0xff]  }
 0x330   : > { %12662 = vst [vmem:[#allocation66_spill] sm:$0xff] %v11576_v5  ;;  %v11580_v25 = vadd.f32 %v5355_v42, %v5202_v40  ;;  %5975 = vmatprep.mubr.bf16.mxu1 %v12665_v35  ;;  %6204 = vmatpush2.bf16.msra.mxu1 %v7902_v34  ;;  %v12668_v35 = vld [vmem:[#allocation56_spill] sm:$0xff]  ;;  %v7917_v5 = vld [vmem:[%s8842_s10 + $0x790] ss:$24 sps:$4 sm:$0xff]  }
 0x331   : > { %v5206_v37 = vpop.f32.mrf.mxu0  ;;  %v5357_v56 = vpop.f32.mrf.mxu1  ;;  %6205 = vmatprep.subr.bf16.mxu1 %v7910_v3  ;;  %v7914_v34 = vld [vmem:[%s8842_s10 + $0xac0] ss:$24 sps:$4 sm:$0xff]   ;;  %v12669_v3 = vld [vmem:[#allocation58_spill] sm:$0xff] }
 0x332   : > { %12664 = vst [vmem:[#allocation65_spill] sm:$0xff] %v11580_v25  ;;  %6053 = vmatpush2.bf16.msra.mxu0 %v7905_v53  ;;  %v11585_v45 = vadd.f32 %v5357_v56, %v5204_v33  ;;  %v7922_v33 = vld [vmem:[%s8842_s10 + $0xa94] ss:$24 sps:$4 sm:$0xff]  }
 0x333   : > { %v5208_v39 = vpop.f32.mrf.mxu0  ;;  %6054 = vmatprep.subr.bf16.mxu0 %v7913_v54  ;;  %v5359_v40 = vpop.f32.mrf.mxu1 }
 0x334   : > { %12666 = vst [vmem:[#allocation67_spill] sm:$0xff] %v11585_v45  ;;  %v11589_v42 = vadd.f32 %v5359_v40, %v5206_v37  ;;  %6206 = vmatpush2.bf16.msra.mxu1 %v7908_v61  ;;  %v12670_v37 = vld [vmem:[#allocation57_spill] sm:$0xff]  ;;  %v12672_v61 = vld [vmem:[#allocation59_spill] sm:$0xff] }
 0x335   : > { %v5212_v25 = vpop.f32.mrf.mxu0  ;;  %5823 = vmatmul.mubr.bf16.gmra.mxu0 %v12668_v35  ;;  %v5361_v53 = vpop.f32.mrf.mxu1  ;;  %6207 = vmatprep.subr.bf16.mxu1 %v7916_v9 }
 0x336   : > { %12667 = vst [vmem:[#allocation108_spill] sm:$0xff] %v11589_v42  ;;  %5832 = vmatprep.mubr.bf16.mxu0 %v12669_v3  ;;  %6055 = vmatpush2.bf16.msra.mxu0 %v7911_v22  ;;  %v11596_v56 = vadd.f32 %v5361_v53, %v5208_v39  ;;  %v7920_v42 = vld [vmem:[%s8842_s10 + $0xa90] ss:$24 sps:$4 sm:$0xff]   ;;  %s8586_s10 = smov [#allocation10]  }
 0x337   : > { %v5214_v54 = vpop.f32.mrf.mxu0  ;;  %6056 = vmatprep.subr.bf16.mxu0 %v7919_v28  ;;  %v5365_v45 = vpop.f32.mrf.mxu1  ;;  %5976 = vmatmul.mubr.bf16.gmra.mxu1 %v12670_v37  ;;  %v12673_v28 = vld [vmem:[#allocation60_spill] sm:$0xff]  ;;  %s8421_s0 = sshll.u32 %s8586_s10, 4  ;;  %s8422_s0 = int_to_ptr.vmem [resolvable:$false] %s8421_s0 }
 0x338   : > { %v11599_v40 = vadd.f32 %v5365_v45, %v5212_v25  ;;  %5985 = vmatprep.mubr.bf16.mxu1 %v12672_v61  ;;  %6208 = vmatpush2.bf16.msra.mxu1 %v7914_v34  ;;  %v12674_v45 = vld [vmem:[#allocation62_spill] sm:$0xff]  ;;  %s8423_s12 = scalar_lea.vmem %s8422_s0, 36864  ;;  %p8424_p2 = scmp.lt.s32.totalorder %s12093_s22, %s8422_s0 }
 0x339   : > { %v5216_v35 = vpop.f32.mrf.mxu0  ;;  %v5367_v50 = vpop.f32.mrf.mxu1  ;;  %6209 = vmatprep.subr.bf16.mxu1 %v7922_v33  ;;  %p8425_p0 = scmp.lt.s32.totalorder %s8423_s12, %s8417_s9 }
 0x33a   : > { %12671 = vst [vmem:[#allocation110_spill] sm:$0xff] %v11599_v40  ;;  %6057 = vmatpush2.bf16.msra.mxu0 %v7917_v5  ;;  %v11603_v22 = vadd.f32 %v5367_v50, %v5214_v54  ;;  %v12675_v40 = vld [vmem:[#allocation61_spill] sm:$0xff] }
 0x33b   : > { %v5218_v39 = vpop.f32.mrf.mxu0  ;;  %v5369_v53 = vpop.f32.mrf.mxu1  ;;  %p8426_p9 = por %p8425_p0, %p8424_p2 }
 0x33c   : > { %v11605_v3 = vadd.f32 %v5369_v53, %v5216_v35  ;;  %6210 = vmatpush2.bf16.msra.mxu1 %v7920_v42 }
 0x33d   : > { %v5222_v9 = vpop.f32.mrf.mxu0  ;;  %5833 = vmatmul.mubr.bf16.gmra.mxu0 %v12673_v28  ;;  %v5371_v25 = vpop.f32.mrf.mxu1  ;;  %p8427_p3 = pnand %p8426_p9, %p8420_p11 }
 0x33e   : > { %5842 = vmatprep.mubr.bf16.mxu0 %v12674_v45  ;;  %v11609_v37 = vadd.f32 %v5371_v25, %v5218_v39 }
 0x33f   : > { %v5224_v34 = vpop.f32.mrf.mxu0  ;;  %v5375_v61 = vpop.f32.mrf.mxu1  ;;  %5986 = vmatmul.mubr.bf16.gmra.mxu1 %v12675_v40 }
 0x340   : > { %v11612_v5 = vadd.f32 %v5375_v61, %v5222_v9  ;;  %5995 = vmatprep.mubr.bf16.mxu1 %v12558_v17 }
 0x341   : > { %v5226_v50 = vpop.f32.mrf.mxu0  ;;  %v5377_v33 = vpop.f32.mrf.mxu1 }
 0x342   : > { %v11615_v54 = vadd.f32 %v5377_v33, %v5224_v34 }
 0x343   : > { %v5228_v35 = vpop.f32.mrf.mxu0  ;;  %v5379_v53 = vpop.f32.mrf.mxu1 }
 0x344   : > { %v11617_v42 = vadd.f32 %v5379_v53, %v5226_v50 }
 0x345   : > { %v5232_v28 = vpop.f32.mrf.mxu0  ;;  %5843 = vmatmul.mubr.bf16.gmra.mxu0 %v12559_v27  ;;  %v5381_v39 = vpop.f32.mrf.mxu1 }
 0x346   : > { %5852 = vmatprep.mubr.bf16.mxu0 %v12560_v48  ;;  %v11621_v25 = vadd.f32 %v5381_v39, %v5228_v35  ;;  %v12677_v35 = vld [vmem:[#allocation70_spill] sm:$0xff] }
 0x347   : > { %v5234_v40 = vpop.f32.mrf.mxu0  ;;  %v5385_v9 = vpop.f32.mrf.mxu1  ;;  %5996 = vmatmul.mubr.bf16.gmra.mxu1 %v12561_v12 }
 0x348   : > { %v11624_v17 = vadd.f32 %v5385_v9, %v5232_v28  ;;  %6005 = vmatprep.mubr.bf16.mxu1 %v12562_v62 }
 0x349   : > { %v5236_v45 = vpop.f32.mrf.mxu0  ;;  %v5387_v34 = vpop.f32.mrf.mxu1 }
 0x34a   : > { %v11627_v61 = vadd.f32 %v5387_v34, %v5234_v40 }
 0x34b   : > { %v5238_v50 = vpop.f32.mrf.mxu0  ;;  %v5389_v33 = vpop.f32.mrf.mxu1 }
 0x34c   : > { %v11629_v27 = vadd.f32 %v5389_v33, %v5236_v45 }
 0x34d   : > { %v5242_v53 = vpop.f32.mrf.mxu0  ;;  %5853 = vmatmul.mubr.bf16.gmra.mxu0 %v12565_v23  ;;  %v5391_v48 = vpop.f32.mrf.mxu1 }
 0x34e   : > { %12676 = vst [vmem:[#allocation68_spill] sm:$0xff] %v11629_v27  ;;  %5862 = vmatprep.mubr.bf16.mxu0 %v12677_v35  ;;  %v11633_v39 = vadd.f32 %v5391_v48, %v5238_v50  ;;  %v12680_v48 = vld [vmem:[#allocation74_spill] sm:$0xff] }
 0x34f   : > { %v5244_v12 = vpop.f32.mrf.mxu0  ;;  %v5395_v28 = vpop.f32.mrf.mxu1  ;;  %6006 = vmatmul.mubr.bf16.gmra.mxu1 %v12567_v2 }
 0x350   : > { %v11636_v62 = vadd.f32 %v5395_v28, %v5242_v53  ;;  %6015 = vmatprep.mubr.bf16.mxu1 %v12568_v43  ;;  %v12681_v28 = vld [vmem:[#allocation73_spill] sm:$0xff] }
 0x351   : > { %v5246_v40 = vpop.f32.mrf.mxu0  ;;  %v5397_v9 = vpop.f32.mrf.mxu1 }
 0x352   : > { %v11639_v45 = vadd.f32 %v5397_v9, %v5244_v12  ;;  %v12682_v9 = vld [vmem:[#allocation75_spill] sm:$0xff] }
 0x353   : > { %v5248_v34 = vpop.f32.mrf.mxu0  ;;  %v5399_v33 = vpop.f32.mrf.mxu1 }
 0x354   : > { %12678 = vst [vmem:[#allocation69_spill] sm:$0xff] %v11639_v45  ;;  %v11641_v23 = vadd.f32 %v5399_v33, %v5246_v40 }
 0x355   : > { %v5252_v27 = vpop.f32.mrf.mxu0  ;;  %5863 = vmatmul.mubr.bf16.gmra.mxu0 %v12569_v46  ;;  %v5401_v50 = vpop.f32.mrf.mxu1 }
 0x356   : > { %12679 = vst [vmem:[#allocation71_spill] sm:$0xff] %v11641_v23  ;;  %6058 = vmatprep.mubr.bf16.mxu0 %v12680_v48  ;;  %v11645_v35 = vadd.f32 %v5401_v50, %v5248_v34 }
 0x357   : > { %v5254_v2 = vpop.f32.mrf.mxu0  ;;  %v5405_v53 = vpop.f32.mrf.mxu1  ;;  %6016 = vmatmul.mubr.bf16.gmra.mxu1 %v12681_v28  ;;  %v1954_v28 = vld [vmem:[%s8863_s24 + $0x10] sm:$0xff] }
 0x358   : > { %v11648_v43 = vadd.f32 %v5405_v53, %v5252_v27  ;;  %6211 = vmatprep.mubr.bf16.mxu1 %v12682_v9  ;;  %v12686_v9 = vld [vmem:[#allocation77_spill] sm:$0xff] }
 0x359   : > { %v5256_v12 = vpop.f32.mrf.mxu0  ;;  %v5407_v40 = vpop.f32.mrf.mxu1 }
 0x35a   : > { %v11651_v33 = vadd.f32 %v5407_v40, %v5254_v2 }
 0x35b   : > { %v5258_v23 = vpop.f32.mrf.mxu0  ;;  %v5409_v46 = vpop.f32.mrf.mxu1 }
 0x35c   : > { %12683 = vst [vmem:[#allocation72_spill] sm:$0xff] %v11651_v33  ;;  %v11653_v45 = vadd.f32 %v5409_v46, %v5256_v12 }
 0x35d   : > { %v5448_v34 = vpop.f32.mrf.mxu0  ;;  %6059 = vmatmul.mubr.bf16.vlgmr.msra.gmra.mxu0 %v12575_v6  ;;  %v5411_v50 = vpop.f32.mrf.mxu1  ;;  %v1955_v6 = vld [vmem:[%s8863_s24 + $0x18] sm:$0xff] }
 0x35e   : > { %12684 = vst [vmem:[#allocation114_spill] sm:$0xff] %v11653_v45  ;;  %v5449_v48 = vadd.f32 %v5448_v34, %v11459_v29  ;;  %6068 = vmatprep.mubr.bf16.mxu0 %v12576_v14  ;;  %v11658_v27 = vadd.f32 %v5411_v50, %v5258_v23  ;;  %v12687_v45 = vld [vmem:[#allocation79_spill] sm:$0xff] }
 0x35f   : > { %v5450_v53 = vpop.f32.mrf.mxu0  ;;  %v5601_v2 = vpop.f32.mrf.mxu1  ;;  %6212 = vmatmul.mubr.bf16.vlgmr.msra.gmra.mxu1 %v12686_v9 }
 0x360   : > { %12685 = vst [vmem:[#allocation116_spill] sm:$0xff] %v11658_v27  ;;  %v5451_v12 = vadd.f32 %v5450_v53, %v11466_v49  ;;  %v5602_v40 = vadd.f32 %v5601_v2, %v5449_v48  ;;  %6221 = vmatprep.mubr.bf16.mxu1 %v12687_v45  ;;  %v1960_v27 = vld [vmem:[%s8863_s24 + $0x40] sm:$0xff]  ;;  %v1961_v45 = vld [vmem:[%s8863_s24 + $0x48] sm:$0xff] }
 0x361   : > { %v5452_v46 = vpop.f32.mrf.mxu0  ;;  %v5603_v29 = vpop.f32.mrf.mxu1 }
 0x362   : > { %v5453_v14 = vadd.f32 %v5452_v46, %v11469_v52  ;;  %v6334_v23 = vadd.f32 %v5602_v40, %v1954_v28  ;;  %v5604_v34 = vadd.f32 %v5603_v29, %v5451_v12 }
 0x363   : > { %v5454_v50 = vpop.f32.mrf.mxu0  ;;  %v5605_v33 = vpop.f32.mrf.mxu1 }
 0x364   : > { %v5455_v9 = vadd.f32 %v5454_v50, %v11475_v18  ;;  %6478 = vst [vmem:[%s8863_s24 + $0x10] sm:$0xff] %v6334_v23  ;;  %v6335_v49 = vadd.f32 %v5604_v34, %v1955_v6  ;;  %v5606_v48 = vadd.f32 %v5605_v33, %v5453_v14  ;;  %v1966_v18 = vld [vmem:[%s8863_s24 + $0x70] sm:$0xff] }
 0x365   : > { %v5458_v53 = vpop.f32.mrf.mxu0  ;;  %6069 = vmatmul.mubr.bf16.gmra.mxu0 %v12579_v26  ;;  %v5607_v2 = vpop.f32.mrf.mxu1 }
 0x366   : > { %v5459_v52 = vadd.f32 %v5458_v53, %v11480_v59  ;;  %6078 = vmatprep.mubr.bf16.mxu0 %v12580_v31  ;;  %6479 = vst [vmem:[%s8863_s24 + $0x18] sm:$0xff] %v6335_v49  ;;  %v6340_v28 = vadd.f32 %v5606_v48, %v1960_v27  ;;  %v5608_v12 = vadd.f32 %v5607_v2, %v5455_v9  ;;  %v1967_v31 = vld [vmem:[%s8863_s24 + $0x78] sm:$0xff]  ;;  %v1973_v48 = vld [vmem:[%s8863_s24 + $0xa8] sm:$0xff] }
 0x367   : > { %v5460_v40 = vpop.f32.mrf.mxu0  ;;  %v5611_v46 = vpop.f32.mrf.mxu1  ;;  %6222 = vmatmul.mubr.bf16.gmra.mxu1 %v12581_v32  ;;  %v1972_v32 = vld [vmem:[%s8863_s24 + $0xa0] sm:$0xff] }
 0x368   : > { %v5461_v33 = vadd.f32 %v5460_v40, %v11485_v0  ;;  %6484 = vst [vmem:[%s8863_s24 + $0x40] sm:$0xff] %v6340_v28  ;;  %v6341_v26 = vadd.f32 %v5608_v12, %v1961_v45  ;;  %v5612_v6 = vadd.f32 %v5611_v46, %v5459_v52  ;;  %6231 = vmatprep.mubr.bf16.mxu1 %v12582_v36 }
 0x369   : > { %v5462_v29 = vpop.f32.mrf.mxu0  ;;  %v5613_v59 = vpop.f32.mrf.mxu1 }
 0x36a   : > { %v5463_v27 = vadd.f32 %v5462_v29, %v11489_v20  ;;  %6485 = vst [vmem:[%s8863_s24 + $0x48] sm:$0xff] %v6341_v26  ;;  %v6346_v14 = vadd.f32 %v5612_v6, %v1966_v18  ;;  %v5614_v23 = vadd.f32 %v5613_v59, %v5461_v33 }
 0x36b   : > { %v5464_v34 = vpop.f32.mrf.mxu0  ;;  %v5615_v0 = vpop.f32.mrf.mxu1 }
 0x36c   : > { %v5465_v50 = vadd.f32 %v5464_v34, %v11496_v57  ;;  %6490 = vst [vmem:[%s8863_s24 + $0x70] sm:$0xff] %v6346_v14  ;;  %v6347_v9 = vadd.f32 %v5614_v23, %v1967_v31  ;;  %v5616_v49 = vadd.f32 %v5615_v0, %v5463_v27  ;;  %v1978_v57 = vld [vmem:[%s8863_s24 + $0xd0] sm:$0xff]  ;;  %v1985_v27 = vld [vmem:[%s8863_s24 + $0x108] sm:$0xff] }
 0x36d   : > { %v5468_v36 = vpop.f32.mrf.mxu0  ;;  %6079 = vmatmul.mubr.bf16.gmra.mxu0 %v12583_v44  ;;  %v5617_v53 = vpop.f32.mrf.mxu1 }
 0x36e   : > { %v5469_v20 = vadd.f32 %v5468_v36, %v11500_v7  ;;  %6088 = vmatprep.mubr.bf16.mxu0 %v12584_v8  ;;  %6491 = vst [vmem:[%s8863_s24 + $0x78] sm:$0xff] %v6347_v9  ;;  %v6352_v45 = vadd.f32 %v5616_v49, %v1972_v32  ;;  %v5618_v2 = vadd.f32 %v5617_v53, %v5465_v50  ;;  %v1979_v8 = vld [vmem:[%s8863_s24 + $0xd8] sm:$0xff] }
 0x36f   : > { %v5470_v52 = vpop.f32.mrf.mxu0  ;;  %v5621_v28 = vpop.f32.mrf.mxu1  ;;  %6232 = vmatmul.mubr.bf16.gmra.mxu1 %v12585_v13  ;;  %v1984_v13 = vld [vmem:[%s8863_s24 + $0x100] sm:$0xff] }
 0x370   : > { %v5471_v12 = vadd.f32 %v5470_v52, %v11505_v30  ;;  %6496 = vst [vmem:[%s8863_s24 + $0xa0] sm:$0xff] %v6352_v45  ;;  %v6353_v44 = vadd.f32 %v5618_v2, %v1973_v48  ;;  %v5622_v40 = vadd.f32 %v5621_v28, %v5469_v20  ;;  %6241 = vmatprep.mubr.bf16.mxu1 %v12586_v60 }
 0x371   : > { %v5472_v18 = vpop.f32.mrf.mxu0  ;;  %v5623_v7 = vpop.f32.mrf.mxu1 }
 0x372   : > { %v5473_v46 = vadd.f32 %v5472_v18, %v11509_v55  ;;  %6497 = vst [vmem:[%s8863_s24 + $0xa8] sm:$0xff] %v6353_v44  ;;  %v6358_v33 = vadd.f32 %v5622_v40, %v1978_v57  ;;  %v5624_v26 = vadd.f32 %v5623_v7, %v5471_v12  ;;  %v1997_v57 = vld [vmem:[%s8863_s24 + $0x168] sm:$0xff] }
 0x373   : > { %v5474_v6 = vpop.f32.mrf.mxu0  ;;  %v5625_v30 = vpop.f32.mrf.mxu1 }
 0x374   : > { %v5475_v29 = vadd.f32 %v5474_v6, %v11516_v21  ;;  %6502 = vst [vmem:[%s8863_s24 + $0xd0] sm:$0xff] %v6358_v33  ;;  %v6359_v31 = vadd.f32 %v5624_v26, %v1979_v8  ;;  %v5626_v59 = vadd.f32 %v5625_v30, %v5473_v46  ;;  %v1990_v21 = vld [vmem:[%s8863_s24 + $0x130] sm:$0xff] }
 0x375   : > { %v5478_v60 = vpop.f32.mrf.mxu0  ;;  %6089 = vmatmul.mubr.bf16.gmra.mxu0 %v12587_v38  ;;  %v5627_v14 = vpop.f32.mrf.mxu1 }
 0x376   : > { %v5479_v55 = vadd.f32 %v5478_v60, %v11520_v4  ;;  %6098 = vmatprep.mubr.bf16.mxu0 %v12588_v1  ;;  %6503 = vst [vmem:[%s8863_s24 + $0xd8] sm:$0xff] %v6359_v31  ;;  %v6364_v23 = vadd.f32 %v5626_v59, %v1984_v13  ;;  %v5628_v34 = vadd.f32 %v5627_v14, %v5475_v29  ;;  %v1991_v1 = vld [vmem:[%s8863_s24 + $0x138] sm:$0xff]  ;;  %v12689_v29 = vld [vmem:[#allocation102_spill] sm:$0xff]  ;;  %v12690_v14 = vld [vmem:[#allocation96_spill] sm:$0xff] }
 0x377   : > { %v5480_v32 = vpop.f32.mrf.mxu0  ;;  %v5631_v0 = vpop.f32.mrf.mxu1  ;;  %6242 = vmatmul.mubr.bf16.gmra.mxu1 %v12589_v51  ;;  %v1996_v51 = vld [vmem:[%s8863_s24 + $0x160] sm:$0xff] }
 0x378   : > { %v5481_v50 = vadd.f32 %v5480_v32, %v11525_v24  ;;  %6508 = vst [vmem:[%s8863_s24 + $0x100] sm:$0xff] %v6364_v23  ;;  %v6365_v38 = vadd.f32 %v5628_v34, %v1985_v27  ;;  %v5632_v9 = vadd.f32 %v5631_v0, %v5479_v55  ;;  %6251 = vmatprep.mubr.bf16.mxu1 %v12590_v10  ;;  %v2009_v55 = vld [vmem:[%s8863_s24 + $0x1c8] sm:$0xff]  ;;  %v12692_v32 = vld [vmem:[#allocation98_spill] sm:$0xff] }
 0x379   : > { %v5482_v49 = vpop.f32.mrf.mxu0  ;;  %v5633_v4 = vpop.f32.mrf.mxu1 }
 0x37a   : > { %v5483_v36 = vadd.f32 %v5482_v49, %v11529_v19  ;;  %6509 = vst [vmem:[%s8863_s24 + $0x108] sm:$0xff] %v6365_v38  ;;  %v6370_v48 = vadd.f32 %v5632_v9, %v1990_v21  ;;  %v5634_v53 = vadd.f32 %v5633_v4, %v5481_v50  ;;  %v2014_v38 = vld [vmem:[%s8863_s24 + $0x1f0] sm:$0xff]  ;;  %v12693_v49 = vld [vmem:[#allocation97_spill] sm:$0xff] }
 0x37b   : > { %v5484_v20 = vpop.f32.mrf.mxu0  ;;  %v5635_v24 = vpop.f32.mrf.mxu1 }
 0x37c   : > { %v5485_v45 = vadd.f32 %v5484_v20, %v11536_v63  ;;  %6514 = vst [vmem:[%s8863_s24 + $0x130] sm:$0xff] %v6370_v48  ;;  %v6371_v2 = vadd.f32 %v5634_v53, %v1991_v1  ;;  %v5636_v52 = vadd.f32 %v5635_v24, %v5483_v36  ;;  %v2002_v63 = vld [vmem:[%s8863_s24 + $0x190] sm:$0xff]  ;;  %v12694_v1 = vld [vmem:[#allocation63_spill] sm:$0xff] }
 0x37d   : > { %v5488_v10 = vpop.f32.mrf.mxu0  ;;  %6099 = vmatmul.mubr.bf16.gmra.mxu0 %v12591_v41  ;;  %v5637_v28 = vpop.f32.mrf.mxu1  ;;  %v12695_v20 = vld [vmem:[#allocation99_spill] sm:$0xff] }
 0x37e   : > { %v5489_v19 = vadd.f32 %v5488_v10, %v11540_v47  ;;  %6108 = vmatprep.mubr.bf16.mxu0 %v12592_v15  ;;  %6515 = vst [vmem:[%s8863_s24 + $0x138] sm:$0xff] %v6371_v2  ;;  %v6376_v12 = vadd.f32 %v5636_v52, %v1996_v51  ;;  %v5638_v44 = vadd.f32 %v5637_v28, %v5485_v45  ;;  %v12688_v47 = vld [vmem:[#allocation95_spill] sm:$0xff]  ;;  %v2003_v15 = vld [vmem:[%s8863_s24 + $0x198] sm:$0xff]  ;;  %v12696_v45 = vld [vmem:[#allocation64_spill] sm:$0xff] }
 0x37f   : > { %v5490_v40 = vpop.f32.mrf.mxu0  ;;  %v5641_v18 = vpop.f32.mrf.mxu1  ;;  %6252 = vmatmul.mubr.bf16.gmra.mxu1 %v12593_v58  ;;  %v2008_v58 = vld [vmem:[%s8863_s24 + $0x1c0] sm:$0xff]  ;;  %v2015_v51 = vld [vmem:[%s8863_s24 + $0x1f8] sm:$0xff] }
 0x380   : > { %v5491_v8 = vadd.f32 %v5490_v40, %v11545_v16  ;;  %6520 = vst [vmem:[%s8863_s24 + $0x160] sm:$0xff] %v6376_v12  ;;  %v6377_v41 = vadd.f32 %v5638_v44, %v1997_v57  ;;  %v5642_v7 = vadd.f32 %v5641_v18, %v5489_v19  ;;  %6261 = vmatprep.mubr.bf16.mxu1 %v12688_v47  ;;  %v2020_v28 = vld [vmem:[%s8863_s24 + $0x220] sm:$0xff] }
 0x381   : > { %v5492_v46 = vpop.f32.mrf.mxu0  ;;  %v5643_v33 = vpop.f32.mrf.mxu1  ;;  %v12697_v12 = vld [vmem:[#allocation66_spill] sm:$0xff] }
 0x382   : > { %v5493_v26 = vadd.f32 %v5492_v46, %v11549_v11  ;;  %6521 = vst [vmem:[%s8863_s24 + $0x168] sm:$0xff] %v6377_v41  ;;  %v6382_v6 = vadd.f32 %v5642_v7, %v2002_v63  ;;  %v5644_v13 = vadd.f32 %v5643_v33, %v5491_v8  ;;  %v12691_v11 = vld [vmem:[#allocation103_spill] sm:$0xff]  ;;  %v12698_v8 = vld [vmem:[#allocation100_spill] sm:$0xff]  ;;  %v12699_v46 = vld [vmem:[#allocation65_spill] sm:$0xff] }
 0x383   : > { %v5494_v30 = vpop.f32.mrf.mxu0  ;;  %v5645_v16 = vpop.f32.mrf.mxu1  ;;  %v2021_v41 = vld [vmem:[%s8863_s24 + $0x228] sm:$0xff] }
 0x384   : > { %v5495_v31 = vadd.f32 %v5494_v30, %v12689_v29  ;;  %6526 = vst [vmem:[%s8863_s24 + $0x190] sm:$0xff] %v6382_v6  ;;  %v6383_v59 = vadd.f32 %v5644_v13, %v2003_v15  ;;  %v5646_v60 = vadd.f32 %v5645_v16, %v5493_v26  ;;  %v12700_v15 = vld [vmem:[#allocation104_spill] sm:$0xff]  ;;  %v12702_v16 = vld [vmem:[#allocation67_spill] sm:$0xff] }
 0x385   : > { %v5498_v27 = vpop.f32.mrf.mxu0  ;;  %6109 = vmatmul.mubr.bf16.gmra.mxu0 %v12690_v14  ;;  %v5647_v23 = vpop.f32.mrf.mxu1  ;;  %v2026_v13 = vld [vmem:[%s8863_s24 + $0x250] sm:$0xff]  ;;  %v2027_v14 = vld [vmem:[%s8863_s24 + $0x258] sm:$0xff] }
 0x386   : > { %v5499_v34 = vadd.f32 %v5498_v27, %v12691_v11  ;;  %6118 = vmatprep.mubr.bf16.mxu0 %v12692_v32  ;;  %6527 = vst [vmem:[%s8863_s24 + $0x198] sm:$0xff] %v6383_v59  ;;  %v6388_v21 = vadd.f32 %v5646_v60, %v2008_v58  ;;  %v5648_v0 = vadd.f32 %v5647_v23, %v5495_v31  ;;  %v12701_v58 = vld [vmem:[#allocation101_spill] sm:$0xff]  ;;  %v12704_v23 = vld [vmem:[#allocation108_spill] sm:$0xff] }
 0x387   : > { %v5500_v50 = vpop.f32.mrf.mxu0  ;;  %v5651_v9 = vpop.f32.mrf.mxu1  ;;  %6262 = vmatmul.mubr.bf16.gmra.mxu1 %v12693_v49  ;;  %v12703_v27 = vld [vmem:[#allocation105_spill] sm:$0xff] }
 0x388   : > { %v5501_v4 = vadd.f32 %v5500_v50, %v12694_v1  ;;  %6532 = vst [vmem:[%s8863_s24 + $0x1c0] sm:$0xff] %v6388_v21  ;;  %v6389_v36 = vadd.f32 %v5648_v0, %v2009_v55  ;;  %v5652_v48 = vadd.f32 %v5651_v9, %v5499_v34  ;;  %6271 = vmatprep.mubr.bf16.mxu1 %v12695_v20  ;;  %v2032_v0 = vld [vmem:[%s8863_s24 + $0x280] sm:$0xff] }
 0x389   : > { %v5502_v53 = vpop.f32.mrf.mxu0  ;;  %v5653_v24 = vpop.f32.mrf.mxu1 }
 0x38a   : > { %v5503_v2 = vadd.f32 %v5502_v53, %v12696_v45  ;;  %6533 = vst [vmem:[%s8863_s24 + $0x1c8] sm:$0xff] %v6389_v36  ;;  %v6394_v52 = vadd.f32 %v5652_v48, %v2014_v38  ;;  %v5654_v10 = vadd.f32 %v5653_v24, %v5501_v4  ;;  %v12705_v4 = vld [vmem:[#allocation106_spill] sm:$0xff]  ;;  %v2033_v36 = vld [vmem:[%s8863_s24 + $0x288] sm:$0xff] }
 0x38b   : > { %v5504_v57 = vpop.f32.mrf.mxu0  ;;  %v5655_v19 = vpop.f32.mrf.mxu1  ;;  %v12706_v53 = vld [vmem:[#allocation110_spill] sm:$0xff] }
 0x38c   : > { %v5505_v44 = vadd.f32 %v5504_v57, %v12697_v12  ;;  %6538 = vst [vmem:[%s8863_s24 + $0x1f0] sm:$0xff] %v6394_v52  ;;  %v6395_v40 = vadd.f32 %v5654_v10, %v2015_v51  ;;  %v5656_v63 = vadd.f32 %v5655_v19, %v5503_v2  ;;  %v12707_v51 = vld [vmem:[#allocation109_spill] sm:$0xff]  ;;  %v12708_v10 = vld [vmem:[#allocation107_spill] sm:$0xff] }
 0x38d   : > { %v5508_v18 = vpop.f32.mrf.mxu0  ;;  %6119 = vmatmul.mubr.bf16.gmra.mxu0 %v12698_v8  ;;  %v5657_v7 = vpop.f32.mrf.mxu1 }
 0x38e   : > { %v5509_v47 = vadd.f32 %v5508_v18, %v12699_v46  ;;  %6128 = vmatprep.mubr.bf16.mxu0 %v12700_v15  ;;  %6539 = vst [vmem:[%s8863_s24 + $0x1f8] sm:$0xff] %v6395_v40  ;;  %v6400_v33 = vadd.f32 %v5656_v63, %v2020_v28  ;;  %v5658_v26 = vadd.f32 %v5657_v7, %v5505_v44  ;;  %v12709_v44 = vld [vmem:[#allocation111_spill] sm:$0xff]  ;;  %v2039_v40 = vld [vmem:[%s8863_s24 + $0x2b8] sm:$0xff]  ;;  %v2044_v46 = vld [vmem:[%s8863_s24 + $0x2e0] sm:$0xff] }
 0x38f   : > { %v5510_v6 = vpop.f32.mrf.mxu0  ;;  %v5661_v30 = vpop.f32.mrf.mxu1  ;;  %6272 = vmatmul.mubr.bf16.gmra.mxu1 %v12701_v58  ;;  %v12711_v58 = vld [vmem:[#allocation115_spill] sm:$0xff] }
 0x390   : > { %v5511_v29 = vadd.f32 %v5510_v6, %v12702_v16  ;;  %6544 = vst [vmem:[%s8863_s24 + $0x220] sm:$0xff] %v6400_v33  ;;  %v6401_v31 = vadd.f32 %v5658_v26, %v2021_v41  ;;  %v5662_v59 = vadd.f32 %v5661_v30, %v5509_v47  ;;  %6281 = vmatprep.mubr.bf16.mxu1 %v12703_v27  ;;  %v12710_v6 = vld [vmem:[#allocation112_spill] sm:$0xff] }
 0x391   : > { %v5512_v60 = vpop.f32.mrf.mxu0  ;;  %v5663_v55 = vpop.f32.mrf.mxu1 }
 0x392   : > { %v5513_v11 = vadd.f32 %v5512_v60, %v12704_v23  ;;  %6545 = vst [vmem:[%s8863_s24 + $0x228] sm:$0xff] %v6401_v31  ;;  %v6406_v34 = vadd.f32 %v5662_v59, %v2026_v13  ;;  %v5664_v32 = vadd.f32 %v5663_v55, %v5511_v29  ;;  %v2045_v13 = vld [vmem:[%s8863_s24 + $0x2e8] sm:$0xff]  ;;  %v12712_v60 = vld [vmem:[#allocation113_spill] sm:$0xff] }
 0x393   : > { %v5514_v21 = vpop.f32.mrf.mxu0  ;;  %v5665_v50 = vpop.f32.mrf.mxu1 }
 0x394   : > { %v5515_v38 = vadd.f32 %v5514_v21, %v11596_v56  ;;  %6550 = vst [vmem:[%s8863_s24 + $0x250] sm:$0xff] %v6406_v34  ;;  %v6407_v9 = vadd.f32 %v5664_v32, %v2027_v14  ;;  %v5666_v49 = vadd.f32 %v5665_v50, %v5513_v11  ;;  %v2038_v56 = vld [vmem:[%s8863_s24 + $0x2b0] sm:$0xff]  ;;  %v2051_v11 = vld [vmem:[%s8863_s24 + $0x318] sm:$0xff] }
 0x395   : > { %v5518_v1 = vpop.f32.mrf.mxu0  ;;  %6129 = vmatmul.mubr.bf16.gmra.mxu0 %v12705_v4  ;;  %v5667_v48 = vpop.f32.mrf.mxu1 }
 0x396   : > { %v5519_v20 = vadd.f32 %v5518_v1, %v12706_v53  ;;  %6138 = vmatprep.mubr.bf16.mxu0 %v12707_v51  ;;  %6551 = vst [vmem:[%s8863_s24 + $0x258] sm:$0xff] %v6407_v9  ;;  %v6412_v24 = vadd.f32 %v5666_v49, %v2032_v0  ;;  %v5668_v45 = vadd.f32 %v5667_v48, %v5515_v38  ;;  %v2056_v38 = vld [vmem:[%s8863_s24 + $0x340] sm:$0xff]  ;;  %v2057_v48 = vld [vmem:[%s8863_s24 + $0x348] sm:$0xff] }
 0x397   : > { %v5520_v2 = vpop.f32.mrf.mxu0  ;;  %v5671_v52 = vpop.f32.mrf.mxu1  ;;  %6282 = vmatmul.mubr.bf16.gmra.mxu1 %v12708_v10 }
 0x398   : > { %v5521_v57 = vadd.f32 %v5520_v2, %v11603_v22  ;;  %6556 = vst [vmem:[%s8863_s24 + $0x280] sm:$0xff] %v6412_v24  ;;  %v6413_v28 = vadd.f32 %v5668_v45, %v2033_v36  ;;  %v5672_v19 = vadd.f32 %v5671_v52, %v5519_v20  ;;  %6291 = vmatprep.mubr.bf16.mxu1 %v12709_v44  ;;  %v12714_v36 = vld [vmem:[#allocation118_spill] sm:$0xff]  ;;  %v12715_v20 = vld [vmem:[#allocation120_spill] sm:$0xff] }
 0x399   : > { %v5522_v12 = vpop.f32.mrf.mxu0  ;;  %v5673_v63 = vpop.f32.mrf.mxu1  ;;  %v12718_v44 = vld [vmem:[#allocation68_spill] sm:$0xff] }
 0x39a   : > { %v5523_v18 = vadd.f32 %v5522_v12, %v11605_v3  ;;  %6557 = vst [vmem:[%s8863_s24 + $0x288] sm:$0xff] %v6413_v28  ;;  %v6418_v8 = vadd.f32 %v5672_v19, %v2038_v56  ;;  %v5674_v41 = vadd.f32 %v5673_v63, %v5521_v57  ;;  %v12716_v56 = vld [vmem:[#allocation119_spill] sm:$0xff]  ;;  %v2063_v19 = vld [vmem:[%s8863_s24 + $0x378] sm:$0xff] }
 0x39b   : > { %v5524_v7 = vpop.f32.mrf.mxu0  ;;  %v5675_v22 = vpop.f32.mrf.mxu1 }
 0x39c   : > { %v5525_v47 = vadd.f32 %v5524_v7, %v11609_v37  ;;  %6562 = vst [vmem:[%s8863_s24 + $0x2b0] sm:$0xff] %v6418_v8  ;;  %v6419_v15 = vadd.f32 %v5674_v41, %v2039_v40  ;;  %v5676_v33 = vadd.f32 %v5675_v22, %v5523_v18  ;;  %v2050_v37 = vld [vmem:[%s8863_s24 + $0x310] sm:$0xff]  ;;  %v2068_v41 = vld [vmem:[%s8863_s24 + $0x3a0] sm:$0xff] }
 0x39d   : > { %v5528_v26 = vpop.f32.mrf.mxu0  ;;  %6139 = vmatmul.mubr.bf16.gmra.mxu0 %v12710_v6  ;;  %v5677_v30 = vpop.f32.mrf.mxu1 }
 0x39e   : > { %v5529_v3 = vadd.f32 %v5528_v26, %v11612_v5  ;;  %6148 = vmatprep.mubr.bf16.mxu0 %v12711_v58  ;;  %6563 = vst [vmem:[%s8863_s24 + $0x2b8] sm:$0xff] %v6419_v15  ;;  %v6424_v16 = vadd.f32 %v5676_v33, %v2044_v46  ;;  %v5678_v29 = vadd.f32 %v5677_v30, %v5525_v47  ;;  %v12713_v5 = vld [vmem:[#allocation117_spill] sm:$0xff]  ;;  %v12719_v15 = vld [vmem:[#allocation122_spill] sm:$0xff]  ;;  %v2069_v33 = vld [vmem:[%s8863_s24 + $0x3a8] sm:$0xff] }
 0x39f   : > { %v5530_v31 = vpop.f32.mrf.mxu0  ;;  %v5681_v59 = vpop.f32.mrf.mxu1  ;;  %6292 = vmatmul.mubr.bf16.gmra.mxu1 %v12712_v60 }
 0x3a0   : > { %v5531_v27 = vadd.f32 %v5530_v31, %v11615_v54  ;;  %6568 = vst [vmem:[%s8863_s24 + $0x2e0] sm:$0xff] %v6424_v16  ;;  %v6425_v14 = vadd.f32 %v5678_v29, %v2045_v13  ;;  %v5682_v55 = vadd.f32 %v5681_v59, %v5529_v3  ;;  %6301 = vmatprep.mubr.bf16.mxu1 %v12713_v5  ;;  %v12720_v13 = vld [vmem:[#allocation124_spill] sm:$0xff]  ;;  %v12721_v29 = vld [vmem:[#allocation123_spill] sm:$0xff]  ;;  %v12722_v31 = vld [vmem:[#allocation69_spill] sm:$0xff] }
 0x3a1   : > { %v5532_v23 = vpop.f32.mrf.mxu0  ;;  %v5683_v34 = vpop.f32.mrf.mxu1 }
 0x3a2   : > { %v5533_v32 = vadd.f32 %v5532_v23, %v11617_v42  ;;  %6569 = vst [vmem:[%s8863_s24 + $0x2e8] sm:$0xff] %v6425_v14  ;;  %v6430_v21 = vadd.f32 %v5682_v55, %v2050_v37  ;;  %v5684_v0 = vadd.f32 %v5683_v34, %v5531_v27  ;;  %v2075_v14 = vld [vmem:[%s8863_s24 + $0x3d8] sm:$0xff]  ;;  %v12724_v23 = vld [vmem:[#allocation71_spill] sm:$0xff] }
 0x3a3   : > { %v5534_v50 = vpop.f32.mrf.mxu0  ;;  %v5685_v54 = vpop.f32.mrf.mxu1 }
 0x3a4   : > { %v5535_v9 = vadd.f32 %v5534_v50, %v11621_v25  ;;  %6574 = vst [vmem:[%s8863_s24 + $0x310] sm:$0xff] %v6430_v21  ;;  %v6431_v49 = vadd.f32 %v5684_v0, %v2051_v11  ;;  %v5686_v1 = vadd.f32 %v5685_v54, %v5533_v32  ;;  %v2062_v25 = vld [vmem:[%s8863_s24 + $0x370] sm:$0xff]  ;;  %v2080_v21 = vld [vmem:[%s8863_s24 + $0x400] sm:$0xff] }
 0x3a5   : > { %v5538_v4 = vpop.f32.mrf.mxu0  ;;  %6149 = vmatmul.mubr.bf16.gmra.mxu0 %v12714_v36  ;;  %v5687_v53 = vpop.f32.mrf.mxu1 }
 0x3a6   : > { %v5539_v42 = vadd.f32 %v5538_v4, %v11624_v17  ;;  %6158 = vmatprep.mubr.bf16.mxu0 %v12715_v20  ;;  %6575 = vst [vmem:[%s8863_s24 + $0x318] sm:$0xff] %v6431_v49  ;;  %v6436_v51 = vadd.f32 %v5686_v1, %v2056_v38  ;;  %v5688_v24 = vadd.f32 %v5687_v53, %v5535_v9  ;;  %v12717_v17 = vld [vmem:[#allocation121_spill] sm:$0xff]  ;;  %v12725_v49 = vld [vmem:[#allocation126_spill] sm:$0xff]  ;;  %v2081_v1 = vld [vmem:[%s8863_s24 + $0x408] sm:$0xff] }
 0x3a7   : > { %v5540_v45 = vpop.f32.mrf.mxu0  ;;  %v5691_v2 = vpop.f32.mrf.mxu1  ;;  %6302 = vmatmul.mubr.bf16.gmra.mxu1 %v12716_v56  ;;  %v2086_v20 = vld [vmem:[%s8863_s24 + $0x430] sm:$0xff] }
 0x3a8   : > { %v5541_v52 = vadd.f32 %v5540_v45, %v11627_v61  ;;  %6580 = vst [vmem:[%s8863_s24 + $0x340] sm:$0xff] %v6436_v51  ;;  %v6437_v10 = vadd.f32 %v5688_v24, %v2057_v48  ;;  %v5692_v57 = vadd.f32 %v5691_v2, %v5539_v42  ;;  %6311 = vmatprep.mubr.bf16.mxu1 %v12717_v17  ;;  %v12726_v51 = vld [vmem:[#allocation127_spill] sm:$0xff]  ;;  %v12727_v24 = vld [vmem:[#allocation72_spill] sm:$0xff] }
 0x3a9   : > { %v5542_v28 = vpop.f32.mrf.mxu0  ;;  %v5693_v12 = vpop.f32.mrf.mxu1 }
 0x3aa   : > { %v5543_v40 = vadd.f32 %v5542_v28, %v12718_v44  ;;  %6581 = vst [vmem:[%s8863_s24 + $0x348] sm:$0xff] %v6437_v10  ;;  %v6442_v63 = vadd.f32 %v5692_v57, %v2062_v25  ;;  %v5694_v18 = vadd.f32 %v5693_v12, %v5541_v52  ;;  %v2087_v52 = vld [vmem:[%s8863_s24 + $0x438] sm:$0xff]  ;;  %v12728_v10 = vld [vmem:[#allocation114_spill] sm:$0xff] }
 0x3ab   : > { %v5544_v8 = vpop.f32.mrf.mxu0  ;;  %v5695_v61 = vpop.f32.mrf.mxu1  ;;  %v2092_v12 = vld [vmem:[%s8863_s24 + $0x460] sm:$0xff] }
 0x3ac   : > { %v5545_v7 = vadd.f32 %v5544_v8, %v11633_v39  ;;  %6586 = vst [vmem:[%s8863_s24 + $0x370] sm:$0xff] %v6442_v63  ;;  %v6443_v46 = vadd.f32 %v5694_v18, %v2063_v19  ;;  %v5696_v22 = vadd.f32 %v5695_v61, %v5543_v40  ;;  %v2074_v39 = vld [vmem:[%s8863_s24 + $0x3d0] sm:$0xff]  ;;  %v2093_v61 = vld [vmem:[%s8863_s24 + $0x468] sm:$0xff] }
 0x3ad   : > { %v5548_v47 = vpop.f32.mrf.mxu0  ;;  %6159 = vmatmul.mubr.bf16.gmra.mxu0 %v12719_v15  ;;  %v5697_v26 = vpop.f32.mrf.mxu1  ;;  %v12729_v40 = vld [vmem:[#allocation116_spill] sm:$0xff] }
 0x3ae   : > { %v5549_v6 = vadd.f32 %v5548_v47, %v11636_v62  ;;  %6168 = vmatprep.mubr.bf16.mxu0 %v12720_v13  ;;  %6587 = vst [vmem:[%s8863_s24 + $0x378] sm:$0xff] %v6443_v46  ;;  %v6448_v30 = vadd.f32 %v5696_v22, %v2068_v41  ;;  %v5698_v3 = vadd.f32 %v5697_v26, %v5545_v7  ;;  %v12723_v62 = vld [vmem:[#allocation125_spill] sm:$0xff] }
 0x3af   : > { %v5550_v58 = vpop.f32.mrf.mxu0  ;;  %v5701_v16 = vpop.f32.mrf.mxu1  ;;  %6312 = vmatmul.mubr.bf16.gmra.mxu1 %v12721_v29 }
 0x3b0   : > { %v5551_v37 = vadd.f32 %v5550_v58, %v12722_v31  ;;  %6592 = vst [vmem:[%s8863_s24 + $0x3a0] sm:$0xff] %v6448_v30  ;;  %v6449_v59 = vadd.f32 %v5698_v3, %v2069_v33  ;;  %v5702_v60 = vadd.f32 %v5701_v16, %v5549_v6  ;;  %6321 = vmatprep.mubr.bf16.mxu1 %v12723_v62 }
 0x3b1   : > { %v5552_v27 = vpop.f32.mrf.mxu0  ;;  %v5703_v55 = vpop.f32.mrf.mxu1 }
 0x3b2   : > { %v5553_v5 = vadd.f32 %v5552_v27, %v12724_v23  ;;  %6593 = vst [vmem:[%s8863_s24 + $0x3a8] sm:$0xff] %v6449_v59  ;;  %v6454_v11 = vadd.f32 %v5702_v60, %v2074_v39  ;;  %v5704_v34 = vadd.f32 %v5703_v55, %v5551_v37 }
 0x3b3   : > { %v5554_v32 = vpop.f32.mrf.mxu0  ;;  %v5705_v0 = vpop.f32.mrf.mxu1 }
 0x3b4   : > { %v5555_v50 = vadd.f32 %v5554_v32, %v11645_v35  ;;  %6598 = vst [vmem:[%s8863_s24 + $0x3d0] sm:$0xff] %v6454_v11  ;;  %v6455_v38 = vadd.f32 %v5704_v34, %v2075_v14  ;;  %v5706_v54 = vadd.f32 %v5705_v0, %v5553_v5 }
 0x3b5   : > { %v5558_v9 = vpop.f32.mrf.mxu0  ;;  %6169 = vmatmul.mubr.bf16.gmra.mxu0 %v12725_v49  ;;  %v5707_v4 = vpop.f32.mrf.mxu1 }
 0x3b6   : > { %v5559_v36 = vadd.f32 %v5558_v9, %v11648_v43  ;;  %6599 = vst [vmem:[%s8863_s24 + $0x3d8] sm:$0xff] %v6455_v38  ;;  %v6460_v48 = vadd.f32 %v5706_v54, %v2080_v21  ;;  %v5708_v53 = vadd.f32 %v5707_v4, %v5555_v50 }
 0x3b7   : > { %v5560_v42 = vpop.f32.mrf.mxu0  ;;  %v5711_v35 = vpop.f32.mrf.mxu1  ;;  %6322 = vmatmul.mubr.bf16.gmra.mxu1 %v12726_v51 }
 0x3b8   : > { %v5561_v45 = vadd.f32 %v5560_v42, %v12727_v24  ;;  %6604 = vst [vmem:[%s8863_s24 + $0x400] sm:$0xff] %v6460_v48  ;;  %v6461_v25 = vadd.f32 %v5708_v53, %v2081_v1  ;;  %v5712_v2 = vadd.f32 %v5711_v35, %v5559_v36 }
 0x3b9   : > { %v5562_v56 = vpop.f32.mrf.mxu0  ;;  %v5713_v43 = vpop.f32.mrf.mxu1 }
 0x3ba   : > { %v5563_v57 = vadd.f32 %v5562_v56, %v12728_v10  ;;  %6605 = vst [vmem:[%s8863_s24 + $0x408] sm:$0xff] %v6461_v25  ;;  %v6466_v28 = vadd.f32 %v5712_v2, %v2086_v20  ;;  %v5714_v17 = vadd.f32 %v5713_v43, %v5561_v45 }
 0x3bb   : > { %v5564_v19 = vpop.f32.mrf.mxu0  ;;  %v5715_v44 = vpop.f32.mrf.mxu1 }
 0x3bc   : > { %v5565_v63 = vadd.f32 %v5564_v19, %v12729_v40  ;;  %6610 = vst [vmem:[%s8863_s24 + $0x430] sm:$0xff] %v6466_v28  ;;  %v6467_v18 = vadd.f32 %v5714_v17, %v2087_v52  ;;  %v5716_v8 = vadd.f32 %v5715_v44, %v5563_v57 }
 0x3bd   : > { %v5754_v41 = vpop.f32.mrf.mxu0  ;;  %v5717_v7 = vpop.f32.mrf.mxu1 }
 0x3be   : > { %6611 = vst [vmem:[%s8863_s24 + $0x438] sm:$0xff] %v6467_v18  ;;  %v6472_v46 = vadd.f32 %v5716_v8, %v2092_v12  ;;  %v5718_v22 = vadd.f32 %v5717_v7, %v5565_v63 }
 0x3bf   : > { %v5756_v47 = vpop.f32.mrf.mxu0  ;;  %v5907_v15 = vpop.f32.mrf.mxu1 }
 0x3c0   : > { %6616 = vst [vmem:[%s8863_s24 + $0x460] sm:$0xff] %v6472_v46  ;;  %v6473_v33 = vadd.f32 %v5718_v22, %v2093_v61  ;;  %v11846_v26 = vadd.f32 %v5907_v15, %v5754_v41 }
 0x3c1   : > { %v5758_v6 = vpop.f32.mrf.mxu0  ;;  %v5909_v13 = vpop.f32.mrf.mxu1 }
 0x3c2   : > { %6617 = vst [vmem:[%s8863_s24 + $0x468] sm:$0xff] %v6473_v33  ;;  %v11849_v30 = vadd.f32 %v5909_v13, %v5756_v47 }
 0x3c3   : > { %v5760_v3 = vpop.f32.mrf.mxu0  ;;  %v5911_v58 = vpop.f32.mrf.mxu1 }
 0x3c4   : > { %v11851_v39 = vadd.f32 %v5911_v58, %v5758_v6 }
 0x3c5   : > { %v5764_v16 = vpop.f32.mrf.mxu0  ;;  %v5913_v29 = vpop.f32.mrf.mxu1 }
 0x3c6   : > { %v11853_v31 = vadd.f32 %v5913_v29, %v5760_v3 }
 0x3c7   : > { %v5766_v37 = vpop.f32.mrf.mxu0  ;;  %v5917_v59 = vpop.f32.mrf.mxu1 }
 0x3c8   : > { %v11855_v60 = vadd.f32 %v5917_v59, %v5764_v16 }
 0x3c9   : > { %v5768_v27 = vpop.f32.mrf.mxu0  ;;  %v5919_v62 = vpop.f32.mrf.mxu1 }
 0x3ca   : > { %v11857_v14 = vadd.f32 %v5919_v62, %v5766_v37 }
 0x3cb   : > { %v5770_v55 = vpop.f32.mrf.mxu0  ;;  %v5921_v23 = vpop.f32.mrf.mxu1 }
 0x3cc   : > { %v11859_v5 = vadd.f32 %v5921_v23, %v5768_v27 }
 0x3cd   : > { %v5774_v11 = vpop.f32.mrf.mxu0  ;;  %v5923_v34 = vpop.f32.mrf.mxu1 }
 0x3ce   : > { %v11861_v32 = vadd.f32 %v5923_v34, %v5770_v55 }
 0x3cf   : > { %v5776_v21 = vpop.f32.mrf.mxu0  ;;  %v5927_v0 = vpop.f32.mrf.mxu1 }
 0x3d0   : > { %v11863_v50 = vadd.f32 %v5927_v0, %v5774_v11 }
 0x3d1   : > { %v5778_v38 = vpop.f32.mrf.mxu0  ;;  %v5929_v54 = vpop.f32.mrf.mxu1 }
 0x3d2   : > { %v11865_v9 = vadd.f32 %v5929_v54, %v5776_v21 }
 0x3d3   : > { %v5780_v49 = vpop.f32.mrf.mxu0  ;;  %v5931_v1 = vpop.f32.mrf.mxu1 }
 0x3d4   : > { %v11867_v4 = vadd.f32 %v5931_v1, %v5778_v38 }
 0x3d5   : > { %v5784_v36 = vpop.f32.mrf.mxu0  ;;  %v5933_v48 = vpop.f32.mrf.mxu1 }
 0x3d6   : > { %v11869_v53 = vadd.f32 %v5933_v48, %v5780_v49 }
 0x3d7   : > { %v5786_v42 = vpop.f32.mrf.mxu0  ;;  %v5937_v20 = vpop.f32.mrf.mxu1 }
 0x3d8   : > { %v11871_v35 = vadd.f32 %v5937_v20, %v5784_v36 }
 0x3d9   : > { %v5788_v51 = vpop.f32.mrf.mxu0  ;;  %v5939_v24 = vpop.f32.mrf.mxu1 }
 0x3da   : > { %v11873_v45 = vadd.f32 %v5939_v24, %v5786_v42 }
 0x3db   : > { %v5790_v25 = vpop.f32.mrf.mxu0  ;;  %v5941_v2 = vpop.f32.mrf.mxu1 }
 0x3dc   : > { %v11875_v56 = vadd.f32 %v5941_v2, %v5788_v51 }
 0x3dd   : > { %v5794_v52 = vpop.f32.mrf.mxu0  ;;  %v5943_v43 = vpop.f32.mrf.mxu1 }
 0x3de   : > { %v11877_v10 = vadd.f32 %v5943_v43, %v5790_v25 }
 0x3df   : > { %v5796_v57 = vpop.f32.mrf.mxu0  ;;  %v5947_v28 = vpop.f32.mrf.mxu1 }
 0x3e0   : > { %v11879_v17 = vadd.f32 %v5947_v28, %v5794_v52 }
 0x3e1   : > { %v5798_v19 = vpop.f32.mrf.mxu0  ;;  %v5949_v12 = vpop.f32.mrf.mxu1 }
 0x3e2   : > { %v11881_v44 = vadd.f32 %v5949_v12, %v5796_v57 }
 0x3e3   : > { %v5800_v40 = vpop.f32.mrf.mxu0  ;;  %v5951_v63 = vpop.f32.mrf.mxu1 }
 0x3e4   : > { %v11883_v18 = vadd.f32 %v5951_v63, %v5798_v19 }
 0x3e5   : > { %v5804_v8 = vpop.f32.mrf.mxu0  ;;  %v5953_v41 = vpop.f32.mrf.mxu1 }
 0x3e6   : > { %v11885_v61 = vadd.f32 %v5953_v41, %v5800_v40 }
 0x3e7   : > { %v5806_v7 = vpop.f32.mrf.mxu0  ;;  %v5957_v46 = vpop.f32.mrf.mxu1 }
 0x3e8   : > { %v11887_v22 = vadd.f32 %v5957_v46, %v5804_v8 }
 0x3e9   : > { %v5808_v47 = vpop.f32.mrf.mxu0  ;;  %v5959_v15 = vpop.f32.mrf.mxu1 }
 0x3ea   : > { %v11889_v33 = vadd.f32 %v5959_v15, %v5806_v7 }
 0x3eb   : > { %v5810_v6 = vpop.f32.mrf.mxu0  ;;  %v5961_v13 = vpop.f32.mrf.mxu1 }
 0x3ec   : > { %v11891_v3 = vadd.f32 %v5961_v13, %v5808_v47 }
 0x3ed   : > { %v5814_v58 = vpop.f32.mrf.mxu0  ;;  %v5963_v16 = vpop.f32.mrf.mxu1 }
 0x3ee   : > { %v11893_v29 = vadd.f32 %v5963_v16, %v5810_v6 }
 0x3ef   : > { %v5816_v37 = vpop.f32.mrf.mxu0  ;;  %v5967_v59 = vpop.f32.mrf.mxu1 }
 0x3f0   : > { %v11895_v27 = vadd.f32 %v5967_v59, %v5814_v58 }
 0x3f1   : > { %v5818_v62 = vpop.f32.mrf.mxu0  ;;  %v5969_v55 = vpop.f32.mrf.mxu1 }
 0x3f2   : > { %v11897_v23 = vadd.f32 %v5969_v55, %v5816_v37 }
 0x3f3   : > { %v5820_v11 = vpop.f32.mrf.mxu0  ;;  %v5971_v34 = vpop.f32.mrf.mxu1 }
 0x3f4   : > { %v11899_v21 = vadd.f32 %v5971_v34, %v5818_v62 }
 0x3f5   : > { %v5824_v0 = vpop.f32.mrf.mxu0  ;;  %v5973_v38 = vpop.f32.mrf.mxu1 }
 0x3f6   : > { %v11901_v54 = vadd.f32 %v5973_v38, %v5820_v11 }
 0x3f7   : > { %v5826_v49 = vpop.f32.mrf.mxu0  ;;  %v5977_v1 = vpop.f32.mrf.mxu1 }
 0x3f8   : > { %v11903_v36 = vadd.f32 %v5977_v1, %v5824_v0 }
 0x3f9   : > { %v5828_v48 = vpop.f32.mrf.mxu0  ;;  %v5979_v42 = vpop.f32.mrf.mxu1 }
 0x3fa   : > { %v11905_v20 = vadd.f32 %v5979_v42, %v5826_v49 }
 0x3fb   : > { %v5830_v51 = vpop.f32.mrf.mxu0  ;;  %v5981_v24 = vpop.f32.mrf.mxu1 }
 0x3fc   : > { %v11907_v25 = vadd.f32 %v5981_v24, %v5828_v48 }
 0x3fd   : > { %v5834_v2 = vpop.f32.mrf.mxu0  ;;  %v5983_v52 = vpop.f32.mrf.mxu1 }
 0x3fe   : > { %v11909_v43 = vadd.f32 %v5983_v52, %v5830_v51 }
 0x3ff   : > { %v5836_v57 = vpop.f32.mrf.mxu0  ;;  %v5987_v28 = vpop.f32.mrf.mxu1 }
 0x400   : > { %v11911_v19 = vadd.f32 %v5987_v28, %v5834_v2 }
 0x401   : > { %v5838_v12 = vpop.f32.mrf.mxu0  ;;  %v5989_v40 = vpop.f32.mrf.mxu1 }
 0x402   : > { %v11913_v63 = vadd.f32 %v5989_v40, %v5836_v57 }
 0x403   : > { %v5840_v8 = vpop.f32.mrf.mxu0  ;;  %v5991_v41 = vpop.f32.mrf.mxu1 }
 0x404   : > { %v11915_v7 = vadd.f32 %v5991_v41, %v5838_v12 }
 0x405   : > { %v5844_v46 = vpop.f32.mrf.mxu0  ;;  %v5993_v47 = vpop.f32.mrf.mxu1 }
 0x406   : > { %v11917_v15 = vadd.f32 %v5993_v47, %v5840_v8 }
 0x407   : > { %v5846_v6 = vpop.f32.mrf.mxu0  ;;  %v5997_v13 = vpop.f32.mrf.mxu1 }
 0x408   : > { %v11919_v58 = vadd.f32 %v5997_v13, %v5844_v46 }
 0x409   : > { %v5848_v16 = vpop.f32.mrf.mxu0  ;;  %v5999_v37 = vpop.f32.mrf.mxu1 }
 0x40a   : > { %v11921_v59 = vadd.f32 %v5999_v37, %v5846_v6 }
 0x40b   : > { %v5850_v62 = vpop.f32.mrf.mxu0  ;;  %v6001_v55 = vpop.f32.mrf.mxu1 }
 0x40c   : > { %v11923_v11 = vadd.f32 %v6001_v55, %v5848_v16 }
 0x40d   : > { %v5854_v34 = vpop.f32.mrf.mxu0  ;;  %v6003_v0 = vpop.f32.mrf.mxu1 }
 0x40e   : > { %v11925_v38 = vadd.f32 %v6003_v0, %v5850_v62 }
 0x40f   : > { %v5856_v49 = vpop.f32.mrf.mxu0  ;;  %v6007_v1 = vpop.f32.mrf.mxu1 }
 0x410   : > { %v11927_v48 = vadd.f32 %v6007_v1, %v5854_v34 }
 0x411   : > { %v5858_v42 = vpop.f32.mrf.mxu0  ;;  %v6009_v51 = vpop.f32.mrf.mxu1 }
 0x412   : > { %v11929_v24 = vadd.f32 %v6009_v51, %v5856_v49 }
 0x413   : > { %v5860_v2 = vpop.f32.mrf.mxu0  ;;  %v6011_v52 = vpop.f32.mrf.mxu1 }
 0x414   : > { %v11931_v57 = vadd.f32 %v6011_v52, %v5858_v42  ;;  %v1956_v42 = vld [vmem:[%s8863_s24 + $0x20] sm:$0xff] }
 0x415   : > { %v5864_v28 = vpop.f32.mrf.mxu0  ;;  %v6013_v12 = vpop.f32.mrf.mxu1 }
 0x416   : > { %v11933_v40 = vadd.f32 %v6013_v12, %v5860_v2  ;;  %v1957_v12 = vld [vmem:[%s8863_s24 + $0x28] sm:$0xff] }
 0x417   : > { %v5866_v8 = vpop.f32.mrf.mxu0  ;;  %v6017_v41 = vpop.f32.mrf.mxu1 }
 0x418   : > { %v11935_v46 = vadd.f32 %v6017_v41, %v5864_v28 }
 0x419   : > { %v5868_v47 = vpop.f32.mrf.mxu0  ;;  %v6019_v6 = vpop.f32.mrf.mxu1 }
 0x41a   : > { %v11937_v13 = vadd.f32 %v6019_v6, %v5866_v8 }
 0x41b   : > { %v5870_v16 = vpop.f32.mrf.mxu0  ;;  %v6021_v37 = vpop.f32.mrf.mxu1 }
 0x41c   : > { %v11939_v62 = vadd.f32 %v6021_v37, %v5868_v47 }
 0x41d   : > { %v6060_v55 = vpop.f32.mrf.mxu0  ;;  %v6023_v34 = vpop.f32.mrf.mxu1 }
 0x41e   : > { %v6061_v0 = vadd.f32 %v6060_v55, %v11846_v26  ;;  %v11942_v49 = vadd.f32 %v6023_v34, %v5870_v16  ;;  %v1962_v16 = vld [vmem:[%s8863_s24 + $0x50] sm:$0xff] }
 0x41f   : > { %v6062_v1 = vpop.f32.mrf.mxu0  ;;  %v6213_v51 = vpop.f32.mrf.mxu1 }
 0x420   : > { %12730 = vst [vmem:[#allocation76_spill] sm:$0xff] %v11942_v49  ;;  %v6063_v2 = vadd.f32 %v6062_v1, %v11849_v30  ;;  %v6214_v52 = vadd.f32 %v6213_v51, %v6061_v0  ;;  %v1963_v1 = vld [vmem:[%s8863_s24 + $0x58] sm:$0xff] }
 0x421   : > { %v6064_v28 = vpop.f32.mrf.mxu0  ;;  %v6215_v8 = vpop.f32.mrf.mxu1 }
 0x422   : > { %v6065_v41 = vadd.f32 %v6064_v28, %v11851_v39  ;;  %v6336_v47 = vadd.f32 %v6214_v52, %v1956_v42  ;;  %v6216_v6 = vadd.f32 %v6215_v8, %v6063_v2  ;;  %v1968_v52 = vld [vmem:[%s8863_s24 + $0x80] sm:$0xff] }
 0x423   : > { %v6066_v26 = vpop.f32.mrf.mxu0  ;;  %v6217_v37 = vpop.f32.mrf.mxu1 }
 0x424   : > { %v6067_v55 = vadd.f32 %v6066_v26, %v11853_v31  ;;  %6480 = vst [vmem:[%s8863_s24 + $0x20] sm:$0xff] %v6336_v47  ;;  %v6337_v34 = vadd.f32 %v6216_v6, %v1957_v12  ;;  %v6218_v30 = vadd.f32 %v6217_v37, %v6065_v41  ;;  %v1969_v47 = vld [vmem:[%s8863_s24 + $0x88] sm:$0xff] }
 0x425   : > { %v6070_v0 = vpop.f32.mrf.mxu0  ;;  %v6219_v51 = vpop.f32.mrf.mxu1 }
 0x426   : > { %v6071_v49 = vadd.f32 %v6070_v0, %v11855_v60  ;;  %6481 = vst [vmem:[%s8863_s24 + $0x28] sm:$0xff] %v6337_v34  ;;  %v6342_v39 = vadd.f32 %v6218_v30, %v1962_v16  ;;  %v6220_v42 = vadd.f32 %v6219_v51, %v6067_v55  ;;  %v1974_v55 = vld [vmem:[%s8863_s24 + $0xb0] sm:$0xff] }
 0x427   : > { %v6072_v2 = vpop.f32.mrf.mxu0  ;;  %v6223_v28 = vpop.f32.mrf.mxu1 }
 0x428   : > { %v6073_v31 = vadd.f32 %v6072_v2, %v11857_v14  ;;  %6486 = vst [vmem:[%s8863_s24 + $0x50] sm:$0xff] %v6342_v39  ;;  %v6343_v12 = vadd.f32 %v6220_v42, %v1963_v1  ;;  %v6224_v8 = vadd.f32 %v6223_v28, %v6071_v49  ;;  %v1975_v1 = vld [vmem:[%s8863_s24 + $0xb8] sm:$0xff] }
 0x429   : > { %v6074_v41 = vpop.f32.mrf.mxu0  ;;  %v6225_v6 = vpop.f32.mrf.mxu1 }
 0x42a   : > { %v6075_v60 = vadd.f32 %v6074_v41, %v11859_v5  ;;  %6487 = vst [vmem:[%s8863_s24 + $0x58] sm:$0xff] %v6343_v12  ;;  %v6348_v26 = vadd.f32 %v6224_v8, %v1968_v52  ;;  %v6226_v16 = vadd.f32 %v6225_v6, %v6073_v31  ;;  %v1980_v52 = vld [vmem:[%s8863_s24 + $0xe0] sm:$0xff]  ;;  %v1981_v41 = vld [vmem:[%s8863_s24 + $0xe8] sm:$0xff] }
 0x42b   : > { %v6076_v37 = vpop.f32.mrf.mxu0  ;;  %v6227_v34 = vpop.f32.mrf.mxu1 }
 0x42c   : > { %v6077_v14 = vadd.f32 %v6076_v37, %v11861_v32  ;;  %6492 = vst [vmem:[%s8863_s24 + $0x80] sm:$0xff] %v6348_v26  ;;  %v6349_v30 = vadd.f32 %v6226_v16, %v1969_v47  ;;  %v6228_v49 = vadd.f32 %v6227_v34, %v6075_v60  ;;  %v1986_v16 = vld [vmem:[%s8863_s24 + $0x110] sm:$0xff] }
 0x42d   : > { %v6080_v0 = vpop.f32.mrf.mxu0  ;;  %v6229_v51 = vpop.f32.mrf.mxu1 }
 0x42e   : > { %v6081_v5 = vadd.f32 %v6080_v0, %v11863_v50  ;;  %6493 = vst [vmem:[%s8863_s24 + $0x88] sm:$0xff] %v6349_v30  ;;  %v6354_v39 = vadd.f32 %v6228_v49, %v1974_v55  ;;  %v6230_v42 = vadd.f32 %v6229_v51, %v6077_v14  ;;  %v1987_v30 = vld [vmem:[%s8863_s24 + $0x118] sm:$0xff] }
 0x42f   : > { %v6082_v2 = vpop.f32.mrf.mxu0  ;;  %v6233_v28 = vpop.f32.mrf.mxu1 }
 0x430   : > { %v6083_v32 = vadd.f32 %v6082_v2, %v11865_v9  ;;  %6498 = vst [vmem:[%s8863_s24 + $0xb0] sm:$0xff] %v6354_v39  ;;  %v6355_v31 = vadd.f32 %v6230_v42, %v1975_v1  ;;  %v6234_v12 = vadd.f32 %v6233_v28, %v6081_v5  ;;  %v1992_v5 = vld [vmem:[%s8863_s24 + $0x140] sm:$0xff]  ;;  %v1993_v28 = vld [vmem:[%s8863_s24 + $0x148] sm:$0xff] }
 0x431   : > { %v6084_v8 = vpop.f32.mrf.mxu0  ;;  %v6235_v47 = vpop.f32.mrf.mxu1 }
 0x432   : > { %v6085_v50 = vadd.f32 %v6084_v8, %v11867_v4  ;;  %6499 = vst [vmem:[%s8863_s24 + $0xb8] sm:$0xff] %v6355_v31  ;;  %v6360_v6 = vadd.f32 %v6234_v12, %v1980_v52  ;;  %v6236_v60 = vadd.f32 %v6235_v47, %v6083_v32 }
 0x433   : > { %v6086_v26 = vpop.f32.mrf.mxu0  ;;  %v6237_v37 = vpop.f32.mrf.mxu1 }
 0x434   : > { %v6087_v9 = vadd.f32 %v6086_v26, %v11869_v53  ;;  %6504 = vst [vmem:[%s8863_s24 + $0xe0] sm:$0xff] %v6360_v6  ;;  %v6361_v55 = vadd.f32 %v6236_v60, %v1981_v41  ;;  %v6238_v34 = vadd.f32 %v6237_v37, %v6085_v50  ;;  %v1998_v41 = vld [vmem:[%s8863_s24 + $0x170] sm:$0xff]  ;;  %v1999_v26 = vld [vmem:[%s8863_s24 + $0x178] sm:$0xff] }
 0x435   : > { %v6090_v14 = vpop.f32.mrf.mxu0  ;;  %v6239_v49 = vpop.f32.mrf.mxu1 }
 0x436   : > { %v6091_v4 = vadd.f32 %v6090_v14, %v11871_v35  ;;  %6505 = vst [vmem:[%s8863_s24 + $0xe8] sm:$0xff] %v6361_v55  ;;  %v6366_v0 = vadd.f32 %v6238_v34, %v1986_v16  ;;  %v6240_v1 = vadd.f32 %v6239_v49, %v6087_v9  ;;  %v2004_v34 = vld [vmem:[%s8863_s24 + $0x1a0] sm:$0xff] }
 0x437   : > { %v6092_v51 = vpop.f32.mrf.mxu0  ;;  %v6243_v39 = vpop.f32.mrf.mxu1 }
 0x438   : > { %v6093_v53 = vadd.f32 %v6092_v51, %v11873_v45  ;;  %6510 = vst [vmem:[%s8863_s24 + $0x110] sm:$0xff] %v6366_v0  ;;  %v6367_v42 = vadd.f32 %v6240_v1, %v1987_v30  ;;  %v6244_v2 = vadd.f32 %v6243_v39, %v6091_v4  ;;  %v2005_v0 = vld [vmem:[%s8863_s24 + $0x1a8] sm:$0xff] }
 0x439   : > { %v6094_v52 = vpop.f32.mrf.mxu0  ;;  %v6245_v32 = vpop.f32.mrf.mxu1 }
 0x43a   : > { %v6095_v35 = vadd.f32 %v6094_v52, %v11875_v56  ;;  %6511 = vst [vmem:[%s8863_s24 + $0x118] sm:$0xff] %v6367_v42  ;;  %v6372_v31 = vadd.f32 %v6244_v2, %v1992_v5  ;;  %v6246_v12 = vadd.f32 %v6245_v32, %v6093_v53  ;;  %v2010_v53 = vld [vmem:[%s8863_s24 + $0x1d0] sm:$0xff]  ;;  %v2011_v32 = vld [vmem:[%s8863_s24 + $0x1d8] sm:$0xff] }
 0x43b   : > { %v6096_v8 = vpop.f32.mrf.mxu0  ;;  %v6247_v47 = vpop.f32.mrf.mxu1 }
 0x43c   : > { %v6097_v45 = vadd.f32 %v6096_v8, %v11877_v10  ;;  %6516 = vst [vmem:[%s8863_s24 + $0x140] sm:$0xff] %v6372_v31  ;;  %v6373_v50 = vadd.f32 %v6246_v12, %v1993_v28  ;;  %v6248_v6 = vadd.f32 %v6247_v47, %v6095_v35 }
 0x43d   : > { %v6100_v60 = vpop.f32.mrf.mxu0  ;;  %v6249_v16 = vpop.f32.mrf.mxu1 }
 0x43e   : > { %v6101_v56 = vadd.f32 %v6100_v60, %v11879_v17  ;;  %6517 = vst [vmem:[%s8863_s24 + $0x148] sm:$0xff] %v6373_v50  ;;  %v6378_v37 = vadd.f32 %v6248_v6, %v1998_v41  ;;  %v6250_v9 = vadd.f32 %v6249_v16, %v6097_v45  ;;  %v2016_v41 = vld [vmem:[%s8863_s24 + $0x200] sm:$0xff]  ;;  %v2017_v60 = vld [vmem:[%s8863_s24 + $0x208] sm:$0xff] }
 0x43f   : > { %v6102_v55 = vpop.f32.mrf.mxu0  ;;  %v6253_v14 = vpop.f32.mrf.mxu1 }
 0x440   : > { %v6103_v10 = vadd.f32 %v6102_v55, %v11881_v44  ;;  %6522 = vst [vmem:[%s8863_s24 + $0x170] sm:$0xff] %v6378_v37  ;;  %v6379_v30 = vadd.f32 %v6250_v9, %v1999_v26  ;;  %v6254_v49 = vadd.f32 %v6253_v14, %v6101_v56  ;;  %v2022_v9 = vld [vmem:[%s8863_s24 + $0x230] sm:$0xff] }
 0x441   : > { %v6104_v4 = vpop.f32.mrf.mxu0  ;;  %v6255_v1 = vpop.f32.mrf.mxu1 }
 0x442   : > { %v6105_v17 = vadd.f32 %v6104_v4, %v11883_v18  ;;  %6523 = vst [vmem:[%s8863_s24 + $0x178] sm:$0xff] %v6379_v30  ;;  %v6384_v51 = vadd.f32 %v6254_v49, %v2004_v34  ;;  %v6256_v5 = vadd.f32 %v6255_v1, %v6103_v10  ;;  %v2023_v30 = vld [vmem:[%s8863_s24 + $0x238] sm:$0xff] }
 0x443   : > { %v6106_v39 = vpop.f32.mrf.mxu0  ;;  %v6257_v42 = vpop.f32.mrf.mxu1 }
 0x444   : > { %v6107_v44 = vadd.f32 %v6106_v39, %v11885_v61  ;;  %6528 = vst [vmem:[%s8863_s24 + $0x1a0] sm:$0xff] %v6384_v51  ;;  %v6385_v2 = vadd.f32 %v6256_v5, %v2005_v0  ;;  %v6258_v52 = vadd.f32 %v6257_v42, %v6105_v17  ;;  %v2028_v17 = vld [vmem:[%s8863_s24 + $0x260] sm:$0xff]  ;;  %v2029_v42 = vld [vmem:[%s8863_s24 + $0x268] sm:$0xff] }
 0x445   : > { %v6110_v28 = vpop.f32.mrf.mxu0  ;;  %v6259_v35 = vpop.f32.mrf.mxu1 }
 0x446   : > { %v6111_v18 = vadd.f32 %v6110_v28, %v11887_v22  ;;  %6529 = vst [vmem:[%s8863_s24 + $0x1a8] sm:$0xff] %v6385_v2  ;;  %v6390_v31 = vadd.f32 %v6258_v52, %v2010_v53  ;;  %v6260_v12 = vadd.f32 %v6259_v35, %v6107_v44 }
 0x447   : > { %v6112_v8 = vpop.f32.mrf.mxu0  ;;  %v6263_v47 = vpop.f32.mrf.mxu1 }
 0x448   : > { %v6113_v61 = vadd.f32 %v6112_v8, %v11889_v33  ;;  %6534 = vst [vmem:[%s8863_s24 + $0x1d0] sm:$0xff] %v6390_v31  ;;  %v6391_v45 = vadd.f32 %v6260_v12, %v2011_v32  ;;  %v6264_v50 = vadd.f32 %v6263_v47, %v6111_v18  ;;  %v2034_v32 = vld [vmem:[%s8863_s24 + $0x290] sm:$0xff]  ;;  %v2035_v8 = vld [vmem:[%s8863_s24 + $0x298] sm:$0xff] }
 0x449   : > { %v6114_v6 = vpop.f32.mrf.mxu0  ;;  %v6265_v26 = vpop.f32.mrf.mxu1 }
 0x44a   : > { %v6115_v22 = vadd.f32 %v6114_v6, %v11891_v3  ;;  %6535 = vst [vmem:[%s8863_s24 + $0x1d8] sm:$0xff] %v6391_v45  ;;  %v6396_v16 = vadd.f32 %v6264_v50, %v2016_v41  ;;  %v6266_v56 = vadd.f32 %v6265_v26, %v6113_v61  ;;  %v2040_v50 = vld [vmem:[%s8863_s24 + $0x2c0] sm:$0xff] }
 0x44b   : > { %v6116_v37 = vpop.f32.mrf.mxu0  ;;  %v6267_v55 = vpop.f32.mrf.mxu1 }
 0x44c   : > { %v6117_v33 = vadd.f32 %v6116_v37, %v11893_v29  ;;  %6540 = vst [vmem:[%s8863_s24 + $0x200] sm:$0xff] %v6396_v16  ;;  %v6397_v34 = vadd.f32 %v6266_v56, %v2017_v60  ;;  %v6268_v14 = vadd.f32 %v6267_v55, %v6115_v22  ;;  %v2041_v16 = vld [vmem:[%s8863_s24 + $0x2c8] sm:$0xff] }
 0x44d   : > { %v6120_v10 = vpop.f32.mrf.mxu0  ;;  %v6269_v49 = vpop.f32.mrf.mxu1 }
 0x44e   : > { %v6121_v3 = vadd.f32 %v6120_v10, %v11895_v27  ;;  %6541 = vst [vmem:[%s8863_s24 + $0x208] sm:$0xff] %v6397_v34  ;;  %v6402_v4 = vadd.f32 %v6268_v14, %v2022_v9  ;;  %v6270_v0 = vadd.f32 %v6269_v49, %v6117_v33  ;;  %v2046_v33 = vld [vmem:[%s8863_s24 + $0x2f0] sm:$0xff]  ;;  %v2047_v49 = vld [vmem:[%s8863_s24 + $0x2f8] sm:$0xff] }
 0x44f   : > { %v6122_v1 = vpop.f32.mrf.mxu0  ;;  %v6273_v51 = vpop.f32.mrf.mxu1 }
 0x450   : > { %v6123_v29 = vadd.f32 %v6122_v1, %v11897_v23  ;;  %6546 = vst [vmem:[%s8863_s24 + $0x230] sm:$0xff] %v6402_v4  ;;  %v6403_v5 = vadd.f32 %v6270_v0, %v2023_v30  ;;  %v6274_v39 = vadd.f32 %v6273_v51, %v6121_v3 }
 0x451   : > { %v6124_v53 = vpop.f32.mrf.mxu0  ;;  %v6275_v44 = vpop.f32.mrf.mxu1 }
 0x452   : > { %v6125_v27 = vadd.f32 %v6124_v53, %v11899_v21  ;;  %6547 = vst [vmem:[%s8863_s24 + $0x238] sm:$0xff] %v6403_v5  ;;  %v6408_v2 = vadd.f32 %v6274_v39, %v2028_v17  ;;  %v6276_v52 = vadd.f32 %v6275_v44, %v6123_v29  ;;  %v2052_v17 = vld [vmem:[%s8863_s24 + $0x320] sm:$0xff]  ;;  %v2053_v53 = vld [vmem:[%s8863_s24 + $0x328] sm:$0xff] }
 0x453   : > { %v6126_v28 = vpop.f32.mrf.mxu0  ;;  %v6277_v35 = vpop.f32.mrf.mxu1 }
 0x454   : > { %v6127_v23 = vadd.f32 %v6126_v28, %v11901_v54  ;;  %6552 = vst [vmem:[%s8863_s24 + $0x260] sm:$0xff] %v6408_v2  ;;  %v6409_v18 = vadd.f32 %v6276_v52, %v2029_v42  ;;  %v6278_v31 = vadd.f32 %v6277_v35, %v6125_v27  ;;  %v2058_v52 = vld [vmem:[%s8863_s24 + $0x350] sm:$0xff] }
 0x455   : > { %v6130_v12 = vpop.f32.mrf.mxu0  ;;  %v6279_v41 = vpop.f32.mrf.mxu1 }
 0x456   : > { %v6131_v21 = vadd.f32 %v6130_v12, %v11903_v36  ;;  %6553 = vst [vmem:[%s8863_s24 + $0x268] sm:$0xff] %v6409_v18  ;;  %v6414_v47 = vadd.f32 %v6278_v31, %v2034_v32  ;;  %v6280_v61 = vadd.f32 %v6279_v41, %v6127_v23  ;;  %v2059_v18 = vld [vmem:[%s8863_s24 + $0x358] sm:$0xff] }
 0x457   : > { %v6132_v45 = vpop.f32.mrf.mxu0  ;;  %v6283_v6 = vpop.f32.mrf.mxu1 }
 0x458   : > { %v6133_v54 = vadd.f32 %v6132_v45, %v11905_v20  ;;  %6558 = vst [vmem:[%s8863_s24 + $0x290] sm:$0xff] %v6414_v47  ;;  %v6415_v60 = vadd.f32 %v6280_v61, %v2035_v8  ;;  %v6284_v26 = vadd.f32 %v6283_v6, %v6131_v21  ;;  %v2064_v21 = vld [vmem:[%s8863_s24 + $0x380] sm:$0xff]  ;;  %v2065_v6 = vld [vmem:[%s8863_s24 + $0x388] sm:$0xff] }
 0x459   : > { %v6134_v22 = vpop.f32.mrf.mxu0  ;;  %v6285_v56 = vpop.f32.mrf.mxu1 }
 0x45a   : > { %v6135_v36 = vadd.f32 %v6134_v22, %v11907_v25  ;;  %6559 = vst [vmem:[%s8863_s24 + $0x298] sm:$0xff] %v6415_v60  ;;  %v6420_v37 = vadd.f32 %v6284_v26, %v2040_v50  ;;  %v6286_v9 = vadd.f32 %v6285_v56, %v6133_v54 }
 0x45b   : > { %v6136_v55 = vpop.f32.mrf.mxu0  ;;  %v6287_v34 = vpop.f32.mrf.mxu1 }
 0x45c   : > { %v6137_v20 = vadd.f32 %v6136_v55, %v11909_v43  ;;  %6564 = vst [vmem:[%s8863_s24 + $0x2c0] sm:$0xff] %v6420_v37  ;;  %v6421_v14 = vadd.f32 %v6286_v9, %v2041_v16  ;;  %v6288_v10 = vadd.f32 %v6287_v34, %v6135_v36  ;;  %v2070_v16 = vld [vmem:[%s8863_s24 + $0x3b0] sm:$0xff]  ;;  %v2071_v55 = vld [vmem:[%s8863_s24 + $0x3b8] sm:$0xff] }
 0x45d   : > { %v6140_v30 = vpop.f32.mrf.mxu0  ;;  %v6289_v3 = vpop.f32.mrf.mxu1 }
 0x45e   : > { %v6141_v25 = vadd.f32 %v6140_v30, %v11911_v19  ;;  %6565 = vst [vmem:[%s8863_s24 + $0x2c8] sm:$0xff] %v6421_v14  ;;  %v6426_v4 = vadd.f32 %v6288_v10, %v2046_v33  ;;  %v6290_v0 = vadd.f32 %v6289_v3, %v6137_v20  ;;  %v2076_v10 = vld [vmem:[%s8863_s24 + $0x3e0] sm:$0xff] }
 0x45f   : > { %v6142_v1 = vpop.f32.mrf.mxu0  ;;  %v6293_v51 = vpop.f32.mrf.mxu1 }
 0x460   : > { %v6143_v43 = vadd.f32 %v6142_v1, %v11913_v63  ;;  %6570 = vst [vmem:[%s8863_s24 + $0x2f0] sm:$0xff] %v6426_v4  ;;  %v6427_v29 = vadd.f32 %v6290_v0, %v2047_v49  ;;  %v6294_v5 = vadd.f32 %v6293_v51, %v6141_v25  ;;  %v2077_v4 = vld [vmem:[%s8863_s24 + $0x3e8] sm:$0xff] }
 0x461   : > { %v6144_v39 = vpop.f32.mrf.mxu0  ;;  %v6295_v42 = vpop.f32.mrf.mxu1 }
 0x462   : > { %v6145_v19 = vadd.f32 %v6144_v39, %v11915_v7  ;;  %6571 = vst [vmem:[%s8863_s24 + $0x2f8] sm:$0xff] %v6427_v29  ;;  %v6432_v44 = vadd.f32 %v6294_v5, %v2052_v17  ;;  %v6296_v27 = vadd.f32 %v6295_v42, %v6143_v43  ;;  %v2082_v43 = vld [vmem:[%s8863_s24 + $0x410] sm:$0xff]  ;;  %v2083_v42 = vld [vmem:[%s8863_s24 + $0x418] sm:$0xff] }
 0x463   : > { %v6146_v2 = vpop.f32.mrf.mxu0  ;;  %v6297_v28 = vpop.f32.mrf.mxu1 }
 0x464   : > { %v6147_v63 = vadd.f32 %v6146_v2, %v11917_v15  ;;  %6576 = vst [vmem:[%s8863_s24 + $0x320] sm:$0xff] %v6432_v44  ;;  %v6433_v32 = vadd.f32 %v6296_v27, %v2053_v53  ;;  %v6298_v35 = vadd.f32 %v6297_v28, %v6145_v19 }
 0x465   : > { %v6150_v23 = vpop.f32.mrf.mxu0  ;;  %v6299_v31 = vpop.f32.mrf.mxu1 }
 0x466   : > { %v6151_v7 = vadd.f32 %v6150_v23, %v11919_v58  ;;  %6577 = vst [vmem:[%s8863_s24 + $0x328] sm:$0xff] %v6433_v32  ;;  %v6438_v12 = vadd.f32 %v6298_v35, %v2058_v52  ;;  %v6300_v8 = vadd.f32 %v6299_v31, %v6147_v63  ;;  %v2088_v52 = vld [vmem:[%s8863_s24 + $0x440] sm:$0xff]  ;;  %v2089_v23 = vld [vmem:[%s8863_s24 + $0x448] sm:$0xff] }
 0x467   : > { %v6152_v41 = vpop.f32.mrf.mxu0  ;;  %v6303_v47 = vpop.f32.mrf.mxu1 }
 0x468   : > { %v6153_v15 = vadd.f32 %v6152_v41, %v11921_v59  ;;  %6582 = vst [vmem:[%s8863_s24 + $0x350] sm:$0xff] %v6438_v12  ;;  %v6439_v61 = vadd.f32 %v6300_v8, %v2059_v18  ;;  %v6304_v45 = vadd.f32 %v6303_v47, %v6151_v7  ;;  %v2094_v8 = vld [vmem:[%s8863_s24 + $0x470] sm:$0xff] }
 0x469   : > { %v6154_v50 = vpop.f32.mrf.mxu0  ;;  %v6305_v54 = vpop.f32.mrf.mxu1 }
 0x46a   : > { %v6155_v58 = vadd.f32 %v6154_v50, %v11923_v11  ;;  %6583 = vst [vmem:[%s8863_s24 + $0x358] sm:$0xff] %v6439_v61  ;;  %v6444_v60 = vadd.f32 %v6304_v45, %v2064_v21  ;;  %v6306_v26 = vadd.f32 %v6305_v54, %v6153_v15  ;;  %v2095_v61 = vld [vmem:[%s8863_s24 + $0x478] sm:$0xff] }
 0x46b   : > { %v6156_v22 = vpop.f32.mrf.mxu0  ;;  %v6307_v56 = vpop.f32.mrf.mxu1 }
 0x46c   : > { %v6157_v59 = vadd.f32 %v6156_v22, %v11925_v38  ;;  %6588 = vst [vmem:[%s8863_s24 + $0x380] sm:$0xff] %v6444_v60  ;;  %v6445_v36 = vadd.f32 %v6306_v26, %v2065_v6  ;;  %v6308_v37 = vadd.f32 %v6307_v56, %v6155_v58 }
 0x46d   : > { %v6160_v9 = vpop.f32.mrf.mxu0  ;;  %v6309_v33 = vpop.f32.mrf.mxu1 }
 0x46e   : > { %v6161_v11 = vadd.f32 %v6160_v9, %v11927_v48  ;;  %6589 = vst [vmem:[%s8863_s24 + $0x388] sm:$0xff] %v6445_v36  ;;  %v6450_v34 = vadd.f32 %v6308_v37, %v2070_v16  ;;  %v6310_v20 = vadd.f32 %v6309_v33, %v6157_v59 }
 0x46f   : > { %v6162_v14 = vpop.f32.mrf.mxu0  ;;  %v6313_v30 = vpop.f32.mrf.mxu1 }
 0x470   : > { %v6163_v38 = vadd.f32 %v6162_v14, %v11929_v24  ;;  %6594 = vst [vmem:[%s8863_s24 + $0x3b0] sm:$0xff] %v6450_v34  ;;  %v6451_v49 = vadd.f32 %v6310_v20, %v2071_v55  ;;  %v6314_v3 = vadd.f32 %v6313_v30, %v6161_v11 }
 0x471   : > { %v6164_v25 = vpop.f32.mrf.mxu0  ;;  %v6315_v0 = vpop.f32.mrf.mxu1 }
 0x472   : > { %v6165_v48 = vadd.f32 %v6164_v25, %v11931_v57  ;;  %6595 = vst [vmem:[%s8863_s24 + $0x3b8] sm:$0xff] %v6451_v49  ;;  %v6456_v1 = vadd.f32 %v6314_v3, %v2076_v10  ;;  %v6316_v17 = vadd.f32 %v6315_v0, %v6163_v38 }
 0x473   : > { %v6166_v51 = vpop.f32.mrf.mxu0  ;;  %v6317_v29 = vpop.f32.mrf.mxu1 }
 0x474   : > { %v6167_v24 = vadd.f32 %v6166_v51, %v11933_v40  ;;  %6600 = vst [vmem:[%s8863_s24 + $0x3e0] sm:$0xff] %v6456_v1  ;;  %v6457_v5 = vadd.f32 %v6316_v17, %v2077_v4  ;;  %v6318_v39 = vadd.f32 %v6317_v29, %v6165_v48 }
 0x475   : > { %v6170_v53 = vpop.f32.mrf.mxu0  ;;  %v6319_v19 = vpop.f32.mrf.mxu1 }
 0x476   : > { %v6171_v57 = vadd.f32 %v6170_v53, %v11935_v46  ;;  %6601 = vst [vmem:[%s8863_s24 + $0x3e8] sm:$0xff] %v6457_v5  ;;  %v6462_v44 = vadd.f32 %v6318_v39, %v2082_v43  ;;  %v6320_v27 = vadd.f32 %v6319_v19, %v6167_v24 }
 0x477   : > { %v6172_v2 = vpop.f32.mrf.mxu0  ;;  %v6323_v28 = vpop.f32.mrf.mxu1 }
 0x478   : > { %v6173_v40 = vadd.f32 %v6172_v2, %v11937_v13  ;;  %6606 = vst [vmem:[%s8863_s24 + $0x410] sm:$0xff] %v6462_v44  ;;  %v6463_v63 = vadd.f32 %v6320_v27, %v2083_v42  ;;  %v6324_v32 = vadd.f32 %v6323_v28, %v6171_v57  ;;  %v12732_v13 = vld [vmem:[#allocation76_spill] sm:$0xff] }
 0x479   : > { %v6174_v35 = vpop.f32.mrf.mxu0  ;;  %v6325_v18 = vpop.f32.mrf.mxu1 }
 0x47a   : > { %v6175_v46 = vadd.f32 %v6174_v35, %v11939_v62  ;;  %6607 = vst [vmem:[%s8863_s24 + $0x418] sm:$0xff] %v6463_v63  ;;  %v6468_v31 = vadd.f32 %v6324_v32, %v2088_v52  ;;  %v6326_v7 = vadd.f32 %v6325_v18, %v6173_v40 }
 0x47b   : > { %v6176_v12 = vpop.f32.mrf.mxu0  ;;  %v6327_v41 = vpop.f32.mrf.mxu1 }
 0x47c   : > { %v6177_v21 = vadd.f32 %v6176_v12, %v12732_v13  ;;  %6612 = vst [vmem:[%s8863_s24 + $0x440] sm:$0xff] %v6468_v31  ;;  %v6469_v47 = vadd.f32 %v6326_v7, %v2089_v23  ;;  %v6328_v15 = vadd.f32 %v6327_v41, %v6175_v46 }
 0x47d   : > { %v6329_v45 = vpop.f32.mrf.mxu1 }
 0x47e   : > { %6613 = vst [vmem:[%s8863_s24 + $0x448] sm:$0xff] %v6469_v47  ;;  %v6474_v62 = vadd.f32 %v6328_v15, %v2094_v8  ;;  %v6330_v50 = vadd.f32 %v6329_v45, %v6177_v21 }
 0x480   : > { %6618 = vst [vmem:[%s8863_s24 + $0x470] sm:$0xff] %v6474_v62  ;;  %v6475_v6 = vadd.f32 %v6330_v50, %v2095_v61 }
 0x482   : > { %6619 = vst [vmem:[%s8863_s24 + $0x478] sm:$0xff] %v6475_v6 }
 0x483   : > { %8430 = shalt.err (!%p8427_p3)
}
 0x484   : > { %s8431_s13 = scalar_lea.hbm %s12090_s5, 18432  ;;  %s8435_s18 = scalar_lea.hbm %s12733_s14, 36864 }
 0x485   : > { %p8432_p5 = scmp.ne.s32.totalorder %s12090_s5, %s8431_s13  ;;  %p8436_p13 = scmp.lt.s32.totalorder %s12090_s5, %s12733_s14 }
 0x486   : > { %p8437_p4 = scmp.lt.s32.totalorder %s8435_s18, %s8431_s13 }
 0x487   : > { %p8433_p7 = pnand %p8432_p5, %p8813_p8 }
 0x488   : > { %p8438_p6 = por %p8437_p4, %p8436_p13 }
 0x489   : > { %p8434_p12 = pneg %p8433_p7 }
 0x48b   : > { %p8439_p10 = pnand %p8438_p6, %p8434_p12 }
 0x48d   : > { %8442 = shalt.err (!%p8439_p10)
}
 0x48e   : > { %s8587_s7 = smov 768   ;;  %s8588_s6 = smov 48  }
 0x48f   : > { %7198 = dma.vmem_to_hbm [thread:$0]  (%p8813_p8), %s12093_s22, 18432, %s12090_s5, %s6621_s21, %s8587_s7, %s8587_s7, %s8588_s6  }
 0x490 PF: > { %s12734_s9 = sld [smem:[#allocation16_spill]]  ;;  %p7224_p1 = scmp.ge.s32.totalorder %s8573_s28, 2 }
 0x491   : > { %s12735_s10 = sld [smem:[#allocation23_spill]] }
 0x496   : > { %s6650_s0 = sand.u32 1, %s12734_s9  }
 0x497   : > { %p12736_p11 = scmp.ne.s32.totalorder %s12735_s10, 0  ;;  %s6651_s12 = scalar_lea.sflag [#allocation4], %s6650_s0 }
 0x499   : > { %p7215_p2 = pnand %p7224_p1, %p12736_p11 }
 0x49b   : > { %p7216_p0 = pneg %p7215_p2 }
 0x49d   : > { %8516 = dma.done.wait (%p7216_p0), %s6651_s12, 18432  }
 0x49e   : > { %8518 = vsyncadd (%p7216_p0), %s6651_s12, 4294948864  ;;  %s26_s28 = sadd.s32 1, %s8573_s28   ;;  %s12738_s21 = sld [smem:[#allocation17_spill]] }
 0x49f   : > { %p12124_p9 = scmp.ge.s32.totalorder %s26_s28, 8   ;;  %s12739_s2 = smov %s8758_s15 }
 0x4a0   : > { %s12740_s8 = sld [smem:[#allocation24_spill]]  ;;  %s12742_s15 = smov %s8525_s16 }
 0x4a1   : > { %s12741_s5 = sld [smem:[#allocation25_spill]]  ;;  %s12743_s16 = smov %s8529_s17 }
 0x4a2   : > { %s12744_s17 = smov %s8807_s30  ;;  %s12745_s18 = smov %s8537_s19 }
 0x4a3   : > { %s12746_s19 = smov %s8541_s20  ;;  %s12747_s20 = smov %s8782_s11 }
 0x4a4   : > { %s12748_s22 = smov %s8553_s23  ;;  %s12749_s23 = smov %s12739_s2 }
 0x4a5   : > { %s12750_s24 = smov %s8565_s26  ;;  %s12751_s25 = smov %s8569_s27 }
 0x4a6   : > { %s12752_s26 = smov %s12740_s8  ;;  %25 = sbr.rel (!%p12124_p9) target bundleno = 18 (0x12), region = 115 }
 0x4a7   : > { %s12753_s27 = smov %s12741_s5 }
 0x4ab   :  { %6656 = vsyncpa [#allocation3], 1 }
 0x4ac   :  { %6658 = vsyncpa [#allocation3 + $0x1], 1 }
 0x4ad   :  { %6659 = vsyncpa [#allocation6], 1 }
 0x4ae   :  { %6661 = vsyncpa [#allocation6 + $0x1], 1 }
 0x4af   :  { %6662 = vsyncpa [#allocation9], 1 }
 0x4b0   :  { %6664 = vsyncpa [#allocation9 + $0x1], 1 }
 0x4b1   :  { %6665 = vsyncpa [#allocation4], 1 }
 0x4b2   :  { %6667 = vsyncpa [#allocation4 + $0x1], 1 }

</bundles_post_ra>
